<compile_context>
chip_gen: v5e
topology: v5e:2x2
jax: 0.10.0
libtpu: 0.0.40
codegen_flags: <defaults>
</compile_context>

<pallas_src>
import functools
import math

import numpy as np
import jax
import jax.numpy as jnp
from jax import lax
from jax.experimental import pallas as pl
from jax.experimental.pallas import tpu as pltpu

CFG = dict(word_size=50, char_size=20, word_dim=16, char_dim=8, dim=32,
           num_heads=4, video_feature_dim=40, max_pos_len=64, drop_rate=0.0)
CHAR_KERNELS = (1, 2, 3, 4)       # Conv2d kernel widths in CharacterEmbedding
CHAR_CHANNELS = (10, 20, 30, 40)  # corresponding output channels (sum = 100)
KSIZE = 7                         # depthwise conv kernel size
NEG_INF = -1e30                   # mask_logits fill value
CHAR_GROUP_LANES = 128            # each char-kernel-width group gets its own 128-lane slot
NUM_GRAPH_LAYERS = 4


# --------------------------- in-kernel helpers ------------------------------

def _ln(x, g, b):
    """nn.LayerNorm(dim, eps=1e-6) over the last dim."""
    mu = jnp.mean(x, axis=-1, keepdims=True)
    var = jnp.mean((x - mu) ** 2, axis=-1, keepdims=True)
    return (x - mu) * lax.rsqrt(var + 1e-6) * g + b


def _attention(x, wref, offs, prefix, mask2d, num_heads):
    """Multi-head attention with host-masked per-head weights.

    Wq_h / Wv_h (and their biases) are zero outside head h's columns, so
      (x @ Wq_h) . (x @ Wk + bk)  ==  q_h . k_h         (no lane slicing)
      sum_h softmax(...) @ (x @ Wv_h + bv_h)            (no concat)
    mask2d is a pre-broadcast (L, L) additive logit mask.
    """
    L, D = x.shape
    C = D // num_heads
    scale = 1.0 / math.sqrt(C)
    o_wk = offs[prefix + '_wk']
    o_wq = offs[prefix + '_wq']
    o_wv = offs[prefix + '_wv']
    o_b = offs[prefix + '_b']
    k_full = jnp.dot(x, wref[o_wk:o_wk + D, :],
                     preferred_element_type=jnp.float32) + wref[o_b:o_b + 1, :]
    out = None
    for h in range(num_heads):
        wq = wref[o_wq + h * D:o_wq + (h + 1) * D, :]
        wv = wref[o_wv + h * D:o_wv + (h + 1) * D, :]
        bq = wref[o_b + 1 + h:o_b + 2 + h, :]
        bv = wref[o_b + 1 + num_heads + h:o_b + 2 + num_heads + h, :]
        qh = jnp.dot(x, wq, preferred_element_type=jnp.float32) + bq
        vh = jnp.dot(x, wv, preferred_element_type=jnp.float32) + bv
        s = lax.dot_general(qh, k_full, (((1,), (1,)), ((), ())),
                            preferred_element_type=jnp.float32) * scale + mask2d
        s = s - jnp.max(s, axis=-1, keepdims=True)
        p = jnp.exp(s)
        p = p * pl.reciprocal(jnp.sum(p, axis=-1, keepdims=True), approx=True)
        oh = jnp.dot(p, vh, preferred_element_type=jnp.float32)
        out = oh if out is None else out + oh
    return out


def _feature_encoder(feat, key_mask_row, wref, offs, *, num_heads, ksize):
    """Shared FeatureEncoder: pos-emb + 4 depthwise-separable conv blocks + MHA."""
    L, D = feat.shape
    pad = ksize // 2
    feat = feat + wref[offs['pos']:offs['pos'] + L, :]
    # hoisted additive key mask (broadcast_in_dim is not CSE'd)
    mask2d = jnp.broadcast_to(key_mask_row, (L, L))
    # constant shift matrices for the depthwise conv (zero rows = zero padding);
    # built once from iotas, reused across the 4 conv blocks; the shift itself
    # becomes a matmul so the work lands on the (mostly idle) MXU.
    ri = lax.broadcasted_iota(jnp.int32, (L, L), 0)
    ci = lax.broadcasted_iota(jnp.int32, (L, L), 1)
    diff = ci - ri
    shift_mats = {k: (diff == (k - pad)).astype(jnp.float32)
                  for k in range(ksize) if k != pad}
    for i in range(4):
        res = feat
        y = _ln(feat,
                wref[offs['cg'] + i:offs['cg'] + i + 1, :],
                wref[offs['cb'] + i:offs['cb'] + i + 1, :])
        # depthwise + pointwise conv as 7 shifted matmuls with dw folded into pw
        base = offs['pwf'] + i * ksize * D
        acc = jnp.dot(y, wref[base + pad * D:base + (pad + 1) * D, :],
                      preferred_element_type=jnp.float32)
        for k in range(ksize):
            if k == pad:
                continue
            yk = jnp.dot(shift_mats[k], y, preferred_element_type=jnp.float32)
            acc = acc + jnp.dot(yk, wref[base + k * D:base + (k + 1) * D, :],
                                preferred_element_type=jnp.float32)
        z = acc + wref[offs['pb'] + i:offs['pb'] + i + 1, :]
        feat = jnp.maximum(z, 0.0) + res
    # multi-head attention block
    ln = offs['ln']
    y = _ln(feat, wref[ln:ln + 1, :], wref[ln + 1:ln + 2, :])
    attn = _attention(y, wref, offs, 'e', mask2d, num_heads)
    res = feat + attn
    y = _ln(res, wref[ln + 2:ln + 3, :], wref[ln + 3:ln + 4, :])
    out = jnp.dot(y, wref[offs['wo']:offs['wo'] + D, :],
                  preferred_element_type=jnp.float32) + wref[offs['bo']:offs['bo'] + 1, :]
    return out + res


def _query_embedding(wemb, cemb, wref, charw_ref, offs, *, char_len, char_dim,
                     bias_row):
    """Char-CNN (one banded matmul for all windows/kernel widths) + projection."""
    wdim = wemb.shape[1]
    feat = jnp.dot(wemb, wref[offs['emb_w_word']:offs['emb_w_word'] + wdim, :],
                   preferred_element_type=jnp.float32) \
           + wref[offs['emb_b']:offs['emb_b'] + 1, :]
    win = jnp.dot(cemb, charw_ref[0:char_len * char_dim, :],
                  preferred_element_type=jnp.float32) \
          + charw_ref[bias_row:bias_row + 1, :]
    win = jnp.maximum(win, 0.0)                       # ReLU once (commutes with max)
    for g, (kw, ch) in enumerate(zip(CHAR_KERNELS, CHAR_CHANNELS)):
        n_win = char_len - kw + 1
        col = g * CHAR_GROUP_LANES
        pooled = win[:, col:col + ch]
        for t in range(1, n_win):                     # segment max over windows
            pooled = jnp.maximum(pooled, win[:, col + t * ch:col + (t + 1) * ch])
        o = offs['emb_w_char%d' % g]
        feat = feat + jnp.dot(pooled, wref[o:o + ch, :],
                              preferred_element_type=jnp.float32)
    return feat


def _graph_head(qf, vf, wref, adj, offs, *, num_heads, num_layers):
    """query mean-pool + 4 TransformerConv layers + fused start/end predictor."""
    Lv, D = vf.shape
    q_mean = jnp.mean(qf, axis=0, keepdims=True)      # unmasked mean (matches reference)
    nodes = jnp.concatenate([q_mean, vf], axis=0)     # (N = Lv + 1, D)
    for l in range(num_layers):
        ows = offs['g%d_wskip' % l]
        obs = offs['g%d_bskip' % l]
        skip = jnp.dot(nodes, wref[ows:ows + D, :],
                       preferred_element_type=jnp.float32) + wref[obs:obs + 1, :]
        attn = _attention(nodes, wref, offs, 'g%d' % l, adj, num_heads)
        nodes = attn + skip
    # lane-dense (2, Lv) logits: row 0 = start, row 1 = end
    hw = wref[offs['head_w']:offs['head_w'] + 2, :]            # (2, D)
    hb = wref[offs['head_b']:offs['head_b'] + 2, 0:1]          # (2, 1)
    logits = lax.dot_general(hw, nodes[1:, :], (((1,), (1,)), ((), ())),
                             preferred_element_type=jnp.float32) + hb
    return logits


# ------------------------------ fused kernel --------------------------------

def _vslnet_kernel(vfeat_ref, wemb_ref, cemb_ref, vmask_ref, qmask_ref,
                   packd_ref, charw_ref, adj_ref, out_ref,
                   *, offs, num_heads, ksize, char_len, char_dim, bias_row):
    # ---- video path: VisualProjection + FeatureEncoder ----
    vx = vfeat_ref[0]                                           # (Lv, Din)
    din = vx.shape[1]
    vfeat = jnp.dot(vx, packd_ref[offs['vp_w']:offs['vp_w'] + din, :],
                    preferred_element_type=jnp.float32) \
            + packd_ref[offs['vp_b']:offs['vp_b'] + 1, :]
    v_addmask = (1.0 - vmask_ref[0]) * NEG_INF                  # (1, Lv)
    vf = _feature_encoder(vfeat, v_addmask, packd_ref, offs,
                          num_heads=num_heads, ksize=ksize)
    # ---- query path: char CNN + embedding projection + shared FeatureEncoder ----
    qfeat = _query_embedding(wemb_ref[0], cemb_ref[0], packd_ref, charw_ref, offs,
                             char_len=char_len, char_dim=char_dim,
                             bias_row=bias_row)
    q_addmask = (1.0 - qmask_ref[0]) * NEG_INF                  # (1, Lq)
    qf = _feature_encoder(qfeat, q_addmask, packd_ref, offs,
                          num_heads=num_heads, ksize=ksize)
    # ---- graph layers + start/end predictor ----
    out_ref[0] = _graph_head(qf, vf, packd_ref, adj_ref[...], offs,
                             num_heads=num_heads, num_layers=NUM_GRAPH_LAYERS)


# ------------------------------- wrapper ------------------------------------

def make_vslnet_forward(meta):
    offs = meta['offs']
    bias_row = meta['char_bias_row']
    num_heads = CFG['num_heads']
    char_dim = CFG['char_dim']

    def forward(arrays, word_ids, char_ids, video_features, v_mask, q_mask):
        B, Lv, _ = video_features.shape
        Lq = word_ids.shape[1]
        Lc = char_ids.shape[-1]
        # embedding gathers stay in XLA (data-dependent gather); everything else
        # runs inside one fused pallas_call.
        w_emb = arrays['word_table'][word_ids]                          # (B, Lq, word_dim)
        c_emb = arrays['char_table'][char_ids].reshape(B, Lq, Lc * char_dim)
        vm = v_mask.reshape(B, 1, Lv).astype(jnp.float32)
        qm = q_mask.reshape(B, 1, Lq).astype(jnp.float32)

        kernel = functools.partial(
            _vslnet_kernel, offs=offs, num_heads=num_heads, ksize=KSIZE,
            char_len=Lc, char_dim=char_dim, bias_row=bias_row)

        def _data_spec(shape):
            nd = len(shape)
            return pl.BlockSpec((1,) + tuple(shape[1:]),
                                lambda b, nd=nd: (b,) + (0,) * (nd - 1))

        def _w_spec(a):
            nd = a.ndim
            return pl.BlockSpec(a.shape, lambda b, nd=nd: (0,) * nd)

        out = pl.pallas_call(
            kernel,
            out_shape=jax.ShapeDtypeStruct((B, 2, Lv), jnp.float32),
            grid=(B,),
            in_specs=[_data_spec(video_features.shape), _data_spec(w_emb.shape),
                      _data_spec(c_emb.shape), _data_spec(vm.shape),
                      _data_spec(qm.shape),
                      _w_spec(arrays['packd']), _w_spec(arrays['charw']),
                      _w_spec(arrays['adj'])],
            out_specs=pl.BlockSpec((1, 2, Lv), lambda b: (b, 0, 0)),
            # "parallel" shards the batch over v7x's 2 TensorCores; on v5e/v6e it
            # is 2 serial steps (~0.7 us of overhead total, negligible post-fusion).
            compiler_params=pltpu.CompilerParams(dimension_semantics=("parallel",)),
        )(video_features, w_emb, c_emb, vm, qm,
          arrays['packd'], arrays['charw'], arrays['adj'])
        return out[:, 0, :], out[:, 1, :]

    return forward


# --------------------------- parameters / packing ----------------------------

def build_adj_logcount_mask(num_segments, num_hops=2):
    """Same edge set as VSLNet.build_graph_edges, as an additive attention mask:
    log(edge multiplicity) where an edge src->dst exists, -inf elsewhere."""
    edges = []
    edges += [(i, i + 1) for i in range(num_segments - 1)]
    edges += [(i + 1, i) for i in range(num_segments - 1)]
    for hop in range(2, num_hops + 1):
        edges += [(i, i + hop) for i in range(num_segments - hop)]
        edges += [(i + hop, i) for i in range(num_segments - hop)]
    edges += [(0, i + 1) for i in range(num_segments)]
    edges += [(i + 1, 0) for i in range(num_segments)]
    n = num_segments + 1
    count = np.zeros((n, n), dtype=np.float64)
    for src, dst in edges:          # PyG: messages flow src -> dst, softmax per dst
        count[dst, src] += 1.0
    mask = np.where(count > 0, np.log(np.maximum(count, 1.0)), NEG_INF)
    return jnp.asarray(mask, dtype=jnp.float32)


def init_params(key):
    d = CFG['dim']
    wd, cd = CFG['word_dim'], CFG['char_dim']
    keys = iter(jax.random.split(key, 64))

    def w(shape, scale=0.1):
        return jax.random.normal(next(keys), shape, jnp.float32) * scale

    p = {}
    p['word_table'] = w((CFG['word_size'], wd)).at[0].set(0.0)   # pad row
    p['char_table'] = w((CFG['char_size'], cd)).at[0].set(0.0)   # padding_idx=0
    # Conv2d(char_dim -> ch, kernel=(1,k)) stored as (k*char_dim, ch) matmul weight
    p['char_w'] = [w((k * cd, ch)) for k, ch in zip(CHAR_KERNELS, CHAR_CHANNELS)]
    p['char_b'] = [w((1, ch), 0.05) for ch in CHAR_CHANNELS]
    # Embedding projection Conv1D(word_dim + 100 -> d), weight split word/char
    p['emb_w_word'] = w((wd, d))
    p['emb_w_char'] = [w((ch, d)) for ch in CHAR_CHANNELS]
    p['emb_b'] = w((1, d), 0.05)
    p['vp_w'] = w((CFG['video_feature_dim'], d))
    p['vp_b'] = w((1, d), 0.05)
    p['enc'] = dict(
        pos=w((CFG['max_pos_len'], d)),
        cg=jnp.ones((4, 1, d), jnp.float32), cb=jnp.zeros((4, 1, d), jnp.float32),
        dw=w((4, KSIZE, d)), pw=w((4, d, d)), pb=w((4, 1, d), 0.05),
        ln1g=jnp.ones((1, d), jnp.float32), ln1b=jnp.zeros((1, d), jnp.float32),
        ln2g=jnp.ones((1, d), jnp.float32), ln2b=jnp.zeros((1, d), jnp.float32),
        wqkv=w((d, 3 * d)), bqkv=w((1, 3 * d), 0.05),
        wo=w((d, d)), bo=w((1, d), 0.05))
    # 4 TransformerConv layers, Q/K/V fused, stacked along a leading axis
    p['g_wqkv'] = w((NUM_GRAPH_LAYERS, d, 3 * d))
    p['g_bqkv'] = w((NUM_GRAPH_LAYERS, 1, 3 * d), 0.05)
    p['g_wskip'] = w((NUM_GRAPH_LAYERS, d, d))
    p['g_bskip'] = w((NUM_GRAPH_LAYERS, 1, d), 0.05)
    # start/end predictors fused into a (d, 2) projection
    p['head_w'] = w((d, 2))
    p['head_b'] = w((1, 2), 0.05)
    return p


def _pack_rows(sections):
    """Pack (name, (rows, lane)) sections into one array, 8-row-aligned sections.
    Returns the packed array and {name: static row offset}."""
    offs = {}
    parts = []
    cur = 0
    lane = sections[0][1].shape[-1]
    for name, a in sections:
        a2 = jnp.asarray(a, jnp.float32).reshape(-1, lane)
        offs[name] = cur
        parts.append(a2)
        n = a2.shape[0]
        padn = (-n) % 8
        if padn:
            parts.append(jnp.zeros((padn, lane), jnp.float32))
        cur += n + padn
    return jnp.concatenate(parts, axis=0), offs


def pack_params(p, char_len, num_segments):
    """Build the packed weight arrays + static offsets consumed by the kernel."""
    D = CFG['dim']
    H = CFG['num_heads']
    C = D // H
    head_mask = np.zeros((H, D), np.float32)
    for h in range(H):
        head_mask[h, h * C:(h + 1) * C] = 1.0
    head_mask = jnp.asarray(head_mask)

    def split_attn(wqkv, bqkv):
        wq, wk, wv = wqkv[:, :D], wqkv[:, D:2 * D], wqkv[:, 2 * D:3 * D]
        bq, bk, bv = bqkv[:, :D], bqkv[:, D:2 * D], bqkv[:, 2 * D:3 * D]
        wq_h = jnp.concatenate([wq * head_mask[h][None, :] for h in range(H)], axis=0)
        wv_h = jnp.concatenate([wv * head_mask[h][None, :] for h in range(H)], axis=0)
        b_rows = jnp.concatenate([bk, bq * head_mask, bv * head_mask], axis=0)
        return wk, wq_h, wv_h, b_rows

    enc = p['enc']
    # fold depthwise taps into the pointwise weight: pwf[i,k] = diag(dw[i,k]) @ pw[i]
    pwf = jnp.concatenate(
        [enc['dw'][i, k][:, None] * enc['pw'][i]
         for i in range(4) for k in range(KSIZE)], axis=0)          # (4*KSIZE*D, D)
    e_wk, e_wq, e_wv, e_b = split_attn(enc['wqkv'], enc['bqkv'])

    head_b2 = jnp.zeros((2, D), jnp.float32).at[:, 0].set(p['head_b'].reshape(2))

    sections = [
        ('vp_w', p['vp_w']), ('vp_b', p['vp_b']),
        ('emb_w_word', p['emb_w_word']), ('emb_b', p['emb_b']),
        ('pos', enc['pos']),
        ('cg', enc['cg'].reshape(4, D)), ('cb', enc['cb'].reshape(4, D)),
        ('pb', enc['pb'].reshape(4, D)),
        ('pwf', pwf),
        ('ln', jnp.concatenate([enc['ln1g'], enc['ln1b'],
                                enc['ln2g'], enc['ln2b']], axis=0)),
        ('e_wk', e_wk), ('e_wq', e_wq), ('e_wv', e_wv), ('e_b', e_b),
        ('wo', enc['wo']), ('bo', enc['bo']),
    ]
    for g in range(len(CHAR_KERNELS)):
        sections.append(('emb_w_char%d' % g, p['emb_w_char'][g]))
    for l in range(NUM_GRAPH_LAYERS):
        wk, wq, wv, b = split_attn(p['g_wqkv'][l], p['g_bqkv'][l])
        sections += [('g%d_wk' % l, wk), ('g%d_wq' % l, wq), ('g%d_wv' % l, wv),
                     ('g%d_b' % l, b), ('g%d_wskip' % l, p['g_wskip'][l]),
                     ('g%d_bskip' % l, p['g_bskip'][l])]
    sections += [('head_w', p['head_w'].T), ('head_b', head_b2)]
    packd, offs = _pack_rows(sections)

    # banded char-CNN weight: every window of every kernel width in one matmul,
    # bias in a dedicated row; each kernel-width group gets its own 128-lane slot.
    cd = CFG['char_dim']
    assert char_len >= max(CHAR_KERNELS), "char_len must be >= max char kernel width"
    bias_row = char_len * cd
    n_groups = len(CHAR_KERNELS)
    charw = np.zeros((bias_row + 8, n_groups * CHAR_GROUP_LANES), np.float32)
    for g, (kw, ch) in enumerate(zip(CHAR_KERNELS, CHAR_CHANNELS)):
        W = np.asarray(p['char_w'][g])                  # (kw*cd, ch)
        b = np.asarray(p['char_b'][g]).reshape(ch)
        n_win = char_len - kw + 1
        assert n_win * ch <= CHAR_GROUP_LANES, "char group exceeds its lane slot"
        for t in range(n_win):
            c0 = g * CHAR_GROUP_LANES + t * ch
            charw[t * cd:(t + kw) * cd, c0:c0 + ch] = W
            charw[bias_row, c0:c0 + ch] = b

    arrays = dict(word_table=p['word_table'], char_table=p['char_table'],
                  packd=packd, charw=jnp.asarray(charw),
                  adj=build_adj_logcount_mask(num_segments))
    meta = dict(offs=offs, char_bias_row=bias_row)
    return arrays, meta


# ---------------------------------- main --------------------------------------

if __name__ == "__main__":
    B, Lq, Lc, Lv = 2, 8, 6, 16
    key = jax.random.PRNGKey(0)
    k1, k2, k3, kp = jax.random.split(key, 4)
    word_ids = jax.random.randint(k1, (B, Lq), 0, CFG['word_size'], dtype=jnp.int32)
    char_ids = jax.random.randint(k2, (B, Lq, Lc), 0, CFG['char_size'], dtype=jnp.int32)
    video_features = jax.random.normal(
        k3, (B, Lv, CFG['video_feature_dim']), jnp.float32)
    v_mask = jnp.concatenate(
        [jnp.ones((B, Lv - 4), jnp.float32),
         jnp.array([[1.0] * 4, [0.0] * 4], jnp.float32)], axis=1)    # (B, Lv)
    q_mask = jnp.concatenate(
        [jnp.ones((B, Lq - 2), jnp.float32),
         jnp.array([[1.0, 1.0], [0.0, 0.0]], jnp.float32)], axis=1)  # (B, Lq)

    logical_params = init_params(kp)
    arrays, meta = pack_params(logical_params, char_len=Lc, num_segments=Lv)

    fwd = jax.jit(make_vslnet_forward(meta))
    start_logits, end_logits = fwd(arrays, word_ids, char_ids, video_features,
                                   v_mask, q_mask)
    jax.block_until_ready((start_logits, end_logits))
    assert start_logits.shape == (B, Lv) and end_logits.shape == (B, Lv)
    assert bool(jnp.all(jnp.isfinite(start_logits))) and bool(jnp.all(jnp.isfinite(end_logits)))
    print("KERNEL_OK")
</pallas_src>

<mosaic_0001>
module attributes {stable_mosaic.version = 11 : i64} {
  func.func @_vslnet_kernel(%arg0: i32, %arg1: memref<1x16x40xf32, #tpu.memory_space<vmem>>, %arg2: memref<1x8x16xf32, #tpu.memory_space<vmem>>, %arg3: memref<1x8x48xf32, #tpu.memory_space<vmem>>, %arg4: memref<1x1x16xf32, #tpu.memory_space<vmem>>, %arg5: memref<1x1x8xf32, #tpu.memory_space<vmem>>, %arg6: memref<2912x32xf32, #tpu.memory_space<vmem>>, %arg7: memref<56x512xf32, #tpu.memory_space<vmem>>, %arg8: memref<17x17xf32, #tpu.memory_space<vmem>>, %arg9: memref<1x2x16xf32, #tpu.memory_space<vmem>>) attributes {dimension_semantics = [#tpu.dimension_semantics<parallel>], iteration_bounds = array<i64: 2>, scalar_prefetch = 0 : i64, scratch_operands = 0 : i64, tpu.core_type = #tpu.core_type<tc>, window_params = [{transform_indices = @transform_0, window_bounds = array<i64: 1, 16, 40>}, {transform_indices = @transform_1, window_bounds = array<i64: 1, 8, 16>}, {transform_indices = @transform_2, window_bounds = array<i64: 1, 8, 48>}, {transform_indices = @transform_3, window_bounds = array<i64: 1, 1, 16>}, {transform_indices = @transform_4, window_bounds = array<i64: 1, 1, 8>}, {pipeline_mode = #tpu.pipeline_mode<synchronous>, transform_indices = @transform_5, window_bounds = array<i64: 2912, 32>}, {pipeline_mode = #tpu.pipeline_mode<synchronous>, transform_indices = @transform_6, window_bounds = array<i64: 56, 512>}, {pipeline_mode = #tpu.pipeline_mode<synchronous>, transform_indices = @transform_7, window_bounds = array<i64: 17, 17>}, {transform_indices = @transform_8, window_bounds = array<i64: 1, 2, 16>}]} {
    %c0 = arith.constant 0 : index
    %c0_0 = arith.constant 0 : index
    %c0_1 = arith.constant 0 : index
    %0 = vector.load %arg1[%c0, %c0_0, %c0_1] : memref<1x16x40xf32, #tpu.memory_space<vmem>>, vector<1x16x40xf32>
    %1 = vector.shape_cast %0 : vector<1x16x40xf32> to vector<16x40xf32>
    %c0_2 = arith.constant 0 : index
    %c0_3 = arith.constant 0 : index
    %2 = vector.load %arg6[%c0_2, %c0_3] : memref<2912x32xf32, #tpu.memory_space<vmem>>, vector<40x32xf32>
    %cst = arith.constant dense<0.000000e+00> : vector<16x32xf32>
    %3 = tpu.matmul %1, %2, %cst {dimension_numbers = #tpu.dot_dimension_numbers<[1], [0], [0], [1], [0, 0, 1, 1], [], []>} : vector<16x40xf32>, vector<40x32xf32>, vector<16x32xf32> -> vector<16x32xf32>
    %c40 = arith.constant 40 : index
    %c0_4 = arith.constant 0 : index
    %4 = vector.load %arg6[%c40, %c0_4] : memref<2912x32xf32, #tpu.memory_space<vmem>>, vector<1x32xf32>
    %5 = vector.broadcast %4 : vector<1x32xf32> to vector<16x32xf32>
    %6 = arith.addf %3, %5 : vector<16x32xf32>
    %c0_5 = arith.constant 0 : index
    %c0_6 = arith.constant 0 : index
    %c0_7 = arith.constant 0 : index
    %7 = vector.load %arg4[%c0_5, %c0_6, %c0_7] : memref<1x1x16xf32, #tpu.memory_space<vmem>>, vector<1x1x16xf32>
    %8 = vector.shape_cast %7 : vector<1x1x16xf32> to vector<1x16xf32>
    %cst_8 = arith.constant 1.000000e+00 : f32
    %9 = vector.broadcast %cst_8 : f32 to vector<1x16xf32>
    %10 = arith.subf %9, %8 : vector<1x16xf32>
    %cst_9 = arith.constant -1.000000e+30 : f32
    %11 = vector.broadcast %cst_9 : f32 to vector<1x16xf32>
    %12 = arith.mulf %10, %11 : vector<1x16xf32>
    %c72 = arith.constant 72 : index
    %c0_10 = arith.constant 0 : index
    %13 = vector.load %arg6[%c72, %c0_10] : memref<2912x32xf32, #tpu.memory_space<vmem>>, vector<16x32xf32>
    %14 = arith.addf %6, %13 : vector<16x32xf32>
    %15 = vector.shape_cast %12 : vector<1x16xf32> to vector<1x16xf32>
    %16 = vector.broadcast %15 : vector<1x16xf32> to vector<16x16xf32>
    %17 = tpu.iota {dimensions = array<i32: 0>} : vector<16x16xi32>
    %18 = tpu.iota {dimensions = array<i32: 1>} : vector<16x16xi32>
    %19 = arith.subi %18, %17 : vector<16x16xi32>
    %c-3_i32 = arith.constant -3 : i32
    %20 = vector.broadcast %c-3_i32 : i32 to vector<16x16xi32>
    %21 = arith.cmpi eq, %19, %20 : vector<16x16xi32>
    %22 = arith.extui %21 : vector<16x16xi1> to vector<16x16xi32>
    %23 = arith.sitofp %22 : vector<16x16xi32> to vector<16x16xf32>
    %c-2_i32 = arith.constant -2 : i32
    %24 = vector.broadcast %c-2_i32 : i32 to vector<16x16xi32>
    %25 = arith.cmpi eq, %19, %24 : vector<16x16xi32>
    %26 = arith.extui %25 : vector<16x16xi1> to vector<16x16xi32>
    %27 = arith.sitofp %26 : vector<16x16xi32> to vector<16x16xf32>
    %c-1_i32 = arith.constant -1 : i32
    %28 = vector.broadcast %c-1_i32 : i32 to vector<16x16xi32>
    %29 = arith.cmpi eq, %19, %28 : vector<16x16xi32>
    %30 = arith.extui %29 : vector<16x16xi1> to vector<16x16xi32>
    %31 = arith.sitofp %30 : vector<16x16xi32> to vector<16x16xf32>
    %c1_i32 = arith.constant 1 : i32
    %32 = vector.broadcast %c1_i32 : i32 to vector<16x16xi32>
    %33 = arith.cmpi eq, %19, %32 : vector<16x16xi32>
    %34 = arith.extui %33 : vector<16x16xi1> to vector<16x16xi32>
    %35 = arith.sitofp %34 : vector<16x16xi32> to vector<16x16xf32>
    %c2_i32 = arith.constant 2 : i32
    %36 = vector.broadcast %c2_i32 : i32 to vector<16x16xi32>
    %37 = arith.cmpi eq, %19, %36 : vector<16x16xi32>
    %38 = arith.extui %37 : vector<16x16xi1> to vector<16x16xi32>
    %39 = arith.sitofp %38 : vector<16x16xi32> to vector<16x16xf32>
    %c3_i32 = arith.constant 3 : i32
    %40 = vector.broadcast %c3_i32 : i32 to vector<16x16xi32>
    %41 = arith.cmpi eq, %19, %40 : vector<16x16xi32>
    %42 = arith.extui %41 : vector<16x16xi1> to vector<16x16xi32>
    %43 = arith.sitofp %42 : vector<16x16xi32> to vector<16x16xf32>
    %c136 = arith.constant 136 : index
    %c0_11 = arith.constant 0 : index
    %44 = vector.load %arg6[%c136, %c0_11] : memref<2912x32xf32, #tpu.memory_space<vmem>>, vector<1x32xf32>
    %c144 = arith.constant 144 : index
    %c0_12 = arith.constant 0 : index
    %45 = vector.load %arg6[%c144, %c0_12] : memref<2912x32xf32, #tpu.memory_space<vmem>>, vector<1x32xf32>
    %cst_13 = arith.constant dense<0.000000e+00> : vector<16xf32>
    %46 = vector.multi_reduction <add>, %14, %cst_13 [1] : vector<16x32xf32> to vector<16xf32>
    %47 = vector.shape_cast %46 : vector<16xf32> to vector<16x1xf32>
    %cst_14 = arith.constant 3.200000e+01 : f32
    %48 = vector.broadcast %cst_14 : f32 to vector<16x1xf32>
    %49 = arith.divf %47, %48 : vector<16x1xf32>
    %50 = vector.broadcast %49 : vector<16x1xf32> to vector<16x32xf32>
    %51 = arith.subf %14, %50 : vector<16x32xf32>
    %52 = arith.mulf %51, %51 : vector<16x32xf32>
    %cst_15 = arith.constant dense<0.000000e+00> : vector<16xf32>
    %53 = vector.multi_reduction <add>, %52, %cst_15 [1] : vector<16x32xf32> to vector<16xf32>
    %54 = vector.shape_cast %53 : vector<16xf32> to vector<16x1xf32>
    %cst_16 = arith.constant 3.200000e+01 : f32
    %55 = vector.broadcast %cst_16 : f32 to vector<16x1xf32>
    %56 = arith.divf %54, %55 : vector<16x1xf32>
    %57 = vector.broadcast %49 : vector<16x1xf32> to vector<16x32xf32>
    %58 = arith.subf %14, %57 : vector<16x32xf32>
    %cst_17 = arith.constant 9.99999997E-7 : f32
    %59 = vector.broadcast %cst_17 : f32 to vector<16x1xf32>
    %60 = arith.addf %56, %59 : vector<16x1xf32>
    %61 = math.rsqrt %60 : vector<16x1xf32>
    %62 = vector.broadcast %61 : vector<16x1xf32> to vector<16x32xf32>
    %63 = arith.mulf %58, %62 : vector<16x32xf32>
    %64 = vector.broadcast %44 : vector<1x32xf32> to vector<16x32xf32>
    %65 = arith.mulf %63, %64 : vector<16x32xf32>
    %66 = vector.broadcast %45 : vector<1x32xf32> to vector<16x32xf32>
    %67 = arith.addf %65, %66 : vector<16x32xf32>
    %c256 = arith.constant 256 : index
    %c0_18 = arith.constant 0 : index
    %68 = vector.load %arg6[%c256, %c0_18] : memref<2912x32xf32, #tpu.memory_space<vmem>>, vector<32x32xf32>
    %cst_19 = arith.constant dense<0.000000e+00> : vector<16x32xf32>
    %69 = tpu.matmul %67, %68, %cst_19 {dimension_numbers = #tpu.dot_dimension_numbers<[1], [0], [0], [1], [0, 0, 1, 1], [], []>} : vector<16x32xf32>, vector<32x32xf32>, vector<16x32xf32> -> vector<16x32xf32>
    %cst_20 = arith.constant dense<0.000000e+00> : vector<16x32xf32>
    %70 = tpu.matmul %23, %67, %cst_20 {dimension_numbers = #tpu.dot_dimension_numbers<[1], [0], [0], [1], [0, 0, 1, 1], [], []>} : vector<16x16xf32>, vector<16x32xf32>, vector<16x32xf32> -> vector<16x32xf32>
    %c160 = arith.constant 160 : index
    %c0_21 = arith.constant 0 : index
    %71 = vector.load %arg6[%c160, %c0_21] : memref<2912x32xf32, #tpu.memory_space<vmem>>, vector<32x32xf32>
    %cst_22 = arith.constant dense<0.000000e+00> : vector<16x32xf32>
    %72 = tpu.matmul %70, %71, %cst_22 {dimension_numbers = #tpu.dot_dimension_numbers<[1], [0], [0], [1], [0, 0, 1, 1], [], []>} : vector<16x32xf32>, vector<32x32xf32>, vector<16x32xf32> -> vector<16x32xf32>
    %73 = arith.addf %69, %72 : vector<16x32xf32>
    %cst_23 = arith.constant dense<0.000000e+00> : vector<16x32xf32>
    %74 = tpu.matmul %27, %67, %cst_23 {dimension_numbers = #tpu.dot_dimension_numbers<[1], [0], [0], [1], [0, 0, 1, 1], [], []>} : vector<16x16xf32>, vector<16x32xf32>, vector<16x32xf32> -> vector<16x32xf32>
    %c192 = arith.constant 192 : index
    %c0_24 = arith.constant 0 : index
    %75 = vector.load %arg6[%c192, %c0_24] : memref<2912x32xf32, #tpu.memory_space<vmem>>, vector<32x32xf32>
    %cst_25 = arith.constant dense<0.000000e+00> : vector<16x32xf32>
    %76 = tpu.matmul %74, %75, %cst_25 {dimension_numbers = #tpu.dot_dimension_numbers<[1], [0], [0], [1], [0, 0, 1, 1], [], []>} : vector<16x32xf32>, vector<32x32xf32>, vector<16x32xf32> -> vector<16x32xf32>
    %77 = arith.addf %73, %76 : vector<16x32xf32>
    %cst_26 = arith.constant dense<0.000000e+00> : vector<16x32xf32>
    %78 = tpu.matmul %31, %67, %cst_26 {dimension_numbers = #tpu.dot_dimension_numbers<[1], [0], [0], [1], [0, 0, 1, 1], [], []>} : vector<16x16xf32>, vector<16x32xf32>, vector<16x32xf32> -> vector<16x32xf32>
    %c224 = arith.constant 224 : index
    %c0_27 = arith.constant 0 : index
    %79 = vector.load %arg6[%c224, %c0_27] : memref<2912x32xf32, #tpu.memory_space<vmem>>, vector<32x32xf32>
    %cst_28 = arith.constant dense<0.000000e+00> : vector<16x32xf32>
    %80 = tpu.matmul %78, %79, %cst_28 {dimension_numbers = #tpu.dot_dimension_numbers<[1], [0], [0], [1], [0, 0, 1, 1], [], []>} : vector<16x32xf32>, vector<32x32xf32>, vector<16x32xf32> -> vector<16x32xf32>
    %81 = arith.addf %77, %80 : vector<16x32xf32>
    %cst_29 = arith.constant dense<0.000000e+00> : vector<16x32xf32>
    %82 = tpu.matmul %35, %67, %cst_29 {dimension_numbers = #tpu.dot_dimension_numbers<[1], [0], [0], [1], [0, 0, 1, 1], [], []>} : vector<16x16xf32>, vector<16x32xf32>, vector<16x32xf32> -> vector<16x32xf32>
    %c288 = arith.constant 288 : index
    %c0_30 = arith.constant 0 : index
    %83 = vector.load %arg6[%c288, %c0_30] : memref<2912x32xf32, #tpu.memory_space<vmem>>, vector<32x32xf32>
    %cst_31 = arith.constant dense<0.000000e+00> : vector<16x32xf32>
    %84 = tpu.matmul %82, %83, %cst_31 {dimension_numbers = #tpu.dot_dimension_numbers<[1], [0], [0], [1], [0, 0, 1, 1], [], []>} : vector<16x32xf32>, vector<32x32xf32>, vector<16x32xf32> -> vector<16x32xf32>
    %85 = arith.addf %81, %84 : vector<16x32xf32>
    %cst_32 = arith.constant dense<0.000000e+00> : vector<16x32xf32>
    %86 = tpu.matmul %39, %67, %cst_32 {dimension_numbers = #tpu.dot_dimension_numbers<[1], [0], [0], [1], [0, 0, 1, 1], [], []>} : vector<16x16xf32>, vector<16x32xf32>, vector<16x32xf32> -> vector<16x32xf32>
    %c320 = arith.constant 320 : index
    %c0_33 = arith.constant 0 : index
    %87 = vector.load %arg6[%c320, %c0_33] : memref<2912x32xf32, #tpu.memory_space<vmem>>, vector<32x32xf32>
    %cst_34 = arith.constant dense<0.000000e+00> : vector<16x32xf32>
    %88 = tpu.matmul %86, %87, %cst_34 {dimension_numbers = #tpu.dot_dimension_numbers<[1], [0], [0], [1], [0, 0, 1, 1], [], []>} : vector<16x32xf32>, vector<32x32xf32>, vector<16x32xf32> -> vector<16x32xf32>
    %89 = arith.addf %85, %88 : vector<16x32xf32>
    %cst_35 = arith.constant dense<0.000000e+00> : vector<16x32xf32>
    %90 = tpu.matmul %43, %67, %cst_35 {dimension_numbers = #tpu.dot_dimension_numbers<[1], [0], [0], [1], [0, 0, 1, 1], [], []>} : vector<16x16xf32>, vector<16x32xf32>, vector<16x32xf32> -> vector<16x32xf32>
    %c352 = arith.constant 352 : index
    %c0_36 = arith.constant 0 : index
    %91 = vector.load %arg6[%c352, %c0_36] : memref<2912x32xf32, #tpu.memory_space<vmem>>, vector<32x32xf32>
    %cst_37 = arith.constant dense<0.000000e+00> : vector<16x32xf32>
    %92 = tpu.matmul %90, %91, %cst_37 {dimension_numbers = #tpu.dot_dimension_numbers<[1], [0], [0], [1], [0, 0, 1, 1], [], []>} : vector<16x32xf32>, vector<32x32xf32>, vector<16x32xf32> -> vector<16x32xf32>
    %93 = arith.addf %89, %92 : vector<16x32xf32>
    %c152 = arith.constant 152 : index
    %c0_38 = arith.constant 0 : index
    %94 = vector.load %arg6[%c152, %c0_38] : memref<2912x32xf32, #tpu.memory_space<vmem>>, vector<1x32xf32>
    %95 = vector.broadcast %94 : vector<1x32xf32> to vector<16x32xf32>
    %96 = arith.addf %93, %95 : vector<16x32xf32>
    %cst_39 = arith.constant 0.000000e+00 : f32
    %97 = vector.broadcast %cst_39 : f32 to vector<16x32xf32>
    %98 = arith.maximumf %96, %97 : vector<16x32xf32>
    %99 = arith.addf %98, %14 : vector<16x32xf32>
    %c137 = arith.constant 137 : index
    %c0_40 = arith.constant 0 : index
    %100 = vector.load %arg6[%c137, %c0_40] : memref<2912x32xf32, #tpu.memory_space<vmem>>, vector<1x32xf32>
    %c145 = arith.constant 145 : index
    %c0_41 = arith.constant 0 : index
    %101 = vector.load %arg6[%c145, %c0_41] : memref<2912x32xf32, #tpu.memory_space<vmem>>, vector<1x32xf32>
    %cst_42 = arith.constant dense<0.000000e+00> : vector<16xf32>
    %102 = vector.multi_reduction <add>, %99, %cst_42 [1] : vector<16x32xf32> to vector<16xf32>
    %103 = vector.shape_cast %102 : vector<16xf32> to vector<16x1xf32>
    %cst_43 = arith.constant 3.200000e+01 : f32
    %104 = vector.broadcast %cst_43 : f32 to vector<16x1xf32>
    %105 = arith.divf %103, %104 : vector<16x1xf32>
    %106 = vector.broadcast %105 : vector<16x1xf32> to vector<16x32xf32>
    %107 = arith.subf %99, %106 : vector<16x32xf32>
    %108 = arith.mulf %107, %107 : vector<16x32xf32>
    %cst_44 = arith.constant dense<0.000000e+00> : vector<16xf32>
    %109 = vector.multi_reduction <add>, %108, %cst_44 [1] : vector<16x32xf32> to vector<16xf32>
    %110 = vector.shape_cast %109 : vector<16xf32> to vector<16x1xf32>
    %cst_45 = arith.constant 3.200000e+01 : f32
    %111 = vector.broadcast %cst_45 : f32 to vector<16x1xf32>
    %112 = arith.divf %110, %111 : vector<16x1xf32>
    %113 = vector.broadcast %105 : vector<16x1xf32> to vector<16x32xf32>
    %114 = arith.subf %99, %113 : vector<16x32xf32>
    %cst_46 = arith.constant 9.99999997E-7 : f32
    %115 = vector.broadcast %cst_46 : f32 to vector<16x1xf32>
    %116 = arith.addf %112, %115 : vector<16x1xf32>
    %117 = math.rsqrt %116 : vector<16x1xf32>
    %118 = vector.broadcast %117 : vector<16x1xf32> to vector<16x32xf32>
    %119 = arith.mulf %114, %118 : vector<16x32xf32>
    %120 = vector.broadcast %100 : vector<1x32xf32> to vector<16x32xf32>
    %121 = arith.mulf %119, %120 : vector<16x32xf32>
    %122 = vector.broadcast %101 : vector<1x32xf32> to vector<16x32xf32>
    %123 = arith.addf %121, %122 : vector<16x32xf32>
    %c480 = arith.constant 480 : index
    %c0_47 = arith.constant 0 : index
    %124 = vector.load %arg6[%c480, %c0_47] : memref<2912x32xf32, #tpu.memory_space<vmem>>, vector<32x32xf32>
    %cst_48 = arith.constant dense<0.000000e+00> : vector<16x32xf32>
    %125 = tpu.matmul %123, %124, %cst_48 {dimension_numbers = #tpu.dot_dimension_numbers<[1], [0], [0], [1], [0, 0, 1, 1], [], []>} : vector<16x32xf32>, vector<32x32xf32>, vector<16x32xf32> -> vector<16x32xf32>
    %cst_49 = arith.constant dense<0.000000e+00> : vector<16x32xf32>
    %126 = tpu.matmul %23, %123, %cst_49 {dimension_numbers = #tpu.dot_dimension_numbers<[1], [0], [0], [1], [0, 0, 1, 1], [], []>} : vector<16x16xf32>, vector<16x32xf32>, vector<16x32xf32> -> vector<16x32xf32>
    %c384 = arith.constant 384 : index
    %c0_50 = arith.constant 0 : index
    %127 = vector.load %arg6[%c384, %c0_50] : memref<2912x32xf32, #tpu.memory_space<vmem>>, vector<32x32xf32>
    %cst_51 = arith.constant dense<0.000000e+00> : vector<16x32xf32>
    %128 = tpu.matmul %126, %127, %cst_51 {dimension_numbers = #tpu.dot_dimension_numbers<[1], [0], [0], [1], [0, 0, 1, 1], [], []>} : vector<16x32xf32>, vector<32x32xf32>, vector<16x32xf32> -> vector<16x32xf32>
    %129 = arith.addf %125, %128 : vector<16x32xf32>
    %cst_52 = arith.constant dense<0.000000e+00> : vector<16x32xf32>
    %130 = tpu.matmul %27, %123, %cst_52 {dimension_numbers = #tpu.dot_dimension_numbers<[1], [0], [0], [1], [0, 0, 1, 1], [], []>} : vector<16x16xf32>, vector<16x32xf32>, vector<16x32xf32> -> vector<16x32xf32>
    %c416 = arith.constant 416 : index
    %c0_53 = arith.constant 0 : index
    %131 = vector.load %arg6[%c416, %c0_53] : memref<2912x32xf32, #tpu.memory_space<vmem>>, vector<32x32xf32>
    %cst_54 = arith.constant dense<0.000000e+00> : vector<16x32xf32>
    %132 = tpu.matmul %130, %131, %cst_54 {dimension_numbers = #tpu.dot_dimension_numbers<[1], [0], [0], [1], [0, 0, 1, 1], [], []>} : vector<16x32xf32>, vector<32x32xf32>, vector<16x32xf32> -> vector<16x32xf32>
    %133 = arith.addf %129, %132 : vector<16x32xf32>
    %cst_55 = arith.constant dense<0.000000e+00> : vector<16x32xf32>
    %134 = tpu.matmul %31, %123, %cst_55 {dimension_numbers = #tpu.dot_dimension_numbers<[1], [0], [0], [1], [0, 0, 1, 1], [], []>} : vector<16x16xf32>, vector<16x32xf32>, vector<16x32xf32> -> vector<16x32xf32>
    %c448 = arith.constant 448 : index
    %c0_56 = arith.constant 0 : index
    %135 = vector.load %arg6[%c448, %c0_56] : memref<2912x32xf32, #tpu.memory_space<vmem>>, vector<32x32xf32>
    %cst_57 = arith.constant dense<0.000000e+00> : vector<16x32xf32>
    %136 = tpu.matmul %134, %135, %cst_57 {dimension_numbers = #tpu.dot_dimension_numbers<[1], [0], [0], [1], [0, 0, 1, 1], [], []>} : vector<16x32xf32>, vector<32x32xf32>, vector<16x32xf32> -> vector<16x32xf32>
    %137 = arith.addf %133, %136 : vector<16x32xf32>
    %cst_58 = arith.constant dense<0.000000e+00> : vector<16x32xf32>
    %138 = tpu.matmul %35, %123, %cst_58 {dimension_numbers = #tpu.dot_dimension_numbers<[1], [0], [0], [1], [0, 0, 1, 1], [], []>} : vector<16x16xf32>, vector<16x32xf32>, vector<16x32xf32> -> vector<16x32xf32>
    %c512 = arith.constant 512 : index
    %c0_59 = arith.constant 0 : index
    %139 = vector.load %arg6[%c512, %c0_59] : memref<2912x32xf32, #tpu.memory_space<vmem>>, vector<32x32xf32>
    %cst_60 = arith.constant dense<0.000000e+00> : vector<16x32xf32>
    %140 = tpu.matmul %138, %139, %cst_60 {dimension_numbers = #tpu.dot_dimension_numbers<[1], [0], [0], [1], [0, 0, 1, 1], [], []>} : vector<16x32xf32>, vector<32x32xf32>, vector<16x32xf32> -> vector<16x32xf32>
    %141 = arith.addf %137, %140 : vector<16x32xf32>
    %cst_61 = arith.constant dense<0.000000e+00> : vector<16x32xf32>
    %142 = tpu.matmul %39, %123, %cst_61 {dimension_numbers = #tpu.dot_dimension_numbers<[1], [0], [0], [1], [0, 0, 1, 1], [], []>} : vector<16x16xf32>, vector<16x32xf32>, vector<16x32xf32> -> vector<16x32xf32>
    %c544 = arith.constant 544 : index
    %c0_62 = arith.constant 0 : index
    %143 = vector.load %arg6[%c544, %c0_62] : memref<2912x32xf32, #tpu.memory_space<vmem>>, vector<32x32xf32>
    %cst_63 = arith.constant dense<0.000000e+00> : vector<16x32xf32>
    %144 = tpu.matmul %142, %143, %cst_63 {dimension_numbers = #tpu.dot_dimension_numbers<[1], [0], [0], [1], [0, 0, 1, 1], [], []>} : vector<16x32xf32>, vector<32x32xf32>, vector<16x32xf32> -> vector<16x32xf32>
    %145 = arith.addf %141, %144 : vector<16x32xf32>
    %cst_64 = arith.constant dense<0.000000e+00> : vector<16x32xf32>
    %146 = tpu.matmul %43, %123, %cst_64 {dimension_numbers = #tpu.dot_dimension_numbers<[1], [0], [0], [1], [0, 0, 1, 1], [], []>} : vector<16x16xf32>, vector<16x32xf32>, vector<16x32xf32> -> vector<16x32xf32>
    %c576 = arith.constant 576 : index
    %c0_65 = arith.constant 0 : index
    %147 = vector.load %arg6[%c576, %c0_65] : memref<2912x32xf32, #tpu.memory_space<vmem>>, vector<32x32xf32>
    %cst_66 = arith.constant dense<0.000000e+00> : vector<16x32xf32>
    %148 = tpu.matmul %146, %147, %cst_66 {dimension_numbers = #tpu.dot_dimension_numbers<[1], [0], [0], [1], [0, 0, 1, 1], [], []>} : vector<16x32xf32>, vector<32x32xf32>, vector<16x32xf32> -> vector<16x32xf32>
    %149 = arith.addf %145, %148 : vector<16x32xf32>
    %c153 = arith.constant 153 : index
    %c0_67 = arith.constant 0 : index
    %150 = vector.load %arg6[%c153, %c0_67] : memref<2912x32xf32, #tpu.memory_space<vmem>>, vector<1x32xf32>
    %151 = vector.broadcast %150 : vector<1x32xf32> to vector<16x32xf32>
    %152 = arith.addf %149, %151 : vector<16x32xf32>
    %cst_68 = arith.constant 0.000000e+00 : f32
    %153 = vector.broadcast %cst_68 : f32 to vector<16x32xf32>
    %154 = arith.maximumf %152, %153 : vector<16x32xf32>
    %155 = arith.addf %154, %99 : vector<16x32xf32>
    %c138 = arith.constant 138 : index
    %c0_69 = arith.constant 0 : index
    %156 = vector.load %arg6[%c138, %c0_69] : memref<2912x32xf32, #tpu.memory_space<vmem>>, vector<1x32xf32>
    %c146 = arith.constant 146 : index
    %c0_70 = arith.constant 0 : index
    %157 = vector.load %arg6[%c146, %c0_70] : memref<2912x32xf32, #tpu.memory_space<vmem>>, vector<1x32xf32>
    %cst_71 = arith.constant dense<0.000000e+00> : vector<16xf32>
    %158 = vector.multi_reduction <add>, %155, %cst_71 [1] : vector<16x32xf32> to vector<16xf32>
    %159 = vector.shape_cast %158 : vector<16xf32> to vector<16x1xf32>
    %cst_72 = arith.constant 3.200000e+01 : f32
    %160 = vector.broadcast %cst_72 : f32 to vector<16x1xf32>
    %161 = arith.divf %159, %160 : vector<16x1xf32>
    %162 = vector.broadcast %161 : vector<16x1xf32> to vector<16x32xf32>
    %163 = arith.subf %155, %162 : vector<16x32xf32>
    %164 = arith.mulf %163, %163 : vector<16x32xf32>
    %cst_73 = arith.constant dense<0.000000e+00> : vector<16xf32>
    %165 = vector.multi_reduction <add>, %164, %cst_73 [1] : vector<16x32xf32> to vector<16xf32>
    %166 = vector.shape_cast %165 : vector<16xf32> to vector<16x1xf32>
    %cst_74 = arith.constant 3.200000e+01 : f32
    %167 = vector.broadcast %cst_74 : f32 to vector<16x1xf32>
    %168 = arith.divf %166, %167 : vector<16x1xf32>
    %169 = vector.broadcast %161 : vector<16x1xf32> to vector<16x32xf32>
    %170 = arith.subf %155, %169 : vector<16x32xf32>
    %cst_75 = arith.constant 9.99999997E-7 : f32
    %171 = vector.broadcast %cst_75 : f32 to vector<16x1xf32>
    %172 = arith.addf %168, %171 : vector<16x1xf32>
    %173 = math.rsqrt %172 : vector<16x1xf32>
    %174 = vector.broadcast %173 : vector<16x1xf32> to vector<16x32xf32>
    %175 = arith.mulf %170, %174 : vector<16x32xf32>
    %176 = vector.broadcast %156 : vector<1x32xf32> to vector<16x32xf32>
    %177 = arith.mulf %175, %176 : vector<16x32xf32>
    %178 = vector.broadcast %157 : vector<1x32xf32> to vector<16x32xf32>
    %179 = arith.addf %177, %178 : vector<16x32xf32>
    %c704 = arith.constant 704 : index
    %c0_76 = arith.constant 0 : index
    %180 = vector.load %arg6[%c704, %c0_76] : memref<2912x32xf32, #tpu.memory_space<vmem>>, vector<32x32xf32>
    %cst_77 = arith.constant dense<0.000000e+00> : vector<16x32xf32>
    %181 = tpu.matmul %179, %180, %cst_77 {dimension_numbers = #tpu.dot_dimension_numbers<[1], [0], [0], [1], [0, 0, 1, 1], [], []>} : vector<16x32xf32>, vector<32x32xf32>, vector<16x32xf32> -> vector<16x32xf32>
    %cst_78 = arith.constant dense<0.000000e+00> : vector<16x32xf32>
    %182 = tpu.matmul %23, %179, %cst_78 {dimension_numbers = #tpu.dot_dimension_numbers<[1], [0], [0], [1], [0, 0, 1, 1], [], []>} : vector<16x16xf32>, vector<16x32xf32>, vector<16x32xf32> -> vector<16x32xf32>
    %c608 = arith.constant 608 : index
    %c0_79 = arith.constant 0 : index
    %183 = vector.load %arg6[%c608, %c0_79] : memref<2912x32xf32, #tpu.memory_space<vmem>>, vector<32x32xf32>
    %cst_80 = arith.constant dense<0.000000e+00> : vector<16x32xf32>
    %184 = tpu.matmul %182, %183, %cst_80 {dimension_numbers = #tpu.dot_dimension_numbers<[1], [0], [0], [1], [0, 0, 1, 1], [], []>} : vector<16x32xf32>, vector<32x32xf32>, vector<16x32xf32> -> vector<16x32xf32>
    %185 = arith.addf %181, %184 : vector<16x32xf32>
    %cst_81 = arith.constant dense<0.000000e+00> : vector<16x32xf32>
    %186 = tpu.matmul %27, %179, %cst_81 {dimension_numbers = #tpu.dot_dimension_numbers<[1], [0], [0], [1], [0, 0, 1, 1], [], []>} : vector<16x16xf32>, vector<16x32xf32>, vector<16x32xf32> -> vector<16x32xf32>
    %c640 = arith.constant 640 : index
    %c0_82 = arith.constant 0 : index
    %187 = vector.load %arg6[%c640, %c0_82] : memref<2912x32xf32, #tpu.memory_space<vmem>>, vector<32x32xf32>
    %cst_83 = arith.constant dense<0.000000e+00> : vector<16x32xf32>
    %188 = tpu.matmul %186, %187, %cst_83 {dimension_numbers = #tpu.dot_dimension_numbers<[1], [0], [0], [1], [0, 0, 1, 1], [], []>} : vector<16x32xf32>, vector<32x32xf32>, vector<16x32xf32> -> vector<16x32xf32>
    %189 = arith.addf %185, %188 : vector<16x32xf32>
    %cst_84 = arith.constant dense<0.000000e+00> : vector<16x32xf32>
    %190 = tpu.matmul %31, %179, %cst_84 {dimension_numbers = #tpu.dot_dimension_numbers<[1], [0], [0], [1], [0, 0, 1, 1], [], []>} : vector<16x16xf32>, vector<16x32xf32>, vector<16x32xf32> -> vector<16x32xf32>
    %c672 = arith.constant 672 : index
    %c0_85 = arith.constant 0 : index
    %191 = vector.load %arg6[%c672, %c0_85] : memref<2912x32xf32, #tpu.memory_space<vmem>>, vector<32x32xf32>
    %cst_86 = arith.constant dense<0.000000e+00> : vector<16x32xf32>
    %192 = tpu.matmul %190, %191, %cst_86 {dimension_numbers = #tpu.dot_dimension_numbers<[1], [0], [0], [1], [0, 0, 1, 1], [], []>} : vector<16x32xf32>, vector<32x32xf32>, vector<16x32xf32> -> vector<16x32xf32>
    %193 = arith.addf %189, %192 : vector<16x32xf32>
    %cst_87 = arith.constant dense<0.000000e+00> : vector<16x32xf32>
    %194 = tpu.matmul %35, %179, %cst_87 {dimension_numbers = #tpu.dot_dimension_numbers<[1], [0], [0], [1], [0, 0, 1, 1], [], []>} : vector<16x16xf32>, vector<16x32xf32>, vector<16x32xf32> -> vector<16x32xf32>
    %c736 = arith.constant 736 : index
    %c0_88 = arith.constant 0 : index
    %195 = vector.load %arg6[%c736, %c0_88] : memref<2912x32xf32, #tpu.memory_space<vmem>>, vector<32x32xf32>
    %cst_89 = arith.constant dense<0.000000e+00> : vector<16x32xf32>
    %196 = tpu.matmul %194, %195, %cst_89 {dimension_numbers = #tpu.dot_dimension_numbers<[1], [0], [0], [1], [0, 0, 1, 1], [], []>} : vector<16x32xf32>, vector<32x32xf32>, vector<16x32xf32> -> vector<16x32xf32>
    %197 = arith.addf %193, %196 : vector<16x32xf32>
    %cst_90 = arith.constant dense<0.000000e+00> : vector<16x32xf32>
    %198 = tpu.matmul %39, %179, %cst_90 {dimension_numbers = #tpu.dot_dimension_numbers<[1], [0], [0], [1], [0, 0, 1, 1], [], []>} : vector<16x16xf32>, vector<16x32xf32>, vector<16x32xf32> -> vector<16x32xf32>
    %c768 = arith.constant 768 : index
    %c0_91 = arith.constant 0 : index
    %199 = vector.load %arg6[%c768, %c0_91] : memref<2912x32xf32, #tpu.memory_space<vmem>>, vector<32x32xf32>
    %cst_92 = arith.constant dense<0.000000e+00> : vector<16x32xf32>
    %200 = tpu.matmul %198, %199, %cst_92 {dimension_numbers = #tpu.dot_dimension_numbers<[1], [0], [0], [1], [0, 0, 1, 1], [], []>} : vector<16x32xf32>, vector<32x32xf32>, vector<16x32xf32> -> vector<16x32xf32>
    %201 = arith.addf %197, %200 : vector<16x32xf32>
    %cst_93 = arith.constant dense<0.000000e+00> : vector<16x32xf32>
    %202 = tpu.matmul %43, %179, %cst_93 {dimension_numbers = #tpu.dot_dimension_numbers<[1], [0], [0], [1], [0, 0, 1, 1], [], []>} : vector<16x16xf32>, vector<16x32xf32>, vector<16x32xf32> -> vector<16x32xf32>
    %c800 = arith.constant 800 : index
    %c0_94 = arith.constant 0 : index
    %203 = vector.load %arg6[%c800, %c0_94] : memref<2912x32xf32, #tpu.memory_space<vmem>>, vector<32x32xf32>
    %cst_95 = arith.constant dense<0.000000e+00> : vector<16x32xf32>
    %204 = tpu.matmul %202, %203, %cst_95 {dimension_numbers = #tpu.dot_dimension_numbers<[1], [0], [0], [1], [0, 0, 1, 1], [], []>} : vector<16x32xf32>, vector<32x32xf32>, vector<16x32xf32> -> vector<16x32xf32>
    %205 = arith.addf %201, %204 : vector<16x32xf32>
    %c154 = arith.constant 154 : index
    %c0_96 = arith.constant 0 : index
    %206 = vector.load %arg6[%c154, %c0_96] : memref<2912x32xf32, #tpu.memory_space<vmem>>, vector<1x32xf32>
    %207 = vector.broadcast %206 : vector<1x32xf32> to vector<16x32xf32>
    %208 = arith.addf %205, %207 : vector<16x32xf32>
    %cst_97 = arith.constant 0.000000e+00 : f32
    %209 = vector.broadcast %cst_97 : f32 to vector<16x32xf32>
    %210 = arith.maximumf %208, %209 : vector<16x32xf32>
    %211 = arith.addf %210, %155 : vector<16x32xf32>
    %c139 = arith.constant 139 : index
    %c0_98 = arith.constant 0 : index
    %212 = vector.load %arg6[%c139, %c0_98] : memref<2912x32xf32, #tpu.memory_space<vmem>>, vector<1x32xf32>
    %c147 = arith.constant 147 : index
    %c0_99 = arith.constant 0 : index
    %213 = vector.load %arg6[%c147, %c0_99] : memref<2912x32xf32, #tpu.memory_space<vmem>>, vector<1x32xf32>
    %cst_100 = arith.constant dense<0.000000e+00> : vector<16xf32>
    %214 = vector.multi_reduction <add>, %211, %cst_100 [1] : vector<16x32xf32> to vector<16xf32>
    %215 = vector.shape_cast %214 : vector<16xf32> to vector<16x1xf32>
    %cst_101 = arith.constant 3.200000e+01 : f32
    %216 = vector.broadcast %cst_101 : f32 to vector<16x1xf32>
    %217 = arith.divf %215, %216 : vector<16x1xf32>
    %218 = vector.broadcast %217 : vector<16x1xf32> to vector<16x32xf32>
    %219 = arith.subf %211, %218 : vector<16x32xf32>
    %220 = arith.mulf %219, %219 : vector<16x32xf32>
    %cst_102 = arith.constant dense<0.000000e+00> : vector<16xf32>
    %221 = vector.multi_reduction <add>, %220, %cst_102 [1] : vector<16x32xf32> to vector<16xf32>
    %222 = vector.shape_cast %221 : vector<16xf32> to vector<16x1xf32>
    %cst_103 = arith.constant 3.200000e+01 : f32
    %223 = vector.broadcast %cst_103 : f32 to vector<16x1xf32>
    %224 = arith.divf %222, %223 : vector<16x1xf32>
    %225 = vector.broadcast %217 : vector<16x1xf32> to vector<16x32xf32>
    %226 = arith.subf %211, %225 : vector<16x32xf32>
    %cst_104 = arith.constant 9.99999997E-7 : f32
    %227 = vector.broadcast %cst_104 : f32 to vector<16x1xf32>
    %228 = arith.addf %224, %227 : vector<16x1xf32>
    %229 = math.rsqrt %228 : vector<16x1xf32>
    %230 = vector.broadcast %229 : vector<16x1xf32> to vector<16x32xf32>
    %231 = arith.mulf %226, %230 : vector<16x32xf32>
    %232 = vector.broadcast %212 : vector<1x32xf32> to vector<16x32xf32>
    %233 = arith.mulf %231, %232 : vector<16x32xf32>
    %234 = vector.broadcast %213 : vector<1x32xf32> to vector<16x32xf32>
    %235 = arith.addf %233, %234 : vector<16x32xf32>
    %c928 = arith.constant 928 : index
    %c0_105 = arith.constant 0 : index
    %236 = vector.load %arg6[%c928, %c0_105] : memref<2912x32xf32, #tpu.memory_space<vmem>>, vector<32x32xf32>
    %cst_106 = arith.constant dense<0.000000e+00> : vector<16x32xf32>
    %237 = tpu.matmul %235, %236, %cst_106 {dimension_numbers = #tpu.dot_dimension_numbers<[1], [0], [0], [1], [0, 0, 1, 1], [], []>} : vector<16x32xf32>, vector<32x32xf32>, vector<16x32xf32> -> vector<16x32xf32>
    %cst_107 = arith.constant dense<0.000000e+00> : vector<16x32xf32>
    %238 = tpu.matmul %23, %235, %cst_107 {dimension_numbers = #tpu.dot_dimension_numbers<[1], [0], [0], [1], [0, 0, 1, 1], [], []>} : vector<16x16xf32>, vector<16x32xf32>, vector<16x32xf32> -> vector<16x32xf32>
    %c832 = arith.constant 832 : index
    %c0_108 = arith.constant 0 : index
    %239 = vector.load %arg6[%c832, %c0_108] : memref<2912x32xf32, #tpu.memory_space<vmem>>, vector<32x32xf32>
    %cst_109 = arith.constant dense<0.000000e+00> : vector<16x32xf32>
    %240 = tpu.matmul %238, %239, %cst_109 {dimension_numbers = #tpu.dot_dimension_numbers<[1], [0], [0], [1], [0, 0, 1, 1], [], []>} : vector<16x32xf32>, vector<32x32xf32>, vector<16x32xf32> -> vector<16x32xf32>
    %241 = arith.addf %237, %240 : vector<16x32xf32>
    %cst_110 = arith.constant dense<0.000000e+00> : vector<16x32xf32>
    %242 = tpu.matmul %27, %235, %cst_110 {dimension_numbers = #tpu.dot_dimension_numbers<[1], [0], [0], [1], [0, 0, 1, 1], [], []>} : vector<16x16xf32>, vector<16x32xf32>, vector<16x32xf32> -> vector<16x32xf32>
    %c864 = arith.constant 864 : index
    %c0_111 = arith.constant 0 : index
    %243 = vector.load %arg6[%c864, %c0_111] : memref<2912x32xf32, #tpu.memory_space<vmem>>, vector<32x32xf32>
    %cst_112 = arith.constant dense<0.000000e+00> : vector<16x32xf32>
    %244 = tpu.matmul %242, %243, %cst_112 {dimension_numbers = #tpu.dot_dimension_numbers<[1], [0], [0], [1], [0, 0, 1, 1], [], []>} : vector<16x32xf32>, vector<32x32xf32>, vector<16x32xf32> -> vector<16x32xf32>
    %245 = arith.addf %241, %244 : vector<16x32xf32>
    %cst_113 = arith.constant dense<0.000000e+00> : vector<16x32xf32>
    %246 = tpu.matmul %31, %235, %cst_113 {dimension_numbers = #tpu.dot_dimension_numbers<[1], [0], [0], [1], [0, 0, 1, 1], [], []>} : vector<16x16xf32>, vector<16x32xf32>, vector<16x32xf32> -> vector<16x32xf32>
    %c896 = arith.constant 896 : index
    %c0_114 = arith.constant 0 : index
    %247 = vector.load %arg6[%c896, %c0_114] : memref<2912x32xf32, #tpu.memory_space<vmem>>, vector<32x32xf32>
    %cst_115 = arith.constant dense<0.000000e+00> : vector<16x32xf32>
    %248 = tpu.matmul %246, %247, %cst_115 {dimension_numbers = #tpu.dot_dimension_numbers<[1], [0], [0], [1], [0, 0, 1, 1], [], []>} : vector<16x32xf32>, vector<32x32xf32>, vector<16x32xf32> -> vector<16x32xf32>
    %249 = arith.addf %245, %248 : vector<16x32xf32>
    %cst_116 = arith.constant dense<0.000000e+00> : vector<16x32xf32>
    %250 = tpu.matmul %35, %235, %cst_116 {dimension_numbers = #tpu.dot_dimension_numbers<[1], [0], [0], [1], [0, 0, 1, 1], [], []>} : vector<16x16xf32>, vector<16x32xf32>, vector<16x32xf32> -> vector<16x32xf32>
    %c960 = arith.constant 960 : index
    %c0_117 = arith.constant 0 : index
    %251 = vector.load %arg6[%c960, %c0_117] : memref<2912x32xf32, #tpu.memory_space<vmem>>, vector<32x32xf32>
    %cst_118 = arith.constant dense<0.000000e+00> : vector<16x32xf32>
    %252 = tpu.matmul %250, %251, %cst_118 {dimension_numbers = #tpu.dot_dimension_numbers<[1], [0], [0], [1], [0, 0, 1, 1], [], []>} : vector<16x32xf32>, vector<32x32xf32>, vector<16x32xf32> -> vector<16x32xf32>
    %253 = arith.addf %249, %252 : vector<16x32xf32>
    %cst_119 = arith.constant dense<0.000000e+00> : vector<16x32xf32>
    %254 = tpu.matmul %39, %235, %cst_119 {dimension_numbers = #tpu.dot_dimension_numbers<[1], [0], [0], [1], [0, 0, 1, 1], [], []>} : vector<16x16xf32>, vector<16x32xf32>, vector<16x32xf32> -> vector<16x32xf32>
    %c992 = arith.constant 992 : index
    %c0_120 = arith.constant 0 : index
    %255 = vector.load %arg6[%c992, %c0_120] : memref<2912x32xf32, #tpu.memory_space<vmem>>, vector<32x32xf32>
    %cst_121 = arith.constant dense<0.000000e+00> : vector<16x32xf32>
    %256 = tpu.matmul %254, %255, %cst_121 {dimension_numbers = #tpu.dot_dimension_numbers<[1], [0], [0], [1], [0, 0, 1, 1], [], []>} : vector<16x32xf32>, vector<32x32xf32>, vector<16x32xf32> -> vector<16x32xf32>
    %257 = arith.addf %253, %256 : vector<16x32xf32>
    %cst_122 = arith.constant dense<0.000000e+00> : vector<16x32xf32>
    %258 = tpu.matmul %43, %235, %cst_122 {dimension_numbers = #tpu.dot_dimension_numbers<[1], [0], [0], [1], [0, 0, 1, 1], [], []>} : vector<16x16xf32>, vector<16x32xf32>, vector<16x32xf32> -> vector<16x32xf32>
    %c1024 = arith.constant 1024 : index
    %c0_123 = arith.constant 0 : index
    %259 = vector.load %arg6[%c1024, %c0_123] : memref<2912x32xf32, #tpu.memory_space<vmem>>, vector<32x32xf32>
    %cst_124 = arith.constant dense<0.000000e+00> : vector<16x32xf32>
    %260 = tpu.matmul %258, %259, %cst_124 {dimension_numbers = #tpu.dot_dimension_numbers<[1], [0], [0], [1], [0, 0, 1, 1], [], []>} : vector<16x32xf32>, vector<32x32xf32>, vector<16x32xf32> -> vector<16x32xf32>
    %261 = arith.addf %257, %260 : vector<16x32xf32>
    %c155 = arith.constant 155 : index
    %c0_125 = arith.constant 0 : index
    %262 = vector.load %arg6[%c155, %c0_125] : memref<2912x32xf32, #tpu.memory_space<vmem>>, vector<1x32xf32>
    %263 = vector.broadcast %262 : vector<1x32xf32> to vector<16x32xf32>
    %264 = arith.addf %261, %263 : vector<16x32xf32>
    %cst_126 = arith.constant 0.000000e+00 : f32
    %265 = vector.broadcast %cst_126 : f32 to vector<16x32xf32>
    %266 = arith.maximumf %264, %265 : vector<16x32xf32>
    %267 = arith.addf %266, %211 : vector<16x32xf32>
    %c1056 = arith.constant 1056 : index
    %c0_127 = arith.constant 0 : index
    %268 = vector.load %arg6[%c1056, %c0_127] : memref<2912x32xf32, #tpu.memory_space<vmem>>, vector<1x32xf32>
    %c1057 = arith.constant 1057 : index
    %c0_128 = arith.constant 0 : index
    %269 = vector.load %arg6[%c1057, %c0_128] : memref<2912x32xf32, #tpu.memory_space<vmem>>, vector<1x32xf32>
    %cst_129 = arith.constant dense<0.000000e+00> : vector<16xf32>
    %270 = vector.multi_reduction <add>, %267, %cst_129 [1] : vector<16x32xf32> to vector<16xf32>
    %271 = vector.shape_cast %270 : vector<16xf32> to vector<16x1xf32>
    %cst_130 = arith.constant 3.200000e+01 : f32
    %272 = vector.broadcast %cst_130 : f32 to vector<16x1xf32>
    %273 = arith.divf %271, %272 : vector<16x1xf32>
    %274 = vector.broadcast %273 : vector<16x1xf32> to vector<16x32xf32>
    %275 = arith.subf %267, %274 : vector<16x32xf32>
    %276 = arith.mulf %275, %275 : vector<16x32xf32>
    %cst_131 = arith.constant dense<0.000000e+00> : vector<16xf32>
    %277 = vector.multi_reduction <add>, %276, %cst_131 [1] : vector<16x32xf32> to vector<16xf32>
    %278 = vector.shape_cast %277 : vector<16xf32> to vector<16x1xf32>
    %cst_132 = arith.constant 3.200000e+01 : f32
    %279 = vector.broadcast %cst_132 : f32 to vector<16x1xf32>
    %280 = arith.divf %278, %279 : vector<16x1xf32>
    %281 = vector.broadcast %273 : vector<16x1xf32> to vector<16x32xf32>
    %282 = arith.subf %267, %281 : vector<16x32xf32>
    %cst_133 = arith.constant 9.99999997E-7 : f32
    %283 = vector.broadcast %cst_133 : f32 to vector<16x1xf32>
    %284 = arith.addf %280, %283 : vector<16x1xf32>
    %285 = math.rsqrt %284 : vector<16x1xf32>
    %286 = vector.broadcast %285 : vector<16x1xf32> to vector<16x32xf32>
    %287 = arith.mulf %282, %286 : vector<16x32xf32>
    %288 = vector.broadcast %268 : vector<1x32xf32> to vector<16x32xf32>
    %289 = arith.mulf %287, %288 : vector<16x32xf32>
    %290 = vector.broadcast %269 : vector<1x32xf32> to vector<16x32xf32>
    %291 = arith.addf %289, %290 : vector<16x32xf32>
    %c1064 = arith.constant 1064 : index
    %c0_134 = arith.constant 0 : index
    %292 = vector.load %arg6[%c1064, %c0_134] : memref<2912x32xf32, #tpu.memory_space<vmem>>, vector<32x32xf32>
    %cst_135 = arith.constant dense<0.000000e+00> : vector<16x32xf32>
    %293 = tpu.matmul %291, %292, %cst_135 {dimension_numbers = #tpu.dot_dimension_numbers<[1], [0], [0], [1], [0, 0, 1, 1], [], []>} : vector<16x32xf32>, vector<32x32xf32>, vector<16x32xf32> -> vector<16x32xf32>
    %c1352 = arith.constant 1352 : index
    %c0_136 = arith.constant 0 : index
    %294 = vector.load %arg6[%c1352, %c0_136] : memref<2912x32xf32, #tpu.memory_space<vmem>>, vector<1x32xf32>
    %295 = vector.broadcast %294 : vector<1x32xf32> to vector<16x32xf32>
    %296 = arith.addf %293, %295 : vector<16x32xf32>
    %c1096 = arith.constant 1096 : index
    %c0_137 = arith.constant 0 : index
    %297 = vector.load %arg6[%c1096, %c0_137] : memref<2912x32xf32, #tpu.memory_space<vmem>>, vector<32x32xf32>
    %c1224 = arith.constant 1224 : index
    %c0_138 = arith.constant 0 : index
    %298 = vector.load %arg6[%c1224, %c0_138] : memref<2912x32xf32, #tpu.memory_space<vmem>>, vector<32x32xf32>
    %c1353 = arith.constant 1353 : index
    %c0_139 = arith.constant 0 : index
    %299 = vector.load %arg6[%c1353, %c0_139] : memref<2912x32xf32, #tpu.memory_space<vmem>>, vector<1x32xf32>
    %c1357 = arith.constant 1357 : index
    %c0_140 = arith.constant 0 : index
    %300 = vector.load %arg6[%c1357, %c0_140] : memref<2912x32xf32, #tpu.memory_space<vmem>>, vector<1x32xf32>
    %cst_141 = arith.constant dense<0.000000e+00> : vector<16x32xf32>
    %301 = tpu.matmul %291, %297, %cst_141 {dimension_numbers = #tpu.dot_dimension_numbers<[1], [0], [0], [1], [0, 0, 1, 1], [], []>} : vector<16x32xf32>, vector<32x32xf32>, vector<16x32xf32> -> vector<16x32xf32>
    %302 = vector.broadcast %299 : vector<1x32xf32> to vector<16x32xf32>
    %303 = arith.addf %301, %302 : vector<16x32xf32>
    %cst_142 = arith.constant dense<0.000000e+00> : vector<16x32xf32>
    %304 = tpu.matmul %291, %298, %cst_142 {dimension_numbers = #tpu.dot_dimension_numbers<[1], [0], [0], [1], [0, 0, 1, 1], [], []>} : vector<16x32xf32>, vector<32x32xf32>, vector<16x32xf32> -> vector<16x32xf32>
    %305 = vector.broadcast %300 : vector<1x32xf32> to vector<16x32xf32>
    %306 = arith.addf %304, %305 : vector<16x32xf32>
    %cst_143 = arith.constant dense<0.000000e+00> : vector<16x16xf32>
    %307 = tpu.matmul %303, %296, %cst_143 {dimension_numbers = #tpu.dot_dimension_numbers<[1], [1], [0], [0], [0, 0, 1, 0], [], []>} : vector<16x32xf32>, vector<16x32xf32>, vector<16x16xf32> -> vector<16x16xf32>
    %cst_144 = arith.constant 0.353553385 : f32
    %308 = vector.broadcast %cst_144 : f32 to vector<16x16xf32>
    %309 = arith.mulf %307, %308 : vector<16x16xf32>
    %310 = arith.addf %309, %16 : vector<16x16xf32>
    %cst_145 = arith.constant dense<0xFF800000> : vector<16xf32>
    %311 = vector.multi_reduction <maximumf>, %310, %cst_145 [1] : vector<16x16xf32> to vector<16xf32>
    %312 = vector.shape_cast %311 : vector<16xf32> to vector<16x1xf32>
    %313 = vector.broadcast %312 : vector<16x1xf32> to vector<16x16xf32>
    %314 = arith.subf %310, %313 : vector<16x16xf32>
    %315 = math.exp %314 : vector<16x16xf32>
    %cst_146 = arith.constant dense<0.000000e+00> : vector<16xf32>
    %316 = vector.multi_reduction <add>, %315, %cst_146 [1] : vector<16x16xf32> to vector<16xf32>
    %317 = vector.shape_cast %316 : vector<16xf32> to vector<16x1xf32>
    %318 = tpu.reciprocal %317 {approx = true} : vector<16x1xf32> -> vector<16x1xf32>
    %319 = vector.broadcast %318 : vector<16x1xf32> to vector<16x16xf32>
    %320 = arith.mulf %315, %319 : vector<16x16xf32>
    %cst_147 = arith.constant dense<0.000000e+00> : vector<16x32xf32>
    %321 = tpu.matmul %320, %306, %cst_147 {dimension_numbers = #tpu.dot_dimension_numbers<[1], [0], [0], [1], [0, 0, 1, 1], [], []>} : vector<16x16xf32>, vector<16x32xf32>, vector<16x32xf32> -> vector<16x32xf32>
    %c1128 = arith.constant 1128 : index
    %c0_148 = arith.constant 0 : index
    %322 = vector.load %arg6[%c1128, %c0_148] : memref<2912x32xf32, #tpu.memory_space<vmem>>, vector<32x32xf32>
    %c1256 = arith.constant 1256 : index
    %c0_149 = arith.constant 0 : index
    %323 = vector.load %arg6[%c1256, %c0_149] : memref<2912x32xf32, #tpu.memory_space<vmem>>, vector<32x32xf32>
    %c1354 = arith.constant 1354 : index
    %c0_150 = arith.constant 0 : index
    %324 = vector.load %arg6[%c1354, %c0_150] : memref<2912x32xf32, #tpu.memory_space<vmem>>, vector<1x32xf32>
    %c1358 = arith.constant 1358 : index
    %c0_151 = arith.constant 0 : index
    %325 = vector.load %arg6[%c1358, %c0_151] : memref<2912x32xf32, #tpu.memory_space<vmem>>, vector<1x32xf32>
    %cst_152 = arith.constant dense<0.000000e+00> : vector<16x32xf32>
    %326 = tpu.matmul %291, %322, %cst_152 {dimension_numbers = #tpu.dot_dimension_numbers<[1], [0], [0], [1], [0, 0, 1, 1], [], []>} : vector<16x32xf32>, vector<32x32xf32>, vector<16x32xf32> -> vector<16x32xf32>
    %327 = vector.broadcast %324 : vector<1x32xf32> to vector<16x32xf32>
    %328 = arith.addf %326, %327 : vector<16x32xf32>
    %cst_153 = arith.constant dense<0.000000e+00> : vector<16x32xf32>
    %329 = tpu.matmul %291, %323, %cst_153 {dimension_numbers = #tpu.dot_dimension_numbers<[1], [0], [0], [1], [0, 0, 1, 1], [], []>} : vector<16x32xf32>, vector<32x32xf32>, vector<16x32xf32> -> vector<16x32xf32>
    %330 = vector.broadcast %325 : vector<1x32xf32> to vector<16x32xf32>
    %331 = arith.addf %329, %330 : vector<16x32xf32>
    %cst_154 = arith.constant dense<0.000000e+00> : vector<16x16xf32>
    %332 = tpu.matmul %328, %296, %cst_154 {dimension_numbers = #tpu.dot_dimension_numbers<[1], [1], [0], [0], [0, 0, 1, 0], [], []>} : vector<16x32xf32>, vector<16x32xf32>, vector<16x16xf32> -> vector<16x16xf32>
    %cst_155 = arith.constant 0.353553385 : f32
    %333 = vector.broadcast %cst_155 : f32 to vector<16x16xf32>
    %334 = arith.mulf %332, %333 : vector<16x16xf32>
    %335 = arith.addf %334, %16 : vector<16x16xf32>
    %cst_156 = arith.constant dense<0xFF800000> : vector<16xf32>
    %336 = vector.multi_reduction <maximumf>, %335, %cst_156 [1] : vector<16x16xf32> to vector<16xf32>
    %337 = vector.shape_cast %336 : vector<16xf32> to vector<16x1xf32>
    %338 = vector.broadcast %337 : vector<16x1xf32> to vector<16x16xf32>
    %339 = arith.subf %335, %338 : vector<16x16xf32>
    %340 = math.exp %339 : vector<16x16xf32>
    %cst_157 = arith.constant dense<0.000000e+00> : vector<16xf32>
    %341 = vector.multi_reduction <add>, %340, %cst_157 [1] : vector<16x16xf32> to vector<16xf32>
    %342 = vector.shape_cast %341 : vector<16xf32> to vector<16x1xf32>
    %343 = tpu.reciprocal %342 {approx = true} : vector<16x1xf32> -> vector<16x1xf32>
    %344 = vector.broadcast %343 : vector<16x1xf32> to vector<16x16xf32>
    %345 = arith.mulf %340, %344 : vector<16x16xf32>
    %cst_158 = arith.constant dense<0.000000e+00> : vector<16x32xf32>
    %346 = tpu.matmul %345, %331, %cst_158 {dimension_numbers = #tpu.dot_dimension_numbers<[1], [0], [0], [1], [0, 0, 1, 1], [], []>} : vector<16x16xf32>, vector<16x32xf32>, vector<16x32xf32> -> vector<16x32xf32>
    %347 = arith.addf %321, %346 : vector<16x32xf32>
    %c1160 = arith.constant 1160 : index
    %c0_159 = arith.constant 0 : index
    %348 = vector.load %arg6[%c1160, %c0_159] : memref<2912x32xf32, #tpu.memory_space<vmem>>, vector<32x32xf32>
    %c1288 = arith.constant 1288 : index
    %c0_160 = arith.constant 0 : index
    %349 = vector.load %arg6[%c1288, %c0_160] : memref<2912x32xf32, #tpu.memory_space<vmem>>, vector<32x32xf32>
    %c1355 = arith.constant 1355 : index
    %c0_161 = arith.constant 0 : index
    %350 = vector.load %arg6[%c1355, %c0_161] : memref<2912x32xf32, #tpu.memory_space<vmem>>, vector<1x32xf32>
    %c1359 = arith.constant 1359 : index
    %c0_162 = arith.constant 0 : index
    %351 = vector.load %arg6[%c1359, %c0_162] : memref<2912x32xf32, #tpu.memory_space<vmem>>, vector<1x32xf32>
    %cst_163 = arith.constant dense<0.000000e+00> : vector<16x32xf32>
    %352 = tpu.matmul %291, %348, %cst_163 {dimension_numbers = #tpu.dot_dimension_numbers<[1], [0], [0], [1], [0, 0, 1, 1], [], []>} : vector<16x32xf32>, vector<32x32xf32>, vector<16x32xf32> -> vector<16x32xf32>
    %353 = vector.broadcast %350 : vector<1x32xf32> to vector<16x32xf32>
    %354 = arith.addf %352, %353 : vector<16x32xf32>
    %cst_164 = arith.constant dense<0.000000e+00> : vector<16x32xf32>
    %355 = tpu.matmul %291, %349, %cst_164 {dimension_numbers = #tpu.dot_dimension_numbers<[1], [0], [0], [1], [0, 0, 1, 1], [], []>} : vector<16x32xf32>, vector<32x32xf32>, vector<16x32xf32> -> vector<16x32xf32>
    %356 = vector.broadcast %351 : vector<1x32xf32> to vector<16x32xf32>
    %357 = arith.addf %355, %356 : vector<16x32xf32>
    %cst_165 = arith.constant dense<0.000000e+00> : vector<16x16xf32>
    %358 = tpu.matmul %354, %296, %cst_165 {dimension_numbers = #tpu.dot_dimension_numbers<[1], [1], [0], [0], [0, 0, 1, 0], [], []>} : vector<16x32xf32>, vector<16x32xf32>, vector<16x16xf32> -> vector<16x16xf32>
    %cst_166 = arith.constant 0.353553385 : f32
    %359 = vector.broadcast %cst_166 : f32 to vector<16x16xf32>
    %360 = arith.mulf %358, %359 : vector<16x16xf32>
    %361 = arith.addf %360, %16 : vector<16x16xf32>
    %cst_167 = arith.constant dense<0xFF800000> : vector<16xf32>
    %362 = vector.multi_reduction <maximumf>, %361, %cst_167 [1] : vector<16x16xf32> to vector<16xf32>
    %363 = vector.shape_cast %362 : vector<16xf32> to vector<16x1xf32>
    %364 = vector.broadcast %363 : vector<16x1xf32> to vector<16x16xf32>
    %365 = arith.subf %361, %364 : vector<16x16xf32>
    %366 = math.exp %365 : vector<16x16xf32>
    %cst_168 = arith.constant dense<0.000000e+00> : vector<16xf32>
    %367 = vector.multi_reduction <add>, %366, %cst_168 [1] : vector<16x16xf32> to vector<16xf32>
    %368 = vector.shape_cast %367 : vector<16xf32> to vector<16x1xf32>
    %369 = tpu.reciprocal %368 {approx = true} : vector<16x1xf32> -> vector<16x1xf32>
    %370 = vector.broadcast %369 : vector<16x1xf32> to vector<16x16xf32>
    %371 = arith.mulf %366, %370 : vector<16x16xf32>
    %cst_169 = arith.constant dense<0.000000e+00> : vector<16x32xf32>
    %372 = tpu.matmul %371, %357, %cst_169 {dimension_numbers = #tpu.dot_dimension_numbers<[1], [0], [0], [1], [0, 0, 1, 1], [], []>} : vector<16x16xf32>, vector<16x32xf32>, vector<16x32xf32> -> vector<16x32xf32>
    %373 = arith.addf %347, %372 : vector<16x32xf32>
    %c1192 = arith.constant 1192 : index
    %c0_170 = arith.constant 0 : index
    %374 = vector.load %arg6[%c1192, %c0_170] : memref<2912x32xf32, #tpu.memory_space<vmem>>, vector<32x32xf32>
    %c1320 = arith.constant 1320 : index
    %c0_171 = arith.constant 0 : index
    %375 = vector.load %arg6[%c1320, %c0_171] : memref<2912x32xf32, #tpu.memory_space<vmem>>, vector<32x32xf32>
    %c1356 = arith.constant 1356 : index
    %c0_172 = arith.constant 0 : index
    %376 = vector.load %arg6[%c1356, %c0_172] : memref<2912x32xf32, #tpu.memory_space<vmem>>, vector<1x32xf32>
    %c1360 = arith.constant 1360 : index
    %c0_173 = arith.constant 0 : index
    %377 = vector.load %arg6[%c1360, %c0_173] : memref<2912x32xf32, #tpu.memory_space<vmem>>, vector<1x32xf32>
    %cst_174 = arith.constant dense<0.000000e+00> : vector<16x32xf32>
    %378 = tpu.matmul %291, %374, %cst_174 {dimension_numbers = #tpu.dot_dimension_numbers<[1], [0], [0], [1], [0, 0, 1, 1], [], []>} : vector<16x32xf32>, vector<32x32xf32>, vector<16x32xf32> -> vector<16x32xf32>
    %379 = vector.broadcast %376 : vector<1x32xf32> to vector<16x32xf32>
    %380 = arith.addf %378, %379 : vector<16x32xf32>
    %cst_175 = arith.constant dense<0.000000e+00> : vector<16x32xf32>
    %381 = tpu.matmul %291, %375, %cst_175 {dimension_numbers = #tpu.dot_dimension_numbers<[1], [0], [0], [1], [0, 0, 1, 1], [], []>} : vector<16x32xf32>, vector<32x32xf32>, vector<16x32xf32> -> vector<16x32xf32>
    %382 = vector.broadcast %377 : vector<1x32xf32> to vector<16x32xf32>
    %383 = arith.addf %381, %382 : vector<16x32xf32>
    %cst_176 = arith.constant dense<0.000000e+00> : vector<16x16xf32>
    %384 = tpu.matmul %380, %296, %cst_176 {dimension_numbers = #tpu.dot_dimension_numbers<[1], [1], [0], [0], [0, 0, 1, 0], [], []>} : vector<16x32xf32>, vector<16x32xf32>, vector<16x16xf32> -> vector<16x16xf32>
    %cst_177 = arith.constant 0.353553385 : f32
    %385 = vector.broadcast %cst_177 : f32 to vector<16x16xf32>
    %386 = arith.mulf %384, %385 : vector<16x16xf32>
    %387 = arith.addf %386, %16 : vector<16x16xf32>
    %cst_178 = arith.constant dense<0xFF800000> : vector<16xf32>
    %388 = vector.multi_reduction <maximumf>, %387, %cst_178 [1] : vector<16x16xf32> to vector<16xf32>
    %389 = vector.shape_cast %388 : vector<16xf32> to vector<16x1xf32>
    %390 = vector.broadcast %389 : vector<16x1xf32> to vector<16x16xf32>
    %391 = arith.subf %387, %390 : vector<16x16xf32>
    %392 = math.exp %391 : vector<16x16xf32>
    %cst_179 = arith.constant dense<0.000000e+00> : vector<16xf32>
    %393 = vector.multi_reduction <add>, %392, %cst_179 [1] : vector<16x16xf32> to vector<16xf32>
    %394 = vector.shape_cast %393 : vector<16xf32> to vector<16x1xf32>
    %395 = tpu.reciprocal %394 {approx = true} : vector<16x1xf32> -> vector<16x1xf32>
    %396 = vector.broadcast %395 : vector<16x1xf32> to vector<16x16xf32>
    %397 = arith.mulf %392, %396 : vector<16x16xf32>
    %cst_180 = arith.constant dense<0.000000e+00> : vector<16x32xf32>
    %398 = tpu.matmul %397, %383, %cst_180 {dimension_numbers = #tpu.dot_dimension_numbers<[1], [0], [0], [1], [0, 0, 1, 1], [], []>} : vector<16x16xf32>, vector<16x32xf32>, vector<16x32xf32> -> vector<16x32xf32>
    %399 = arith.addf %373, %398 : vector<16x32xf32>
    %400 = arith.addf %267, %399 : vector<16x32xf32>
    %c1058 = arith.constant 1058 : index
    %c0_181 = arith.constant 0 : index
    %401 = vector.load %arg6[%c1058, %c0_181] : memref<2912x32xf32, #tpu.memory_space<vmem>>, vector<1x32xf32>
    %c1059 = arith.constant 1059 : index
    %c0_182 = arith.constant 0 : index
    %402 = vector.load %arg6[%c1059, %c0_182] : memref<2912x32xf32, #tpu.memory_space<vmem>>, vector<1x32xf32>
    %cst_183 = arith.constant dense<0.000000e+00> : vector<16xf32>
    %403 = vector.multi_reduction <add>, %400, %cst_183 [1] : vector<16x32xf32> to vector<16xf32>
    %404 = vector.shape_cast %403 : vector<16xf32> to vector<16x1xf32>
    %cst_184 = arith.constant 3.200000e+01 : f32
    %405 = vector.broadcast %cst_184 : f32 to vector<16x1xf32>
    %406 = arith.divf %404, %405 : vector<16x1xf32>
    %407 = vector.broadcast %406 : vector<16x1xf32> to vector<16x32xf32>
    %408 = arith.subf %400, %407 : vector<16x32xf32>
    %409 = arith.mulf %408, %408 : vector<16x32xf32>
    %cst_185 = arith.constant dense<0.000000e+00> : vector<16xf32>
    %410 = vector.multi_reduction <add>, %409, %cst_185 [1] : vector<16x32xf32> to vector<16xf32>
    %411 = vector.shape_cast %410 : vector<16xf32> to vector<16x1xf32>
    %cst_186 = arith.constant 3.200000e+01 : f32
    %412 = vector.broadcast %cst_186 : f32 to vector<16x1xf32>
    %413 = arith.divf %411, %412 : vector<16x1xf32>
    %414 = vector.broadcast %406 : vector<16x1xf32> to vector<16x32xf32>
    %415 = arith.subf %400, %414 : vector<16x32xf32>
    %cst_187 = arith.constant 9.99999997E-7 : f32
    %416 = vector.broadcast %cst_187 : f32 to vector<16x1xf32>
    %417 = arith.addf %413, %416 : vector<16x1xf32>
    %418 = math.rsqrt %417 : vector<16x1xf32>
    %419 = vector.broadcast %418 : vector<16x1xf32> to vector<16x32xf32>
    %420 = arith.mulf %415, %419 : vector<16x32xf32>
    %421 = vector.broadcast %401 : vector<1x32xf32> to vector<16x32xf32>
    %422 = arith.mulf %420, %421 : vector<16x32xf32>
    %423 = vector.broadcast %402 : vector<1x32xf32> to vector<16x32xf32>
    %424 = arith.addf %422, %423 : vector<16x32xf32>
    %c1368 = arith.constant 1368 : index
    %c0_188 = arith.constant 0 : index
    %425 = vector.load %arg6[%c1368, %c0_188] : memref<2912x32xf32, #tpu.memory_space<vmem>>, vector<32x32xf32>
    %cst_189 = arith.constant dense<0.000000e+00> : vector<16x32xf32>
    %426 = tpu.matmul %424, %425, %cst_189 {dimension_numbers = #tpu.dot_dimension_numbers<[1], [0], [0], [1], [0, 0, 1, 1], [], []>} : vector<16x32xf32>, vector<32x32xf32>, vector<16x32xf32> -> vector<16x32xf32>
    %c1400 = arith.constant 1400 : index
    %c0_190 = arith.constant 0 : index
    %427 = vector.load %arg6[%c1400, %c0_190] : memref<2912x32xf32, #tpu.memory_space<vmem>>, vector<1x32xf32>
    %428 = vector.broadcast %427 : vector<1x32xf32> to vector<16x32xf32>
    %429 = arith.addf %426, %428 : vector<16x32xf32>
    %430 = arith.addf %429, %400 : vector<16x32xf32>
    %c0_191 = arith.constant 0 : index
    %c0_192 = arith.constant 0 : index
    %c0_193 = arith.constant 0 : index
    %431 = vector.load %arg2[%c0_191, %c0_192, %c0_193] : memref<1x8x16xf32, #tpu.memory_space<vmem>>, vector<1x8x16xf32>
    %432 = vector.shape_cast %431 : vector<1x8x16xf32> to vector<8x16xf32>
    %c0_194 = arith.constant 0 : index
    %c0_195 = arith.constant 0 : index
    %c0_196 = arith.constant 0 : index
    %433 = vector.load %arg3[%c0_194, %c0_195, %c0_196] : memref<1x8x48xf32, #tpu.memory_space<vmem>>, vector<1x8x48xf32>
    %434 = vector.shape_cast %433 : vector<1x8x48xf32> to vector<8x48xf32>
    %c48 = arith.constant 48 : index
    %c0_197 = arith.constant 0 : index
    %435 = vector.load %arg6[%c48, %c0_197] : memref<2912x32xf32, #tpu.memory_space<vmem>>, vector<16x32xf32>
    %cst_198 = arith.constant dense<0.000000e+00> : vector<8x32xf32>
    %436 = tpu.matmul %432, %435, %cst_198 {dimension_numbers = #tpu.dot_dimension_numbers<[1], [0], [0], [1], [0, 0, 1, 1], [], []>} : vector<8x16xf32>, vector<16x32xf32>, vector<8x32xf32> -> vector<8x32xf32>
    %c64 = arith.constant 64 : index
    %c0_199 = arith.constant 0 : index
    %437 = vector.load %arg6[%c64, %c0_199] : memref<2912x32xf32, #tpu.memory_space<vmem>>, vector<1x32xf32>
    %438 = vector.broadcast %437 : vector<1x32xf32> to vector<8x32xf32>
    %439 = arith.addf %436, %438 : vector<8x32xf32>
    %c0_200 = arith.constant 0 : index
    %c0_201 = arith.constant 0 : index
    %440 = vector.load %arg7[%c0_200, %c0_201] : memref<56x512xf32, #tpu.memory_space<vmem>>, vector<48x512xf32>
    %cst_202 = arith.constant dense<0.000000e+00> : vector<8x512xf32>
    %441 = tpu.matmul %434, %440, %cst_202 {dimension_numbers = #tpu.dot_dimension_numbers<[1], [0], [0], [1], [0, 0, 1, 1], [], []>} : vector<8x48xf32>, vector<48x512xf32>, vector<8x512xf32> -> vector<8x512xf32>
    %c48_203 = arith.constant 48 : index
    %c0_204 = arith.constant 0 : index
    %442 = vector.load %arg7[%c48_203, %c0_204] : memref<56x512xf32, #tpu.memory_space<vmem>>, vector<1x512xf32>
    %443 = vector.broadcast %442 : vector<1x512xf32> to vector<8x512xf32>
    %444 = arith.addf %441, %443 : vector<8x512xf32>
    %cst_205 = arith.constant 0.000000e+00 : f32
    %445 = vector.broadcast %cst_205 : f32 to vector<8x512xf32>
    %446 = arith.maximumf %444, %445 : vector<8x512xf32>
    %447 = vector.extract_strided_slice %446 {offsets = [0, 0], sizes = [8, 10], strides = [1, 1]} : vector<8x512xf32> to vector<8x10xf32>
    %448 = vector.extract_strided_slice %446 {offsets = [0, 10], sizes = [8, 10], strides = [1, 1]} : vector<8x512xf32> to vector<8x10xf32>
    %449 = arith.maximumf %447, %448 : vector<8x10xf32>
    %450 = vector.extract_strided_slice %446 {offsets = [0, 20], sizes = [8, 10], strides = [1, 1]} : vector<8x512xf32> to vector<8x10xf32>
    %451 = arith.maximumf %449, %450 : vector<8x10xf32>
    %452 = vector.extract_strided_slice %446 {offsets = [0, 30], sizes = [8, 10], strides = [1, 1]} : vector<8x512xf32> to vector<8x10xf32>
    %453 = arith.maximumf %451, %452 : vector<8x10xf32>
    %454 = vector.extract_strided_slice %446 {offsets = [0, 40], sizes = [8, 10], strides = [1, 1]} : vector<8x512xf32> to vector<8x10xf32>
    %455 = arith.maximumf %453, %454 : vector<8x10xf32>
    %456 = vector.extract_strided_slice %446 {offsets = [0, 50], sizes = [8, 10], strides = [1, 1]} : vector<8x512xf32> to vector<8x10xf32>
    %457 = arith.maximumf %455, %456 : vector<8x10xf32>
    %c1408 = arith.constant 1408 : index
    %c0_206 = arith.constant 0 : index
    %458 = vector.load %arg6[%c1408, %c0_206] : memref<2912x32xf32, #tpu.memory_space<vmem>>, vector<10x32xf32>
    %cst_207 = arith.constant dense<0.000000e+00> : vector<8x32xf32>
    %459 = tpu.matmul %457, %458, %cst_207 {dimension_numbers = #tpu.dot_dimension_numbers<[1], [0], [0], [1], [0, 0, 1, 1], [], []>} : vector<8x10xf32>, vector<10x32xf32>, vector<8x32xf32> -> vector<8x32xf32>
    %460 = arith.addf %439, %459 : vector<8x32xf32>
    %461 = vector.extract_strided_slice %446 {offsets = [0, 128], sizes = [8, 20], strides = [1, 1]} : vector<8x512xf32> to vector<8x20xf32>
    %462 = vector.extract_strided_slice %446 {offsets = [0, 148], sizes = [8, 20], strides = [1, 1]} : vector<8x512xf32> to vector<8x20xf32>
    %463 = arith.maximumf %461, %462 : vector<8x20xf32>
    %464 = vector.extract_strided_slice %446 {offsets = [0, 168], sizes = [8, 20], strides = [1, 1]} : vector<8x512xf32> to vector<8x20xf32>
    %465 = arith.maximumf %463, %464 : vector<8x20xf32>
    %466 = vector.extract_strided_slice %446 {offsets = [0, 188], sizes = [8, 20], strides = [1, 1]} : vector<8x512xf32> to vector<8x20xf32>
    %467 = arith.maximumf %465, %466 : vector<8x20xf32>
    %468 = vector.extract_strided_slice %446 {offsets = [0, 208], sizes = [8, 20], strides = [1, 1]} : vector<8x512xf32> to vector<8x20xf32>
    %469 = arith.maximumf %467, %468 : vector<8x20xf32>
    %c1424 = arith.constant 1424 : index
    %c0_208 = arith.constant 0 : index
    %470 = vector.load %arg6[%c1424, %c0_208] : memref<2912x32xf32, #tpu.memory_space<vmem>>, vector<20x32xf32>
    %cst_209 = arith.constant dense<0.000000e+00> : vector<8x32xf32>
    %471 = tpu.matmul %469, %470, %cst_209 {dimension_numbers = #tpu.dot_dimension_numbers<[1], [0], [0], [1], [0, 0, 1, 1], [], []>} : vector<8x20xf32>, vector<20x32xf32>, vector<8x32xf32> -> vector<8x32xf32>
    %472 = arith.addf %460, %471 : vector<8x32xf32>
    %473 = vector.extract_strided_slice %446 {offsets = [0, 256], sizes = [8, 30], strides = [1, 1]} : vector<8x512xf32> to vector<8x30xf32>
    %474 = vector.extract_strided_slice %446 {offsets = [0, 286], sizes = [8, 30], strides = [1, 1]} : vector<8x512xf32> to vector<8x30xf32>
    %475 = arith.maximumf %473, %474 : vector<8x30xf32>
    %476 = vector.extract_strided_slice %446 {offsets = [0, 316], sizes = [8, 30], strides = [1, 1]} : vector<8x512xf32> to vector<8x30xf32>
    %477 = arith.maximumf %475, %476 : vector<8x30xf32>
    %478 = vector.extract_strided_slice %446 {offsets = [0, 346], sizes = [8, 30], strides = [1, 1]} : vector<8x512xf32> to vector<8x30xf32>
    %479 = arith.maximumf %477, %478 : vector<8x30xf32>
    %c1448 = arith.constant 1448 : index
    %c0_210 = arith.constant 0 : index
    %480 = vector.load %arg6[%c1448, %c0_210] : memref<2912x32xf32, #tpu.memory_space<vmem>>, vector<30x32xf32>
    %cst_211 = arith.constant dense<0.000000e+00> : vector<8x32xf32>
    %481 = tpu.matmul %479, %480, %cst_211 {dimension_numbers = #tpu.dot_dimension_numbers<[1], [0], [0], [1], [0, 0, 1, 1], [], []>} : vector<8x30xf32>, vector<30x32xf32>, vector<8x32xf32> -> vector<8x32xf32>
    %482 = arith.addf %472, %481 : vector<8x32xf32>
    %483 = vector.extract_strided_slice %446 {offsets = [0, 384], sizes = [8, 40], strides = [1, 1]} : vector<8x512xf32> to vector<8x40xf32>
    %484 = vector.extract_strided_slice %446 {offsets = [0, 424], sizes = [8, 40], strides = [1, 1]} : vector<8x512xf32> to vector<8x40xf32>
    %485 = arith.maximumf %483, %484 : vector<8x40xf32>
    %486 = vector.extract_strided_slice %446 {offsets = [0, 464], sizes = [8, 40], strides = [1, 1]} : vector<8x512xf32> to vector<8x40xf32>
    %487 = arith.maximumf %485, %486 : vector<8x40xf32>
    %c1480 = arith.constant 1480 : index
    %c0_212 = arith.constant 0 : index
    %488 = vector.load %arg6[%c1480, %c0_212] : memref<2912x32xf32, #tpu.memory_space<vmem>>, vector<40x32xf32>
    %cst_213 = arith.constant dense<0.000000e+00> : vector<8x32xf32>
    %489 = tpu.matmul %487, %488, %cst_213 {dimension_numbers = #tpu.dot_dimension_numbers<[1], [0], [0], [1], [0, 0, 1, 1], [], []>} : vector<8x40xf32>, vector<40x32xf32>, vector<8x32xf32> -> vector<8x32xf32>
    %490 = arith.addf %482, %489 : vector<8x32xf32>
    %c0_214 = arith.constant 0 : index
    %c0_215 = arith.constant 0 : index
    %c0_216 = arith.constant 0 : index
    %491 = vector.load %arg5[%c0_214, %c0_215, %c0_216] : memref<1x1x8xf32, #tpu.memory_space<vmem>>, vector<1x1x8xf32>
    %492 = vector.shape_cast %491 : vector<1x1x8xf32> to vector<1x8xf32>
    %cst_217 = arith.constant 1.000000e+00 : f32
    %493 = vector.broadcast %cst_217 : f32 to vector<1x8xf32>
    %494 = arith.subf %493, %492 : vector<1x8xf32>
    %cst_218 = arith.constant -1.000000e+30 : f32
    %495 = vector.broadcast %cst_218 : f32 to vector<1x8xf32>
    %496 = arith.mulf %494, %495 : vector<1x8xf32>
    %c72_219 = arith.constant 72 : index
    %c0_220 = arith.constant 0 : index
    %497 = vector.load %arg6[%c72_219, %c0_220] : memref<2912x32xf32, #tpu.memory_space<vmem>>, vector<8x32xf32>
    %498 = arith.addf %490, %497 : vector<8x32xf32>
    %499 = vector.shape_cast %496 : vector<1x8xf32> to vector<1x8xf32>
    %500 = vector.broadcast %499 : vector<1x8xf32> to vector<8x8xf32>
    %501 = tpu.iota {dimensions = array<i32: 0>} : vector<8x8xi32>
    %502 = tpu.iota {dimensions = array<i32: 1>} : vector<8x8xi32>
    %503 = arith.subi %502, %501 : vector<8x8xi32>
    %c-3_i32_221 = arith.constant -3 : i32
    %504 = vector.broadcast %c-3_i32_221 : i32 to vector<8x8xi32>
    %505 = arith.cmpi eq, %503, %504 : vector<8x8xi32>
    %506 = arith.extui %505 : vector<8x8xi1> to vector<8x8xi32>
    %507 = arith.sitofp %506 : vector<8x8xi32> to vector<8x8xf32>
    %c-2_i32_222 = arith.constant -2 : i32
    %508 = vector.broadcast %c-2_i32_222 : i32 to vector<8x8xi32>
    %509 = arith.cmpi eq, %503, %508 : vector<8x8xi32>
    %510 = arith.extui %509 : vector<8x8xi1> to vector<8x8xi32>
    %511 = arith.sitofp %510 : vector<8x8xi32> to vector<8x8xf32>
    %c-1_i32_223 = arith.constant -1 : i32
    %512 = vector.broadcast %c-1_i32_223 : i32 to vector<8x8xi32>
    %513 = arith.cmpi eq, %503, %512 : vector<8x8xi32>
    %514 = arith.extui %513 : vector<8x8xi1> to vector<8x8xi32>
    %515 = arith.sitofp %514 : vector<8x8xi32> to vector<8x8xf32>
    %c1_i32_224 = arith.constant 1 : i32
    %516 = vector.broadcast %c1_i32_224 : i32 to vector<8x8xi32>
    %517 = arith.cmpi eq, %503, %516 : vector<8x8xi32>
    %518 = arith.extui %517 : vector<8x8xi1> to vector<8x8xi32>
    %519 = arith.sitofp %518 : vector<8x8xi32> to vector<8x8xf32>
    %c2_i32_225 = arith.constant 2 : i32
    %520 = vector.broadcast %c2_i32_225 : i32 to vector<8x8xi32>
    %521 = arith.cmpi eq, %503, %520 : vector<8x8xi32>
    %522 = arith.extui %521 : vector<8x8xi1> to vector<8x8xi32>
    %523 = arith.sitofp %522 : vector<8x8xi32> to vector<8x8xf32>
    %c3_i32_226 = arith.constant 3 : i32
    %524 = vector.broadcast %c3_i32_226 : i32 to vector<8x8xi32>
    %525 = arith.cmpi eq, %503, %524 : vector<8x8xi32>
    %526 = arith.extui %525 : vector<8x8xi1> to vector<8x8xi32>
    %527 = arith.sitofp %526 : vector<8x8xi32> to vector<8x8xf32>
    %c136_227 = arith.constant 136 : index
    %c0_228 = arith.constant 0 : index
    %528 = vector.load %arg6[%c136_227, %c0_228] : memref<2912x32xf32, #tpu.memory_space<vmem>>, vector<1x32xf32>
    %c144_229 = arith.constant 144 : index
    %c0_230 = arith.constant 0 : index
    %529 = vector.load %arg6[%c144_229, %c0_230] : memref<2912x32xf32, #tpu.memory_space<vmem>>, vector<1x32xf32>
    %cst_231 = arith.constant dense<0.000000e+00> : vector<8xf32>
    %530 = vector.multi_reduction <add>, %498, %cst_231 [1] : vector<8x32xf32> to vector<8xf32>
    %531 = vector.shape_cast %530 : vector<8xf32> to vector<8x1xf32>
    %cst_232 = arith.constant 3.200000e+01 : f32
    %532 = vector.broadcast %cst_232 : f32 to vector<8x1xf32>
    %533 = arith.divf %531, %532 : vector<8x1xf32>
    %534 = vector.broadcast %533 : vector<8x1xf32> to vector<8x32xf32>
    %535 = arith.subf %498, %534 : vector<8x32xf32>
    %536 = arith.mulf %535, %535 : vector<8x32xf32>
    %cst_233 = arith.constant dense<0.000000e+00> : vector<8xf32>
    %537 = vector.multi_reduction <add>, %536, %cst_233 [1] : vector<8x32xf32> to vector<8xf32>
    %538 = vector.shape_cast %537 : vector<8xf32> to vector<8x1xf32>
    %cst_234 = arith.constant 3.200000e+01 : f32
    %539 = vector.broadcast %cst_234 : f32 to vector<8x1xf32>
    %540 = arith.divf %538, %539 : vector<8x1xf32>
    %541 = vector.broadcast %533 : vector<8x1xf32> to vector<8x32xf32>
    %542 = arith.subf %498, %541 : vector<8x32xf32>
    %cst_235 = arith.constant 9.99999997E-7 : f32
    %543 = vector.broadcast %cst_235 : f32 to vector<8x1xf32>
    %544 = arith.addf %540, %543 : vector<8x1xf32>
    %545 = math.rsqrt %544 : vector<8x1xf32>
    %546 = vector.broadcast %545 : vector<8x1xf32> to vector<8x32xf32>
    %547 = arith.mulf %542, %546 : vector<8x32xf32>
    %548 = vector.broadcast %528 : vector<1x32xf32> to vector<8x32xf32>
    %549 = arith.mulf %547, %548 : vector<8x32xf32>
    %550 = vector.broadcast %529 : vector<1x32xf32> to vector<8x32xf32>
    %551 = arith.addf %549, %550 : vector<8x32xf32>
    %c256_236 = arith.constant 256 : index
    %c0_237 = arith.constant 0 : index
    %552 = vector.load %arg6[%c256_236, %c0_237] : memref<2912x32xf32, #tpu.memory_space<vmem>>, vector<32x32xf32>
    %cst_238 = arith.constant dense<0.000000e+00> : vector<8x32xf32>
    %553 = tpu.matmul %551, %552, %cst_238 {dimension_numbers = #tpu.dot_dimension_numbers<[1], [0], [0], [1], [0, 0, 1, 1], [], []>} : vector<8x32xf32>, vector<32x32xf32>, vector<8x32xf32> -> vector<8x32xf32>
    %cst_239 = arith.constant dense<0.000000e+00> : vector<8x32xf32>
    %554 = tpu.matmul %507, %551, %cst_239 {dimension_numbers = #tpu.dot_dimension_numbers<[1], [0], [0], [1], [0, 0, 1, 1], [], []>} : vector<8x8xf32>, vector<8x32xf32>, vector<8x32xf32> -> vector<8x32xf32>
    %c160_240 = arith.constant 160 : index
    %c0_241 = arith.constant 0 : index
    %555 = vector.load %arg6[%c160_240, %c0_241] : memref<2912x32xf32, #tpu.memory_space<vmem>>, vector<32x32xf32>
    %cst_242 = arith.constant dense<0.000000e+00> : vector<8x32xf32>
    %556 = tpu.matmul %554, %555, %cst_242 {dimension_numbers = #tpu.dot_dimension_numbers<[1], [0], [0], [1], [0, 0, 1, 1], [], []>} : vector<8x32xf32>, vector<32x32xf32>, vector<8x32xf32> -> vector<8x32xf32>
    %557 = arith.addf %553, %556 : vector<8x32xf32>
    %cst_243 = arith.constant dense<0.000000e+00> : vector<8x32xf32>
    %558 = tpu.matmul %511, %551, %cst_243 {dimension_numbers = #tpu.dot_dimension_numbers<[1], [0], [0], [1], [0, 0, 1, 1], [], []>} : vector<8x8xf32>, vector<8x32xf32>, vector<8x32xf32> -> vector<8x32xf32>
    %c192_244 = arith.constant 192 : index
    %c0_245 = arith.constant 0 : index
    %559 = vector.load %arg6[%c192_244, %c0_245] : memref<2912x32xf32, #tpu.memory_space<vmem>>, vector<32x32xf32>
    %cst_246 = arith.constant dense<0.000000e+00> : vector<8x32xf32>
    %560 = tpu.matmul %558, %559, %cst_246 {dimension_numbers = #tpu.dot_dimension_numbers<[1], [0], [0], [1], [0, 0, 1, 1], [], []>} : vector<8x32xf32>, vector<32x32xf32>, vector<8x32xf32> -> vector<8x32xf32>
    %561 = arith.addf %557, %560 : vector<8x32xf32>
    %cst_247 = arith.constant dense<0.000000e+00> : vector<8x32xf32>
    %562 = tpu.matmul %515, %551, %cst_247 {dimension_numbers = #tpu.dot_dimension_numbers<[1], [0], [0], [1], [0, 0, 1, 1], [], []>} : vector<8x8xf32>, vector<8x32xf32>, vector<8x32xf32> -> vector<8x32xf32>
    %c224_248 = arith.constant 224 : index
    %c0_249 = arith.constant 0 : index
    %563 = vector.load %arg6[%c224_248, %c0_249] : memref<2912x32xf32, #tpu.memory_space<vmem>>, vector<32x32xf32>
    %cst_250 = arith.constant dense<0.000000e+00> : vector<8x32xf32>
    %564 = tpu.matmul %562, %563, %cst_250 {dimension_numbers = #tpu.dot_dimension_numbers<[1], [0], [0], [1], [0, 0, 1, 1], [], []>} : vector<8x32xf32>, vector<32x32xf32>, vector<8x32xf32> -> vector<8x32xf32>
    %565 = arith.addf %561, %564 : vector<8x32xf32>
    %cst_251 = arith.constant dense<0.000000e+00> : vector<8x32xf32>
    %566 = tpu.matmul %519, %551, %cst_251 {dimension_numbers = #tpu.dot_dimension_numbers<[1], [0], [0], [1], [0, 0, 1, 1], [], []>} : vector<8x8xf32>, vector<8x32xf32>, vector<8x32xf32> -> vector<8x32xf32>
    %c288_252 = arith.constant 288 : index
    %c0_253 = arith.constant 0 : index
    %567 = vector.load %arg6[%c288_252, %c0_253] : memref<2912x32xf32, #tpu.memory_space<vmem>>, vector<32x32xf32>
    %cst_254 = arith.constant dense<0.000000e+00> : vector<8x32xf32>
    %568 = tpu.matmul %566, %567, %cst_254 {dimension_numbers = #tpu.dot_dimension_numbers<[1], [0], [0], [1], [0, 0, 1, 1], [], []>} : vector<8x32xf32>, vector<32x32xf32>, vector<8x32xf32> -> vector<8x32xf32>
    %569 = arith.addf %565, %568 : vector<8x32xf32>
    %cst_255 = arith.constant dense<0.000000e+00> : vector<8x32xf32>
    %570 = tpu.matmul %523, %551, %cst_255 {dimension_numbers = #tpu.dot_dimension_numbers<[1], [0], [0], [1], [0, 0, 1, 1], [], []>} : vector<8x8xf32>, vector<8x32xf32>, vector<8x32xf32> -> vector<8x32xf32>
    %c320_256 = arith.constant 320 : index
    %c0_257 = arith.constant 0 : index
    %571 = vector.load %arg6[%c320_256, %c0_257] : memref<2912x32xf32, #tpu.memory_space<vmem>>, vector<32x32xf32>
    %cst_258 = arith.constant dense<0.000000e+00> : vector<8x32xf32>
    %572 = tpu.matmul %570, %571, %cst_258 {dimension_numbers = #tpu.dot_dimension_numbers<[1], [0], [0], [1], [0, 0, 1, 1], [], []>} : vector<8x32xf32>, vector<32x32xf32>, vector<8x32xf32> -> vector<8x32xf32>
    %573 = arith.addf %569, %572 : vector<8x32xf32>
    %cst_259 = arith.constant dense<0.000000e+00> : vector<8x32xf32>
    %574 = tpu.matmul %527, %551, %cst_259 {dimension_numbers = #tpu.dot_dimension_numbers<[1], [0], [0], [1], [0, 0, 1, 1], [], []>} : vector<8x8xf32>, vector<8x32xf32>, vector<8x32xf32> -> vector<8x32xf32>
    %c352_260 = arith.constant 352 : index
    %c0_261 = arith.constant 0 : index
    %575 = vector.load %arg6[%c352_260, %c0_261] : memref<2912x32xf32, #tpu.memory_space<vmem>>, vector<32x32xf32>
    %cst_262 = arith.constant dense<0.000000e+00> : vector<8x32xf32>
    %576 = tpu.matmul %574, %575, %cst_262 {dimension_numbers = #tpu.dot_dimension_numbers<[1], [0], [0], [1], [0, 0, 1, 1], [], []>} : vector<8x32xf32>, vector<32x32xf32>, vector<8x32xf32> -> vector<8x32xf32>
    %577 = arith.addf %573, %576 : vector<8x32xf32>
    %c152_263 = arith.constant 152 : index
    %c0_264 = arith.constant 0 : index
    %578 = vector.load %arg6[%c152_263, %c0_264] : memref<2912x32xf32, #tpu.memory_space<vmem>>, vector<1x32xf32>
    %579 = vector.broadcast %578 : vector<1x32xf32> to vector<8x32xf32>
    %580 = arith.addf %577, %579 : vector<8x32xf32>
    %cst_265 = arith.constant 0.000000e+00 : f32
    %581 = vector.broadcast %cst_265 : f32 to vector<8x32xf32>
    %582 = arith.maximumf %580, %581 : vector<8x32xf32>
    %583 = arith.addf %582, %498 : vector<8x32xf32>
    %c137_266 = arith.constant 137 : index
    %c0_267 = arith.constant 0 : index
    %584 = vector.load %arg6[%c137_266, %c0_267] : memref<2912x32xf32, #tpu.memory_space<vmem>>, vector<1x32xf32>
    %c145_268 = arith.constant 145 : index
    %c0_269 = arith.constant 0 : index
    %585 = vector.load %arg6[%c145_268, %c0_269] : memref<2912x32xf32, #tpu.memory_space<vmem>>, vector<1x32xf32>
    %cst_270 = arith.constant dense<0.000000e+00> : vector<8xf32>
    %586 = vector.multi_reduction <add>, %583, %cst_270 [1] : vector<8x32xf32> to vector<8xf32>
    %587 = vector.shape_cast %586 : vector<8xf32> to vector<8x1xf32>
    %cst_271 = arith.constant 3.200000e+01 : f32
    %588 = vector.broadcast %cst_271 : f32 to vector<8x1xf32>
    %589 = arith.divf %587, %588 : vector<8x1xf32>
    %590 = vector.broadcast %589 : vector<8x1xf32> to vector<8x32xf32>
    %591 = arith.subf %583, %590 : vector<8x32xf32>
    %592 = arith.mulf %591, %591 : vector<8x32xf32>
    %cst_272 = arith.constant dense<0.000000e+00> : vector<8xf32>
    %593 = vector.multi_reduction <add>, %592, %cst_272 [1] : vector<8x32xf32> to vector<8xf32>
    %594 = vector.shape_cast %593 : vector<8xf32> to vector<8x1xf32>
    %cst_273 = arith.constant 3.200000e+01 : f32
    %595 = vector.broadcast %cst_273 : f32 to vector<8x1xf32>
    %596 = arith.divf %594, %595 : vector<8x1xf32>
    %597 = vector.broadcast %589 : vector<8x1xf32> to vector<8x32xf32>
    %598 = arith.subf %583, %597 : vector<8x32xf32>
    %cst_274 = arith.constant 9.99999997E-7 : f32
    %599 = vector.broadcast %cst_274 : f32 to vector<8x1xf32>
    %600 = arith.addf %596, %599 : vector<8x1xf32>
    %601 = math.rsqrt %600 : vector<8x1xf32>
    %602 = vector.broadcast %601 : vector<8x1xf32> to vector<8x32xf32>
    %603 = arith.mulf %598, %602 : vector<8x32xf32>
    %604 = vector.broadcast %584 : vector<1x32xf32> to vector<8x32xf32>
    %605 = arith.mulf %603, %604 : vector<8x32xf32>
    %606 = vector.broadcast %585 : vector<1x32xf32> to vector<8x32xf32>
    %607 = arith.addf %605, %606 : vector<8x32xf32>
    %c480_275 = arith.constant 480 : index
    %c0_276 = arith.constant 0 : index
    %608 = vector.load %arg6[%c480_275, %c0_276] : memref<2912x32xf32, #tpu.memory_space<vmem>>, vector<32x32xf32>
    %cst_277 = arith.constant dense<0.000000e+00> : vector<8x32xf32>
    %609 = tpu.matmul %607, %608, %cst_277 {dimension_numbers = #tpu.dot_dimension_numbers<[1], [0], [0], [1], [0, 0, 1, 1], [], []>} : vector<8x32xf32>, vector<32x32xf32>, vector<8x32xf32> -> vector<8x32xf32>
    %cst_278 = arith.constant dense<0.000000e+00> : vector<8x32xf32>
    %610 = tpu.matmul %507, %607, %cst_278 {dimension_numbers = #tpu.dot_dimension_numbers<[1], [0], [0], [1], [0, 0, 1, 1], [], []>} : vector<8x8xf32>, vector<8x32xf32>, vector<8x32xf32> -> vector<8x32xf32>
    %c384_279 = arith.constant 384 : index
    %c0_280 = arith.constant 0 : index
    %611 = vector.load %arg6[%c384_279, %c0_280] : memref<2912x32xf32, #tpu.memory_space<vmem>>, vector<32x32xf32>
    %cst_281 = arith.constant dense<0.000000e+00> : vector<8x32xf32>
    %612 = tpu.matmul %610, %611, %cst_281 {dimension_numbers = #tpu.dot_dimension_numbers<[1], [0], [0], [1], [0, 0, 1, 1], [], []>} : vector<8x32xf32>, vector<32x32xf32>, vector<8x32xf32> -> vector<8x32xf32>
    %613 = arith.addf %609, %612 : vector<8x32xf32>
    %cst_282 = arith.constant dense<0.000000e+00> : vector<8x32xf32>
    %614 = tpu.matmul %511, %607, %cst_282 {dimension_numbers = #tpu.dot_dimension_numbers<[1], [0], [0], [1], [0, 0, 1, 1], [], []>} : vector<8x8xf32>, vector<8x32xf32>, vector<8x32xf32> -> vector<8x32xf32>
    %c416_283 = arith.constant 416 : index
    %c0_284 = arith.constant 0 : index
    %615 = vector.load %arg6[%c416_283, %c0_284] : memref<2912x32xf32, #tpu.memory_space<vmem>>, vector<32x32xf32>
    %cst_285 = arith.constant dense<0.000000e+00> : vector<8x32xf32>
    %616 = tpu.matmul %614, %615, %cst_285 {dimension_numbers = #tpu.dot_dimension_numbers<[1], [0], [0], [1], [0, 0, 1, 1], [], []>} : vector<8x32xf32>, vector<32x32xf32>, vector<8x32xf32> -> vector<8x32xf32>
    %617 = arith.addf %613, %616 : vector<8x32xf32>
    %cst_286 = arith.constant dense<0.000000e+00> : vector<8x32xf32>
    %618 = tpu.matmul %515, %607, %cst_286 {dimension_numbers = #tpu.dot_dimension_numbers<[1], [0], [0], [1], [0, 0, 1, 1], [], []>} : vector<8x8xf32>, vector<8x32xf32>, vector<8x32xf32> -> vector<8x32xf32>
    %c448_287 = arith.constant 448 : index
    %c0_288 = arith.constant 0 : index
    %619 = vector.load %arg6[%c448_287, %c0_288] : memref<2912x32xf32, #tpu.memory_space<vmem>>, vector<32x32xf32>
    %cst_289 = arith.constant dense<0.000000e+00> : vector<8x32xf32>
    %620 = tpu.matmul %618, %619, %cst_289 {dimension_numbers = #tpu.dot_dimension_numbers<[1], [0], [0], [1], [0, 0, 1, 1], [], []>} : vector<8x32xf32>, vector<32x32xf32>, vector<8x32xf32> -> vector<8x32xf32>
    %621 = arith.addf %617, %620 : vector<8x32xf32>
    %cst_290 = arith.constant dense<0.000000e+00> : vector<8x32xf32>
    %622 = tpu.matmul %519, %607, %cst_290 {dimension_numbers = #tpu.dot_dimension_numbers<[1], [0], [0], [1], [0, 0, 1, 1], [], []>} : vector<8x8xf32>, vector<8x32xf32>, vector<8x32xf32> -> vector<8x32xf32>
    %c512_291 = arith.constant 512 : index
    %c0_292 = arith.constant 0 : index
    %623 = vector.load %arg6[%c512_291, %c0_292] : memref<2912x32xf32, #tpu.memory_space<vmem>>, vector<32x32xf32>
    %cst_293 = arith.constant dense<0.000000e+00> : vector<8x32xf32>
    %624 = tpu.matmul %622, %623, %cst_293 {dimension_numbers = #tpu.dot_dimension_numbers<[1], [0], [0], [1], [0, 0, 1, 1], [], []>} : vector<8x32xf32>, vector<32x32xf32>, vector<8x32xf32> -> vector<8x32xf32>
    %625 = arith.addf %621, %624 : vector<8x32xf32>
    %cst_294 = arith.constant dense<0.000000e+00> : vector<8x32xf32>
    %626 = tpu.matmul %523, %607, %cst_294 {dimension_numbers = #tpu.dot_dimension_numbers<[1], [0], [0], [1], [0, 0, 1, 1], [], []>} : vector<8x8xf32>, vector<8x32xf32>, vector<8x32xf32> -> vector<8x32xf32>
    %c544_295 = arith.constant 544 : index
    %c0_296 = arith.constant 0 : index
    %627 = vector.load %arg6[%c544_295, %c0_296] : memref<2912x32xf32, #tpu.memory_space<vmem>>, vector<32x32xf32>
    %cst_297 = arith.constant dense<0.000000e+00> : vector<8x32xf32>
    %628 = tpu.matmul %626, %627, %cst_297 {dimension_numbers = #tpu.dot_dimension_numbers<[1], [0], [0], [1], [0, 0, 1, 1], [], []>} : vector<8x32xf32>, vector<32x32xf32>, vector<8x32xf32> -> vector<8x32xf32>
    %629 = arith.addf %625, %628 : vector<8x32xf32>
    %cst_298 = arith.constant dense<0.000000e+00> : vector<8x32xf32>
    %630 = tpu.matmul %527, %607, %cst_298 {dimension_numbers = #tpu.dot_dimension_numbers<[1], [0], [0], [1], [0, 0, 1, 1], [], []>} : vector<8x8xf32>, vector<8x32xf32>, vector<8x32xf32> -> vector<8x32xf32>
    %c576_299 = arith.constant 576 : index
    %c0_300 = arith.constant 0 : index
    %631 = vector.load %arg6[%c576_299, %c0_300] : memref<2912x32xf32, #tpu.memory_space<vmem>>, vector<32x32xf32>
    %cst_301 = arith.constant dense<0.000000e+00> : vector<8x32xf32>
    %632 = tpu.matmul %630, %631, %cst_301 {dimension_numbers = #tpu.dot_dimension_numbers<[1], [0], [0], [1], [0, 0, 1, 1], [], []>} : vector<8x32xf32>, vector<32x32xf32>, vector<8x32xf32> -> vector<8x32xf32>
    %633 = arith.addf %629, %632 : vector<8x32xf32>
    %c153_302 = arith.constant 153 : index
    %c0_303 = arith.constant 0 : index
    %634 = vector.load %arg6[%c153_302, %c0_303] : memref<2912x32xf32, #tpu.memory_space<vmem>>, vector<1x32xf32>
    %635 = vector.broadcast %634 : vector<1x32xf32> to vector<8x32xf32>
    %636 = arith.addf %633, %635 : vector<8x32xf32>
    %cst_304 = arith.constant 0.000000e+00 : f32
    %637 = vector.broadcast %cst_304 : f32 to vector<8x32xf32>
    %638 = arith.maximumf %636, %637 : vector<8x32xf32>
    %639 = arith.addf %638, %583 : vector<8x32xf32>
    %c138_305 = arith.constant 138 : index
    %c0_306 = arith.constant 0 : index
    %640 = vector.load %arg6[%c138_305, %c0_306] : memref<2912x32xf32, #tpu.memory_space<vmem>>, vector<1x32xf32>
    %c146_307 = arith.constant 146 : index
    %c0_308 = arith.constant 0 : index
    %641 = vector.load %arg6[%c146_307, %c0_308] : memref<2912x32xf32, #tpu.memory_space<vmem>>, vector<1x32xf32>
    %cst_309 = arith.constant dense<0.000000e+00> : vector<8xf32>
    %642 = vector.multi_reduction <add>, %639, %cst_309 [1] : vector<8x32xf32> to vector<8xf32>
    %643 = vector.shape_cast %642 : vector<8xf32> to vector<8x1xf32>
    %cst_310 = arith.constant 3.200000e+01 : f32
    %644 = vector.broadcast %cst_310 : f32 to vector<8x1xf32>
    %645 = arith.divf %643, %644 : vector<8x1xf32>
    %646 = vector.broadcast %645 : vector<8x1xf32> to vector<8x32xf32>
    %647 = arith.subf %639, %646 : vector<8x32xf32>
    %648 = arith.mulf %647, %647 : vector<8x32xf32>
    %cst_311 = arith.constant dense<0.000000e+00> : vector<8xf32>
    %649 = vector.multi_reduction <add>, %648, %cst_311 [1] : vector<8x32xf32> to vector<8xf32>
    %650 = vector.shape_cast %649 : vector<8xf32> to vector<8x1xf32>
    %cst_312 = arith.constant 3.200000e+01 : f32
    %651 = vector.broadcast %cst_312 : f32 to vector<8x1xf32>
    %652 = arith.divf %650, %651 : vector<8x1xf32>
    %653 = vector.broadcast %645 : vector<8x1xf32> to vector<8x32xf32>
    %654 = arith.subf %639, %653 : vector<8x32xf32>
    %cst_313 = arith.constant 9.99999997E-7 : f32
    %655 = vector.broadcast %cst_313 : f32 to vector<8x1xf32>
    %656 = arith.addf %652, %655 : vector<8x1xf32>
    %657 = math.rsqrt %656 : vector<8x1xf32>
    %658 = vector.broadcast %657 : vector<8x1xf32> to vector<8x32xf32>
    %659 = arith.mulf %654, %658 : vector<8x32xf32>
    %660 = vector.broadcast %640 : vector<1x32xf32> to vector<8x32xf32>
    %661 = arith.mulf %659, %660 : vector<8x32xf32>
    %662 = vector.broadcast %641 : vector<1x32xf32> to vector<8x32xf32>
    %663 = arith.addf %661, %662 : vector<8x32xf32>
    %c704_314 = arith.constant 704 : index
    %c0_315 = arith.constant 0 : index
    %664 = vector.load %arg6[%c704_314, %c0_315] : memref<2912x32xf32, #tpu.memory_space<vmem>>, vector<32x32xf32>
    %cst_316 = arith.constant dense<0.000000e+00> : vector<8x32xf32>
    %665 = tpu.matmul %663, %664, %cst_316 {dimension_numbers = #tpu.dot_dimension_numbers<[1], [0], [0], [1], [0, 0, 1, 1], [], []>} : vector<8x32xf32>, vector<32x32xf32>, vector<8x32xf32> -> vector<8x32xf32>
    %cst_317 = arith.constant dense<0.000000e+00> : vector<8x32xf32>
    %666 = tpu.matmul %507, %663, %cst_317 {dimension_numbers = #tpu.dot_dimension_numbers<[1], [0], [0], [1], [0, 0, 1, 1], [], []>} : vector<8x8xf32>, vector<8x32xf32>, vector<8x32xf32> -> vector<8x32xf32>
    %c608_318 = arith.constant 608 : index
    %c0_319 = arith.constant 0 : index
    %667 = vector.load %arg6[%c608_318, %c0_319] : memref<2912x32xf32, #tpu.memory_space<vmem>>, vector<32x32xf32>
    %cst_320 = arith.constant dense<0.000000e+00> : vector<8x32xf32>
    %668 = tpu.matmul %666, %667, %cst_320 {dimension_numbers = #tpu.dot_dimension_numbers<[1], [0], [0], [1], [0, 0, 1, 1], [], []>} : vector<8x32xf32>, vector<32x32xf32>, vector<8x32xf32> -> vector<8x32xf32>
    %669 = arith.addf %665, %668 : vector<8x32xf32>
    %cst_321 = arith.constant dense<0.000000e+00> : vector<8x32xf32>
    %670 = tpu.matmul %511, %663, %cst_321 {dimension_numbers = #tpu.dot_dimension_numbers<[1], [0], [0], [1], [0, 0, 1, 1], [], []>} : vector<8x8xf32>, vector<8x32xf32>, vector<8x32xf32> -> vector<8x32xf32>
    %c640_322 = arith.constant 640 : index
    %c0_323 = arith.constant 0 : index
    %671 = vector.load %arg6[%c640_322, %c0_323] : memref<2912x32xf32, #tpu.memory_space<vmem>>, vector<32x32xf32>
    %cst_324 = arith.constant dense<0.000000e+00> : vector<8x32xf32>
    %672 = tpu.matmul %670, %671, %cst_324 {dimension_numbers = #tpu.dot_dimension_numbers<[1], [0], [0], [1], [0, 0, 1, 1], [], []>} : vector<8x32xf32>, vector<32x32xf32>, vector<8x32xf32> -> vector<8x32xf32>
    %673 = arith.addf %669, %672 : vector<8x32xf32>
    %cst_325 = arith.constant dense<0.000000e+00> : vector<8x32xf32>
    %674 = tpu.matmul %515, %663, %cst_325 {dimension_numbers = #tpu.dot_dimension_numbers<[1], [0], [0], [1], [0, 0, 1, 1], [], []>} : vector<8x8xf32>, vector<8x32xf32>, vector<8x32xf32> -> vector<8x32xf32>
    %c672_326 = arith.constant 672 : index
    %c0_327 = arith.constant 0 : index
    %675 = vector.load %arg6[%c672_326, %c0_327] : memref<2912x32xf32, #tpu.memory_space<vmem>>, vector<32x32xf32>
    %cst_328 = arith.constant dense<0.000000e+00> : vector<8x32xf32>
    %676 = tpu.matmul %674, %675, %cst_328 {dimension_numbers = #tpu.dot_dimension_numbers<[1], [0], [0], [1], [0, 0, 1, 1], [], []>} : vector<8x32xf32>, vector<32x32xf32>, vector<8x32xf32> -> vector<8x32xf32>
    %677 = arith.addf %673, %676 : vector<8x32xf32>
    %cst_329 = arith.constant dense<0.000000e+00> : vector<8x32xf32>
    %678 = tpu.matmul %519, %663, %cst_329 {dimension_numbers = #tpu.dot_dimension_numbers<[1], [0], [0], [1], [0, 0, 1, 1], [], []>} : vector<8x8xf32>, vector<8x32xf32>, vector<8x32xf32> -> vector<8x32xf32>
    %c736_330 = arith.constant 736 : index
    %c0_331 = arith.constant 0 : index
    %679 = vector.load %arg6[%c736_330, %c0_331] : memref<2912x32xf32, #tpu.memory_space<vmem>>, vector<32x32xf32>
    %cst_332 = arith.constant dense<0.000000e+00> : vector<8x32xf32>
    %680 = tpu.matmul %678, %679, %cst_332 {dimension_numbers = #tpu.dot_dimension_numbers<[1], [0], [0], [1], [0, 0, 1, 1], [], []>} : vector<8x32xf32>, vector<32x32xf32>, vector<8x32xf32> -> vector<8x32xf32>
    %681 = arith.addf %677, %680 : vector<8x32xf32>
    %cst_333 = arith.constant dense<0.000000e+00> : vector<8x32xf32>
    %682 = tpu.matmul %523, %663, %cst_333 {dimension_numbers = #tpu.dot_dimension_numbers<[1], [0], [0], [1], [0, 0, 1, 1], [], []>} : vector<8x8xf32>, vector<8x32xf32>, vector<8x32xf32> -> vector<8x32xf32>
    %c768_334 = arith.constant 768 : index
    %c0_335 = arith.constant 0 : index
    %683 = vector.load %arg6[%c768_334, %c0_335] : memref<2912x32xf32, #tpu.memory_space<vmem>>, vector<32x32xf32>
    %cst_336 = arith.constant dense<0.000000e+00> : vector<8x32xf32>
    %684 = tpu.matmul %682, %683, %cst_336 {dimension_numbers = #tpu.dot_dimension_numbers<[1], [0], [0], [1], [0, 0, 1, 1], [], []>} : vector<8x32xf32>, vector<32x32xf32>, vector<8x32xf32> -> vector<8x32xf32>
    %685 = arith.addf %681, %684 : vector<8x32xf32>
    %cst_337 = arith.constant dense<0.000000e+00> : vector<8x32xf32>
    %686 = tpu.matmul %527, %663, %cst_337 {dimension_numbers = #tpu.dot_dimension_numbers<[1], [0], [0], [1], [0, 0, 1, 1], [], []>} : vector<8x8xf32>, vector<8x32xf32>, vector<8x32xf32> -> vector<8x32xf32>
    %c800_338 = arith.constant 800 : index
    %c0_339 = arith.constant 0 : index
    %687 = vector.load %arg6[%c800_338, %c0_339] : memref<2912x32xf32, #tpu.memory_space<vmem>>, vector<32x32xf32>
    %cst_340 = arith.constant dense<0.000000e+00> : vector<8x32xf32>
    %688 = tpu.matmul %686, %687, %cst_340 {dimension_numbers = #tpu.dot_dimension_numbers<[1], [0], [0], [1], [0, 0, 1, 1], [], []>} : vector<8x32xf32>, vector<32x32xf32>, vector<8x32xf32> -> vector<8x32xf32>
    %689 = arith.addf %685, %688 : vector<8x32xf32>
    %c154_341 = arith.constant 154 : index
    %c0_342 = arith.constant 0 : index
    %690 = vector.load %arg6[%c154_341, %c0_342] : memref<2912x32xf32, #tpu.memory_space<vmem>>, vector<1x32xf32>
    %691 = vector.broadcast %690 : vector<1x32xf32> to vector<8x32xf32>
    %692 = arith.addf %689, %691 : vector<8x32xf32>
    %cst_343 = arith.constant 0.000000e+00 : f32
    %693 = vector.broadcast %cst_343 : f32 to vector<8x32xf32>
    %694 = arith.maximumf %692, %693 : vector<8x32xf32>
    %695 = arith.addf %694, %639 : vector<8x32xf32>
    %c139_344 = arith.constant 139 : index
    %c0_345 = arith.constant 0 : index
    %696 = vector.load %arg6[%c139_344, %c0_345] : memref<2912x32xf32, #tpu.memory_space<vmem>>, vector<1x32xf32>
    %c147_346 = arith.constant 147 : index
    %c0_347 = arith.constant 0 : index
    %697 = vector.load %arg6[%c147_346, %c0_347] : memref<2912x32xf32, #tpu.memory_space<vmem>>, vector<1x32xf32>
    %cst_348 = arith.constant dense<0.000000e+00> : vector<8xf32>
    %698 = vector.multi_reduction <add>, %695, %cst_348 [1] : vector<8x32xf32> to vector<8xf32>
    %699 = vector.shape_cast %698 : vector<8xf32> to vector<8x1xf32>
    %cst_349 = arith.constant 3.200000e+01 : f32
    %700 = vector.broadcast %cst_349 : f32 to vector<8x1xf32>
    %701 = arith.divf %699, %700 : vector<8x1xf32>
    %702 = vector.broadcast %701 : vector<8x1xf32> to vector<8x32xf32>
    %703 = arith.subf %695, %702 : vector<8x32xf32>
    %704 = arith.mulf %703, %703 : vector<8x32xf32>
    %cst_350 = arith.constant dense<0.000000e+00> : vector<8xf32>
    %705 = vector.multi_reduction <add>, %704, %cst_350 [1] : vector<8x32xf32> to vector<8xf32>
    %706 = vector.shape_cast %705 : vector<8xf32> to vector<8x1xf32>
    %cst_351 = arith.constant 3.200000e+01 : f32
    %707 = vector.broadcast %cst_351 : f32 to vector<8x1xf32>
    %708 = arith.divf %706, %707 : vector<8x1xf32>
    %709 = vector.broadcast %701 : vector<8x1xf32> to vector<8x32xf32>
    %710 = arith.subf %695, %709 : vector<8x32xf32>
    %cst_352 = arith.constant 9.99999997E-7 : f32
    %711 = vector.broadcast %cst_352 : f32 to vector<8x1xf32>
    %712 = arith.addf %708, %711 : vector<8x1xf32>
    %713 = math.rsqrt %712 : vector<8x1xf32>
    %714 = vector.broadcast %713 : vector<8x1xf32> to vector<8x32xf32>
    %715 = arith.mulf %710, %714 : vector<8x32xf32>
    %716 = vector.broadcast %696 : vector<1x32xf32> to vector<8x32xf32>
    %717 = arith.mulf %715, %716 : vector<8x32xf32>
    %718 = vector.broadcast %697 : vector<1x32xf32> to vector<8x32xf32>
    %719 = arith.addf %717, %718 : vector<8x32xf32>
    %c928_353 = arith.constant 928 : index
    %c0_354 = arith.constant 0 : index
    %720 = vector.load %arg6[%c928_353, %c0_354] : memref<2912x32xf32, #tpu.memory_space<vmem>>, vector<32x32xf32>
    %cst_355 = arith.constant dense<0.000000e+00> : vector<8x32xf32>
    %721 = tpu.matmul %719, %720, %cst_355 {dimension_numbers = #tpu.dot_dimension_numbers<[1], [0], [0], [1], [0, 0, 1, 1], [], []>} : vector<8x32xf32>, vector<32x32xf32>, vector<8x32xf32> -> vector<8x32xf32>
    %cst_356 = arith.constant dense<0.000000e+00> : vector<8x32xf32>
    %722 = tpu.matmul %507, %719, %cst_356 {dimension_numbers = #tpu.dot_dimension_numbers<[1], [0], [0], [1], [0, 0, 1, 1], [], []>} : vector<8x8xf32>, vector<8x32xf32>, vector<8x32xf32> -> vector<8x32xf32>
    %c832_357 = arith.constant 832 : index
    %c0_358 = arith.constant 0 : index
    %723 = vector.load %arg6[%c832_357, %c0_358] : memref<2912x32xf32, #tpu.memory_space<vmem>>, vector<32x32xf32>
    %cst_359 = arith.constant dense<0.000000e+00> : vector<8x32xf32>
    %724 = tpu.matmul %722, %723, %cst_359 {dimension_numbers = #tpu.dot_dimension_numbers<[1], [0], [0], [1], [0, 0, 1, 1], [], []>} : vector<8x32xf32>, vector<32x32xf32>, vector<8x32xf32> -> vector<8x32xf32>
    %725 = arith.addf %721, %724 : vector<8x32xf32>
    %cst_360 = arith.constant dense<0.000000e+00> : vector<8x32xf32>
    %726 = tpu.matmul %511, %719, %cst_360 {dimension_numbers = #tpu.dot_dimension_numbers<[1], [0], [0], [1], [0, 0, 1, 1], [], []>} : vector<8x8xf32>, vector<8x32xf32>, vector<8x32xf32> -> vector<8x32xf32>
    %c864_361 = arith.constant 864 : index
    %c0_362 = arith.constant 0 : index
    %727 = vector.load %arg6[%c864_361, %c0_362] : memref<2912x32xf32, #tpu.memory_space<vmem>>, vector<32x32xf32>
    %cst_363 = arith.constant dense<0.000000e+00> : vector<8x32xf32>
    %728 = tpu.matmul %726, %727, %cst_363 {dimension_numbers = #tpu.dot_dimension_numbers<[1], [0], [0], [1], [0, 0, 1, 1], [], []>} : vector<8x32xf32>, vector<32x32xf32>, vector<8x32xf32> -> vector<8x32xf32>
    %729 = arith.addf %725, %728 : vector<8x32xf32>
    %cst_364 = arith.constant dense<0.000000e+00> : vector<8x32xf32>
    %730 = tpu.matmul %515, %719, %cst_364 {dimension_numbers = #tpu.dot_dimension_numbers<[1], [0], [0], [1], [0, 0, 1, 1], [], []>} : vector<8x8xf32>, vector<8x32xf32>, vector<8x32xf32> -> vector<8x32xf32>
    %c896_365 = arith.constant 896 : index
    %c0_366 = arith.constant 0 : index
    %731 = vector.load %arg6[%c896_365, %c0_366] : memref<2912x32xf32, #tpu.memory_space<vmem>>, vector<32x32xf32>
    %cst_367 = arith.constant dense<0.000000e+00> : vector<8x32xf32>
    %732 = tpu.matmul %730, %731, %cst_367 {dimension_numbers = #tpu.dot_dimension_numbers<[1], [0], [0], [1], [0, 0, 1, 1], [], []>} : vector<8x32xf32>, vector<32x32xf32>, vector<8x32xf32> -> vector<8x32xf32>
    %733 = arith.addf %729, %732 : vector<8x32xf32>
    %cst_368 = arith.constant dense<0.000000e+00> : vector<8x32xf32>
    %734 = tpu.matmul %519, %719, %cst_368 {dimension_numbers = #tpu.dot_dimension_numbers<[1], [0], [0], [1], [0, 0, 1, 1], [], []>} : vector<8x8xf32>, vector<8x32xf32>, vector<8x32xf32> -> vector<8x32xf32>
    %c960_369 = arith.constant 960 : index
    %c0_370 = arith.constant 0 : index
    %735 = vector.load %arg6[%c960_369, %c0_370] : memref<2912x32xf32, #tpu.memory_space<vmem>>, vector<32x32xf32>
    %cst_371 = arith.constant dense<0.000000e+00> : vector<8x32xf32>
    %736 = tpu.matmul %734, %735, %cst_371 {dimension_numbers = #tpu.dot_dimension_numbers<[1], [0], [0], [1], [0, 0, 1, 1], [], []>} : vector<8x32xf32>, vector<32x32xf32>, vector<8x32xf32> -> vector<8x32xf32>
    %737 = arith.addf %733, %736 : vector<8x32xf32>
    %cst_372 = arith.constant dense<0.000000e+00> : vector<8x32xf32>
    %738 = tpu.matmul %523, %719, %cst_372 {dimension_numbers = #tpu.dot_dimension_numbers<[1], [0], [0], [1], [0, 0, 1, 1], [], []>} : vector<8x8xf32>, vector<8x32xf32>, vector<8x32xf32> -> vector<8x32xf32>
    %c992_373 = arith.constant 992 : index
    %c0_374 = arith.constant 0 : index
    %739 = vector.load %arg6[%c992_373, %c0_374] : memref<2912x32xf32, #tpu.memory_space<vmem>>, vector<32x32xf32>
    %cst_375 = arith.constant dense<0.000000e+00> : vector<8x32xf32>
    %740 = tpu.matmul %738, %739, %cst_375 {dimension_numbers = #tpu.dot_dimension_numbers<[1], [0], [0], [1], [0, 0, 1, 1], [], []>} : vector<8x32xf32>, vector<32x32xf32>, vector<8x32xf32> -> vector<8x32xf32>
    %741 = arith.addf %737, %740 : vector<8x32xf32>
    %cst_376 = arith.constant dense<0.000000e+00> : vector<8x32xf32>
    %742 = tpu.matmul %527, %719, %cst_376 {dimension_numbers = #tpu.dot_dimension_numbers<[1], [0], [0], [1], [0, 0, 1, 1], [], []>} : vector<8x8xf32>, vector<8x32xf32>, vector<8x32xf32> -> vector<8x32xf32>
    %c1024_377 = arith.constant 1024 : index
    %c0_378 = arith.constant 0 : index
    %743 = vector.load %arg6[%c1024_377, %c0_378] : memref<2912x32xf32, #tpu.memory_space<vmem>>, vector<32x32xf32>
    %cst_379 = arith.constant dense<0.000000e+00> : vector<8x32xf32>
    %744 = tpu.matmul %742, %743, %cst_379 {dimension_numbers = #tpu.dot_dimension_numbers<[1], [0], [0], [1], [0, 0, 1, 1], [], []>} : vector<8x32xf32>, vector<32x32xf32>, vector<8x32xf32> -> vector<8x32xf32>
    %745 = arith.addf %741, %744 : vector<8x32xf32>
    %c155_380 = arith.constant 155 : index
    %c0_381 = arith.constant 0 : index
    %746 = vector.load %arg6[%c155_380, %c0_381] : memref<2912x32xf32, #tpu.memory_space<vmem>>, vector<1x32xf32>
    %747 = vector.broadcast %746 : vector<1x32xf32> to vector<8x32xf32>
    %748 = arith.addf %745, %747 : vector<8x32xf32>
    %cst_382 = arith.constant 0.000000e+00 : f32
    %749 = vector.broadcast %cst_382 : f32 to vector<8x32xf32>
    %750 = arith.maximumf %748, %749 : vector<8x32xf32>
    %751 = arith.addf %750, %695 : vector<8x32xf32>
    %c1056_383 = arith.constant 1056 : index
    %c0_384 = arith.constant 0 : index
    %752 = vector.load %arg6[%c1056_383, %c0_384] : memref<2912x32xf32, #tpu.memory_space<vmem>>, vector<1x32xf32>
    %c1057_385 = arith.constant 1057 : index
    %c0_386 = arith.constant 0 : index
    %753 = vector.load %arg6[%c1057_385, %c0_386] : memref<2912x32xf32, #tpu.memory_space<vmem>>, vector<1x32xf32>
    %cst_387 = arith.constant dense<0.000000e+00> : vector<8xf32>
    %754 = vector.multi_reduction <add>, %751, %cst_387 [1] : vector<8x32xf32> to vector<8xf32>
    %755 = vector.shape_cast %754 : vector<8xf32> to vector<8x1xf32>
    %cst_388 = arith.constant 3.200000e+01 : f32
    %756 = vector.broadcast %cst_388 : f32 to vector<8x1xf32>
    %757 = arith.divf %755, %756 : vector<8x1xf32>
    %758 = vector.broadcast %757 : vector<8x1xf32> to vector<8x32xf32>
    %759 = arith.subf %751, %758 : vector<8x32xf32>
    %760 = arith.mulf %759, %759 : vector<8x32xf32>
    %cst_389 = arith.constant dense<0.000000e+00> : vector<8xf32>
    %761 = vector.multi_reduction <add>, %760, %cst_389 [1] : vector<8x32xf32> to vector<8xf32>
    %762 = vector.shape_cast %761 : vector<8xf32> to vector<8x1xf32>
    %cst_390 = arith.constant 3.200000e+01 : f32
    %763 = vector.broadcast %cst_390 : f32 to vector<8x1xf32>
    %764 = arith.divf %762, %763 : vector<8x1xf32>
    %765 = vector.broadcast %757 : vector<8x1xf32> to vector<8x32xf32>
    %766 = arith.subf %751, %765 : vector<8x32xf32>
    %cst_391 = arith.constant 9.99999997E-7 : f32
    %767 = vector.broadcast %cst_391 : f32 to vector<8x1xf32>
    %768 = arith.addf %764, %767 : vector<8x1xf32>
    %769 = math.rsqrt %768 : vector<8x1xf32>
    %770 = vector.broadcast %769 : vector<8x1xf32> to vector<8x32xf32>
    %771 = arith.mulf %766, %770 : vector<8x32xf32>
    %772 = vector.broadcast %752 : vector<1x32xf32> to vector<8x32xf32>
    %773 = arith.mulf %771, %772 : vector<8x32xf32>
    %774 = vector.broadcast %753 : vector<1x32xf32> to vector<8x32xf32>
    %775 = arith.addf %773, %774 : vector<8x32xf32>
    %c1064_392 = arith.constant 1064 : index
    %c0_393 = arith.constant 0 : index
    %776 = vector.load %arg6[%c1064_392, %c0_393] : memref<2912x32xf32, #tpu.memory_space<vmem>>, vector<32x32xf32>
    %cst_394 = arith.constant dense<0.000000e+00> : vector<8x32xf32>
    %777 = tpu.matmul %775, %776, %cst_394 {dimension_numbers = #tpu.dot_dimension_numbers<[1], [0], [0], [1], [0, 0, 1, 1], [], []>} : vector<8x32xf32>, vector<32x32xf32>, vector<8x32xf32> -> vector<8x32xf32>
    %c1352_395 = arith.constant 1352 : index
    %c0_396 = arith.constant 0 : index
    %778 = vector.load %arg6[%c1352_395, %c0_396] : memref<2912x32xf32, #tpu.memory_space<vmem>>, vector<1x32xf32>
    %779 = vector.broadcast %778 : vector<1x32xf32> to vector<8x32xf32>
    %780 = arith.addf %777, %779 : vector<8x32xf32>
    %c1096_397 = arith.constant 1096 : index
    %c0_398 = arith.constant 0 : index
    %781 = vector.load %arg6[%c1096_397, %c0_398] : memref<2912x32xf32, #tpu.memory_space<vmem>>, vector<32x32xf32>
    %c1224_399 = arith.constant 1224 : index
    %c0_400 = arith.constant 0 : index
    %782 = vector.load %arg6[%c1224_399, %c0_400] : memref<2912x32xf32, #tpu.memory_space<vmem>>, vector<32x32xf32>
    %c1353_401 = arith.constant 1353 : index
    %c0_402 = arith.constant 0 : index
    %783 = vector.load %arg6[%c1353_401, %c0_402] : memref<2912x32xf32, #tpu.memory_space<vmem>>, vector<1x32xf32>
    %c1357_403 = arith.constant 1357 : index
    %c0_404 = arith.constant 0 : index
    %784 = vector.load %arg6[%c1357_403, %c0_404] : memref<2912x32xf32, #tpu.memory_space<vmem>>, vector<1x32xf32>
    %cst_405 = arith.constant dense<0.000000e+00> : vector<8x32xf32>
    %785 = tpu.matmul %775, %781, %cst_405 {dimension_numbers = #tpu.dot_dimension_numbers<[1], [0], [0], [1], [0, 0, 1, 1], [], []>} : vector<8x32xf32>, vector<32x32xf32>, vector<8x32xf32> -> vector<8x32xf32>
    %786 = vector.broadcast %783 : vector<1x32xf32> to vector<8x32xf32>
    %787 = arith.addf %785, %786 : vector<8x32xf32>
    %cst_406 = arith.constant dense<0.000000e+00> : vector<8x32xf32>
    %788 = tpu.matmul %775, %782, %cst_406 {dimension_numbers = #tpu.dot_dimension_numbers<[1], [0], [0], [1], [0, 0, 1, 1], [], []>} : vector<8x32xf32>, vector<32x32xf32>, vector<8x32xf32> -> vector<8x32xf32>
    %789 = vector.broadcast %784 : vector<1x32xf32> to vector<8x32xf32>
    %790 = arith.addf %788, %789 : vector<8x32xf32>
    %cst_407 = arith.constant dense<0.000000e+00> : vector<8x8xf32>
    %791 = tpu.matmul %787, %780, %cst_407 {dimension_numbers = #tpu.dot_dimension_numbers<[1], [1], [0], [0], [0, 0, 1, 0], [], []>} : vector<8x32xf32>, vector<8x32xf32>, vector<8x8xf32> -> vector<8x8xf32>
    %cst_408 = arith.constant 0.353553385 : f32
    %792 = vector.broadcast %cst_408 : f32 to vector<8x8xf32>
    %793 = arith.mulf %791, %792 : vector<8x8xf32>
    %794 = arith.addf %793, %500 : vector<8x8xf32>
    %cst_409 = arith.constant dense<0xFF800000> : vector<8xf32>
    %795 = vector.multi_reduction <maximumf>, %794, %cst_409 [1] : vector<8x8xf32> to vector<8xf32>
    %796 = vector.shape_cast %795 : vector<8xf32> to vector<8x1xf32>
    %797 = vector.broadcast %796 : vector<8x1xf32> to vector<8x8xf32>
    %798 = arith.subf %794, %797 : vector<8x8xf32>
    %799 = math.exp %798 : vector<8x8xf32>
    %cst_410 = arith.constant dense<0.000000e+00> : vector<8xf32>
    %800 = vector.multi_reduction <add>, %799, %cst_410 [1] : vector<8x8xf32> to vector<8xf32>
    %801 = vector.shape_cast %800 : vector<8xf32> to vector<8x1xf32>
    %802 = tpu.reciprocal %801 {approx = true} : vector<8x1xf32> -> vector<8x1xf32>
    %803 = vector.broadcast %802 : vector<8x1xf32> to vector<8x8xf32>
    %804 = arith.mulf %799, %803 : vector<8x8xf32>
    %cst_411 = arith.constant dense<0.000000e+00> : vector<8x32xf32>
    %805 = tpu.matmul %804, %790, %cst_411 {dimension_numbers = #tpu.dot_dimension_numbers<[1], [0], [0], [1], [0, 0, 1, 1], [], []>} : vector<8x8xf32>, vector<8x32xf32>, vector<8x32xf32> -> vector<8x32xf32>
    %c1128_412 = arith.constant 1128 : index
    %c0_413 = arith.constant 0 : index
    %806 = vector.load %arg6[%c1128_412, %c0_413] : memref<2912x32xf32, #tpu.memory_space<vmem>>, vector<32x32xf32>
    %c1256_414 = arith.constant 1256 : index
    %c0_415 = arith.constant 0 : index
    %807 = vector.load %arg6[%c1256_414, %c0_415] : memref<2912x32xf32, #tpu.memory_space<vmem>>, vector<32x32xf32>
    %c1354_416 = arith.constant 1354 : index
    %c0_417 = arith.constant 0 : index
    %808 = vector.load %arg6[%c1354_416, %c0_417] : memref<2912x32xf32, #tpu.memory_space<vmem>>, vector<1x32xf32>
    %c1358_418 = arith.constant 1358 : index
    %c0_419 = arith.constant 0 : index
    %809 = vector.load %arg6[%c1358_418, %c0_419] : memref<2912x32xf32, #tpu.memory_space<vmem>>, vector<1x32xf32>
    %cst_420 = arith.constant dense<0.000000e+00> : vector<8x32xf32>
    %810 = tpu.matmul %775, %806, %cst_420 {dimension_numbers = #tpu.dot_dimension_numbers<[1], [0], [0], [1], [0, 0, 1, 1], [], []>} : vector<8x32xf32>, vector<32x32xf32>, vector<8x32xf32> -> vector<8x32xf32>
    %811 = vector.broadcast %808 : vector<1x32xf32> to vector<8x32xf32>
    %812 = arith.addf %810, %811 : vector<8x32xf32>
    %cst_421 = arith.constant dense<0.000000e+00> : vector<8x32xf32>
    %813 = tpu.matmul %775, %807, %cst_421 {dimension_numbers = #tpu.dot_dimension_numbers<[1], [0], [0], [1], [0, 0, 1, 1], [], []>} : vector<8x32xf32>, vector<32x32xf32>, vector<8x32xf32> -> vector<8x32xf32>
    %814 = vector.broadcast %809 : vector<1x32xf32> to vector<8x32xf32>
    %815 = arith.addf %813, %814 : vector<8x32xf32>
    %cst_422 = arith.constant dense<0.000000e+00> : vector<8x8xf32>
    %816 = tpu.matmul %812, %780, %cst_422 {dimension_numbers = #tpu.dot_dimension_numbers<[1], [1], [0], [0], [0, 0, 1, 0], [], []>} : vector<8x32xf32>, vector<8x32xf32>, vector<8x8xf32> -> vector<8x8xf32>
    %cst_423 = arith.constant 0.353553385 : f32
    %817 = vector.broadcast %cst_423 : f32 to vector<8x8xf32>
    %818 = arith.mulf %816, %817 : vector<8x8xf32>
    %819 = arith.addf %818, %500 : vector<8x8xf32>
    %cst_424 = arith.constant dense<0xFF800000> : vector<8xf32>
    %820 = vector.multi_reduction <maximumf>, %819, %cst_424 [1] : vector<8x8xf32> to vector<8xf32>
    %821 = vector.shape_cast %820 : vector<8xf32> to vector<8x1xf32>
    %822 = vector.broadcast %821 : vector<8x1xf32> to vector<8x8xf32>
    %823 = arith.subf %819, %822 : vector<8x8xf32>
    %824 = math.exp %823 : vector<8x8xf32>
    %cst_425 = arith.constant dense<0.000000e+00> : vector<8xf32>
    %825 = vector.multi_reduction <add>, %824, %cst_425 [1] : vector<8x8xf32> to vector<8xf32>
    %826 = vector.shape_cast %825 : vector<8xf32> to vector<8x1xf32>
    %827 = tpu.reciprocal %826 {approx = true} : vector<8x1xf32> -> vector<8x1xf32>
    %828 = vector.broadcast %827 : vector<8x1xf32> to vector<8x8xf32>
    %829 = arith.mulf %824, %828 : vector<8x8xf32>
    %cst_426 = arith.constant dense<0.000000e+00> : vector<8x32xf32>
    %830 = tpu.matmul %829, %815, %cst_426 {dimension_numbers = #tpu.dot_dimension_numbers<[1], [0], [0], [1], [0, 0, 1, 1], [], []>} : vector<8x8xf32>, vector<8x32xf32>, vector<8x32xf32> -> vector<8x32xf32>
    %831 = arith.addf %805, %830 : vector<8x32xf32>
    %c1160_427 = arith.constant 1160 : index
    %c0_428 = arith.constant 0 : index
    %832 = vector.load %arg6[%c1160_427, %c0_428] : memref<2912x32xf32, #tpu.memory_space<vmem>>, vector<32x32xf32>
    %c1288_429 = arith.constant 1288 : index
    %c0_430 = arith.constant 0 : index
    %833 = vector.load %arg6[%c1288_429, %c0_430] : memref<2912x32xf32, #tpu.memory_space<vmem>>, vector<32x32xf32>
    %c1355_431 = arith.constant 1355 : index
    %c0_432 = arith.constant 0 : index
    %834 = vector.load %arg6[%c1355_431, %c0_432] : memref<2912x32xf32, #tpu.memory_space<vmem>>, vector<1x32xf32>
    %c1359_433 = arith.constant 1359 : index
    %c0_434 = arith.constant 0 : index
    %835 = vector.load %arg6[%c1359_433, %c0_434] : memref<2912x32xf32, #tpu.memory_space<vmem>>, vector<1x32xf32>
    %cst_435 = arith.constant dense<0.000000e+00> : vector<8x32xf32>
    %836 = tpu.matmul %775, %832, %cst_435 {dimension_numbers = #tpu.dot_dimension_numbers<[1], [0], [0], [1], [0, 0, 1, 1], [], []>} : vector<8x32xf32>, vector<32x32xf32>, vector<8x32xf32> -> vector<8x32xf32>
    %837 = vector.broadcast %834 : vector<1x32xf32> to vector<8x32xf32>
    %838 = arith.addf %836, %837 : vector<8x32xf32>
    %cst_436 = arith.constant dense<0.000000e+00> : vector<8x32xf32>
    %839 = tpu.matmul %775, %833, %cst_436 {dimension_numbers = #tpu.dot_dimension_numbers<[1], [0], [0], [1], [0, 0, 1, 1], [], []>} : vector<8x32xf32>, vector<32x32xf32>, vector<8x32xf32> -> vector<8x32xf32>
    %840 = vector.broadcast %835 : vector<1x32xf32> to vector<8x32xf32>
    %841 = arith.addf %839, %840 : vector<8x32xf32>
    %cst_437 = arith.constant dense<0.000000e+00> : vector<8x8xf32>
    %842 = tpu.matmul %838, %780, %cst_437 {dimension_numbers = #tpu.dot_dimension_numbers<[1], [1], [0], [0], [0, 0, 1, 0], [], []>} : vector<8x32xf32>, vector<8x32xf32>, vector<8x8xf32> -> vector<8x8xf32>
    %cst_438 = arith.constant 0.353553385 : f32
    %843 = vector.broadcast %cst_438 : f32 to vector<8x8xf32>
    %844 = arith.mulf %842, %843 : vector<8x8xf32>
    %845 = arith.addf %844, %500 : vector<8x8xf32>
    %cst_439 = arith.constant dense<0xFF800000> : vector<8xf32>
    %846 = vector.multi_reduction <maximumf>, %845, %cst_439 [1] : vector<8x8xf32> to vector<8xf32>
    %847 = vector.shape_cast %846 : vector<8xf32> to vector<8x1xf32>
    %848 = vector.broadcast %847 : vector<8x1xf32> to vector<8x8xf32>
    %849 = arith.subf %845, %848 : vector<8x8xf32>
    %850 = math.exp %849 : vector<8x8xf32>
    %cst_440 = arith.constant dense<0.000000e+00> : vector<8xf32>
    %851 = vector.multi_reduction <add>, %850, %cst_440 [1] : vector<8x8xf32> to vector<8xf32>
    %852 = vector.shape_cast %851 : vector<8xf32> to vector<8x1xf32>
    %853 = tpu.reciprocal %852 {approx = true} : vector<8x1xf32> -> vector<8x1xf32>
    %854 = vector.broadcast %853 : vector<8x1xf32> to vector<8x8xf32>
    %855 = arith.mulf %850, %854 : vector<8x8xf32>
    %cst_441 = arith.constant dense<0.000000e+00> : vector<8x32xf32>
    %856 = tpu.matmul %855, %841, %cst_441 {dimension_numbers = #tpu.dot_dimension_numbers<[1], [0], [0], [1], [0, 0, 1, 1], [], []>} : vector<8x8xf32>, vector<8x32xf32>, vector<8x32xf32> -> vector<8x32xf32>
    %857 = arith.addf %831, %856 : vector<8x32xf32>
    %c1192_442 = arith.constant 1192 : index
    %c0_443 = arith.constant 0 : index
    %858 = vector.load %arg6[%c1192_442, %c0_443] : memref<2912x32xf32, #tpu.memory_space<vmem>>, vector<32x32xf32>
    %c1320_444 = arith.constant 1320 : index
    %c0_445 = arith.constant 0 : index
    %859 = vector.load %arg6[%c1320_444, %c0_445] : memref<2912x32xf32, #tpu.memory_space<vmem>>, vector<32x32xf32>
    %c1356_446 = arith.constant 1356 : index
    %c0_447 = arith.constant 0 : index
    %860 = vector.load %arg6[%c1356_446, %c0_447] : memref<2912x32xf32, #tpu.memory_space<vmem>>, vector<1x32xf32>
    %c1360_448 = arith.constant 1360 : index
    %c0_449 = arith.constant 0 : index
    %861 = vector.load %arg6[%c1360_448, %c0_449] : memref<2912x32xf32, #tpu.memory_space<vmem>>, vector<1x32xf32>
    %cst_450 = arith.constant dense<0.000000e+00> : vector<8x32xf32>
    %862 = tpu.matmul %775, %858, %cst_450 {dimension_numbers = #tpu.dot_dimension_numbers<[1], [0], [0], [1], [0, 0, 1, 1], [], []>} : vector<8x32xf32>, vector<32x32xf32>, vector<8x32xf32> -> vector<8x32xf32>
    %863 = vector.broadcast %860 : vector<1x32xf32> to vector<8x32xf32>
    %864 = arith.addf %862, %863 : vector<8x32xf32>
    %cst_451 = arith.constant dense<0.000000e+00> : vector<8x32xf32>
    %865 = tpu.matmul %775, %859, %cst_451 {dimension_numbers = #tpu.dot_dimension_numbers<[1], [0], [0], [1], [0, 0, 1, 1], [], []>} : vector<8x32xf32>, vector<32x32xf32>, vector<8x32xf32> -> vector<8x32xf32>
    %866 = vector.broadcast %861 : vector<1x32xf32> to vector<8x32xf32>
    %867 = arith.addf %865, %866 : vector<8x32xf32>
    %cst_452 = arith.constant dense<0.000000e+00> : vector<8x8xf32>
    %868 = tpu.matmul %864, %780, %cst_452 {dimension_numbers = #tpu.dot_dimension_numbers<[1], [1], [0], [0], [0, 0, 1, 0], [], []>} : vector<8x32xf32>, vector<8x32xf32>, vector<8x8xf32> -> vector<8x8xf32>
    %cst_453 = arith.constant 0.353553385 : f32
    %869 = vector.broadcast %cst_453 : f32 to vector<8x8xf32>
    %870 = arith.mulf %868, %869 : vector<8x8xf32>
    %871 = arith.addf %870, %500 : vector<8x8xf32>
    %cst_454 = arith.constant dense<0xFF800000> : vector<8xf32>
    %872 = vector.multi_reduction <maximumf>, %871, %cst_454 [1] : vector<8x8xf32> to vector<8xf32>
    %873 = vector.shape_cast %872 : vector<8xf32> to vector<8x1xf32>
    %874 = vector.broadcast %873 : vector<8x1xf32> to vector<8x8xf32>
    %875 = arith.subf %871, %874 : vector<8x8xf32>
    %876 = math.exp %875 : vector<8x8xf32>
    %cst_455 = arith.constant dense<0.000000e+00> : vector<8xf32>
    %877 = vector.multi_reduction <add>, %876, %cst_455 [1] : vector<8x8xf32> to vector<8xf32>
    %878 = vector.shape_cast %877 : vector<8xf32> to vector<8x1xf32>
    %879 = tpu.reciprocal %878 {approx = true} : vector<8x1xf32> -> vector<8x1xf32>
    %880 = vector.broadcast %879 : vector<8x1xf32> to vector<8x8xf32>
    %881 = arith.mulf %876, %880 : vector<8x8xf32>
    %cst_456 = arith.constant dense<0.000000e+00> : vector<8x32xf32>
    %882 = tpu.matmul %881, %867, %cst_456 {dimension_numbers = #tpu.dot_dimension_numbers<[1], [0], [0], [1], [0, 0, 1, 1], [], []>} : vector<8x8xf32>, vector<8x32xf32>, vector<8x32xf32> -> vector<8x32xf32>
    %883 = arith.addf %857, %882 : vector<8x32xf32>
    %884 = arith.addf %751, %883 : vector<8x32xf32>
    %c1058_457 = arith.constant 1058 : index
    %c0_458 = arith.constant 0 : index
    %885 = vector.load %arg6[%c1058_457, %c0_458] : memref<2912x32xf32, #tpu.memory_space<vmem>>, vector<1x32xf32>
    %c1059_459 = arith.constant 1059 : index
    %c0_460 = arith.constant 0 : index
    %886 = vector.load %arg6[%c1059_459, %c0_460] : memref<2912x32xf32, #tpu.memory_space<vmem>>, vector<1x32xf32>
    %cst_461 = arith.constant dense<0.000000e+00> : vector<8xf32>
    %887 = vector.multi_reduction <add>, %884, %cst_461 [1] : vector<8x32xf32> to vector<8xf32>
    %888 = vector.shape_cast %887 : vector<8xf32> to vector<8x1xf32>
    %cst_462 = arith.constant 3.200000e+01 : f32
    %889 = vector.broadcast %cst_462 : f32 to vector<8x1xf32>
    %890 = arith.divf %888, %889 : vector<8x1xf32>
    %891 = vector.broadcast %890 : vector<8x1xf32> to vector<8x32xf32>
    %892 = arith.subf %884, %891 : vector<8x32xf32>
    %893 = arith.mulf %892, %892 : vector<8x32xf32>
    %cst_463 = arith.constant dense<0.000000e+00> : vector<8xf32>
    %894 = vector.multi_reduction <add>, %893, %cst_463 [1] : vector<8x32xf32> to vector<8xf32>
    %895 = vector.shape_cast %894 : vector<8xf32> to vector<8x1xf32>
    %cst_464 = arith.constant 3.200000e+01 : f32
    %896 = vector.broadcast %cst_464 : f32 to vector<8x1xf32>
    %897 = arith.divf %895, %896 : vector<8x1xf32>
    %898 = vector.broadcast %890 : vector<8x1xf32> to vector<8x32xf32>
    %899 = arith.subf %884, %898 : vector<8x32xf32>
    %cst_465 = arith.constant 9.99999997E-7 : f32
    %900 = vector.broadcast %cst_465 : f32 to vector<8x1xf32>
    %901 = arith.addf %897, %900 : vector<8x1xf32>
    %902 = math.rsqrt %901 : vector<8x1xf32>
    %903 = vector.broadcast %902 : vector<8x1xf32> to vector<8x32xf32>
    %904 = arith.mulf %899, %903 : vector<8x32xf32>
    %905 = vector.broadcast %885 : vector<1x32xf32> to vector<8x32xf32>
    %906 = arith.mulf %904, %905 : vector<8x32xf32>
    %907 = vector.broadcast %886 : vector<1x32xf32> to vector<8x32xf32>
    %908 = arith.addf %906, %907 : vector<8x32xf32>
    %c1368_466 = arith.constant 1368 : index
    %c0_467 = arith.constant 0 : index
    %909 = vector.load %arg6[%c1368_466, %c0_467] : memref<2912x32xf32, #tpu.memory_space<vmem>>, vector<32x32xf32>
    %cst_468 = arith.constant dense<0.000000e+00> : vector<8x32xf32>
    %910 = tpu.matmul %908, %909, %cst_468 {dimension_numbers = #tpu.dot_dimension_numbers<[1], [0], [0], [1], [0, 0, 1, 1], [], []>} : vector<8x32xf32>, vector<32x32xf32>, vector<8x32xf32> -> vector<8x32xf32>
    %c1400_469 = arith.constant 1400 : index
    %c0_470 = arith.constant 0 : index
    %911 = vector.load %arg6[%c1400_469, %c0_470] : memref<2912x32xf32, #tpu.memory_space<vmem>>, vector<1x32xf32>
    %912 = vector.broadcast %911 : vector<1x32xf32> to vector<8x32xf32>
    %913 = arith.addf %910, %912 : vector<8x32xf32>
    %914 = arith.addf %913, %884 : vector<8x32xf32>
    %c0_471 = arith.constant 0 : index
    %c0_472 = arith.constant 0 : index
    %915 = vector.load %arg8[%c0_471, %c0_472] : memref<17x17xf32, #tpu.memory_space<vmem>>, vector<17x17xf32>
    %cst_473 = arith.constant dense<0.000000e+00> : vector<32xf32>
    %916 = vector.multi_reduction <add>, %914, %cst_473 [0] : vector<8x32xf32> to vector<32xf32>
    %917 = vector.shape_cast %916 : vector<32xf32> to vector<1x32xf32>
    %cst_474 = arith.constant 8.000000e+00 : f32
    %918 = vector.broadcast %cst_474 : f32 to vector<1x32xf32>
    %919 = arith.divf %917, %918 : vector<1x32xf32>
    %920 = tpu.concatenate %919, %430 in 0 : vector<1x32xf32>, vector<16x32xf32> -> vector<17x32xf32>
    %c1824 = arith.constant 1824 : index
    %c0_475 = arith.constant 0 : index
    %921 = vector.load %arg6[%c1824, %c0_475] : memref<2912x32xf32, #tpu.memory_space<vmem>>, vector<32x32xf32>
    %cst_476 = arith.constant dense<0.000000e+00> : vector<17x32xf32>
    %922 = tpu.matmul %920, %921, %cst_476 {dimension_numbers = #tpu.dot_dimension_numbers<[1], [0], [0], [1], [0, 0, 1, 1], [], []>} : vector<17x32xf32>, vector<32x32xf32>, vector<17x32xf32> -> vector<17x32xf32>
    %c1856 = arith.constant 1856 : index
    %c0_477 = arith.constant 0 : index
    %923 = vector.load %arg6[%c1856, %c0_477] : memref<2912x32xf32, #tpu.memory_space<vmem>>, vector<1x32xf32>
    %924 = vector.broadcast %923 : vector<1x32xf32> to vector<17x32xf32>
    %925 = arith.addf %922, %924 : vector<17x32xf32>
    %c1520 = arith.constant 1520 : index
    %c0_478 = arith.constant 0 : index
    %926 = vector.load %arg6[%c1520, %c0_478] : memref<2912x32xf32, #tpu.memory_space<vmem>>, vector<32x32xf32>
    %cst_479 = arith.constant dense<0.000000e+00> : vector<17x32xf32>
    %927 = tpu.matmul %920, %926, %cst_479 {dimension_numbers = #tpu.dot_dimension_numbers<[1], [0], [0], [1], [0, 0, 1, 1], [], []>} : vector<17x32xf32>, vector<32x32xf32>, vector<17x32xf32> -> vector<17x32xf32>
    %c1808 = arith.constant 1808 : index
    %c0_480 = arith.constant 0 : index
    %928 = vector.load %arg6[%c1808, %c0_480] : memref<2912x32xf32, #tpu.memory_space<vmem>>, vector<1x32xf32>
    %929 = vector.broadcast %928 : vector<1x32xf32> to vector<17x32xf32>
    %930 = arith.addf %927, %929 : vector<17x32xf32>
    %c1552 = arith.constant 1552 : index
    %c0_481 = arith.constant 0 : index
    %931 = vector.load %arg6[%c1552, %c0_481] : memref<2912x32xf32, #tpu.memory_space<vmem>>, vector<32x32xf32>
    %c1680 = arith.constant 1680 : index
    %c0_482 = arith.constant 0 : index
    %932 = vector.load %arg6[%c1680, %c0_482] : memref<2912x32xf32, #tpu.memory_space<vmem>>, vector<32x32xf32>
    %c1809 = arith.constant 1809 : index
    %c0_483 = arith.constant 0 : index
    %933 = vector.load %arg6[%c1809, %c0_483] : memref<2912x32xf32, #tpu.memory_space<vmem>>, vector<1x32xf32>
    %c1813 = arith.constant 1813 : index
    %c0_484 = arith.constant 0 : index
    %934 = vector.load %arg6[%c1813, %c0_484] : memref<2912x32xf32, #tpu.memory_space<vmem>>, vector<1x32xf32>
    %cst_485 = arith.constant dense<0.000000e+00> : vector<17x32xf32>
    %935 = tpu.matmul %920, %931, %cst_485 {dimension_numbers = #tpu.dot_dimension_numbers<[1], [0], [0], [1], [0, 0, 1, 1], [], []>} : vector<17x32xf32>, vector<32x32xf32>, vector<17x32xf32> -> vector<17x32xf32>
    %936 = vector.broadcast %933 : vector<1x32xf32> to vector<17x32xf32>
    %937 = arith.addf %935, %936 : vector<17x32xf32>
    %cst_486 = arith.constant dense<0.000000e+00> : vector<17x32xf32>
    %938 = tpu.matmul %920, %932, %cst_486 {dimension_numbers = #tpu.dot_dimension_numbers<[1], [0], [0], [1], [0, 0, 1, 1], [], []>} : vector<17x32xf32>, vector<32x32xf32>, vector<17x32xf32> -> vector<17x32xf32>
    %939 = vector.broadcast %934 : vector<1x32xf32> to vector<17x32xf32>
    %940 = arith.addf %938, %939 : vector<17x32xf32>
    %cst_487 = arith.constant dense<0.000000e+00> : vector<17x17xf32>
    %941 = tpu.matmul %937, %930, %cst_487 {dimension_numbers = #tpu.dot_dimension_numbers<[1], [1], [0], [0], [0, 0, 1, 0], [], []>} : vector<17x32xf32>, vector<17x32xf32>, vector<17x17xf32> -> vector<17x17xf32>
    %cst_488 = arith.constant 0.353553385 : f32
    %942 = vector.broadcast %cst_488 : f32 to vector<17x17xf32>
    %943 = arith.mulf %941, %942 : vector<17x17xf32>
    %944 = arith.addf %943, %915 : vector<17x17xf32>
    %cst_489 = arith.constant dense<0xFF800000> : vector<17xf32>
    %945 = vector.multi_reduction <maximumf>, %944, %cst_489 [1] : vector<17x17xf32> to vector<17xf32>
    %946 = vector.shape_cast %945 : vector<17xf32> to vector<17x1xf32>
    %947 = vector.broadcast %946 : vector<17x1xf32> to vector<17x17xf32>
    %948 = arith.subf %944, %947 : vector<17x17xf32>
    %949 = math.exp %948 : vector<17x17xf32>
    %cst_490 = arith.constant dense<0.000000e+00> : vector<17xf32>
    %950 = vector.multi_reduction <add>, %949, %cst_490 [1] : vector<17x17xf32> to vector<17xf32>
    %951 = vector.shape_cast %950 : vector<17xf32> to vector<17x1xf32>
    %952 = tpu.reciprocal %951 {approx = true} : vector<17x1xf32> -> vector<17x1xf32>
    %953 = vector.broadcast %952 : vector<17x1xf32> to vector<17x17xf32>
    %954 = arith.mulf %949, %953 : vector<17x17xf32>
    %cst_491 = arith.constant dense<0.000000e+00> : vector<17x32xf32>
    %955 = tpu.matmul %954, %940, %cst_491 {dimension_numbers = #tpu.dot_dimension_numbers<[1], [0], [0], [1], [0, 0, 1, 1], [], []>} : vector<17x17xf32>, vector<17x32xf32>, vector<17x32xf32> -> vector<17x32xf32>
    %c1584 = arith.constant 1584 : index
    %c0_492 = arith.constant 0 : index
    %956 = vector.load %arg6[%c1584, %c0_492] : memref<2912x32xf32, #tpu.memory_space<vmem>>, vector<32x32xf32>
    %c1712 = arith.constant 1712 : index
    %c0_493 = arith.constant 0 : index
    %957 = vector.load %arg6[%c1712, %c0_493] : memref<2912x32xf32, #tpu.memory_space<vmem>>, vector<32x32xf32>
    %c1810 = arith.constant 1810 : index
    %c0_494 = arith.constant 0 : index
    %958 = vector.load %arg6[%c1810, %c0_494] : memref<2912x32xf32, #tpu.memory_space<vmem>>, vector<1x32xf32>
    %c1814 = arith.constant 1814 : index
    %c0_495 = arith.constant 0 : index
    %959 = vector.load %arg6[%c1814, %c0_495] : memref<2912x32xf32, #tpu.memory_space<vmem>>, vector<1x32xf32>
    %cst_496 = arith.constant dense<0.000000e+00> : vector<17x32xf32>
    %960 = tpu.matmul %920, %956, %cst_496 {dimension_numbers = #tpu.dot_dimension_numbers<[1], [0], [0], [1], [0, 0, 1, 1], [], []>} : vector<17x32xf32>, vector<32x32xf32>, vector<17x32xf32> -> vector<17x32xf32>
    %961 = vector.broadcast %958 : vector<1x32xf32> to vector<17x32xf32>
    %962 = arith.addf %960, %961 : vector<17x32xf32>
    %cst_497 = arith.constant dense<0.000000e+00> : vector<17x32xf32>
    %963 = tpu.matmul %920, %957, %cst_497 {dimension_numbers = #tpu.dot_dimension_numbers<[1], [0], [0], [1], [0, 0, 1, 1], [], []>} : vector<17x32xf32>, vector<32x32xf32>, vector<17x32xf32> -> vector<17x32xf32>
    %964 = vector.broadcast %959 : vector<1x32xf32> to vector<17x32xf32>
    %965 = arith.addf %963, %964 : vector<17x32xf32>
    %cst_498 = arith.constant dense<0.000000e+00> : vector<17x17xf32>
    %966 = tpu.matmul %962, %930, %cst_498 {dimension_numbers = #tpu.dot_dimension_numbers<[1], [1], [0], [0], [0, 0, 1, 0], [], []>} : vector<17x32xf32>, vector<17x32xf32>, vector<17x17xf32> -> vector<17x17xf32>
    %cst_499 = arith.constant 0.353553385 : f32
    %967 = vector.broadcast %cst_499 : f32 to vector<17x17xf32>
    %968 = arith.mulf %966, %967 : vector<17x17xf32>
    %969 = arith.addf %968, %915 : vector<17x17xf32>
    %cst_500 = arith.constant dense<0xFF800000> : vector<17xf32>
    %970 = vector.multi_reduction <maximumf>, %969, %cst_500 [1] : vector<17x17xf32> to vector<17xf32>
    %971 = vector.shape_cast %970 : vector<17xf32> to vector<17x1xf32>
    %972 = vector.broadcast %971 : vector<17x1xf32> to vector<17x17xf32>
    %973 = arith.subf %969, %972 : vector<17x17xf32>
    %974 = math.exp %973 : vector<17x17xf32>
    %cst_501 = arith.constant dense<0.000000e+00> : vector<17xf32>
    %975 = vector.multi_reduction <add>, %974, %cst_501 [1] : vector<17x17xf32> to vector<17xf32>
    %976 = vector.shape_cast %975 : vector<17xf32> to vector<17x1xf32>
    %977 = tpu.reciprocal %976 {approx = true} : vector<17x1xf32> -> vector<17x1xf32>
    %978 = vector.broadcast %977 : vector<17x1xf32> to vector<17x17xf32>
    %979 = arith.mulf %974, %978 : vector<17x17xf32>
    %cst_502 = arith.constant dense<0.000000e+00> : vector<17x32xf32>
    %980 = tpu.matmul %979, %965, %cst_502 {dimension_numbers = #tpu.dot_dimension_numbers<[1], [0], [0], [1], [0, 0, 1, 1], [], []>} : vector<17x17xf32>, vector<17x32xf32>, vector<17x32xf32> -> vector<17x32xf32>
    %981 = arith.addf %955, %980 : vector<17x32xf32>
    %c1616 = arith.constant 1616 : index
    %c0_503 = arith.constant 0 : index
    %982 = vector.load %arg6[%c1616, %c0_503] : memref<2912x32xf32, #tpu.memory_space<vmem>>, vector<32x32xf32>
    %c1744 = arith.constant 1744 : index
    %c0_504 = arith.constant 0 : index
    %983 = vector.load %arg6[%c1744, %c0_504] : memref<2912x32xf32, #tpu.memory_space<vmem>>, vector<32x32xf32>
    %c1811 = arith.constant 1811 : index
    %c0_505 = arith.constant 0 : index
    %984 = vector.load %arg6[%c1811, %c0_505] : memref<2912x32xf32, #tpu.memory_space<vmem>>, vector<1x32xf32>
    %c1815 = arith.constant 1815 : index
    %c0_506 = arith.constant 0 : index
    %985 = vector.load %arg6[%c1815, %c0_506] : memref<2912x32xf32, #tpu.memory_space<vmem>>, vector<1x32xf32>
    %cst_507 = arith.constant dense<0.000000e+00> : vector<17x32xf32>
    %986 = tpu.matmul %920, %982, %cst_507 {dimension_numbers = #tpu.dot_dimension_numbers<[1], [0], [0], [1], [0, 0, 1, 1], [], []>} : vector<17x32xf32>, vector<32x32xf32>, vector<17x32xf32> -> vector<17x32xf32>
    %987 = vector.broadcast %984 : vector<1x32xf32> to vector<17x32xf32>
    %988 = arith.addf %986, %987 : vector<17x32xf32>
    %cst_508 = arith.constant dense<0.000000e+00> : vector<17x32xf32>
    %989 = tpu.matmul %920, %983, %cst_508 {dimension_numbers = #tpu.dot_dimension_numbers<[1], [0], [0], [1], [0, 0, 1, 1], [], []>} : vector<17x32xf32>, vector<32x32xf32>, vector<17x32xf32> -> vector<17x32xf32>
    %990 = vector.broadcast %985 : vector<1x32xf32> to vector<17x32xf32>
    %991 = arith.addf %989, %990 : vector<17x32xf32>
    %cst_509 = arith.constant dense<0.000000e+00> : vector<17x17xf32>
    %992 = tpu.matmul %988, %930, %cst_509 {dimension_numbers = #tpu.dot_dimension_numbers<[1], [1], [0], [0], [0, 0, 1, 0], [], []>} : vector<17x32xf32>, vector<17x32xf32>, vector<17x17xf32> -> vector<17x17xf32>
    %cst_510 = arith.constant 0.353553385 : f32
    %993 = vector.broadcast %cst_510 : f32 to vector<17x17xf32>
    %994 = arith.mulf %992, %993 : vector<17x17xf32>
    %995 = arith.addf %994, %915 : vector<17x17xf32>
    %cst_511 = arith.constant dense<0xFF800000> : vector<17xf32>
    %996 = vector.multi_reduction <maximumf>, %995, %cst_511 [1] : vector<17x17xf32> to vector<17xf32>
    %997 = vector.shape_cast %996 : vector<17xf32> to vector<17x1xf32>
    %998 = vector.broadcast %997 : vector<17x1xf32> to vector<17x17xf32>
    %999 = arith.subf %995, %998 : vector<17x17xf32>
    %1000 = math.exp %999 : vector<17x17xf32>
    %cst_512 = arith.constant dense<0.000000e+00> : vector<17xf32>
    %1001 = vector.multi_reduction <add>, %1000, %cst_512 [1] : vector<17x17xf32> to vector<17xf32>
    %1002 = vector.shape_cast %1001 : vector<17xf32> to vector<17x1xf32>
    %1003 = tpu.reciprocal %1002 {approx = true} : vector<17x1xf32> -> vector<17x1xf32>
    %1004 = vector.broadcast %1003 : vector<17x1xf32> to vector<17x17xf32>
    %1005 = arith.mulf %1000, %1004 : vector<17x17xf32>
    %cst_513 = arith.constant dense<0.000000e+00> : vector<17x32xf32>
    %1006 = tpu.matmul %1005, %991, %cst_513 {dimension_numbers = #tpu.dot_dimension_numbers<[1], [0], [0], [1], [0, 0, 1, 1], [], []>} : vector<17x17xf32>, vector<17x32xf32>, vector<17x32xf32> -> vector<17x32xf32>
    %1007 = arith.addf %981, %1006 : vector<17x32xf32>
    %c1648 = arith.constant 1648 : index
    %c0_514 = arith.constant 0 : index
    %1008 = vector.load %arg6[%c1648, %c0_514] : memref<2912x32xf32, #tpu.memory_space<vmem>>, vector<32x32xf32>
    %c1776 = arith.constant 1776 : index
    %c0_515 = arith.constant 0 : index
    %1009 = vector.load %arg6[%c1776, %c0_515] : memref<2912x32xf32, #tpu.memory_space<vmem>>, vector<32x32xf32>
    %c1812 = arith.constant 1812 : index
    %c0_516 = arith.constant 0 : index
    %1010 = vector.load %arg6[%c1812, %c0_516] : memref<2912x32xf32, #tpu.memory_space<vmem>>, vector<1x32xf32>
    %c1816 = arith.constant 1816 : index
    %c0_517 = arith.constant 0 : index
    %1011 = vector.load %arg6[%c1816, %c0_517] : memref<2912x32xf32, #tpu.memory_space<vmem>>, vector<1x32xf32>
    %cst_518 = arith.constant dense<0.000000e+00> : vector<17x32xf32>
    %1012 = tpu.matmul %920, %1008, %cst_518 {dimension_numbers = #tpu.dot_dimension_numbers<[1], [0], [0], [1], [0, 0, 1, 1], [], []>} : vector<17x32xf32>, vector<32x32xf32>, vector<17x32xf32> -> vector<17x32xf32>
    %1013 = vector.broadcast %1010 : vector<1x32xf32> to vector<17x32xf32>
    %1014 = arith.addf %1012, %1013 : vector<17x32xf32>
    %cst_519 = arith.constant dense<0.000000e+00> : vector<17x32xf32>
    %1015 = tpu.matmul %920, %1009, %cst_519 {dimension_numbers = #tpu.dot_dimension_numbers<[1], [0], [0], [1], [0, 0, 1, 1], [], []>} : vector<17x32xf32>, vector<32x32xf32>, vector<17x32xf32> -> vector<17x32xf32>
    %1016 = vector.broadcast %1011 : vector<1x32xf32> to vector<17x32xf32>
    %1017 = arith.addf %1015, %1016 : vector<17x32xf32>
    %cst_520 = arith.constant dense<0.000000e+00> : vector<17x17xf32>
    %1018 = tpu.matmul %1014, %930, %cst_520 {dimension_numbers = #tpu.dot_dimension_numbers<[1], [1], [0], [0], [0, 0, 1, 0], [], []>} : vector<17x32xf32>, vector<17x32xf32>, vector<17x17xf32> -> vector<17x17xf32>
    %cst_521 = arith.constant 0.353553385 : f32
    %1019 = vector.broadcast %cst_521 : f32 to vector<17x17xf32>
    %1020 = arith.mulf %1018, %1019 : vector<17x17xf32>
    %1021 = arith.addf %1020, %915 : vector<17x17xf32>
    %cst_522 = arith.constant dense<0xFF800000> : vector<17xf32>
    %1022 = vector.multi_reduction <maximumf>, %1021, %cst_522 [1] : vector<17x17xf32> to vector<17xf32>
    %1023 = vector.shape_cast %1022 : vector<17xf32> to vector<17x1xf32>
    %1024 = vector.broadcast %1023 : vector<17x1xf32> to vector<17x17xf32>
    %1025 = arith.subf %1021, %1024 : vector<17x17xf32>
    %1026 = math.exp %1025 : vector<17x17xf32>
    %cst_523 = arith.constant dense<0.000000e+00> : vector<17xf32>
    %1027 = vector.multi_reduction <add>, %1026, %cst_523 [1] : vector<17x17xf32> to vector<17xf32>
    %1028 = vector.shape_cast %1027 : vector<17xf32> to vector<17x1xf32>
    %1029 = tpu.reciprocal %1028 {approx = true} : vector<17x1xf32> -> vector<17x1xf32>
    %1030 = vector.broadcast %1029 : vector<17x1xf32> to vector<17x17xf32>
    %1031 = arith.mulf %1026, %1030 : vector<17x17xf32>
    %cst_524 = arith.constant dense<0.000000e+00> : vector<17x32xf32>
    %1032 = tpu.matmul %1031, %1017, %cst_524 {dimension_numbers = #tpu.dot_dimension_numbers<[1], [0], [0], [1], [0, 0, 1, 1], [], []>} : vector<17x17xf32>, vector<17x32xf32>, vector<17x32xf32> -> vector<17x32xf32>
    %1033 = arith.addf %1007, %1032 : vector<17x32xf32>
    %1034 = arith.addf %1033, %925 : vector<17x32xf32>
    %c2168 = arith.constant 2168 : index
    %c0_525 = arith.constant 0 : index
    %1035 = vector.load %arg6[%c2168, %c0_525] : memref<2912x32xf32, #tpu.memory_space<vmem>>, vector<32x32xf32>
    %cst_526 = arith.constant dense<0.000000e+00> : vector<17x32xf32>
    %1036 = tpu.matmul %1034, %1035, %cst_526 {dimension_numbers = #tpu.dot_dimension_numbers<[1], [0], [0], [1], [0, 0, 1, 1], [], []>} : vector<17x32xf32>, vector<32x32xf32>, vector<17x32xf32> -> vector<17x32xf32>
    %c2200 = arith.constant 2200 : index
    %c0_527 = arith.constant 0 : index
    %1037 = vector.load %arg6[%c2200, %c0_527] : memref<2912x32xf32, #tpu.memory_space<vmem>>, vector<1x32xf32>
    %1038 = vector.broadcast %1037 : vector<1x32xf32> to vector<17x32xf32>
    %1039 = arith.addf %1036, %1038 : vector<17x32xf32>
    %c1864 = arith.constant 1864 : index
    %c0_528 = arith.constant 0 : index
    %1040 = vector.load %arg6[%c1864, %c0_528] : memref<2912x32xf32, #tpu.memory_space<vmem>>, vector<32x32xf32>
    %cst_529 = arith.constant dense<0.000000e+00> : vector<17x32xf32>
    %1041 = tpu.matmul %1034, %1040, %cst_529 {dimension_numbers = #tpu.dot_dimension_numbers<[1], [0], [0], [1], [0, 0, 1, 1], [], []>} : vector<17x32xf32>, vector<32x32xf32>, vector<17x32xf32> -> vector<17x32xf32>
    %c2152 = arith.constant 2152 : index
    %c0_530 = arith.constant 0 : index
    %1042 = vector.load %arg6[%c2152, %c0_530] : memref<2912x32xf32, #tpu.memory_space<vmem>>, vector<1x32xf32>
    %1043 = vector.broadcast %1042 : vector<1x32xf32> to vector<17x32xf32>
    %1044 = arith.addf %1041, %1043 : vector<17x32xf32>
    %c1896 = arith.constant 1896 : index
    %c0_531 = arith.constant 0 : index
    %1045 = vector.load %arg6[%c1896, %c0_531] : memref<2912x32xf32, #tpu.memory_space<vmem>>, vector<32x32xf32>
    %c2024 = arith.constant 2024 : index
    %c0_532 = arith.constant 0 : index
    %1046 = vector.load %arg6[%c2024, %c0_532] : memref<2912x32xf32, #tpu.memory_space<vmem>>, vector<32x32xf32>
    %c2153 = arith.constant 2153 : index
    %c0_533 = arith.constant 0 : index
    %1047 = vector.load %arg6[%c2153, %c0_533] : memref<2912x32xf32, #tpu.memory_space<vmem>>, vector<1x32xf32>
    %c2157 = arith.constant 2157 : index
    %c0_534 = arith.constant 0 : index
    %1048 = vector.load %arg6[%c2157, %c0_534] : memref<2912x32xf32, #tpu.memory_space<vmem>>, vector<1x32xf32>
    %cst_535 = arith.constant dense<0.000000e+00> : vector<17x32xf32>
    %1049 = tpu.matmul %1034, %1045, %cst_535 {dimension_numbers = #tpu.dot_dimension_numbers<[1], [0], [0], [1], [0, 0, 1, 1], [], []>} : vector<17x32xf32>, vector<32x32xf32>, vector<17x32xf32> -> vector<17x32xf32>
    %1050 = vector.broadcast %1047 : vector<1x32xf32> to vector<17x32xf32>
    %1051 = arith.addf %1049, %1050 : vector<17x32xf32>
    %cst_536 = arith.constant dense<0.000000e+00> : vector<17x32xf32>
    %1052 = tpu.matmul %1034, %1046, %cst_536 {dimension_numbers = #tpu.dot_dimension_numbers<[1], [0], [0], [1], [0, 0, 1, 1], [], []>} : vector<17x32xf32>, vector<32x32xf32>, vector<17x32xf32> -> vector<17x32xf32>
    %1053 = vector.broadcast %1048 : vector<1x32xf32> to vector<17x32xf32>
    %1054 = arith.addf %1052, %1053 : vector<17x32xf32>
    %cst_537 = arith.constant dense<0.000000e+00> : vector<17x17xf32>
    %1055 = tpu.matmul %1051, %1044, %cst_537 {dimension_numbers = #tpu.dot_dimension_numbers<[1], [1], [0], [0], [0, 0, 1, 0], [], []>} : vector<17x32xf32>, vector<17x32xf32>, vector<17x17xf32> -> vector<17x17xf32>
    %cst_538 = arith.constant 0.353553385 : f32
    %1056 = vector.broadcast %cst_538 : f32 to vector<17x17xf32>
    %1057 = arith.mulf %1055, %1056 : vector<17x17xf32>
    %1058 = arith.addf %1057, %915 : vector<17x17xf32>
    %cst_539 = arith.constant dense<0xFF800000> : vector<17xf32>
    %1059 = vector.multi_reduction <maximumf>, %1058, %cst_539 [1] : vector<17x17xf32> to vector<17xf32>
    %1060 = vector.shape_cast %1059 : vector<17xf32> to vector<17x1xf32>
    %1061 = vector.broadcast %1060 : vector<17x1xf32> to vector<17x17xf32>
    %1062 = arith.subf %1058, %1061 : vector<17x17xf32>
    %1063 = math.exp %1062 : vector<17x17xf32>
    %cst_540 = arith.constant dense<0.000000e+00> : vector<17xf32>
    %1064 = vector.multi_reduction <add>, %1063, %cst_540 [1] : vector<17x17xf32> to vector<17xf32>
    %1065 = vector.shape_cast %1064 : vector<17xf32> to vector<17x1xf32>
    %1066 = tpu.reciprocal %1065 {approx = true} : vector<17x1xf32> -> vector<17x1xf32>
    %1067 = vector.broadcast %1066 : vector<17x1xf32> to vector<17x17xf32>
    %1068 = arith.mulf %1063, %1067 : vector<17x17xf32>
    %cst_541 = arith.constant dense<0.000000e+00> : vector<17x32xf32>
    %1069 = tpu.matmul %1068, %1054, %cst_541 {dimension_numbers = #tpu.dot_dimension_numbers<[1], [0], [0], [1], [0, 0, 1, 1], [], []>} : vector<17x17xf32>, vector<17x32xf32>, vector<17x32xf32> -> vector<17x32xf32>
    %c1928 = arith.constant 1928 : index
    %c0_542 = arith.constant 0 : index
    %1070 = vector.load %arg6[%c1928, %c0_542] : memref<2912x32xf32, #tpu.memory_space<vmem>>, vector<32x32xf32>
    %c2056 = arith.constant 2056 : index
    %c0_543 = arith.constant 0 : index
    %1071 = vector.load %arg6[%c2056, %c0_543] : memref<2912x32xf32, #tpu.memory_space<vmem>>, vector<32x32xf32>
    %c2154 = arith.constant 2154 : index
    %c0_544 = arith.constant 0 : index
    %1072 = vector.load %arg6[%c2154, %c0_544] : memref<2912x32xf32, #tpu.memory_space<vmem>>, vector<1x32xf32>
    %c2158 = arith.constant 2158 : index
    %c0_545 = arith.constant 0 : index
    %1073 = vector.load %arg6[%c2158, %c0_545] : memref<2912x32xf32, #tpu.memory_space<vmem>>, vector<1x32xf32>
    %cst_546 = arith.constant dense<0.000000e+00> : vector<17x32xf32>
    %1074 = tpu.matmul %1034, %1070, %cst_546 {dimension_numbers = #tpu.dot_dimension_numbers<[1], [0], [0], [1], [0, 0, 1, 1], [], []>} : vector<17x32xf32>, vector<32x32xf32>, vector<17x32xf32> -> vector<17x32xf32>
    %1075 = vector.broadcast %1072 : vector<1x32xf32> to vector<17x32xf32>
    %1076 = arith.addf %1074, %1075 : vector<17x32xf32>
    %cst_547 = arith.constant dense<0.000000e+00> : vector<17x32xf32>
    %1077 = tpu.matmul %1034, %1071, %cst_547 {dimension_numbers = #tpu.dot_dimension_numbers<[1], [0], [0], [1], [0, 0, 1, 1], [], []>} : vector<17x32xf32>, vector<32x32xf32>, vector<17x32xf32> -> vector<17x32xf32>
    %1078 = vector.broadcast %1073 : vector<1x32xf32> to vector<17x32xf32>
    %1079 = arith.addf %1077, %1078 : vector<17x32xf32>
    %cst_548 = arith.constant dense<0.000000e+00> : vector<17x17xf32>
    %1080 = tpu.matmul %1076, %1044, %cst_548 {dimension_numbers = #tpu.dot_dimension_numbers<[1], [1], [0], [0], [0, 0, 1, 0], [], []>} : vector<17x32xf32>, vector<17x32xf32>, vector<17x17xf32> -> vector<17x17xf32>
    %cst_549 = arith.constant 0.353553385 : f32
    %1081 = vector.broadcast %cst_549 : f32 to vector<17x17xf32>
    %1082 = arith.mulf %1080, %1081 : vector<17x17xf32>
    %1083 = arith.addf %1082, %915 : vector<17x17xf32>
    %cst_550 = arith.constant dense<0xFF800000> : vector<17xf32>
    %1084 = vector.multi_reduction <maximumf>, %1083, %cst_550 [1] : vector<17x17xf32> to vector<17xf32>
    %1085 = vector.shape_cast %1084 : vector<17xf32> to vector<17x1xf32>
    %1086 = vector.broadcast %1085 : vector<17x1xf32> to vector<17x17xf32>
    %1087 = arith.subf %1083, %1086 : vector<17x17xf32>
    %1088 = math.exp %1087 : vector<17x17xf32>
    %cst_551 = arith.constant dense<0.000000e+00> : vector<17xf32>
    %1089 = vector.multi_reduction <add>, %1088, %cst_551 [1] : vector<17x17xf32> to vector<17xf32>
    %1090 = vector.shape_cast %1089 : vector<17xf32> to vector<17x1xf32>
    %1091 = tpu.reciprocal %1090 {approx = true} : vector<17x1xf32> -> vector<17x1xf32>
    %1092 = vector.broadcast %1091 : vector<17x1xf32> to vector<17x17xf32>
    %1093 = arith.mulf %1088, %1092 : vector<17x17xf32>
    %cst_552 = arith.constant dense<0.000000e+00> : vector<17x32xf32>
    %1094 = tpu.matmul %1093, %1079, %cst_552 {dimension_numbers = #tpu.dot_dimension_numbers<[1], [0], [0], [1], [0, 0, 1, 1], [], []>} : vector<17x17xf32>, vector<17x32xf32>, vector<17x32xf32> -> vector<17x32xf32>
    %1095 = arith.addf %1069, %1094 : vector<17x32xf32>
    %c1960 = arith.constant 1960 : index
    %c0_553 = arith.constant 0 : index
    %1096 = vector.load %arg6[%c1960, %c0_553] : memref<2912x32xf32, #tpu.memory_space<vmem>>, vector<32x32xf32>
    %c2088 = arith.constant 2088 : index
    %c0_554 = arith.constant 0 : index
    %1097 = vector.load %arg6[%c2088, %c0_554] : memref<2912x32xf32, #tpu.memory_space<vmem>>, vector<32x32xf32>
    %c2155 = arith.constant 2155 : index
    %c0_555 = arith.constant 0 : index
    %1098 = vector.load %arg6[%c2155, %c0_555] : memref<2912x32xf32, #tpu.memory_space<vmem>>, vector<1x32xf32>
    %c2159 = arith.constant 2159 : index
    %c0_556 = arith.constant 0 : index
    %1099 = vector.load %arg6[%c2159, %c0_556] : memref<2912x32xf32, #tpu.memory_space<vmem>>, vector<1x32xf32>
    %cst_557 = arith.constant dense<0.000000e+00> : vector<17x32xf32>
    %1100 = tpu.matmul %1034, %1096, %cst_557 {dimension_numbers = #tpu.dot_dimension_numbers<[1], [0], [0], [1], [0, 0, 1, 1], [], []>} : vector<17x32xf32>, vector<32x32xf32>, vector<17x32xf32> -> vector<17x32xf32>
    %1101 = vector.broadcast %1098 : vector<1x32xf32> to vector<17x32xf32>
    %1102 = arith.addf %1100, %1101 : vector<17x32xf32>
    %cst_558 = arith.constant dense<0.000000e+00> : vector<17x32xf32>
    %1103 = tpu.matmul %1034, %1097, %cst_558 {dimension_numbers = #tpu.dot_dimension_numbers<[1], [0], [0], [1], [0, 0, 1, 1], [], []>} : vector<17x32xf32>, vector<32x32xf32>, vector<17x32xf32> -> vector<17x32xf32>
    %1104 = vector.broadcast %1099 : vector<1x32xf32> to vector<17x32xf32>
    %1105 = arith.addf %1103, %1104 : vector<17x32xf32>
    %cst_559 = arith.constant dense<0.000000e+00> : vector<17x17xf32>
    %1106 = tpu.matmul %1102, %1044, %cst_559 {dimension_numbers = #tpu.dot_dimension_numbers<[1], [1], [0], [0], [0, 0, 1, 0], [], []>} : vector<17x32xf32>, vector<17x32xf32>, vector<17x17xf32> -> vector<17x17xf32>
    %cst_560 = arith.constant 0.353553385 : f32
    %1107 = vector.broadcast %cst_560 : f32 to vector<17x17xf32>
    %1108 = arith.mulf %1106, %1107 : vector<17x17xf32>
    %1109 = arith.addf %1108, %915 : vector<17x17xf32>
    %cst_561 = arith.constant dense<0xFF800000> : vector<17xf32>
    %1110 = vector.multi_reduction <maximumf>, %1109, %cst_561 [1] : vector<17x17xf32> to vector<17xf32>
    %1111 = vector.shape_cast %1110 : vector<17xf32> to vector<17x1xf32>
    %1112 = vector.broadcast %1111 : vector<17x1xf32> to vector<17x17xf32>
    %1113 = arith.subf %1109, %1112 : vector<17x17xf32>
    %1114 = math.exp %1113 : vector<17x17xf32>
    %cst_562 = arith.constant dense<0.000000e+00> : vector<17xf32>
    %1115 = vector.multi_reduction <add>, %1114, %cst_562 [1] : vector<17x17xf32> to vector<17xf32>
    %1116 = vector.shape_cast %1115 : vector<17xf32> to vector<17x1xf32>
    %1117 = tpu.reciprocal %1116 {approx = true} : vector<17x1xf32> -> vector<17x1xf32>
    %1118 = vector.broadcast %1117 : vector<17x1xf32> to vector<17x17xf32>
    %1119 = arith.mulf %1114, %1118 : vector<17x17xf32>
    %cst_563 = arith.constant dense<0.000000e+00> : vector<17x32xf32>
    %1120 = tpu.matmul %1119, %1105, %cst_563 {dimension_numbers = #tpu.dot_dimension_numbers<[1], [0], [0], [1], [0, 0, 1, 1], [], []>} : vector<17x17xf32>, vector<17x32xf32>, vector<17x32xf32> -> vector<17x32xf32>
    %1121 = arith.addf %1095, %1120 : vector<17x32xf32>
    %c1992 = arith.constant 1992 : index
    %c0_564 = arith.constant 0 : index
    %1122 = vector.load %arg6[%c1992, %c0_564] : memref<2912x32xf32, #tpu.memory_space<vmem>>, vector<32x32xf32>
    %c2120 = arith.constant 2120 : index
    %c0_565 = arith.constant 0 : index
    %1123 = vector.load %arg6[%c2120, %c0_565] : memref<2912x32xf32, #tpu.memory_space<vmem>>, vector<32x32xf32>
    %c2156 = arith.constant 2156 : index
    %c0_566 = arith.constant 0 : index
    %1124 = vector.load %arg6[%c2156, %c0_566] : memref<2912x32xf32, #tpu.memory_space<vmem>>, vector<1x32xf32>
    %c2160 = arith.constant 2160 : index
    %c0_567 = arith.constant 0 : index
    %1125 = vector.load %arg6[%c2160, %c0_567] : memref<2912x32xf32, #tpu.memory_space<vmem>>, vector<1x32xf32>
    %cst_568 = arith.constant dense<0.000000e+00> : vector<17x32xf32>
    %1126 = tpu.matmul %1034, %1122, %cst_568 {dimension_numbers = #tpu.dot_dimension_numbers<[1], [0], [0], [1], [0, 0, 1, 1], [], []>} : vector<17x32xf32>, vector<32x32xf32>, vector<17x32xf32> -> vector<17x32xf32>
    %1127 = vector.broadcast %1124 : vector<1x32xf32> to vector<17x32xf32>
    %1128 = arith.addf %1126, %1127 : vector<17x32xf32>
    %cst_569 = arith.constant dense<0.000000e+00> : vector<17x32xf32>
    %1129 = tpu.matmul %1034, %1123, %cst_569 {dimension_numbers = #tpu.dot_dimension_numbers<[1], [0], [0], [1], [0, 0, 1, 1], [], []>} : vector<17x32xf32>, vector<32x32xf32>, vector<17x32xf32> -> vector<17x32xf32>
    %1130 = vector.broadcast %1125 : vector<1x32xf32> to vector<17x32xf32>
    %1131 = arith.addf %1129, %1130 : vector<17x32xf32>
    %cst_570 = arith.constant dense<0.000000e+00> : vector<17x17xf32>
    %1132 = tpu.matmul %1128, %1044, %cst_570 {dimension_numbers = #tpu.dot_dimension_numbers<[1], [1], [0], [0], [0, 0, 1, 0], [], []>} : vector<17x32xf32>, vector<17x32xf32>, vector<17x17xf32> -> vector<17x17xf32>
    %cst_571 = arith.constant 0.353553385 : f32
    %1133 = vector.broadcast %cst_571 : f32 to vector<17x17xf32>
    %1134 = arith.mulf %1132, %1133 : vector<17x17xf32>
    %1135 = arith.addf %1134, %915 : vector<17x17xf32>
    %cst_572 = arith.constant dense<0xFF800000> : vector<17xf32>
    %1136 = vector.multi_reduction <maximumf>, %1135, %cst_572 [1] : vector<17x17xf32> to vector<17xf32>
    %1137 = vector.shape_cast %1136 : vector<17xf32> to vector<17x1xf32>
    %1138 = vector.broadcast %1137 : vector<17x1xf32> to vector<17x17xf32>
    %1139 = arith.subf %1135, %1138 : vector<17x17xf32>
    %1140 = math.exp %1139 : vector<17x17xf32>
    %cst_573 = arith.constant dense<0.000000e+00> : vector<17xf32>
    %1141 = vector.multi_reduction <add>, %1140, %cst_573 [1] : vector<17x17xf32> to vector<17xf32>
    %1142 = vector.shape_cast %1141 : vector<17xf32> to vector<17x1xf32>
    %1143 = tpu.reciprocal %1142 {approx = true} : vector<17x1xf32> -> vector<17x1xf32>
    %1144 = vector.broadcast %1143 : vector<17x1xf32> to vector<17x17xf32>
    %1145 = arith.mulf %1140, %1144 : vector<17x17xf32>
    %cst_574 = arith.constant dense<0.000000e+00> : vector<17x32xf32>
    %1146 = tpu.matmul %1145, %1131, %cst_574 {dimension_numbers = #tpu.dot_dimension_numbers<[1], [0], [0], [1], [0, 0, 1, 1], [], []>} : vector<17x17xf32>, vector<17x32xf32>, vector<17x32xf32> -> vector<17x32xf32>
    %1147 = arith.addf %1121, %1146 : vector<17x32xf32>
    %1148 = arith.addf %1147, %1039 : vector<17x32xf32>
    %c2512 = arith.constant 2512 : index
    %c0_575 = arith.constant 0 : index
    %1149 = vector.load %arg6[%c2512, %c0_575] : memref<2912x32xf32, #tpu.memory_space<vmem>>, vector<32x32xf32>
    %cst_576 = arith.constant dense<0.000000e+00> : vector<17x32xf32>
    %1150 = tpu.matmul %1148, %1149, %cst_576 {dimension_numbers = #tpu.dot_dimension_numbers<[1], [0], [0], [1], [0, 0, 1, 1], [], []>} : vector<17x32xf32>, vector<32x32xf32>, vector<17x32xf32> -> vector<17x32xf32>
    %c2544 = arith.constant 2544 : index
    %c0_577 = arith.constant 0 : index
    %1151 = vector.load %arg6[%c2544, %c0_577] : memref<2912x32xf32, #tpu.memory_space<vmem>>, vector<1x32xf32>
    %1152 = vector.broadcast %1151 : vector<1x32xf32> to vector<17x32xf32>
    %1153 = arith.addf %1150, %1152 : vector<17x32xf32>
    %c2208 = arith.constant 2208 : index
    %c0_578 = arith.constant 0 : index
    %1154 = vector.load %arg6[%c2208, %c0_578] : memref<2912x32xf32, #tpu.memory_space<vmem>>, vector<32x32xf32>
    %cst_579 = arith.constant dense<0.000000e+00> : vector<17x32xf32>
    %1155 = tpu.matmul %1148, %1154, %cst_579 {dimension_numbers = #tpu.dot_dimension_numbers<[1], [0], [0], [1], [0, 0, 1, 1], [], []>} : vector<17x32xf32>, vector<32x32xf32>, vector<17x32xf32> -> vector<17x32xf32>
    %c2496 = arith.constant 2496 : index
    %c0_580 = arith.constant 0 : index
    %1156 = vector.load %arg6[%c2496, %c0_580] : memref<2912x32xf32, #tpu.memory_space<vmem>>, vector<1x32xf32>
    %1157 = vector.broadcast %1156 : vector<1x32xf32> to vector<17x32xf32>
    %1158 = arith.addf %1155, %1157 : vector<17x32xf32>
    %c2240 = arith.constant 2240 : index
    %c0_581 = arith.constant 0 : index
    %1159 = vector.load %arg6[%c2240, %c0_581] : memref<2912x32xf32, #tpu.memory_space<vmem>>, vector<32x32xf32>
    %c2368 = arith.constant 2368 : index
    %c0_582 = arith.constant 0 : index
    %1160 = vector.load %arg6[%c2368, %c0_582] : memref<2912x32xf32, #tpu.memory_space<vmem>>, vector<32x32xf32>
    %c2497 = arith.constant 2497 : index
    %c0_583 = arith.constant 0 : index
    %1161 = vector.load %arg6[%c2497, %c0_583] : memref<2912x32xf32, #tpu.memory_space<vmem>>, vector<1x32xf32>
    %c2501 = arith.constant 2501 : index
    %c0_584 = arith.constant 0 : index
    %1162 = vector.load %arg6[%c2501, %c0_584] : memref<2912x32xf32, #tpu.memory_space<vmem>>, vector<1x32xf32>
    %cst_585 = arith.constant dense<0.000000e+00> : vector<17x32xf32>
    %1163 = tpu.matmul %1148, %1159, %cst_585 {dimension_numbers = #tpu.dot_dimension_numbers<[1], [0], [0], [1], [0, 0, 1, 1], [], []>} : vector<17x32xf32>, vector<32x32xf32>, vector<17x32xf32> -> vector<17x32xf32>
    %1164 = vector.broadcast %1161 : vector<1x32xf32> to vector<17x32xf32>
    %1165 = arith.addf %1163, %1164 : vector<17x32xf32>
    %cst_586 = arith.constant dense<0.000000e+00> : vector<17x32xf32>
    %1166 = tpu.matmul %1148, %1160, %cst_586 {dimension_numbers = #tpu.dot_dimension_numbers<[1], [0], [0], [1], [0, 0, 1, 1], [], []>} : vector<17x32xf32>, vector<32x32xf32>, vector<17x32xf32> -> vector<17x32xf32>
    %1167 = vector.broadcast %1162 : vector<1x32xf32> to vector<17x32xf32>
    %1168 = arith.addf %1166, %1167 : vector<17x32xf32>
    %cst_587 = arith.constant dense<0.000000e+00> : vector<17x17xf32>
    %1169 = tpu.matmul %1165, %1158, %cst_587 {dimension_numbers = #tpu.dot_dimension_numbers<[1], [1], [0], [0], [0, 0, 1, 0], [], []>} : vector<17x32xf32>, vector<17x32xf32>, vector<17x17xf32> -> vector<17x17xf32>
    %cst_588 = arith.constant 0.353553385 : f32
    %1170 = vector.broadcast %cst_588 : f32 to vector<17x17xf32>
    %1171 = arith.mulf %1169, %1170 : vector<17x17xf32>
    %1172 = arith.addf %1171, %915 : vector<17x17xf32>
    %cst_589 = arith.constant dense<0xFF800000> : vector<17xf32>
    %1173 = vector.multi_reduction <maximumf>, %1172, %cst_589 [1] : vector<17x17xf32> to vector<17xf32>
    %1174 = vector.shape_cast %1173 : vector<17xf32> to vector<17x1xf32>
    %1175 = vector.broadcast %1174 : vector<17x1xf32> to vector<17x17xf32>
    %1176 = arith.subf %1172, %1175 : vector<17x17xf32>
    %1177 = math.exp %1176 : vector<17x17xf32>
    %cst_590 = arith.constant dense<0.000000e+00> : vector<17xf32>
    %1178 = vector.multi_reduction <add>, %1177, %cst_590 [1] : vector<17x17xf32> to vector<17xf32>
    %1179 = vector.shape_cast %1178 : vector<17xf32> to vector<17x1xf32>
    %1180 = tpu.reciprocal %1179 {approx = true} : vector<17x1xf32> -> vector<17x1xf32>
    %1181 = vector.broadcast %1180 : vector<17x1xf32> to vector<17x17xf32>
    %1182 = arith.mulf %1177, %1181 : vector<17x17xf32>
    %cst_591 = arith.constant dense<0.000000e+00> : vector<17x32xf32>
    %1183 = tpu.matmul %1182, %1168, %cst_591 {dimension_numbers = #tpu.dot_dimension_numbers<[1], [0], [0], [1], [0, 0, 1, 1], [], []>} : vector<17x17xf32>, vector<17x32xf32>, vector<17x32xf32> -> vector<17x32xf32>
    %c2272 = arith.constant 2272 : index
    %c0_592 = arith.constant 0 : index
    %1184 = vector.load %arg6[%c2272, %c0_592] : memref<2912x32xf32, #tpu.memory_space<vmem>>, vector<32x32xf32>
    %c2400 = arith.constant 2400 : index
    %c0_593 = arith.constant 0 : index
    %1185 = vector.load %arg6[%c2400, %c0_593] : memref<2912x32xf32, #tpu.memory_space<vmem>>, vector<32x32xf32>
    %c2498 = arith.constant 2498 : index
    %c0_594 = arith.constant 0 : index
    %1186 = vector.load %arg6[%c2498, %c0_594] : memref<2912x32xf32, #tpu.memory_space<vmem>>, vector<1x32xf32>
    %c2502 = arith.constant 2502 : index
    %c0_595 = arith.constant 0 : index
    %1187 = vector.load %arg6[%c2502, %c0_595] : memref<2912x32xf32, #tpu.memory_space<vmem>>, vector<1x32xf32>
    %cst_596 = arith.constant dense<0.000000e+00> : vector<17x32xf32>
    %1188 = tpu.matmul %1148, %1184, %cst_596 {dimension_numbers = #tpu.dot_dimension_numbers<[1], [0], [0], [1], [0, 0, 1, 1], [], []>} : vector<17x32xf32>, vector<32x32xf32>, vector<17x32xf32> -> vector<17x32xf32>
    %1189 = vector.broadcast %1186 : vector<1x32xf32> to vector<17x32xf32>
    %1190 = arith.addf %1188, %1189 : vector<17x32xf32>
    %cst_597 = arith.constant dense<0.000000e+00> : vector<17x32xf32>
    %1191 = tpu.matmul %1148, %1185, %cst_597 {dimension_numbers = #tpu.dot_dimension_numbers<[1], [0], [0], [1], [0, 0, 1, 1], [], []>} : vector<17x32xf32>, vector<32x32xf32>, vector<17x32xf32> -> vector<17x32xf32>
    %1192 = vector.broadcast %1187 : vector<1x32xf32> to vector<17x32xf32>
    %1193 = arith.addf %1191, %1192 : vector<17x32xf32>
    %cst_598 = arith.constant dense<0.000000e+00> : vector<17x17xf32>
    %1194 = tpu.matmul %1190, %1158, %cst_598 {dimension_numbers = #tpu.dot_dimension_numbers<[1], [1], [0], [0], [0, 0, 1, 0], [], []>} : vector<17x32xf32>, vector<17x32xf32>, vector<17x17xf32> -> vector<17x17xf32>
    %cst_599 = arith.constant 0.353553385 : f32
    %1195 = vector.broadcast %cst_599 : f32 to vector<17x17xf32>
    %1196 = arith.mulf %1194, %1195 : vector<17x17xf32>
    %1197 = arith.addf %1196, %915 : vector<17x17xf32>
    %cst_600 = arith.constant dense<0xFF800000> : vector<17xf32>
    %1198 = vector.multi_reduction <maximumf>, %1197, %cst_600 [1] : vector<17x17xf32> to vector<17xf32>
    %1199 = vector.shape_cast %1198 : vector<17xf32> to vector<17x1xf32>
    %1200 = vector.broadcast %1199 : vector<17x1xf32> to vector<17x17xf32>
    %1201 = arith.subf %1197, %1200 : vector<17x17xf32>
    %1202 = math.exp %1201 : vector<17x17xf32>
    %cst_601 = arith.constant dense<0.000000e+00> : vector<17xf32>
    %1203 = vector.multi_reduction <add>, %1202, %cst_601 [1] : vector<17x17xf32> to vector<17xf32>
    %1204 = vector.shape_cast %1203 : vector<17xf32> to vector<17x1xf32>
    %1205 = tpu.reciprocal %1204 {approx = true} : vector<17x1xf32> -> vector<17x1xf32>
    %1206 = vector.broadcast %1205 : vector<17x1xf32> to vector<17x17xf32>
    %1207 = arith.mulf %1202, %1206 : vector<17x17xf32>
    %cst_602 = arith.constant dense<0.000000e+00> : vector<17x32xf32>
    %1208 = tpu.matmul %1207, %1193, %cst_602 {dimension_numbers = #tpu.dot_dimension_numbers<[1], [0], [0], [1], [0, 0, 1, 1], [], []>} : vector<17x17xf32>, vector<17x32xf32>, vector<17x32xf32> -> vector<17x32xf32>
    %1209 = arith.addf %1183, %1208 : vector<17x32xf32>
    %c2304 = arith.constant 2304 : index
    %c0_603 = arith.constant 0 : index
    %1210 = vector.load %arg6[%c2304, %c0_603] : memref<2912x32xf32, #tpu.memory_space<vmem>>, vector<32x32xf32>
    %c2432 = arith.constant 2432 : index
    %c0_604 = arith.constant 0 : index
    %1211 = vector.load %arg6[%c2432, %c0_604] : memref<2912x32xf32, #tpu.memory_space<vmem>>, vector<32x32xf32>
    %c2499 = arith.constant 2499 : index
    %c0_605 = arith.constant 0 : index
    %1212 = vector.load %arg6[%c2499, %c0_605] : memref<2912x32xf32, #tpu.memory_space<vmem>>, vector<1x32xf32>
    %c2503 = arith.constant 2503 : index
    %c0_606 = arith.constant 0 : index
    %1213 = vector.load %arg6[%c2503, %c0_606] : memref<2912x32xf32, #tpu.memory_space<vmem>>, vector<1x32xf32>
    %cst_607 = arith.constant dense<0.000000e+00> : vector<17x32xf32>
    %1214 = tpu.matmul %1148, %1210, %cst_607 {dimension_numbers = #tpu.dot_dimension_numbers<[1], [0], [0], [1], [0, 0, 1, 1], [], []>} : vector<17x32xf32>, vector<32x32xf32>, vector<17x32xf32> -> vector<17x32xf32>
    %1215 = vector.broadcast %1212 : vector<1x32xf32> to vector<17x32xf32>
    %1216 = arith.addf %1214, %1215 : vector<17x32xf32>
    %cst_608 = arith.constant dense<0.000000e+00> : vector<17x32xf32>
    %1217 = tpu.matmul %1148, %1211, %cst_608 {dimension_numbers = #tpu.dot_dimension_numbers<[1], [0], [0], [1], [0, 0, 1, 1], [], []>} : vector<17x32xf32>, vector<32x32xf32>, vector<17x32xf32> -> vector<17x32xf32>
    %1218 = vector.broadcast %1213 : vector<1x32xf32> to vector<17x32xf32>
    %1219 = arith.addf %1217, %1218 : vector<17x32xf32>
    %cst_609 = arith.constant dense<0.000000e+00> : vector<17x17xf32>
    %1220 = tpu.matmul %1216, %1158, %cst_609 {dimension_numbers = #tpu.dot_dimension_numbers<[1], [1], [0], [0], [0, 0, 1, 0], [], []>} : vector<17x32xf32>, vector<17x32xf32>, vector<17x17xf32> -> vector<17x17xf32>
    %cst_610 = arith.constant 0.353553385 : f32
    %1221 = vector.broadcast %cst_610 : f32 to vector<17x17xf32>
    %1222 = arith.mulf %1220, %1221 : vector<17x17xf32>
    %1223 = arith.addf %1222, %915 : vector<17x17xf32>
    %cst_611 = arith.constant dense<0xFF800000> : vector<17xf32>
    %1224 = vector.multi_reduction <maximumf>, %1223, %cst_611 [1] : vector<17x17xf32> to vector<17xf32>
    %1225 = vector.shape_cast %1224 : vector<17xf32> to vector<17x1xf32>
    %1226 = vector.broadcast %1225 : vector<17x1xf32> to vector<17x17xf32>
    %1227 = arith.subf %1223, %1226 : vector<17x17xf32>
    %1228 = math.exp %1227 : vector<17x17xf32>
    %cst_612 = arith.constant dense<0.000000e+00> : vector<17xf32>
    %1229 = vector.multi_reduction <add>, %1228, %cst_612 [1] : vector<17x17xf32> to vector<17xf32>
    %1230 = vector.shape_cast %1229 : vector<17xf32> to vector<17x1xf32>
    %1231 = tpu.reciprocal %1230 {approx = true} : vector<17x1xf32> -> vector<17x1xf32>
    %1232 = vector.broadcast %1231 : vector<17x1xf32> to vector<17x17xf32>
    %1233 = arith.mulf %1228, %1232 : vector<17x17xf32>
    %cst_613 = arith.constant dense<0.000000e+00> : vector<17x32xf32>
    %1234 = tpu.matmul %1233, %1219, %cst_613 {dimension_numbers = #tpu.dot_dimension_numbers<[1], [0], [0], [1], [0, 0, 1, 1], [], []>} : vector<17x17xf32>, vector<17x32xf32>, vector<17x32xf32> -> vector<17x32xf32>
    %1235 = arith.addf %1209, %1234 : vector<17x32xf32>
    %c2336 = arith.constant 2336 : index
    %c0_614 = arith.constant 0 : index
    %1236 = vector.load %arg6[%c2336, %c0_614] : memref<2912x32xf32, #tpu.memory_space<vmem>>, vector<32x32xf32>
    %c2464 = arith.constant 2464 : index
    %c0_615 = arith.constant 0 : index
    %1237 = vector.load %arg6[%c2464, %c0_615] : memref<2912x32xf32, #tpu.memory_space<vmem>>, vector<32x32xf32>
    %c2500 = arith.constant 2500 : index
    %c0_616 = arith.constant 0 : index
    %1238 = vector.load %arg6[%c2500, %c0_616] : memref<2912x32xf32, #tpu.memory_space<vmem>>, vector<1x32xf32>
    %c2504 = arith.constant 2504 : index
    %c0_617 = arith.constant 0 : index
    %1239 = vector.load %arg6[%c2504, %c0_617] : memref<2912x32xf32, #tpu.memory_space<vmem>>, vector<1x32xf32>
    %cst_618 = arith.constant dense<0.000000e+00> : vector<17x32xf32>
    %1240 = tpu.matmul %1148, %1236, %cst_618 {dimension_numbers = #tpu.dot_dimension_numbers<[1], [0], [0], [1], [0, 0, 1, 1], [], []>} : vector<17x32xf32>, vector<32x32xf32>, vector<17x32xf32> -> vector<17x32xf32>
    %1241 = vector.broadcast %1238 : vector<1x32xf32> to vector<17x32xf32>
    %1242 = arith.addf %1240, %1241 : vector<17x32xf32>
    %cst_619 = arith.constant dense<0.000000e+00> : vector<17x32xf32>
    %1243 = tpu.matmul %1148, %1237, %cst_619 {dimension_numbers = #tpu.dot_dimension_numbers<[1], [0], [0], [1], [0, 0, 1, 1], [], []>} : vector<17x32xf32>, vector<32x32xf32>, vector<17x32xf32> -> vector<17x32xf32>
    %1244 = vector.broadcast %1239 : vector<1x32xf32> to vector<17x32xf32>
    %1245 = arith.addf %1243, %1244 : vector<17x32xf32>
    %cst_620 = arith.constant dense<0.000000e+00> : vector<17x17xf32>
    %1246 = tpu.matmul %1242, %1158, %cst_620 {dimension_numbers = #tpu.dot_dimension_numbers<[1], [1], [0], [0], [0, 0, 1, 0], [], []>} : vector<17x32xf32>, vector<17x32xf32>, vector<17x17xf32> -> vector<17x17xf32>
    %cst_621 = arith.constant 0.353553385 : f32
    %1247 = vector.broadcast %cst_621 : f32 to vector<17x17xf32>
    %1248 = arith.mulf %1246, %1247 : vector<17x17xf32>
    %1249 = arith.addf %1248, %915 : vector<17x17xf32>
    %cst_622 = arith.constant dense<0xFF800000> : vector<17xf32>
    %1250 = vector.multi_reduction <maximumf>, %1249, %cst_622 [1] : vector<17x17xf32> to vector<17xf32>
    %1251 = vector.shape_cast %1250 : vector<17xf32> to vector<17x1xf32>
    %1252 = vector.broadcast %1251 : vector<17x1xf32> to vector<17x17xf32>
    %1253 = arith.subf %1249, %1252 : vector<17x17xf32>
    %1254 = math.exp %1253 : vector<17x17xf32>
    %cst_623 = arith.constant dense<0.000000e+00> : vector<17xf32>
    %1255 = vector.multi_reduction <add>, %1254, %cst_623 [1] : vector<17x17xf32> to vector<17xf32>
    %1256 = vector.shape_cast %1255 : vector<17xf32> to vector<17x1xf32>
    %1257 = tpu.reciprocal %1256 {approx = true} : vector<17x1xf32> -> vector<17x1xf32>
    %1258 = vector.broadcast %1257 : vector<17x1xf32> to vector<17x17xf32>
    %1259 = arith.mulf %1254, %1258 : vector<17x17xf32>
    %cst_624 = arith.constant dense<0.000000e+00> : vector<17x32xf32>
    %1260 = tpu.matmul %1259, %1245, %cst_624 {dimension_numbers = #tpu.dot_dimension_numbers<[1], [0], [0], [1], [0, 0, 1, 1], [], []>} : vector<17x17xf32>, vector<17x32xf32>, vector<17x32xf32> -> vector<17x32xf32>
    %1261 = arith.addf %1235, %1260 : vector<17x32xf32>
    %1262 = arith.addf %1261, %1153 : vector<17x32xf32>
    %c2856 = arith.constant 2856 : index
    %c0_625 = arith.constant 0 : index
    %1263 = vector.load %arg6[%c2856, %c0_625] : memref<2912x32xf32, #tpu.memory_space<vmem>>, vector<32x32xf32>
    %cst_626 = arith.constant dense<0.000000e+00> : vector<17x32xf32>
    %1264 = tpu.matmul %1262, %1263, %cst_626 {dimension_numbers = #tpu.dot_dimension_numbers<[1], [0], [0], [1], [0, 0, 1, 1], [], []>} : vector<17x32xf32>, vector<32x32xf32>, vector<17x32xf32> -> vector<17x32xf32>
    %c2888 = arith.constant 2888 : index
    %c0_627 = arith.constant 0 : index
    %1265 = vector.load %arg6[%c2888, %c0_627] : memref<2912x32xf32, #tpu.memory_space<vmem>>, vector<1x32xf32>
    %1266 = vector.broadcast %1265 : vector<1x32xf32> to vector<17x32xf32>
    %1267 = arith.addf %1264, %1266 : vector<17x32xf32>
    %c2552 = arith.constant 2552 : index
    %c0_628 = arith.constant 0 : index
    %1268 = vector.load %arg6[%c2552, %c0_628] : memref<2912x32xf32, #tpu.memory_space<vmem>>, vector<32x32xf32>
    %cst_629 = arith.constant dense<0.000000e+00> : vector<17x32xf32>
    %1269 = tpu.matmul %1262, %1268, %cst_629 {dimension_numbers = #tpu.dot_dimension_numbers<[1], [0], [0], [1], [0, 0, 1, 1], [], []>} : vector<17x32xf32>, vector<32x32xf32>, vector<17x32xf32> -> vector<17x32xf32>
    %c2840 = arith.constant 2840 : index
    %c0_630 = arith.constant 0 : index
    %1270 = vector.load %arg6[%c2840, %c0_630] : memref<2912x32xf32, #tpu.memory_space<vmem>>, vector<1x32xf32>
    %1271 = vector.broadcast %1270 : vector<1x32xf32> to vector<17x32xf32>
    %1272 = arith.addf %1269, %1271 : vector<17x32xf32>
    %c2584 = arith.constant 2584 : index
    %c0_631 = arith.constant 0 : index
    %1273 = vector.load %arg6[%c2584, %c0_631] : memref<2912x32xf32, #tpu.memory_space<vmem>>, vector<32x32xf32>
    %c2712 = arith.constant 2712 : index
    %c0_632 = arith.constant 0 : index
    %1274 = vector.load %arg6[%c2712, %c0_632] : memref<2912x32xf32, #tpu.memory_space<vmem>>, vector<32x32xf32>
    %c2841 = arith.constant 2841 : index
    %c0_633 = arith.constant 0 : index
    %1275 = vector.load %arg6[%c2841, %c0_633] : memref<2912x32xf32, #tpu.memory_space<vmem>>, vector<1x32xf32>
    %c2845 = arith.constant 2845 : index
    %c0_634 = arith.constant 0 : index
    %1276 = vector.load %arg6[%c2845, %c0_634] : memref<2912x32xf32, #tpu.memory_space<vmem>>, vector<1x32xf32>
    %cst_635 = arith.constant dense<0.000000e+00> : vector<17x32xf32>
    %1277 = tpu.matmul %1262, %1273, %cst_635 {dimension_numbers = #tpu.dot_dimension_numbers<[1], [0], [0], [1], [0, 0, 1, 1], [], []>} : vector<17x32xf32>, vector<32x32xf32>, vector<17x32xf32> -> vector<17x32xf32>
    %1278 = vector.broadcast %1275 : vector<1x32xf32> to vector<17x32xf32>
    %1279 = arith.addf %1277, %1278 : vector<17x32xf32>
    %cst_636 = arith.constant dense<0.000000e+00> : vector<17x32xf32>
    %1280 = tpu.matmul %1262, %1274, %cst_636 {dimension_numbers = #tpu.dot_dimension_numbers<[1], [0], [0], [1], [0, 0, 1, 1], [], []>} : vector<17x32xf32>, vector<32x32xf32>, vector<17x32xf32> -> vector<17x32xf32>
    %1281 = vector.broadcast %1276 : vector<1x32xf32> to vector<17x32xf32>
    %1282 = arith.addf %1280, %1281 : vector<17x32xf32>
    %cst_637 = arith.constant dense<0.000000e+00> : vector<17x17xf32>
    %1283 = tpu.matmul %1279, %1272, %cst_637 {dimension_numbers = #tpu.dot_dimension_numbers<[1], [1], [0], [0], [0, 0, 1, 0], [], []>} : vector<17x32xf32>, vector<17x32xf32>, vector<17x17xf32> -> vector<17x17xf32>
    %cst_638 = arith.constant 0.353553385 : f32
    %1284 = vector.broadcast %cst_638 : f32 to vector<17x17xf32>
    %1285 = arith.mulf %1283, %1284 : vector<17x17xf32>
    %1286 = arith.addf %1285, %915 : vector<17x17xf32>
    %cst_639 = arith.constant dense<0xFF800000> : vector<17xf32>
    %1287 = vector.multi_reduction <maximumf>, %1286, %cst_639 [1] : vector<17x17xf32> to vector<17xf32>
    %1288 = vector.shape_cast %1287 : vector<17xf32> to vector<17x1xf32>
    %1289 = vector.broadcast %1288 : vector<17x1xf32> to vector<17x17xf32>
    %1290 = arith.subf %1286, %1289 : vector<17x17xf32>
    %1291 = math.exp %1290 : vector<17x17xf32>
    %cst_640 = arith.constant dense<0.000000e+00> : vector<17xf32>
    %1292 = vector.multi_reduction <add>, %1291, %cst_640 [1] : vector<17x17xf32> to vector<17xf32>
    %1293 = vector.shape_cast %1292 : vector<17xf32> to vector<17x1xf32>
    %1294 = tpu.reciprocal %1293 {approx = true} : vector<17x1xf32> -> vector<17x1xf32>
    %1295 = vector.broadcast %1294 : vector<17x1xf32> to vector<17x17xf32>
    %1296 = arith.mulf %1291, %1295 : vector<17x17xf32>
    %cst_641 = arith.constant dense<0.000000e+00> : vector<17x32xf32>
    %1297 = tpu.matmul %1296, %1282, %cst_641 {dimension_numbers = #tpu.dot_dimension_numbers<[1], [0], [0], [1], [0, 0, 1, 1], [], []>} : vector<17x17xf32>, vector<17x32xf32>, vector<17x32xf32> -> vector<17x32xf32>
    %c2616 = arith.constant 2616 : index
    %c0_642 = arith.constant 0 : index
    %1298 = vector.load %arg6[%c2616, %c0_642] : memref<2912x32xf32, #tpu.memory_space<vmem>>, vector<32x32xf32>
    %c2744 = arith.constant 2744 : index
    %c0_643 = arith.constant 0 : index
    %1299 = vector.load %arg6[%c2744, %c0_643] : memref<2912x32xf32, #tpu.memory_space<vmem>>, vector<32x32xf32>
    %c2842 = arith.constant 2842 : index
    %c0_644 = arith.constant 0 : index
    %1300 = vector.load %arg6[%c2842, %c0_644] : memref<2912x32xf32, #tpu.memory_space<vmem>>, vector<1x32xf32>
    %c2846 = arith.constant 2846 : index
    %c0_645 = arith.constant 0 : index
    %1301 = vector.load %arg6[%c2846, %c0_645] : memref<2912x32xf32, #tpu.memory_space<vmem>>, vector<1x32xf32>
    %cst_646 = arith.constant dense<0.000000e+00> : vector<17x32xf32>
    %1302 = tpu.matmul %1262, %1298, %cst_646 {dimension_numbers = #tpu.dot_dimension_numbers<[1], [0], [0], [1], [0, 0, 1, 1], [], []>} : vector<17x32xf32>, vector<32x32xf32>, vector<17x32xf32> -> vector<17x32xf32>
    %1303 = vector.broadcast %1300 : vector<1x32xf32> to vector<17x32xf32>
    %1304 = arith.addf %1302, %1303 : vector<17x32xf32>
    %cst_647 = arith.constant dense<0.000000e+00> : vector<17x32xf32>
    %1305 = tpu.matmul %1262, %1299, %cst_647 {dimension_numbers = #tpu.dot_dimension_numbers<[1], [0], [0], [1], [0, 0, 1, 1], [], []>} : vector<17x32xf32>, vector<32x32xf32>, vector<17x32xf32> -> vector<17x32xf32>
    %1306 = vector.broadcast %1301 : vector<1x32xf32> to vector<17x32xf32>
    %1307 = arith.addf %1305, %1306 : vector<17x32xf32>
    %cst_648 = arith.constant dense<0.000000e+00> : vector<17x17xf32>
    %1308 = tpu.matmul %1304, %1272, %cst_648 {dimension_numbers = #tpu.dot_dimension_numbers<[1], [1], [0], [0], [0, 0, 1, 0], [], []>} : vector<17x32xf32>, vector<17x32xf32>, vector<17x17xf32> -> vector<17x17xf32>
    %cst_649 = arith.constant 0.353553385 : f32
    %1309 = vector.broadcast %cst_649 : f32 to vector<17x17xf32>
    %1310 = arith.mulf %1308, %1309 : vector<17x17xf32>
    %1311 = arith.addf %1310, %915 : vector<17x17xf32>
    %cst_650 = arith.constant dense<0xFF800000> : vector<17xf32>
    %1312 = vector.multi_reduction <maximumf>, %1311, %cst_650 [1] : vector<17x17xf32> to vector<17xf32>
    %1313 = vector.shape_cast %1312 : vector<17xf32> to vector<17x1xf32>
    %1314 = vector.broadcast %1313 : vector<17x1xf32> to vector<17x17xf32>
    %1315 = arith.subf %1311, %1314 : vector<17x17xf32>
    %1316 = math.exp %1315 : vector<17x17xf32>
    %cst_651 = arith.constant dense<0.000000e+00> : vector<17xf32>
    %1317 = vector.multi_reduction <add>, %1316, %cst_651 [1] : vector<17x17xf32> to vector<17xf32>
    %1318 = vector.shape_cast %1317 : vector<17xf32> to vector<17x1xf32>
    %1319 = tpu.reciprocal %1318 {approx = true} : vector<17x1xf32> -> vector<17x1xf32>
    %1320 = vector.broadcast %1319 : vector<17x1xf32> to vector<17x17xf32>
    %1321 = arith.mulf %1316, %1320 : vector<17x17xf32>
    %cst_652 = arith.constant dense<0.000000e+00> : vector<17x32xf32>
    %1322 = tpu.matmul %1321, %1307, %cst_652 {dimension_numbers = #tpu.dot_dimension_numbers<[1], [0], [0], [1], [0, 0, 1, 1], [], []>} : vector<17x17xf32>, vector<17x32xf32>, vector<17x32xf32> -> vector<17x32xf32>
    %1323 = arith.addf %1297, %1322 : vector<17x32xf32>
    %c2648 = arith.constant 2648 : index
    %c0_653 = arith.constant 0 : index
    %1324 = vector.load %arg6[%c2648, %c0_653] : memref<2912x32xf32, #tpu.memory_space<vmem>>, vector<32x32xf32>
    %c2776 = arith.constant 2776 : index
    %c0_654 = arith.constant 0 : index
    %1325 = vector.load %arg6[%c2776, %c0_654] : memref<2912x32xf32, #tpu.memory_space<vmem>>, vector<32x32xf32>
    %c2843 = arith.constant 2843 : index
    %c0_655 = arith.constant 0 : index
    %1326 = vector.load %arg6[%c2843, %c0_655] : memref<2912x32xf32, #tpu.memory_space<vmem>>, vector<1x32xf32>
    %c2847 = arith.constant 2847 : index
    %c0_656 = arith.constant 0 : index
    %1327 = vector.load %arg6[%c2847, %c0_656] : memref<2912x32xf32, #tpu.memory_space<vmem>>, vector<1x32xf32>
    %cst_657 = arith.constant dense<0.000000e+00> : vector<17x32xf32>
    %1328 = tpu.matmul %1262, %1324, %cst_657 {dimension_numbers = #tpu.dot_dimension_numbers<[1], [0], [0], [1], [0, 0, 1, 1], [], []>} : vector<17x32xf32>, vector<32x32xf32>, vector<17x32xf32> -> vector<17x32xf32>
    %1329 = vector.broadcast %1326 : vector<1x32xf32> to vector<17x32xf32>
    %1330 = arith.addf %1328, %1329 : vector<17x32xf32>
    %cst_658 = arith.constant dense<0.000000e+00> : vector<17x32xf32>
    %1331 = tpu.matmul %1262, %1325, %cst_658 {dimension_numbers = #tpu.dot_dimension_numbers<[1], [0], [0], [1], [0, 0, 1, 1], [], []>} : vector<17x32xf32>, vector<32x32xf32>, vector<17x32xf32> -> vector<17x32xf32>
    %1332 = vector.broadcast %1327 : vector<1x32xf32> to vector<17x32xf32>
    %1333 = arith.addf %1331, %1332 : vector<17x32xf32>
    %cst_659 = arith.constant dense<0.000000e+00> : vector<17x17xf32>
    %1334 = tpu.matmul %1330, %1272, %cst_659 {dimension_numbers = #tpu.dot_dimension_numbers<[1], [1], [0], [0], [0, 0, 1, 0], [], []>} : vector<17x32xf32>, vector<17x32xf32>, vector<17x17xf32> -> vector<17x17xf32>
    %cst_660 = arith.constant 0.353553385 : f32
    %1335 = vector.broadcast %cst_660 : f32 to vector<17x17xf32>
    %1336 = arith.mulf %1334, %1335 : vector<17x17xf32>
    %1337 = arith.addf %1336, %915 : vector<17x17xf32>
    %cst_661 = arith.constant dense<0xFF800000> : vector<17xf32>
    %1338 = vector.multi_reduction <maximumf>, %1337, %cst_661 [1] : vector<17x17xf32> to vector<17xf32>
    %1339 = vector.shape_cast %1338 : vector<17xf32> to vector<17x1xf32>
    %1340 = vector.broadcast %1339 : vector<17x1xf32> to vector<17x17xf32>
    %1341 = arith.subf %1337, %1340 : vector<17x17xf32>
    %1342 = math.exp %1341 : vector<17x17xf32>
    %cst_662 = arith.constant dense<0.000000e+00> : vector<17xf32>
    %1343 = vector.multi_reduction <add>, %1342, %cst_662 [1] : vector<17x17xf32> to vector<17xf32>
    %1344 = vector.shape_cast %1343 : vector<17xf32> to vector<17x1xf32>
    %1345 = tpu.reciprocal %1344 {approx = true} : vector<17x1xf32> -> vector<17x1xf32>
    %1346 = vector.broadcast %1345 : vector<17x1xf32> to vector<17x17xf32>
    %1347 = arith.mulf %1342, %1346 : vector<17x17xf32>
    %cst_663 = arith.constant dense<0.000000e+00> : vector<17x32xf32>
    %1348 = tpu.matmul %1347, %1333, %cst_663 {dimension_numbers = #tpu.dot_dimension_numbers<[1], [0], [0], [1], [0, 0, 1, 1], [], []>} : vector<17x17xf32>, vector<17x32xf32>, vector<17x32xf32> -> vector<17x32xf32>
    %1349 = arith.addf %1323, %1348 : vector<17x32xf32>
    %c2680 = arith.constant 2680 : index
    %c0_664 = arith.constant 0 : index
    %1350 = vector.load %arg6[%c2680, %c0_664] : memref<2912x32xf32, #tpu.memory_space<vmem>>, vector<32x32xf32>
    %c2808 = arith.constant 2808 : index
    %c0_665 = arith.constant 0 : index
    %1351 = vector.load %arg6[%c2808, %c0_665] : memref<2912x32xf32, #tpu.memory_space<vmem>>, vector<32x32xf32>
    %c2844 = arith.constant 2844 : index
    %c0_666 = arith.constant 0 : index
    %1352 = vector.load %arg6[%c2844, %c0_666] : memref<2912x32xf32, #tpu.memory_space<vmem>>, vector<1x32xf32>
    %c2848 = arith.constant 2848 : index
    %c0_667 = arith.constant 0 : index
    %1353 = vector.load %arg6[%c2848, %c0_667] : memref<2912x32xf32, #tpu.memory_space<vmem>>, vector<1x32xf32>
    %cst_668 = arith.constant dense<0.000000e+00> : vector<17x32xf32>
    %1354 = tpu.matmul %1262, %1350, %cst_668 {dimension_numbers = #tpu.dot_dimension_numbers<[1], [0], [0], [1], [0, 0, 1, 1], [], []>} : vector<17x32xf32>, vector<32x32xf32>, vector<17x32xf32> -> vector<17x32xf32>
    %1355 = vector.broadcast %1352 : vector<1x32xf32> to vector<17x32xf32>
    %1356 = arith.addf %1354, %1355 : vector<17x32xf32>
    %cst_669 = arith.constant dense<0.000000e+00> : vector<17x32xf32>
    %1357 = tpu.matmul %1262, %1351, %cst_669 {dimension_numbers = #tpu.dot_dimension_numbers<[1], [0], [0], [1], [0, 0, 1, 1], [], []>} : vector<17x32xf32>, vector<32x32xf32>, vector<17x32xf32> -> vector<17x32xf32>
    %1358 = vector.broadcast %1353 : vector<1x32xf32> to vector<17x32xf32>
    %1359 = arith.addf %1357, %1358 : vector<17x32xf32>
    %cst_670 = arith.constant dense<0.000000e+00> : vector<17x17xf32>
    %1360 = tpu.matmul %1356, %1272, %cst_670 {dimension_numbers = #tpu.dot_dimension_numbers<[1], [1], [0], [0], [0, 0, 1, 0], [], []>} : vector<17x32xf32>, vector<17x32xf32>, vector<17x17xf32> -> vector<17x17xf32>
    %cst_671 = arith.constant 0.353553385 : f32
    %1361 = vector.broadcast %cst_671 : f32 to vector<17x17xf32>
    %1362 = arith.mulf %1360, %1361 : vector<17x17xf32>
    %1363 = arith.addf %1362, %915 : vector<17x17xf32>
    %cst_672 = arith.constant dense<0xFF800000> : vector<17xf32>
    %1364 = vector.multi_reduction <maximumf>, %1363, %cst_672 [1] : vector<17x17xf32> to vector<17xf32>
    %1365 = vector.shape_cast %1364 : vector<17xf32> to vector<17x1xf32>
    %1366 = vector.broadcast %1365 : vector<17x1xf32> to vector<17x17xf32>
    %1367 = arith.subf %1363, %1366 : vector<17x17xf32>
    %1368 = math.exp %1367 : vector<17x17xf32>
    %cst_673 = arith.constant dense<0.000000e+00> : vector<17xf32>
    %1369 = vector.multi_reduction <add>, %1368, %cst_673 [1] : vector<17x17xf32> to vector<17xf32>
    %1370 = vector.shape_cast %1369 : vector<17xf32> to vector<17x1xf32>
    %1371 = tpu.reciprocal %1370 {approx = true} : vector<17x1xf32> -> vector<17x1xf32>
    %1372 = vector.broadcast %1371 : vector<17x1xf32> to vector<17x17xf32>
    %1373 = arith.mulf %1368, %1372 : vector<17x17xf32>
    %cst_674 = arith.constant dense<0.000000e+00> : vector<17x32xf32>
    %1374 = tpu.matmul %1373, %1359, %cst_674 {dimension_numbers = #tpu.dot_dimension_numbers<[1], [0], [0], [1], [0, 0, 1, 1], [], []>} : vector<17x17xf32>, vector<17x32xf32>, vector<17x32xf32> -> vector<17x32xf32>
    %1375 = arith.addf %1349, %1374 : vector<17x32xf32>
    %1376 = arith.addf %1375, %1267 : vector<17x32xf32>
    %c2896 = arith.constant 2896 : index
    %c0_675 = arith.constant 0 : index
    %1377 = vector.load %arg6[%c2896, %c0_675] : memref<2912x32xf32, #tpu.memory_space<vmem>>, vector<2x32xf32>
    %c2904 = arith.constant 2904 : index
    %c0_676 = arith.constant 0 : index
    %1378 = vector.load %arg6[%c2904, %c0_676] : memref<2912x32xf32, #tpu.memory_space<vmem>>, vector<2x1xf32>
    %1379 = vector.extract_strided_slice %1376 {offsets = [1, 0], sizes = [16, 32], strides = [1, 1]} : vector<17x32xf32> to vector<16x32xf32>
    %cst_677 = arith.constant dense<0.000000e+00> : vector<2x16xf32>
    %1380 = tpu.matmul %1377, %1379, %cst_677 {dimension_numbers = #tpu.dot_dimension_numbers<[1], [1], [0], [0], [0, 0, 1, 0], [], []>} : vector<2x32xf32>, vector<16x32xf32>, vector<2x16xf32> -> vector<2x16xf32>
    %1381 = vector.broadcast %1378 : vector<2x1xf32> to vector<2x16xf32>
    %1382 = arith.addf %1380, %1381 : vector<2x16xf32>
    %c0_678 = arith.constant 0 : index
    %c0_679 = arith.constant 0 : index
    %c0_680 = arith.constant 0 : index
    %1383 = vector.load %arg9[%c0_678, %c0_679, %c0_680] : memref<1x2x16xf32, #tpu.memory_space<vmem>>, vector<1x2x16xf32>
    %1384 = vector.shape_cast %1383 : vector<1x2x16xf32> to vector<2x16xf32>
    %1385 = vector.shape_cast %1382 : vector<2x16xf32> to vector<1x2x16xf32>
    tpu.vector_store %arg9[%c0_678, %c0_679, %c0_680], %1385 {strides = array<i32>} : memref<1x2x16xf32, #tpu.memory_space<vmem>>, vector<1x2x16xf32>,
    return
  }
  func.func @transform_0(%arg0: i32) -> (i32, i32, i32) {
    %c0_i32 = arith.constant 0 : i32
    %c0_i32_0 = arith.constant 0 : i32
    %c0_i32_1 = arith.constant 0 : i32
    return %arg0, %c0_i32, %c0_i32_0 : i32, i32, i32
  }
  func.func @transform_1(%arg0: i32) -> (i32, i32, i32) {
    %c0_i32 = arith.constant 0 : i32
    %c0_i32_0 = arith.constant 0 : i32
    %c0_i32_1 = arith.constant 0 : i32
    return %arg0, %c0_i32, %c0_i32_0 : i32, i32, i32
  }
  func.func @transform_2(%arg0: i32) -> (i32, i32, i32) {
    %c0_i32 = arith.constant 0 : i32
    %c0_i32_0 = arith.constant 0 : i32
    %c0_i32_1 = arith.constant 0 : i32
    return %arg0, %c0_i32, %c0_i32_0 : i32, i32, i32
  }
  func.func @transform_3(%arg0: i32) -> (i32, i32, i32) {
    %c0_i32 = arith.constant 0 : i32
    %c0_i32_0 = arith.constant 0 : i32
    %c0_i32_1 = arith.constant 0 : i32
    return %arg0, %c0_i32, %c0_i32_0 : i32, i32, i32
  }
  func.func @transform_4(%arg0: i32) -> (i32, i32, i32) {
    %c0_i32 = arith.constant 0 : i32
    %c0_i32_0 = arith.constant 0 : i32
    %c0_i32_1 = arith.constant 0 : i32
    return %arg0, %c0_i32, %c0_i32_0 : i32, i32, i32
  }
  func.func @transform_5(%arg0: i32) -> (i32, i32) {
    %c0_i32 = arith.constant 0 : i32
    %c0_i32_0 = arith.constant 0 : i32
    %c0_i32_1 = arith.constant 0 : i32
    return %c0_i32, %c0_i32_0 : i32, i32
  }
  func.func @transform_6(%arg0: i32) -> (i32, i32) {
    %c0_i32 = arith.constant 0 : i32
    %c0_i32_0 = arith.constant 0 : i32
    %c0_i32_1 = arith.constant 0 : i32
    return %c0_i32, %c0_i32_0 : i32, i32
  }
  func.func @transform_7(%arg0: i32) -> (i32, i32) {
    %c0_i32 = arith.constant 0 : i32
    %c0_i32_0 = arith.constant 0 : i32
    %c0_i32_1 = arith.constant 0 : i32
    return %c0_i32, %c0_i32_0 : i32, i32
  }
  func.func @transform_8(%arg0: i32) -> (i32, i32, i32) {
    %c0_i32 = arith.constant 0 : i32
    %c0_i32_0 = arith.constant 0 : i32
    %c0_i32_1 = arith.constant 0 : i32
    return %arg0, %c0_i32, %c0_i32_0 : i32, i32, i32
  }
}

</mosaic_0001>

<bundles_post_ra>
// kernel: forward.1
= control target key start
LH: loop header
LB: loop body
LE: loop exit
PB: predicated region body
PF: predicated region fallthrough
CT: control target
= control target key end

     0   :  { %s9631_s27 = smov 0   ;;  %s13014_s0 = inlined_call_operand.vmem [shape: f32[2,16,40], index: 0, kind: input, shape index: {}]   ;;  %s13015_s1 = inlined_call_operand.vmem [shape: f32[2,8,16], index: 1, kind: input, shape index: {}]   ;;  %s13016_s2 = inlined_call_operand.vmem [shape: f32[2,8,48], index: 2, kind: input, shape index: {}]   ;;  %s13017_s3 = inlined_call_operand.vmem [shape: f32[2,1,16], index: 3, kind: input, shape index: {}]   ;;  %s13018_s4 = inlined_call_operand.vmem [shape: f32[2,1,8], index: 4, kind: input, shape index: {}]   ;;  %s13019_s5 = inlined_call_operand.vmem [shape: f32[2912,32], index: 5, kind: input, shape index: {}]   ;;  %s13020_s6 = inlined_call_operand.vmem [shape: f32[56,512], index: 6, kind: input, shape index: {}]   ;;  %s13021_s7 = inlined_call_operand.vmem [shape: f32[17,17], index: 7, kind: input, shape index: {}]   ;;  %s13022_s8 = inlined_call_operand.vmem [shape: f32[2,2,16], index: 8, kind: output, shape index: {}]  }
   0x1 LB: > { %s8468_s28 = sadd.s32 4294967295, %s9572_s27   ;;  %p8472_p0 = scmp.ge.s32.totalorder %s9572_s27, 1  ;;  %s9572_s27 = sphi %s9631_s27, %s18_s27  }
   0x2   : > { %p296_p1 = scmp.lt.s32.totalorder %s9572_s27, 3 }
   0x4   : > { %p297_p2 = pnand %p8472_p0, %p296_p1 }
   0x5   : > { %p343_p3 = scmp.lt.s32.totalorder (!%p297_p2), %s8468_s28, 1  ;;  %s9576_s21 = smov (!%p297_p2), 118  }
   0x6   : > { %300 = sbr.rel (%p297_p2) target bundleno = 13986 (0x36a2), region = 52  ;;  %s9577_s22 = smov (!%p297_p2), 108  }
   0x7   : > { %s9579_s24 = smov (!%p297_p2), 78   ;;  %s9580_s25 = smov (!%p297_p2), 48  }
   0x8   : > { %s9582_s29 = smov (!%p297_p2), 68   ;;  %s9583_s30 = smov (!%p297_p2), 38  }
   0xb   : > { %v372_v0 = vld [vmem:[%s13019_s5 + $0x20] sm:$0xff]  ;;  %v371_v1 = vld [vmem:[%s13019_s5 + $0x18] sm:$0xff]  ;;  %v370_v2 = vld [vmem:[%s13019_s5 + $0x10] sm:$0xff]  ;;  %s13024_s28 = smov (!%p343_p3, %s8468_s28), 1  ;;  %vm375_vm0 = vcmask 326656   ;;  %vm460_vm1 = vcmask 261120   ;;  %v415_v53 = vlaneseq }
   0xc   : > { %393 = vmatpush.msra.mxu0 %v372_v0  ;;  %v369_v3 = vld [vmem:[%s13019_s5 + $0x8] sm:$0xff]  ;;  %s9012_s15 = sshll.u32 %s13024_s28, 4  ;;  %v368_v4 = vld [vmem:[%s13019_s5] sm:$0xff]  ;;  %v409_v10 = vld [vmem:[%s13019_s5 + $0x50] sm:$0xff]  ;;  %v9574_v18 = vmov 32.0   ;;  %vm522_vm10 = vcmask 130048   ;;  %s358_s23 = scalar_lea.vmem %s13017_s3, %s13024_s28 }
   0xd   : > { %s347_s18 = scalar_lea.vmem %s13014_s0, %s9012_s15  ;;  %v9035_v8 = vld [vmem:[%s13019_s5 + $0x28] ss:$0 sm:$0xff]  ;;  %9103 = vrcp.f32 %v9574_v18  ;;  %v521_v35 = vld [vmem:[%s13019_s5 + $0x118] sm:$0xff]  ;;  %v520_v36 = vld [vmem:[%s13019_s5 + $0x110] sm:$0xff]  ;;  %v416_v60 = vshrl.u32 %v415_v53, 7  ;;  %v419_v61 = vand.u32 127, %v415_v53  ;;  %s361_s15 = scalar_lea.vmem %s13018_s4, %s13024_s28 }
   0xe   : > { %394 = vmatpush.msra.mxu0 %v371_v1  ;;  %v366_v5 = vld [vmem:[%s347_s18] sm:$0xff]  ;;  %v367_v6 = vld [vmem:[%s347_s18 + $0x8] sm:$0xff]  ;;  %603 = vmatpush.msra.mxu3 %v521_v35  ;;  %v9037_v57 = vld [vmem:[%s13019_s5 + $0x90] ss:$0 sm:$0xff]  ;;  %s8475_s26 = sshll.u32 %s13024_s28, 3  ;;  %s8477_s12 = sshll.u32 %s13024_s28, 1 }
   0xf   : > { %v408_v15 = vld [vmem:[%s13019_s5 + $0x48] sm:$0xff]  ;;  %v518_v38 = vld [vmem:[%s13019_s5 + $0x100] sm:$0xff]  ;;  %v555_v18 = vld [vmem:[%s13019_s5 + $0xb8] sm:$0xff]  ;;  %s351_s11 = scalar_lea.vmem %s13015_s1, %s8475_s26  ;;  %s355_s14 = scalar_lea.vmem %s13016_s2, %s8475_s26 }
  0x10   : > { %395 = vmatpush.msra.mxu0 %v370_v2  ;;  %604 = vmatpush.msra.mxu3 %v520_v36  ;;  %v519_v37 = vld [vmem:[%s13019_s5 + $0x108] sm:$0xff]  ;;  %v420_v2 = vsub.s32 %v419_v61, %v416_v60  ;;  %v707_v36 = vld [vmem:[%s13019_s5 + $0xe0] sm:$0xff]  ;;  %s9581_s26 = smov 98  }
  0x11   : > { %v9036_v54 = vld [vmem:[%s13019_s5 + $0x88] ss:$0 sm:$0xff]  ;;  %574 = vmatpush.msra.mxu2 %v555_v18 }
  0x12   : > { %396 = vmatpush.msra.mxu0 %v369_v3  ;;  %605 = vmatpush.msra.mxu3 %v519_v37  ;;  %vm422_vm9 = vcmp.eq.s32.totalorder %v420_v2, 4294967293  ;;  %vm434_vm12 = vcmp.eq.s32.totalorder %v420_v2, 4294967295  ;;  %vm428_vm13 = vcmp.eq.s32.totalorder %v420_v2, 4294967294  ;;  %v708_v35 = vld [vmem:[%s13019_s5 + $0xe8] sm:$0xff]  ;;  %v774_v37 = vld [vmem:[%s13019_s5 + $0x138] sm:$0xff] }
  0x13   : > { %v9104_v19 = vpop.eup %9103 }
  0x14   : > { %397 = vmatpush.msra.mxu0 %v368_v4  ;;  %v468_v20 = vmul.f32 32.0, %v9104_v19  ;;  %vm472_vm2 = vweird.f32 %v9104_v19  ;;  %606 = vmatpush.msra.mxu3 %v518_v38 }
  0x15   : > { %8478 = vmatmul.msk.f32.vlgmr.msra.gmra.mxu0 %vm375_vm0, %v366_v5  ;;  %v417_v5 = vadd.s32 8, %v416_v60 }
  0x16   : > { %v469_v21 = vsub.f32 1.0, %v468_v20  ;;  %v553_v20 = vld [vmem:[%s13019_s5 + $0xa8] sm:$0xff] }
  0x18   : > { %v470_v22 = vmul.f32 %v9104_v19, %v469_v21 }
  0x1a   : > { %v471_v23 = vadd.f32 %v9104_v19, %v470_v22 }
  0x1c   : > { %v9679_v24 = vsel %vm472_vm2, %v9104_v19, %v471_v23  ;;  %v554_v19 = vld [vmem:[%s13019_s5 + $0xb0] sm:$0xff]  ;;  %vm446_vm2 = vcmp.eq.s32.totalorder %v420_v2, 2 }
  0x1d   : > { %8479 = vmatmul.msk.f32.gmra.mxu0 %vm375_vm0, %v367_v6  ;;  %575 = vmatpush.msra.mxu2 %v554_v19 }
  0x1f   : > { %576 = vmatpush.msra.mxu2 %v553_v20 }
  0x92   : > { %v399_v7 = vpop.f32.mrf.mxu0 }
  0x93   : > { %v400_v13 = vadd.f32 %v9035_v8, %v399_v7 }
  0x95   : > { %v9675_v16 = vadd.f32 %v408_v15, %v400_v13 }
  0x97   : > { %v461_v17 = vsel %vm460_vm1, %v9675_v16, 0.0 }
  0x9a   : > { %v402_v9 = vpop.f32.mrf.mxu0 }
  0x9b   : > { %v403_v11 = vadd.f32 %v9035_v8, %v402_v9  ;;  %v9575_v8 = vmov 0.0  }
  0x9c   : > { %v9707_v9 = vsel %vm422_vm9, 1.0, %v9575_v8  ;;  %v9717_v13 = vsel %vm434_vm12, 1.0, %v9575_v8  ;;  %v9742_v21 = vsel %vm446_vm2, 1.0, %v9575_v8 }
  0x9d   : > { %v9668_v12 = vadd.f32 %v409_v10, %v403_v11  ;;  %v421_v10 = vsub.s32 %v419_v61, %v417_v5 }
  0x9f   : > { %v464_v14 = vsel %vm460_vm1, %v9668_v12, 0.0  ;;  %vm423_vm11 = vcmp.eq.s32.totalorder %v421_v10, 4294967293  ;;  %vm435_vm14 = vcmp.eq.s32.totalorder %v421_v10, 4294967295  ;;  %vm429_vm15 = vcmp.eq.s32.totalorder %v421_v10, 4294967294 }
  0xa0   : > { %465 = vadd.xlane.f32.xlu0 %v464_v14  ;;  %v9712_v11 = vsel %vm423_vm11, 1.0, %v9575_v8  ;;  %v9719_v14 = vsel %vm428_vm13, 1.0, %v9575_v8  ;;  %v9725_v15 = vsel %vm435_vm14, 1.0, %v9575_v8 }
  0xa8   : > { %462 = vadd.xlane.f32.xlu0 %v461_v17  ;;  %v9727_v17 = vsel %vm429_vm15, 1.0, %v9575_v8 }
 0x113   : > { %v466_v25 = vpop.xlane.xlu0 %465 }
 0x114   : > { %v475_v26 = vmul.f32 %v9679_v24, %v466_v25 }
 0x116   : > { %v477_v27 = vsub.f32 %v9668_v12, %v475_v26 }
 0x118   : > { %v479_v28 = vmul.f32 %v477_v27, %v477_v27 }
 0x11a   : > { %v483_v29 = vsel %vm460_vm1, %v479_v28, 0.0  ;;  %v552_v28 = vld [vmem:[%s13019_s5 + $0xa0] sm:$0xff] }
 0x11b   : > { %484 = vadd.xlane.f32.xlu1 %v483_v29  ;;  %v463_v30 = vpop.xlane.xlu0 %462  ;;  %577 = vmatpush.msra.mxu2 %v552_v28  ;;  %v646_v29 = vld [vmem:[%s13019_s5 + $0xd8] sm:$0xff] }
 0x11c   : > { %v474_v31 = vmul.f32 %v9679_v24, %v463_v30  ;;  %v645_v30 = vld [vmem:[%s13019_s5 + $0xd0] sm:$0xff] }
 0x11d   : > { %665 = vmatpush.msrb.mxu2 %v646_v29 }
 0x11e   : > { %v476_v32 = vsub.f32 %v9675_v16, %v474_v31  ;;  %v644_v31 = vld [vmem:[%s13019_s5 + $0xc8] sm:$0xff] }
 0x11f   : > { %666 = vmatpush.msrb.mxu2 %v645_v30 }
 0x120   : > { %v478_v33 = vmul.f32 %v476_v32, %v476_v32 }
 0x121   : > { %667 = vmatpush.msrb.mxu2 %v644_v31 }
 0x122   : > { %v480_v34 = vsel %vm460_vm1, %v478_v33, 0.0  ;;  %v710_v33 = vld [vmem:[%s13019_s5 + $0xf8] sm:$0xff] }
 0x123   : > { %481 = vadd.xlane.f32.xlu1 %v480_v34  ;;  %v709_v34 = vld [vmem:[%s13019_s5 + $0xf0] sm:$0xff]  ;;  %729 = vmatpush.msrb.mxu0 %v710_v33 }
 0x125   : > { %730 = vmatpush.msrb.mxu0 %v709_v34 }
 0x127   : > { %731 = vmatpush.msrb.mxu0 %v708_v35 }
 0x129   : > { %732 = vmatpush.msrb.mxu0 %v707_v36 }
 0x18e   : > { %v485_v39 = vpop.xlane.xlu1 %484 }
 0x18f   : > { %v487_v40 = vmul.f32 %v485_v39, %v9679_v24  ;;  %v773_v39 = vld [vmem:[%s13019_s5 + $0x130] sm:$0xff] }
 0x191   : > { %v489_v41 = vadd.f32 1e-06, %v487_v40  ;;  %v838_v40 = vld [vmem:[%s13019_s5 + $0x158] sm:$0xff] }
 0x192   : > { %857 = vmatpush.msra.mxu0 %v838_v40 }
 0x193   : > { %9105 = vrsqrt.f32 %v489_v41  ;;  %vm506_vm4 = vweird.f32 %v489_v41 }
 0x196   : > { %v482_v42 = vpop.xlane.xlu1 %481 }
 0x197   : > { %v486_v43 = vmul.f32 %v482_v42, %v9679_v24  ;;  %v772_v42 = vld [vmem:[%s13019_s5 + $0x128] sm:$0xff] }
 0x199   : > { %v9106_v44 = vpop.eup %9105  ;;  %v488_v45 = vadd.f32 1e-06, %v486_v43  ;;  %v836_v43 = vld [vmem:[%s13019_s5 + $0x148] sm:$0xff] }
 0x19a   : > { %v501_v46 = vmul.f32 %v9106_v44, %v489_v41  ;;  %vm507_vm3 = vweird.f32 %v9106_v44  ;;  %v837_v41 = vld [vmem:[%s13019_s5 + $0x150] sm:$0xff] }
 0x19b   : > { %9107 = vrsqrt.f32 %v488_v45  ;;  %vm508_vm5 = vmor %vm506_vm4, %vm507_vm3  ;;  %vm496_vm7 = vweird.f32 %v488_v45  ;;  %vm440_vm3 = vcmp.eq.s32.totalorder %v420_v2, 1  ;;  %vm447_vm4 = vcmp.eq.s32.totalorder %v421_v10, 2  ;;  %858 = vmatpush.msra.mxu0 %v837_v41 }
 0x19c   : > { %v502_v47 = vmul.f32 %v9106_v44, %v501_v46  ;;  %v9744_v22 = vsel %vm440_vm3, 1.0, %v9575_v8  ;;  %v9750_v23 = vsel %vm447_vm4, 1.0, %v9575_v8 }
 0x19d   : > { %859 = vmatpush.msra.mxu0 %v836_v43 }
 0x19e   : > { %v503_v48 = vmul.f32 0.5, %v502_v47  ;;  %v835_v47 = vld [vmem:[%s13019_s5 + $0x140] sm:$0xff] }
 0x19f   : > { %860 = vmatpush.msra.mxu0 %v835_v47 }
 0x1a0   : > { %v504_v49 = vsub.f32 1.5, %v503_v48 }
 0x1a1   : > { %v9108_v50 = vpop.eup %9107 }
 0x1a2   : > { %v505_v51 = vmul.f32 %v9106_v44, %v504_v49  ;;  %v491_v52 = vmul.f32 %v9108_v50, %v488_v45  ;;  %vm497_vm6 = vweird.f32 %v9108_v50  ;;  %v771_v45 = vld [vmem:[%s13019_s5 + $0x120] sm:$0xff]  ;;  %v902_v49 = vld [vmem:[%s13019_s5 + $0x178] sm:$0xff] }
 0x1a3   : > { %vm498_vm8 = vmor %vm496_vm7, %vm497_vm6  ;;  %vm452_vm6 = vcmp.eq.s32.totalorder %v420_v2, 3  ;;  %vm453_vm7 = vcmp.eq.s32.totalorder %v421_v10, 3 }
 0x1a4   : > { %v509_v55 = vsel %vm508_vm5, %v9106_v44, %v505_v51  ;;  %v492_v56 = vmul.f32 %v9108_v50, %v491_v52  ;;  %vm441_vm5 = vcmp.eq.s32.totalorder %v421_v10, 1  ;;  %v9758_v26 = vsel %vm452_vm6, 1.0, %v9575_v8  ;;  %v901_v51 = vld [vmem:[%s13019_s5 + $0x170] sm:$0xff]  ;;  %v900_v52 = vld [vmem:[%s13019_s5 + $0x168] sm:$0xff] }
 0x1a5   : > { %v511_v58 = vmul.f32 %v509_v55, %v477_v27  ;;  %v9752_v25 = vsel %vm441_vm5, 1.0, %v9575_v8  ;;  %v9762_v27 = vsel %vm453_vm7, 1.0, %v9575_v8 }
 0x1a6   : > { %v493_v59 = vmul.f32 0.5, %v492_v56 }
 0x1a7   : > { %v514_v62 = vmul.f32 %v9036_v54, %v511_v58 }
 0x1a8   : > { %v494_v63 = vsub.f32 1.5, %v493_v59 }
 0x1a9   : > { %v517_v0 = vadd.f32 %v9037_v57, %v514_v62 }
 0x1aa   : > { %v495_v1 = vmul.f32 %v9108_v50, %v494_v63 }
 0x1ab   : > { %543 = vmatpush.msra.mxu1 %v517_v0  ;;  %698 = vmatpush.msrb.mxu3 %v517_v0 }
 0x1ac   : > { %v499_v3 = vsel %vm498_vm8, %v9108_v50, %v495_v1 }
 0x1ad   : > { %v510_v4 = vmul.f32 %v499_v3, %v476_v32  ;;  %v643_v32 = vld [vmem:[%s13019_s5 + $0xc0] sm:$0xff] }
 0x1ae   : > { %668 = vmatpush.msrb.mxu2 %v643_v32 }
 0x1af   : > { %v513_v6 = vmul.f32 %v9036_v54, %v510_v4  ;;  %v899_v54 = vld [vmem:[%s13019_s5 + $0x160] sm:$0xff] }
 0x1b1   : > { %v516_v7 = vadd.f32 %v9037_v57, %v513_v6 }
 0x1b3   : > { %544 = vmatpush.msra.mxu1 %v516_v7  ;;  %8496 = vmatmul.msk.f32.vlgmr.msra.gmra.mxu3 %vm460_vm1, %v516_v7 }
 0x1b4   : > { %699 = vmatpush.msrb.mxu3 %v516_v7  ;;  %8492 = vmatmul.msk.f32.vlgmr.msra.gmra.mxu1 %vm522_vm10, %v9707_v9 }
 0x1b5   : > { %634 = vmatpush.msrb.mxu1 %v517_v0 }
 0x1b6   : > { %826 = vmatpush.msra.mxu3 %v517_v0 }
 0x1b7   : > { %635 = vmatpush.msrb.mxu1 %v516_v7 }
 0x1b8   : > { %827 = vmatpush.msra.mxu3 %v516_v7 }
 0x1b9   : > { %762 = vmatpush.msra.mxu1 %v517_v0 }
 0x1bb   : > { %763 = vmatpush.msra.mxu1 %v516_v7  ;;  %8497 = vmatmul.msk.f32.gmra.mxu3 %vm460_vm1, %v517_v0 }
 0x1bc   : > { %8493 = vmatmul.msk.f32.gmra.mxu1 %vm522_vm10, %v9712_v11 }
 0x1c3   : > { %8502 = vmatmul.msk.f32.vlgmr.msrb.gmra.mxu3 %vm522_vm10, %v9717_v13 }
 0x1c4   : > { %8498 = vmatmul.msk.f32.vlgmr.msrb.gmra.mxu1 %vm522_vm10, %v9719_v14 }
 0x1c5   : > { %890 = vmatpush.msrb.mxu1 %v517_v0 }
 0x1c7   : > { %891 = vmatpush.msrb.mxu1 %v516_v7 }
 0x1cb   : > { %8503 = vmatmul.msk.f32.gmra.mxu3 %vm522_vm10, %v9725_v15 }
 0x1cc   : > { %8499 = vmatmul.msk.f32.gmra.mxu1 %vm522_vm10, %v9727_v17 }
 0x1d3   : > { %8510 = vmatmul.msk.f32.vlgmr.msra.gmra.mxu3 %vm522_vm10, %v9742_v21 }
 0x1d4   : > { %8506 = vmatmul.msk.f32.vlgmr.msra.gmra.mxu1 %vm522_vm10, %v9744_v22 }
 0x1db   : > { %8511 = vmatmul.msk.f32.gmra.mxu3 %vm522_vm10, %v9750_v23 }
 0x1dc   : > { %8507 = vmatmul.msk.f32.gmra.mxu1 %vm522_vm10, %v9752_v25 }
 0x1e4   : > { %8514 = vmatmul.msk.f32.vlgmr.msrb.gmra.mxu1 %vm522_vm10, %v9758_v26 }
 0x1ec   : > { %8515 = vmatmul.msk.f32.gmra.mxu1 %vm522_vm10, %v9762_v27 }
 0x231   : > { %v546_v38 = vpop.f32.mrf.mxu1 }
 0x232   : > { %8494 = vmatmul.msk.f32.vlgmr.msra.gmra.mxu2 %vm460_vm1, %v546_v38 }
 0x233   : > { %793 = vmatpush.msra.mxu2 %v774_v37  ;;  %v9038_v37 = vld [vmem:[%s13019_s5 + $0x98] ss:$0 sm:$0xff] }
 0x235   : > { %794 = vmatpush.msra.mxu2 %v773_v39 }
 0x236   : > { %v608_v44 = vpop.f32.mrf.mxu3 }
 0x237   : > { %795 = vmatpush.msra.mxu2 %v772_v42 }
 0x239   : > { %v549_v46 = vpop.f32.mrf.mxu1  ;;  %796 = vmatpush.msra.mxu2 %v771_v45 }
 0x23a   : > { %8495 = vmatmul.msk.f32.gmra.mxu2 %vm460_vm1, %v549_v46 }
 0x23e   : > { %v611_v48 = vpop.f32.mrf.mxu3 }
 0x241   : > { %v637_v50 = vpop.f32.mrf.mxu1 }
 0x242   : > { %8500 = vmatmul.msk.f32.vlgmr.msrb.gmra.mxu2 %vm460_vm1, %v637_v50 }
 0x243   : > { %921 = vmatpush.msrb.mxu2 %v902_v49 }
 0x245   : > { %922 = vmatpush.msrb.mxu2 %v901_v51 }
 0x246   : > { %v701_v53 = vpop.f32.mrf.mxu3 }
 0x247   : > { %8504 = vmatmul.msk.f32.vlgmr.msrb.gmra.mxu0 %vm460_vm1, %v701_v53  ;;  %923 = vmatpush.msrb.mxu2 %v900_v52 }
 0x249   : > { %v640_v55 = vpop.f32.mrf.mxu1  ;;  %924 = vmatpush.msrb.mxu2 %v899_v54 }
 0x24a   : > { %8501 = vmatmul.msk.f32.gmra.mxu2 %vm460_vm1, %v640_v55  ;;  %v1024_v55 = vld [vmem:[%s13019_s5 + $0x198] sm:$0xff] }
 0x24b   : > { %1043 = vmatpush.msrb.mxu0 %v1024_v55 }
 0x24e   : > { %v704_v56 = vpop.f32.mrf.mxu3 }
 0x24f   : > { %8505 = vmatmul.msk.f32.gmra.mxu0 %vm460_vm1, %v704_v56  ;;  %v1023_v56 = vld [vmem:[%s13019_s5 + $0x190] sm:$0xff] }
 0x250   : > { %1044 = vmatpush.msrb.mxu0 %v1023_v56  ;;  %v1222_v56 = vld [vmem:[%s13019_s5 + $0x200] sm:$0xff] }
 0x251   : > { %v765_v57 = vpop.f32.mrf.mxu1 }
 0x252   : > { %8508 = vmatmul.msk.f32.vlgmr.msra.gmra.mxu2 %vm460_vm1, %v765_v57  ;;  %v1022_v57 = vld [vmem:[%s13019_s5 + $0x188] sm:$0xff] }
 0x253   : > { %1045 = vmatpush.msrb.mxu0 %v1022_v57  ;;  %v1165_v57 = vld [vmem:[%s13019_s5 + $0x1c8] sm:$0xff] }
 0x256   : > { %v829_v58 = vpop.f32.mrf.mxu3 }
 0x257   : > { %8512 = vmatmul.msk.f32.vlgmr.msra.gmra.mxu0 %vm460_vm1, %v829_v58  ;;  %v1021_v58 = vld [vmem:[%s13019_s5 + $0x180] sm:$0xff] }
 0x258   : > { %1046 = vmatpush.msrb.mxu0 %v1021_v58  ;;  %v1164_v58 = vld [vmem:[%s13019_s5 + $0x1c0] sm:$0xff] }
 0x259   : > { %v768_v59 = vpop.f32.mrf.mxu1 }
 0x25a   : > { %8509 = vmatmul.msk.f32.gmra.mxu2 %vm460_vm1, %v768_v59  ;;  %v997_v59 = vld [vmem:[%s13019_s5 + $0x1f8] sm:$0xff] }
 0x25b   : > { %1072 = vmatpush.msra.mxu1 %v997_v59 }
 0x25e   : > { %v832_v60 = vpop.f32.mrf.mxu3 }
 0x25f   : > { %8513 = vmatmul.msk.f32.gmra.mxu0 %vm460_vm1, %v832_v60 }
 0x261   : > { %v893_v61 = vpop.f32.mrf.mxu1 }
 0x262   : > { %8516 = vmatmul.msk.f32.vlgmr.msrb.gmra.mxu2 %vm460_vm1, %v893_v61  ;;  %v996_v61 = vld [vmem:[%s13019_s5 + $0x1f0] sm:$0xff] }
 0x263   : > { %1073 = vmatpush.msra.mxu1 %v996_v61  ;;  %v1340_v61 = vld [vmem:[%s13019_s5 + $0x250] sm:$0xff] }
 0x269   : > { %v896_v62 = vpop.f32.mrf.mxu1 }
 0x26a   : > { %8517 = vmatmul.msk.f32.gmra.mxu2 %vm460_vm1, %v896_v62 }
 0x2b5   : > { %v579_v63 = vpop.f32.mrf.mxu2 }
 0x2b6   : > { %v609_v8 = vadd.f32 %v608_v44, %v579_v63  ;;  %v995_v63 = vld [vmem:[%s13019_s5 + $0x1e8] sm:$0xff] }
 0x2b7   : > { %1074 = vmatpush.msra.mxu1 %v995_v63  ;;  %v1339_v63 = vld [vmem:[%s13019_s5 + $0x248] sm:$0xff] }
 0x2bd   : > { %v582_v0 = vpop.f32.mrf.mxu2 }
 0x2be   : > { %v612_v10 = vadd.f32 %v611_v48, %v582_v0 }
 0x2c4   : > { %v734_v2 = vpop.f32.mrf.mxu0 }
 0x2c5   : > { %v670_v1 = vpop.f32.mrf.mxu2 }
 0x2c6   : > { %v676_v18 = vadd.f32 %v670_v1, %v609_v8  ;;  %v994_v1 = vld [vmem:[%s13019_s5 + $0x1e0] sm:$0xff] }
 0x2c7   : > { %1075 = vmatpush.msra.mxu1 %v994_v1 }
 0x2c8   : > { %v740_v28 = vadd.f32 %v734_v2, %v676_v18 }
 0x2cc   : > { %v737_v4 = vpop.f32.mrf.mxu0 }
 0x2cd   : > { %v673_v3 = vpop.f32.mrf.mxu2 }
 0x2ce   : > { %v677_v19 = vadd.f32 %v673_v3, %v612_v10 }
 0x2d0   : > { %v741_v29 = vadd.f32 %v737_v4, %v677_v19 }
 0x2d4   : > { %v862_v7 = vpop.f32.mrf.mxu0 }
 0x2d5   : > { %v798_v5 = vpop.f32.mrf.mxu2 }
 0x2d6   : > { %v804_v30 = vadd.f32 %v798_v5, %v740_v28  ;;  %v9039_v28 = vld [vmem:[%s13019_s5 + $0x89] ss:$0 sm:$0xff] }
 0x2d8   : > { %v868_v33 = vadd.f32 %v862_v7, %v804_v30 }
 0x2dc   : > { %v865_v32 = vpop.f32.mrf.mxu0 }
 0x2dd   : > { %v801_v6 = vpop.f32.mrf.mxu2 }
 0x2de   : > { %v805_v31 = vadd.f32 %v801_v6, %v741_v29 }
 0x2e0   : > { %v869_v34 = vadd.f32 %v865_v32, %v805_v31  ;;  %v9040_v31 = vld [vmem:[%s13019_s5 + $0x91] ss:$0 sm:$0xff] }
 0x2e5   : > { %v926_v20 = vpop.f32.mrf.mxu2 }
 0x2e6   : > { %v932_v36 = vadd.f32 %v926_v20, %v868_v33 }
 0x2e8   : > { %v936_v40 = vadd.f32 %v9038_v37, %v932_v36 }
 0x2ea   : > { %v938_v43 = vmax.f32 %v936_v40, 0.0 }
 0x2ec   : > { %v9850_v45 = vadd.f32 %v938_v43, %v9675_v16  ;;  %v1109_v43 = vld [vmem:[%s13019_s5 + $0x1b8] sm:$0xff] }
 0x2ed   : > { %v929_v35 = vpop.f32.mrf.mxu2 }
 0x2ee   : > { %v933_v38 = vadd.f32 %v929_v35, %v869_v34  ;;  %v944_v46 = vsel %vm460_vm1, %v9850_v45, 0.0 }
 0x2f0   : > { %v937_v39 = vadd.f32 %v9038_v37, %v933_v38 }
 0x2f2   : > { %v939_v41 = vmax.f32 %v937_v39, 0.0 }
 0x2f4   : > { %v9845_v42 = vadd.f32 %v939_v41, %v9668_v12 }
 0x2f6   : > { %v947_v44 = vsel %vm460_vm1, %v9845_v42, 0.0 }
 0x2f7   : > { %948 = vadd.xlane.f32.xlu2 %v947_v44  ;;  %v1108_v44 = vld [vmem:[%s13019_s5 + $0x1b0] sm:$0xff] }
 0x2ff   : > { %945 = vadd.xlane.f32.xlu2 %v944_v46  ;;  %v1107_v46 = vld [vmem:[%s13019_s5 + $0x1a8] sm:$0xff] }
 0x36a   : > { %v949_v47 = vpop.xlane.xlu2 %948 }
 0x36b   : > { %v951_v48 = vmul.f32 %v949_v47, %v9679_v24  ;;  %v1106_v47 = vld [vmem:[%s13019_s5 + $0x1a0] sm:$0xff] }
 0x36d   : > { %v953_v49 = vsub.f32 %v9845_v42, %v951_v48 }
 0x36f   : > { %v955_v50 = vmul.f32 %v953_v49, %v953_v49 }
 0x371   : > { %v959_v12 = vsel %vm460_vm1, %v955_v50, 0.0 }
 0x372   : > { %960 = vadd.xlane.f32.xlu0 %v959_v12  ;;  %v946_v51 = vpop.xlane.xlu2 %945 }
 0x373   : > { %v950_v52 = vmul.f32 %v946_v51, %v9679_v24  ;;  %v1225_v51 = vld [vmem:[%s13019_s5 + $0x218] sm:$0xff] }
 0x375   : > { %v952_v53 = vsub.f32 %v9850_v45, %v950_v52  ;;  %v1224_v52 = vld [vmem:[%s13019_s5 + $0x210] sm:$0xff] }
 0x377   : > { %v954_v16 = vmul.f32 %v952_v53, %v952_v53 }
 0x379   : > { %v956_v54 = vsel %vm460_vm1, %v954_v16, 0.0  ;;  %v1223_v16 = vld [vmem:[%s13019_s5 + $0x208] sm:$0xff] }
 0x37a   : > { %957 = vadd.xlane.f32.xlu1 %v956_v54  ;;  %v1166_v54 = vld [vmem:[%s13019_s5 + $0x1d0] sm:$0xff] }
 0x3e5   : > { %v961_v60 = vpop.xlane.xlu0 %960 }
 0x3e6   : > { %v963_v62 = vmul.f32 %v961_v60, %v9679_v24  ;;  %v1341_v60 = vld [vmem:[%s13019_s5 + $0x258] sm:$0xff] }
 0x3e8   : > { %v965_v0 = vadd.f32 1e-06, %v963_v62  ;;  %v1283_v62 = vld [vmem:[%s13019_s5 + $0x238] sm:$0xff] }
 0x3ea   : > { %9109 = vrsqrt.f32 %v965_v0  ;;  %vm982_vm9 = vweird.f32 %v965_v0 }
 0x3ed   : > { %v958_v2 = vpop.xlane.xlu1 %957 }
 0x3ee   : > { %v962_v3 = vmul.f32 %v958_v2, %v9679_v24  ;;  %v1338_v2 = vld [vmem:[%s13019_s5 + $0x240] sm:$0xff] }
 0x3f0   : > { %v9110_v4 = vpop.eup %9109  ;;  %v964_v5 = vadd.f32 1e-06, %v962_v3  ;;  %v1281_v3 = vld [vmem:[%s13019_s5 + $0x228] sm:$0xff] }
 0x3f1   : > { %v977_v6 = vmul.f32 %v9110_v4, %v965_v0  ;;  %vm983_vm8 = vweird.f32 %v9110_v4  ;;  %v1282_v0 = vld [vmem:[%s13019_s5 + $0x230] sm:$0xff] }
 0x3f2   : > { %9111 = vrsqrt.f32 %v964_v5  ;;  %vm984_vm11 = vmor %vm982_vm9, %vm983_vm8  ;;  %vm972_vm13 = vweird.f32 %v964_v5 }
 0x3f3   : > { %v978_v7 = vmul.f32 %v9110_v4, %v977_v6 }
 0x3f5   : > { %v979_v8 = vmul.f32 0.5, %v978_v7 }
 0x3f7   : > { %v980_v10 = vsub.f32 1.5, %v979_v8 }
 0x3f8   : > { %v9112_v18 = vpop.eup %9111 }
 0x3f9   : > { %v981_v19 = vmul.f32 %v9110_v4, %v980_v10  ;;  %v967_v20 = vmul.f32 %v9112_v18, %v964_v5  ;;  %vm973_vm12 = vweird.f32 %v9112_v18  ;;  %v1280_v5 = vld [vmem:[%s13019_s5 + $0x220] sm:$0xff] }
 0x3fa   : > { %vm974_vm14 = vmor %vm972_vm13, %vm973_vm12 }
 0x3fb   : > { %v985_v29 = vsel %vm984_vm11, %v9110_v4, %v981_v19  ;;  %v968_v30 = vmul.f32 %v9112_v18, %v967_v20 }
 0x3fc   : > { %v987_v32 = vmul.f32 %v985_v29, %v953_v49 }
 0x3fd   : > { %v969_v33 = vmul.f32 0.5, %v968_v30 }
 0x3fe   : > { %v990_v34 = vmul.f32 %v9039_v28, %v987_v32 }
 0x3ff   : > { %v970_v35 = vsub.f32 1.5, %v969_v33 }
 0x400   : > { %v993_v36 = vadd.f32 %v9040_v31, %v990_v34 }
 0x401   : > { %v971_v37 = vmul.f32 %v9112_v18, %v970_v35 }
 0x402   : > { %1012 = vmatpush.msrb.mxu3 %v993_v36  ;;  %1097 = vmatpush.msra.mxu2 %v993_v36 }
 0x403   : > { %v975_v38 = vsel %vm974_vm14, %v9112_v18, %v971_v37  ;;  %1155 = vmatpush.msra.mxu0 %v993_v36 }
 0x404   : > { %v986_v39 = vmul.f32 %v975_v38, %v952_v53  ;;  %v1167_v53 = vld [vmem:[%s13019_s5 + $0x1d8] sm:$0xff] }
 0x405   : > { %1186 = vmatpush.msrb.mxu1 %v1167_v53 }
 0x406   : > { %v989_v40 = vmul.f32 %v9039_v28, %v986_v39 }
 0x407   : > { %1187 = vmatpush.msrb.mxu1 %v1166_v54 }
 0x408   : > { %v992_v41 = vadd.f32 %v9040_v31, %v989_v40 }
 0x409   : > { %1188 = vmatpush.msrb.mxu1 %v1165_v57 }
 0x40a   : > { %1013 = vmatpush.msrb.mxu3 %v992_v41  ;;  %8522 = vmatmul.msk.f32.vlgmr.msra.gmra.mxu1 %vm460_vm1, %v992_v41 }
 0x40b   : > { %1098 = vmatpush.msra.mxu2 %v992_v41  ;;  %1156 = vmatpush.msra.mxu0 %v992_v41 }
 0x40c   : > { %8518 = vmatmul.msk.f32.vlgmr.msrb.gmra.mxu3 %vm522_vm10, %v9707_v9  ;;  %8524 = vmatmul.msk.f32.vlgmr.msra.gmra.mxu2 %vm522_vm10, %v9719_v14 }
 0x40d   : > { %1213 = vmatpush.msrb.mxu2 %v993_v36  ;;  %1128 = vmatpush.msra.mxu3 %v1109_v43 }
 0x40e   : > { %1189 = vmatpush.msrb.mxu1 %v1164_v58 }
 0x40f   : > { %1214 = vmatpush.msrb.mxu2 %v992_v41  ;;  %1129 = vmatpush.msra.mxu3 %v1108_v44 }
 0x410   : > { %1302 = vmatpush.msra.mxu1 %v1283_v62 }
 0x411   : > { %1329 = vmatpush.msra.mxu2 %v993_v36  ;;  %1130 = vmatpush.msra.mxu3 %v1107_v46  ;;  %v9041_v46 = vld [vmem:[%s13019_s5 + $0x99] ss:$0 sm:$0xff] }
 0x412   : > { %8523 = vmatmul.msk.f32.gmra.mxu1 %vm460_vm1, %v993_v36 }
 0x413   : > { %1330 = vmatpush.msra.mxu2 %v992_v41  ;;  %1131 = vmatpush.msra.mxu3 %v1106_v47 }
 0x414   : > { %8519 = vmatmul.msk.f32.gmra.mxu3 %vm522_vm10, %v9712_v11  ;;  %8525 = vmatmul.msk.f32.gmra.mxu2 %vm522_vm10, %v9727_v17 }
 0x415   : > { %1244 = vmatpush.msrb.mxu3 %v1225_v51  ;;  %1303 = vmatpush.msra.mxu1 %v1282_v0 }
 0x417   : > { %1245 = vmatpush.msrb.mxu3 %v1224_v52  ;;  %1304 = vmatpush.msra.mxu1 %v1281_v3 }
 0x419   : > { %1246 = vmatpush.msrb.mxu3 %v1223_v16  ;;  %1305 = vmatpush.msra.mxu1 %v1280_v5  ;;  %v1435_v5 = vld [vmem:[%s13019_s5 + $0x2d0] sm:$0xff] }
 0x41b   : > { %1247 = vmatpush.msrb.mxu3 %v1222_v56 }
 0x41c   : > { %8532 = vmatmul.msk.f32.vlgmr.msrb.gmra.mxu2 %vm522_vm10, %v9744_v22 }
 0x424   : > { %8533 = vmatmul.msk.f32.gmra.mxu2 %vm522_vm10, %v9752_v25 }
 0x42c   : > { %8540 = vmatmul.msk.f32.vlgmr.msra.gmra.mxu2 %vm522_vm10, %v9758_v26 }
 0x434   : > { %8541 = vmatmul.msk.f32.gmra.mxu2 %vm522_vm10, %v9762_v27 }
 0x487   : > { %v1077_v28 = vpop.f32.mrf.mxu1 }
 0x48f   : > { %v1015_v48 = vpop.f32.mrf.mxu3  ;;  %v1100_v49 = vpop.f32.mrf.mxu2 }
 0x490   : > { %8520 = vmatmul.msk.f32.vlgmr.msrb.gmra.mxu0 %vm460_vm1, %v1015_v48  ;;  %8526 = vmatmul.msk.f32.vlgmr.msra.gmra.mxu3 %vm460_vm1, %v1100_v49  ;;  %v1080_v30 = vpop.f32.mrf.mxu1 }
 0x491   : > { %1271 = vmatpush.msrb.mxu0 %v993_v36  ;;  %1360 = vmatpush.msra.mxu3 %v1341_v60 }
 0x493   : > { %1272 = vmatpush.msrb.mxu0 %v992_v41  ;;  %1361 = vmatpush.msra.mxu3 %v1340_v61 }
 0x495   : > { %1362 = vmatpush.msra.mxu3 %v1339_v63 }
 0x497   : > { %v1018_v50 = vpop.f32.mrf.mxu3  ;;  %v1103_v12 = vpop.f32.mrf.mxu2  ;;  %1363 = vmatpush.msra.mxu3 %v1338_v2 }
 0x498   : > { %8521 = vmatmul.msk.f32.gmra.mxu0 %vm460_vm1, %v1018_v50  ;;  %8527 = vmatmul.msk.f32.gmra.mxu3 %vm460_vm1, %v1103_v12 }
 0x49f   : > { %v1216_v55 = vpop.f32.mrf.mxu2 }
 0x4a0   : > { %8528 = vmatmul.msk.f32.vlgmr.msra.gmra.mxu0 %vm522_vm10, %v9717_v13  ;;  %8534 = vmatmul.msk.f32.vlgmr.msrb.gmra.mxu3 %vm460_vm1, %v1216_v55 }
 0x4a7   : > { %v1219_v59 = vpop.f32.mrf.mxu2 }
 0x4a8   : > { %8529 = vmatmul.msk.f32.gmra.mxu0 %vm522_vm10, %v9725_v15  ;;  %8535 = vmatmul.msk.f32.gmra.mxu3 %vm460_vm1, %v1219_v59 }
 0x4af   : > { %v1332_v1 = vpop.f32.mrf.mxu2 }
 0x4b0   : > { %8536 = vmatmul.msk.f32.vlgmr.msrb.gmra.mxu0 %vm522_vm10, %v9742_v21  ;;  %8542 = vmatmul.msk.f32.vlgmr.msra.gmra.mxu3 %vm460_vm1, %v1332_v1 }
 0x4b7   : > { %v1335_v6 = vpop.f32.mrf.mxu2 }
 0x4b8   : > { %8537 = vmatmul.msk.f32.gmra.mxu0 %vm522_vm10, %v9750_v23  ;;  %8543 = vmatmul.msk.f32.gmra.mxu3 %vm460_vm1, %v1335_v6  ;;  %v1434_v6 = vld [vmem:[%s13019_s5 + $0x2c8] sm:$0xff] }
 0x50d   : > { %v1048_v4 = vpop.f32.mrf.mxu0 }
 0x50e   : > { %v1078_v34 = vadd.f32 %v1077_v28, %v1048_v4  ;;  %v1436_v4 = vld [vmem:[%s13019_s5 + $0x2d8] sm:$0xff] }
 0x50f   : > { %1511 = vmatpush.msrb.mxu2 %v1436_v4  ;;  %v1663_v4 = vld [vmem:[%s13019_s5 + $0x2f0] sm:$0xff] }
 0x511   : > { %1512 = vmatpush.msrb.mxu2 %v1435_v5  ;;  %v1662_v5 = vld [vmem:[%s13019_s5 + $0x2e8] sm:$0xff] }
 0x513   : > { %v1133_v20 = vpop.f32.mrf.mxu3  ;;  %1513 = vmatpush.msrb.mxu2 %v1434_v6 }
 0x514   : > { %v1139_v36 = vadd.f32 %v1133_v20, %v1078_v34  ;;  %v1461_v20 = vld [vmem:[%s13019_s5 + $0x268] sm:$0xff] }
 0x515   : > { %v1051_v7 = vpop.f32.mrf.mxu0 }
 0x516   : > { %v1081_v39 = vadd.f32 %v1080_v30, %v1051_v7  ;;  %v1433_v7 = vld [vmem:[%s13019_s5 + $0x2c0] sm:$0xff] }
 0x517   : > { %1514 = vmatpush.msrb.mxu2 %v1433_v7  ;;  %v1661_v7 = vld [vmem:[%s13019_s5 + $0x2e0] sm:$0xff] }
 0x51b   : > { %v1136_v29 = vpop.f32.mrf.mxu3 }
 0x51c   : > { %v1140_v43 = vadd.f32 %v1136_v29, %v1081_v39  ;;  %v1460_v29 = vld [vmem:[%s13019_s5 + $0x260] sm:$0xff] }
 0x51d   : > { %v1158_v8 = vpop.f32.mrf.mxu0 }
 0x51e   : > { %8530 = vmatmul.msk.f32.vlgmr.msrb.gmra.mxu1 %vm460_vm1, %v1158_v8  ;;  %v1463_v8 = vld [vmem:[%s13019_s5 + $0x278] sm:$0xff] }
 0x51f   : > { %1482 = vmatpush.msrb.mxu1 %v1463_v8  ;;  %v1722_v8 = vld [vmem:[%s13019_s5 + $0x318] sm:$0xff] }
 0x523   : > { %v1249_v31 = vpop.f32.mrf.mxu3 }
 0x525   : > { %v1161_v10 = vpop.f32.mrf.mxu0 }
 0x526   : > { %8531 = vmatmul.msk.f32.gmra.mxu1 %vm460_vm1, %v1161_v10 }
 0x52b   : > { %v1252_v33 = vpop.f32.mrf.mxu3 }
 0x52d   : > { %v1274_v18 = vpop.f32.mrf.mxu0 }
 0x52e   : > { %8538 = vmatmul.msk.f32.vlgmr.msra.gmra.mxu1 %vm460_vm1, %v1274_v18  ;;  %v1462_v18 = vld [vmem:[%s13019_s5 + $0x270] sm:$0xff] }
 0x52f   : > { %1483 = vmatpush.msrb.mxu1 %v1462_v18  ;;  %v1720_v18 = vld [vmem:[%s13019_s5 + $0x308] sm:$0xff] }
 0x531   : > { %1484 = vmatpush.msrb.mxu1 %v1461_v20 }
 0x533   : > { %v1365_v38 = vpop.f32.mrf.mxu3  ;;  %1485 = vmatpush.msrb.mxu1 %v1460_v29  ;;  %v1780_v29 = vld [vmem:[%s13019_s5 + $0x338] sm:$0xff] }
 0x535   : > { %v1277_v19 = vpop.f32.mrf.mxu0 }
 0x536   : > { %8539 = vmatmul.msk.f32.gmra.mxu1 %vm460_vm1, %v1277_v19 }
 0x53b   : > { %v1368_v52 = vpop.f32.mrf.mxu3 }
 0x59b   : > { %v1191_v32 = vpop.f32.mrf.mxu1 }
 0x59c   : > { %v1197_v37 = vadd.f32 %v1191_v32, %v1139_v36 }
 0x59e   : > { %v1255_v40 = vadd.f32 %v1249_v31, %v1197_v37 }
 0x5a3   : > { %v1194_v35 = vpop.f32.mrf.mxu1 }
 0x5a4   : > { %v1198_v47 = vadd.f32 %v1194_v35, %v1140_v43 }
 0x5a6   : > { %v1256_v50 = vadd.f32 %v1252_v33, %v1198_v47 }
 0x5ab   : > { %v1307_v41 = vpop.f32.mrf.mxu1 }
 0x5ac   : > { %v1313_v44 = vadd.f32 %v1307_v41, %v1255_v40  ;;  %v9042_v41 = vld [vmem:[%s13019_s5 + $0x8a] ss:$0 sm:$0xff] }
 0x5ae   : > { %v1371_v48 = vadd.f32 %v1365_v38, %v1313_v44 }
 0x5b0   : > { %v1375_v49 = vadd.f32 %v9041_v46, %v1371_v48 }
 0x5b2   : > { %v1377_v12 = vmax.f32 %v1375_v49, 0.0 }
 0x5b3   : > { %v1310_v51 = vpop.f32.mrf.mxu1 }
 0x5b4   : > { %v1314_v53 = vadd.f32 %v1310_v51, %v1256_v50  ;;  %v9994_v16 = vadd.f32 %v1377_v12, %v9850_v45 }
 0x5b6   : > { %v1372_v54 = vadd.f32 %v1368_v52, %v1314_v53  ;;  %v1383_v55 = vsel %vm460_vm1, %v9994_v16, 0.0 }
 0x5b7   : > { %1384 = vadd.xlane.f32.xlu0 %v1383_v55 }
 0x5b8   : > { %v1376_v56 = vadd.f32 %v9041_v46, %v1372_v54  ;;  %v9043_v46 = vld [vmem:[%s13019_s5 + $0x92] ss:$0 sm:$0xff] }
 0x5ba   : > { %v1378_v57 = vmax.f32 %v1376_v56, 0.0  ;;  %v1548_v56 = vld [vmem:[%s13019_s5 + $0x298] sm:$0xff] }
 0x5bc   : > { %v9999_v58 = vadd.f32 %v1378_v57, %v9845_v42  ;;  %v1547_v57 = vld [vmem:[%s13019_s5 + $0x290] sm:$0xff] }
 0x5be   : > { %v1386_v59 = vsel %vm460_vm1, %v9999_v58, 0.0 }
 0x5bf   : > { %1387 = vadd.xlane.f32.xlu2 %v1386_v59  ;;  %v1546_v59 = vld [vmem:[%s13019_s5 + $0x288] sm:$0xff] }
 0x62a   : > { %v1385_v60 = vpop.xlane.xlu0 %1384 }
 0x62b   : > { %v1389_v61 = vmul.f32 %v1385_v60, %v9679_v24  ;;  %v1545_v60 = vld [vmem:[%s13019_s5 + $0x280] sm:$0xff] }
 0x62d   : > { %v1391_v45 = vsub.f32 %v9994_v16, %v1389_v61 }
 0x62f   : > { %v1393_v62 = vmul.f32 %v1391_v45, %v1391_v45 }
 0x631   : > { %v1395_v63 = vsel %vm460_vm1, %v1393_v62, 0.0 }
 0x632   : > { %1396 = vadd.xlane.f32.xlu2 %v1395_v63  ;;  %v1388_v0 = vpop.xlane.xlu2 %1387 }
 0x633   : > { %v1390_v1 = vmul.f32 %v1388_v0, %v9679_v24  ;;  %v1606_v0 = vld [vmem:[%s13019_s5 + $0x2b8] sm:$0xff] }
 0x634   : > { %1625 = vmatpush.msra.mxu2 %v1606_v0 }
 0x635   : > { %v1392_v2 = vsub.f32 %v9999_v58, %v1390_v1  ;;  %v1605_v1 = vld [vmem:[%s13019_s5 + $0x2b0] sm:$0xff] }
 0x636   : > { %1626 = vmatpush.msra.mxu2 %v1605_v1 }
 0x637   : > { %v1394_v42 = vmul.f32 %v1392_v2, %v1392_v2 }
 0x639   : > { %v1398_v3 = vsel %vm460_vm1, %v1394_v42, 0.0  ;;  %v1603_v42 = vld [vmem:[%s13019_s5 + $0x2a0] sm:$0xff] }
 0x63a   : > { %1399 = vadd.xlane.f32.xlu1 %v1398_v3  ;;  %v1664_v3 = vld [vmem:[%s13019_s5 + $0x2f8] sm:$0xff] }
 0x6a5   : > { %v1397_v10 = vpop.xlane.xlu2 %1396 }
 0x6a6   : > { %v1401_v19 = vmul.f32 %v1397_v10, %v9679_v24  ;;  %v1721_v10 = vld [vmem:[%s13019_s5 + $0x310] sm:$0xff] }
 0x6a8   : > { %v1403_v28 = vadd.f32 1e-06, %v1401_v19 }
 0x6aa   : > { %9113 = vrsqrt.f32 %v1403_v28  ;;  %vm1411_vm2 = vweird.f32 %v1403_v28 }
 0x6ad   : > { %v1400_v30 = vpop.xlane.xlu1 %1399 }
 0x6ae   : > { %v1402_v31 = vmul.f32 %v1400_v30, %v9679_v24  ;;  %v1779_v30 = vld [vmem:[%s13019_s5 + $0x330] sm:$0xff] }
 0x6b0   : > { %v9114_v32 = vpop.eup %9113  ;;  %v1404_v33 = vadd.f32 1e-06, %v1402_v31  ;;  %v1778_v31 = vld [vmem:[%s13019_s5 + $0x328] sm:$0xff] }
 0x6b1   : > { %v1406_v34 = vmul.f32 %v9114_v32, %v1403_v28  ;;  %vm1412_vm15 = vweird.f32 %v9114_v32  ;;  %v1719_v28 = vld [vmem:[%s13019_s5 + $0x300] sm:$0xff] }
 0x6b2   : > { %9115 = vrsqrt.f32 %v1404_v33  ;;  %vm1413_vm3 = vmor %vm1411_vm2, %vm1412_vm15  ;;  %vm1421_vm5 = vweird.f32 %v1404_v33 }
 0x6b3   : > { %v1407_v35 = vmul.f32 %v9114_v32, %v1406_v34  ;;  %v1777_v34 = vld [vmem:[%s13019_s5 + $0x320] sm:$0xff] }
 0x6b5   : > { %v1408_v36 = vmul.f32 0.5, %v1407_v35 }
 0x6b7   : > { %v1409_v37 = vsub.f32 1.5, %v1408_v36 }
 0x6b8   : > { %v9116_v38 = vpop.eup %9115 }
 0x6b9   : > { %v1410_v39 = vmul.f32 %v9114_v32, %v1409_v37  ;;  %v1416_v40 = vmul.f32 %v9116_v38, %v1404_v33  ;;  %vm1422_vm4 = vweird.f32 %v9116_v38 }
 0x6ba   : > { %vm1423_vm6 = vmor %vm1421_vm5, %vm1422_vm4 }
 0x6bb   : > { %v1414_v43 = vsel %vm1413_vm3, %v9114_v32, %v1410_v39  ;;  %v1417_v44 = vmul.f32 %v9116_v38, %v1416_v40 }
 0x6bc   : > { %v1425_v47 = vmul.f32 %v1414_v43, %v1391_v45 }
 0x6bd   : > { %v1418_v48 = vmul.f32 0.5, %v1417_v44 }
 0x6be   : > { %v1428_v49 = vmul.f32 %v9042_v41, %v1425_v47 }
 0x6bf   : > { %v1419_v50 = vsub.f32 1.5, %v1418_v48 }
 0x6c0   : > { %v1431_v12 = vadd.f32 %v9043_v46, %v1428_v49 }
 0x6c1   : > { %v1420_v51 = vmul.f32 %v9116_v38, %v1419_v50 }
 0x6c2   : > { %8548 = vmatmul.msk.f32.vlgmr.msrb.gmra.mxu2 %vm460_vm1, %v1431_v12 }
 0x6c3   : > { %v1424_v52 = vsel %vm1423_vm6, %v9116_v38, %v1420_v51  ;;  %vm3079_vm6 = vcmask 392192  }
 0x6c4   : > { %v1426_v53 = vmul.f32 %v1424_v52, %v1392_v2  ;;  %v1604_v2 = vld [vmem:[%s13019_s5 + $0x2a8] sm:$0xff] }
 0x6c5   : > { %1627 = vmatpush.msra.mxu2 %v1604_v2 }
 0x6c6   : > { %v1429_v54 = vmul.f32 %v9042_v41, %v1426_v53 }
 0x6c7   : > { %1628 = vmatpush.msra.mxu2 %v1603_v42 }
 0x6c8   : > { %v1432_v55 = vadd.f32 %v9043_v46, %v1429_v54 }
 0x6c9   : > { %1741 = vmatpush.msrb.mxu2 %v1722_v8 }
 0x6ca   : > { %1451 = vmatpush.msra.mxu0 %v1432_v55  ;;  %8549 = vmatmul.msk.f32.gmra.mxu2 %vm460_vm1, %v1432_v55 }
 0x6cb   : > { %1536 = vmatpush.msrb.mxu3 %v1432_v55  ;;  %1594 = vmatpush.msra.mxu1 %v1432_v55 }
 0x6cc   : > { %1452 = vmatpush.msra.mxu0 %v1431_v12  ;;  %1742 = vmatpush.msrb.mxu2 %v1721_v10 }
 0x6cd   : > { %1537 = vmatpush.msrb.mxu3 %v1431_v12  ;;  %1595 = vmatpush.msra.mxu1 %v1431_v12 }
 0x6ce   : > { %8544 = vmatmul.msk.f32.vlgmr.msra.gmra.mxu0 %vm522_vm10, %v9707_v9  ;;  %8550 = vmatmul.msk.f32.vlgmr.msrb.gmra.mxu3 %vm522_vm10, %v9719_v14 }
 0x6cf   : > { %1652 = vmatpush.msra.mxu3 %v1432_v55  ;;  %1567 = vmatpush.msrb.mxu0 %v1548_v56 }
 0x6d0   : > { %1743 = vmatpush.msrb.mxu2 %v1720_v18 }
 0x6d1   : > { %1653 = vmatpush.msra.mxu3 %v1431_v12  ;;  %1568 = vmatpush.msrb.mxu0 %v1547_v57 }
 0x6d2   : > { %1744 = vmatpush.msrb.mxu2 %v1719_v28 }
 0x6d3   : > { %1768 = vmatpush.msrb.mxu3 %v1432_v55  ;;  %1569 = vmatpush.msrb.mxu0 %v1546_v59  ;;  %v9044_v59 = vld [vmem:[%s13019_s5 + $0x9a] ss:$0 sm:$0xff] }
 0x6d5   : > { %1769 = vmatpush.msrb.mxu3 %v1431_v12  ;;  %1570 = vmatpush.msrb.mxu0 %v1545_v60 }
 0x6d6   : > { %8545 = vmatmul.msk.f32.gmra.mxu0 %vm522_vm10, %v9712_v11  ;;  %8551 = vmatmul.msk.f32.gmra.mxu3 %vm522_vm10, %v9727_v17 }
 0x6d7   : > { %1683 = vmatpush.msra.mxu0 %v1664_v3 }
 0x6d9   : > { %1684 = vmatpush.msra.mxu0 %v1663_v4 }
 0x6db   : > { %1685 = vmatpush.msra.mxu0 %v1662_v5 }
 0x6dd   : > { %1686 = vmatpush.msra.mxu0 %v1661_v7 }
 0x6de   : > { %8558 = vmatmul.msk.f32.vlgmr.msra.gmra.mxu3 %vm522_vm10, %v9744_v22 }
 0x6e6   : > { %8559 = vmatmul.msk.f32.gmra.mxu3 %vm522_vm10, %v9752_v25 }
 0x6ee   : > { %8566 = vmatmul.msk.f32.vlgmr.msrb.gmra.mxu3 %vm522_vm10, %v9758_v26 }
 0x6f6   : > { %8567 = vmatmul.msk.f32.gmra.mxu3 %vm522_vm10, %v9762_v27 }
 0x745   : > { %v1516_v41 = vpop.f32.mrf.mxu2 }
 0x74b   : > { %v1454_v61 = vpop.f32.mrf.mxu0 }
 0x74c   : > { %8546 = vmatmul.msk.f32.vlgmr.msrb.gmra.mxu1 %vm460_vm1, %v1454_v61 }
 0x74d   : > { %1710 = vmatpush.msrb.mxu1 %v1432_v55  ;;  %v1519_v44 = vpop.f32.mrf.mxu2 }
 0x74f   : > { %1711 = vmatpush.msrb.mxu1 %v1431_v12 }
 0x751   : > { %v1539_v45 = vpop.f32.mrf.mxu3 }
 0x752   : > { %8552 = vmatmul.msk.f32.vlgmr.msrb.gmra.mxu0 %vm460_vm1, %v1539_v45 }
 0x753   : > { %v1457_v62 = vpop.f32.mrf.mxu0  ;;  %1799 = vmatpush.msrb.mxu0 %v1780_v29 }
 0x754   : > { %8547 = vmatmul.msk.f32.gmra.mxu1 %vm460_vm1, %v1457_v62 }
 0x755   : > { %1800 = vmatpush.msrb.mxu0 %v1779_v30 }
 0x757   : > { %1801 = vmatpush.msrb.mxu0 %v1778_v31 }
 0x759   : > { %v1542_v63 = vpop.f32.mrf.mxu3  ;;  %1802 = vmatpush.msrb.mxu0 %v1777_v34  ;;  %v1873_v34 = vld [vmem:[%s13019_s5 + $0x3a8] sm:$0xff] }
 0x75a   : > { %8553 = vmatmul.msk.f32.gmra.mxu0 %vm460_vm1, %v1542_v63 }
 0x75c   : > { %8554 = vmatmul.msk.f32.vlgmr.msra.gmra.mxu1 %vm522_vm10, %v9717_v13 }
 0x761   : > { %v1655_v6 = vpop.f32.mrf.mxu3 }
 0x762   : > { %8560 = vmatmul.msk.f32.vlgmr.msra.gmra.mxu0 %vm460_vm1, %v1655_v6 }
 0x764   : > { %8555 = vmatmul.msk.f32.gmra.mxu1 %vm522_vm10, %v9725_v15 }
 0x769   : > { %v1658_v20 = vpop.f32.mrf.mxu3 }
 0x76a   : > { %8561 = vmatmul.msk.f32.gmra.mxu0 %vm460_vm1, %v1658_v20 }
 0x76c   : > { %8562 = vmatmul.msk.f32.vlgmr.msrb.gmra.mxu1 %vm522_vm10, %v9742_v21 }
 0x771   : > { %v1771_v33 = vpop.f32.mrf.mxu3 }
 0x772   : > { %8568 = vmatmul.msk.f32.vlgmr.msrb.gmra.mxu0 %vm460_vm1, %v1771_v33  ;;  %v1874_v33 = vld [vmem:[%s13019_s5 + $0x3b0] sm:$0xff] }
 0x774   : > { %8563 = vmatmul.msk.f32.gmra.mxu1 %vm522_vm10, %v9750_v23 }
 0x779   : > { %v1774_v36 = vpop.f32.mrf.mxu3 }
 0x77a   : > { %8569 = vmatmul.msk.f32.gmra.mxu0 %vm460_vm1, %v1774_v36  ;;  %v1902_v36 = vld [vmem:[%s13019_s5 + $0x358] sm:$0xff] }
 0x7c9   : > { %v1487_v19 = vpop.f32.mrf.mxu1 }
 0x7ca   : > { %v1517_v49 = vadd.f32 %v1516_v41, %v1487_v19 }
 0x7cf   : > { %v1572_v40 = vpop.f32.mrf.mxu0 }
 0x7d0   : > { %v1578_v12 = vadd.f32 %v1572_v40, %v1517_v49  ;;  %v1900_v40 = vld [vmem:[%s13019_s5 + $0x348] sm:$0xff] }
 0x7d1   : > { %v1490_v32 = vpop.f32.mrf.mxu1 }
 0x7d2   : > { %v1520_v53 = vadd.f32 %v1519_v44, %v1490_v32  ;;  %v1875_v32 = vld [vmem:[%s13019_s5 + $0x3b8] sm:$0xff] }
 0x7d3   : > { %1950 = vmatpush.msra.mxu3 %v1875_v32  ;;  %v2159_v32 = vld [vmem:[%s13019_s5 + $0x3e8] sm:$0xff] }
 0x7d5   : > { %1951 = vmatpush.msra.mxu3 %v1874_v33 }
 0x7d7   : > { %v1575_v43 = vpop.f32.mrf.mxu0  ;;  %1952 = vmatpush.msra.mxu3 %v1873_v34 }
 0x7d8   : > { %v1579_v56 = vadd.f32 %v1575_v43, %v1520_v53  ;;  %v1899_v43 = vld [vmem:[%s13019_s5 + $0x340] sm:$0xff] }
 0x7d9   : > { %v1597_v35 = vpop.f32.mrf.mxu1 }
 0x7da   : > { %8556 = vmatmul.msk.f32.vlgmr.msra.gmra.mxu2 %vm460_vm1, %v1597_v35  ;;  %v1872_v35 = vld [vmem:[%s13019_s5 + $0x3a0] sm:$0xff] }
 0x7db   : > { %1953 = vmatpush.msra.mxu3 %v1872_v35  ;;  %1921 = vmatpush.msra.mxu2 %v1902_v36  ;;  %v2158_v35 = vld [vmem:[%s13019_s5 + $0x3e0] sm:$0xff]  ;;  %v2219_v36 = vld [vmem:[%s13019_s5 + $0x418] sm:$0xff] }
 0x7df   : > { %v1688_v46 = vpop.f32.mrf.mxu0 }
 0x7e1   : > { %v1600_v37 = vpop.f32.mrf.mxu1 }
 0x7e2   : > { %8557 = vmatmul.msk.f32.gmra.mxu2 %vm460_vm1, %v1600_v37 }
 0x7e7   : > { %v1691_v48 = vpop.f32.mrf.mxu0 }
 0x7e9   : > { %v1713_v38 = vpop.f32.mrf.mxu1 }
 0x7ea   : > { %8564 = vmatmul.msk.f32.vlgmr.msrb.gmra.mxu2 %vm460_vm1, %v1713_v38  ;;  %v1901_v38 = vld [vmem:[%s13019_s5 + $0x350] sm:$0xff] }
 0x7eb   : > { %1922 = vmatpush.msra.mxu2 %v1901_v38  ;;  %v2217_v38 = vld [vmem:[%s13019_s5 + $0x408] sm:$0xff] }
 0x7ed   : > { %1923 = vmatpush.msra.mxu2 %v1900_v40 }
 0x7ef   : > { %v1804_v52 = vpop.f32.mrf.mxu0  ;;  %1924 = vmatpush.msra.mxu2 %v1899_v43 }
 0x7f1   : > { %v1716_v39 = vpop.f32.mrf.mxu1 }
 0x7f2   : > { %8565 = vmatmul.msk.f32.gmra.mxu2 %vm460_vm1, %v1716_v39 }
 0x7f7   : > { %v1807_v1 = vpop.f32.mrf.mxu0 }
 0x85d   : > { %v1630_v47 = vpop.f32.mrf.mxu2 }
 0x85e   : > { %v1636_v51 = vadd.f32 %v1630_v47, %v1578_v12 }
 0x860   : > { %v1694_v54 = vadd.f32 %v1688_v46, %v1636_v51 }
 0x865   : > { %v1633_v50 = vpop.f32.mrf.mxu2 }
 0x866   : > { %v1637_v60 = vadd.f32 %v1633_v50, %v1579_v56 }
 0x868   : > { %v1695_v62 = vadd.f32 %v1691_v48, %v1637_v60 }
 0x86d   : > { %v1746_v55 = vpop.f32.mrf.mxu2 }
 0x86e   : > { %v1752_v57 = vadd.f32 %v1746_v55, %v1694_v54  ;;  %v9045_v55 = vld [vmem:[%s13019_s5 + $0x8b] ss:$0 sm:$0xff] }
 0x870   : > { %v1810_v61 = vadd.f32 %v1804_v52, %v1752_v57 }
 0x872   : > { %v1814_v45 = vadd.f32 %v9044_v59, %v1810_v61 }
 0x874   : > { %v1816_v63 = vmax.f32 %v1814_v45, 0.0 }
 0x875   : > { %v1749_v0 = vpop.f32.mrf.mxu2 }
 0x876   : > { %v1753_v2 = vadd.f32 %v1749_v0, %v1695_v62  ;;  %v10143_v42 = vadd.f32 %v1816_v63, %v9994_v16 }
 0x878   : > { %v1811_v3 = vadd.f32 %v1807_v1, %v1753_v2  ;;  %v1822_v4 = vsel %vm460_vm1, %v10143_v42, 0.0 }
 0x879   : > { %1823 = vadd.xlane.f32.xlu1 %v1822_v4 }
 0x87a   : > { %v1815_v5 = vadd.f32 %v9044_v59, %v1811_v3  ;;  %v9046_v59 = vld [vmem:[%s13019_s5 + $0x93] ss:$0 sm:$0xff] }
 0x87c   : > { %v1817_v6 = vmax.f32 %v1815_v5, 0.0  ;;  %v1987_v5 = vld [vmem:[%s13019_s5 + $0x378] sm:$0xff] }
 0x87e   : > { %v10148_v7 = vadd.f32 %v1817_v6, %v9999_v58 }
 0x880   : > { %v1825_v8 = vsel %vm460_vm1, %v10148_v7, 0.0 }
 0x881   : > { %1826 = vadd.xlane.f32.xlu0 %v1825_v8 }
 0x8ec   : > { %v1824_v10 = vpop.xlane.xlu1 %1823 }
 0x8ed   : > { %v1828_v18 = vmul.f32 %v1824_v10, %v9679_v24 }
 0x8ef   : > { %v1830_v16 = vsub.f32 %v10143_v42, %v1828_v18  ;;  %v2045_v18 = vld [vmem:[%s13019_s5 + $0x398] sm:$0xff] }
 0x8f0   : > { %2064 = vmatpush.msrb.mxu3 %v2045_v18 }
 0x8f1   : > { %v1832_v19 = vmul.f32 %v1830_v16, %v1830_v16 }
 0x8f3   : > { %v1834_v20 = vsel %vm460_vm1, %v1832_v19, 0.0  ;;  %v2043_v19 = vld [vmem:[%s13019_s5 + $0x388] sm:$0xff] }
 0x8f4   : > { %1835 = vadd.xlane.f32.xlu0 %v1834_v20  ;;  %v1827_v28 = vpop.xlane.xlu0 %1826  ;;  %v2102_v20 = vld [vmem:[%s13019_s5 + $0x3d0] sm:$0xff] }
 0x8f5   : > { %v1829_v29 = vmul.f32 %v1827_v28, %v9679_v24  ;;  %v2101_v28 = vld [vmem:[%s13019_s5 + $0x3c8] sm:$0xff] }
 0x8f7   : > { %v1831_v30 = vsub.f32 %v10148_v7, %v1829_v29 }
 0x8f9   : > { %v1833_v58 = vmul.f32 %v1831_v30, %v1831_v30 }
 0x8fb   : > { %v1837_v31 = vsel %vm460_vm1, %v1833_v58, 0.0  ;;  %v2161_v58 = vld [vmem:[%s13019_s5 + $0x3f8] sm:$0xff] }
 0x8fc   : > { %1838 = vadd.xlane.f32.xlu2 %v1837_v31  ;;  %v2160_v31 = vld [vmem:[%s13019_s5 + $0x3f0] sm:$0xff] }
 0x967   : > { %v1836_v37 = vpop.xlane.xlu0 %1835 }
 0x968   : > { %v1840_v39 = vmul.f32 %v1836_v37, %v9679_v24  ;;  %v2218_v37 = vld [vmem:[%s13019_s5 + $0x410] sm:$0xff] }
 0x96a   : > { %v1842_v41 = vadd.f32 1e-06, %v1840_v39 }
 0x96c   : > { %9117 = vrsqrt.f32 %v1842_v41  ;;  %vm1850_vm8 = vweird.f32 %v1842_v41 }
 0x96f   : > { %v1839_v44 = vpop.xlane.xlu2 %1838 }
 0x970   : > { %v1841_v46 = vmul.f32 %v1839_v44, %v9679_v24 }
 0x972   : > { %v9118_v47 = vpop.eup %9117  ;;  %v1843_v48 = vadd.f32 1e-06, %v1841_v46 }
 0x973   : > { %v1845_v49 = vmul.f32 %v9118_v47, %v1842_v41  ;;  %vm1851_vm7 = vweird.f32 %v9118_v47  ;;  %v2216_v41 = vld [vmem:[%s13019_s5 + $0x400] sm:$0xff] }
 0x974   : > { %9119 = vrsqrt.f32 %v1843_v48  ;;  %vm1852_vm9 = vmor %vm1850_vm8, %vm1851_vm7  ;;  %vm1860_vm12 = vweird.f32 %v1843_v48  ;;  %vm3289_vm7 = vcmask 1045504   ;;  %vm3243_vm8 = vcmask 1043456  }
 0x975   : > { %v1846_v50 = vmul.f32 %v9118_v47, %v1845_v49 }
 0x977   : > { %v1847_v12 = vmul.f32 0.5, %v1846_v50 }
 0x979   : > { %v1848_v51 = vsub.f32 1.5, %v1847_v12 }
 0x97a   : > { %v9120_v52 = vpop.eup %9119 }
 0x97b   : > { %v1849_v53 = vmul.f32 %v9118_v47, %v1848_v51  ;;  %v1855_v54 = vmul.f32 %v9120_v52, %v1843_v48  ;;  %vm1861_vm11 = vweird.f32 %v9120_v52 }
 0x97c   : > { %vm1862_vm13 = vmor %vm1860_vm12, %vm1861_vm11 }
 0x97d   : > { %v1853_v56 = vsel %vm1852_vm9, %v9118_v47, %v1849_v53  ;;  %v1856_v57 = vmul.f32 %v9120_v52, %v1855_v54 }
 0x97e   : > { %v1864_v60 = vmul.f32 %v1853_v56, %v1830_v16  ;;  %v2044_v16 = vld [vmem:[%s13019_s5 + $0x390] sm:$0xff] }
 0x97f   : > { %v1857_v61 = vmul.f32 0.5, %v1856_v57  ;;  %2065 = vmatpush.msrb.mxu3 %v2044_v16 }
 0x980   : > { %v1867_v45 = vmul.f32 %v9045_v55, %v1864_v60 }
 0x981   : > { %v1858_v62 = vsub.f32 1.5, %v1857_v61  ;;  %2066 = vmatpush.msrb.mxu3 %v2043_v19 }
 0x982   : > { %v1870_v63 = vadd.f32 %v9046_v59, %v1867_v45 }
 0x983   : > { %v1859_v0 = vmul.f32 %v9120_v52, %v1858_v62 }
 0x984   : > { %8574 = vmatmul.msk.f32.vlgmr.msra.gmra.mxu3 %vm460_vm1, %v1870_v63 }
 0x985   : > { %v1863_v1 = vsel %vm1862_vm13, %v9120_v52, %v1859_v0 }
 0x986   : > { %v1865_v2 = vmul.f32 %v1863_v1, %v1831_v30  ;;  %v2100_v30 = vld [vmem:[%s13019_s5 + $0x3c0] sm:$0xff]  ;;  %v9047_v1 = vld [vmem:[%s13019_s5 + $0x9b] ss:$0 sm:$0xff] }
 0x988   : > { %v1868_v3 = vmul.f32 %v9045_v55, %v1865_v2 }
 0x98a   : > { %v1871_v4 = vadd.f32 %v9046_v59, %v1868_v3 }
 0x98c   : > { %1890 = vmatpush.msra.mxu1 %v1871_v4  ;;  %8575 = vmatmul.msk.f32.gmra.mxu3 %vm460_vm1, %v1871_v4 }
 0x98d   : > { %1975 = vmatpush.msra.mxu0 %v1871_v4  ;;  %2033 = vmatpush.msrb.mxu2 %v1871_v4 }
 0x98e   : > { %1891 = vmatpush.msra.mxu1 %v1870_v63 }
 0x98f   : > { %1976 = vmatpush.msra.mxu0 %v1870_v63  ;;  %2034 = vmatpush.msrb.mxu2 %v1870_v63 }
 0x990   : > { %8570 = vmatmul.msk.f32.vlgmr.msra.gmra.mxu1 %vm522_vm10, %v9707_v9  ;;  %8576 = vmatmul.msk.f32.vlgmr.msra.gmra.mxu0 %vm522_vm10, %v9719_v14 }
 0x991   : > { %2091 = vmatpush.msrb.mxu0 %v1871_v4  ;;  %2006 = vmatpush.msrb.mxu1 %v1987_v5 }
 0x993   : > { %2092 = vmatpush.msrb.mxu0 %v1870_v63 }
 0x995   : > { %2207 = vmatpush.msra.mxu0 %v1871_v4 }
 0x997   : > { %2208 = vmatpush.msra.mxu0 %v1870_v63 }
 0x998   : > { %8571 = vmatmul.msk.f32.gmra.mxu1 %vm522_vm10, %v9712_v11  ;;  %8577 = vmatmul.msk.f32.gmra.mxu0 %vm522_vm10, %v9727_v17  ;;  %v1986_v11 = vld [vmem:[%s13019_s5 + $0x370] sm:$0xff]  ;;  %v1985_v17 = vld [vmem:[%s13019_s5 + $0x368] sm:$0xff] }
 0x999   : > { %2007 = vmatpush.msrb.mxu1 %v1986_v11 }
 0x99b   : > { %2008 = vmatpush.msrb.mxu1 %v1985_v17 }
 0x9a0   : > { %8584 = vmatmul.msk.f32.vlgmr.msrb.gmra.mxu0 %vm522_vm10, %v9744_v22 }
 0x9a8   : > { %8585 = vmatmul.msk.f32.gmra.mxu0 %vm522_vm10, %v9752_v25  ;;  %v1984_v25 = vld [vmem:[%s13019_s5 + $0x360] sm:$0xff] }
 0x9a9   : > { %2009 = vmatpush.msrb.mxu1 %v1984_v25 }
 0x9b0   : > { %8592 = vmatmul.msk.f32.vlgmr.msra.gmra.mxu0 %vm522_vm10, %v9758_v26 }
 0x9b8   : > { %8593 = vmatmul.msk.f32.gmra.mxu0 %vm522_vm10, %v9762_v27 }
 0xa07   : > { %v1955_v50 = vpop.f32.mrf.mxu3 }
 0xa0d   : > { %v1893_v27 = vpop.f32.mrf.mxu1  ;;  %v1978_v6 = vpop.f32.mrf.mxu0 }
 0xa0e   : > { %8572 = vmatmul.msk.f32.vlgmr.msra.gmra.mxu2 %vm460_vm1, %v1893_v27  ;;  %8578 = vmatmul.msk.f32.vlgmr.msrb.gmra.mxu1 %vm460_vm1, %v1978_v6 }
 0xa0f   : > { %2149 = vmatpush.msra.mxu2 %v1871_v4  ;;  %v1958_v51 = vpop.f32.mrf.mxu3 }
 0xa11   : > { %2150 = vmatpush.msra.mxu2 %v1870_v63 }
 0xa15   : > { %v1896_v8 = vpop.f32.mrf.mxu1  ;;  %v1981_v10 = vpop.f32.mrf.mxu0 }
 0xa16   : > { %8573 = vmatmul.msk.f32.gmra.mxu2 %vm460_vm1, %v1896_v8  ;;  %8579 = vmatmul.msk.f32.gmra.mxu1 %vm460_vm1, %v1981_v10 }
 0xa1d   : > { %v2094_v29 = vpop.f32.mrf.mxu0 }
 0xa1e   : > { %8580 = vmatmul.msk.f32.vlgmr.msrb.gmra.mxu2 %vm522_vm10, %v9717_v13 }
 0xa25   : > { %v2097_v34 = vpop.f32.mrf.mxu0 }
 0xa26   : > { %8581 = vmatmul.msk.f32.gmra.mxu2 %vm522_vm10, %v9725_v15  ;;  %v2042_v15 = vld [vmem:[%s13019_s5 + $0x380] sm:$0xff] }
 0xa27   : > { %2067 = vmatpush.msrb.mxu3 %v2042_v15 }
 0xa29   : > { %2180 = vmatpush.msra.mxu3 %v2161_v58 }
 0xa2b   : > { %2181 = vmatpush.msra.mxu3 %v2160_v31 }
 0xa2d   : > { %2182 = vmatpush.msra.mxu3 %v2159_v32  ;;  %v2210_v40 = vpop.f32.mrf.mxu0 }
 0xa2e   : > { %8588 = vmatmul.msk.f32.vlgmr.msra.gmra.mxu2 %vm522_vm10, %v9742_v21 }
 0xa2f   : > { %2183 = vmatpush.msra.mxu3 %v2158_v35  ;;  %v2353_v35 = vld [vmem:[%s13019_s5 + $0x4e0] sm:$0xff] }
 0xa30   : > { %2393 = vmatpush.msrb.mxu0 %v2353_v35 }
 0xa35   : > { %v2213_v44 = vpop.f32.mrf.mxu0 }
 0xa36   : > { %8589 = vmatmul.msk.f32.gmra.mxu2 %vm522_vm10, %v9750_v23  ;;  %v2103_v23 = vld [vmem:[%s13019_s5 + $0x3d8] sm:$0xff] }
 0xa37   : > { %2122 = vmatpush.msra.mxu1 %v2103_v23 }
 0xa39   : > { %2123 = vmatpush.msra.mxu1 %v2102_v20 }
 0xa3b   : > { %2124 = vmatpush.msra.mxu1 %v2101_v28 }
 0xa3d   : > { %2125 = vmatpush.msra.mxu1 %v2100_v30 }
 0xa3e   : > { %8586 = vmatmul.msk.f32.vlgmr.msra.gmra.mxu1 %vm460_vm1, %v2094_v29 }
 0xa3f   : > { %2238 = vmatpush.msrb.mxu1 %v2219_v36  ;;  %v2313_v36 = vld [vmem:[%s13019_s5 + $0x438] sm:$0xff] }
 0xa41   : > { %2239 = vmatpush.msrb.mxu1 %v2218_v37  ;;  %v2348_v37 = vld [vmem:[%s13019_s5 + $0x458] sm:$0xff] }
 0xa43   : > { %2240 = vmatpush.msrb.mxu1 %v2217_v38  ;;  %v2352_v38 = vld [vmem:[%s13019_s5 + $0x4d8] sm:$0xff] }
 0xa44   : > { %2394 = vmatpush.msrb.mxu0 %v2352_v38 }
 0xa45   : > { %2241 = vmatpush.msrb.mxu1 %v2216_v41  ;;  %v2351_v41 = vld [vmem:[%s13019_s5 + $0x4d0] sm:$0xff] }
 0xa46   : > { %8587 = vmatmul.msk.f32.gmra.mxu1 %vm460_vm1, %v2097_v34  ;;  %v2349_v34 = vld [vmem:[%s13019_s5 + $0x460] sm:$0xff]  ;;  %2395 = vmatpush.msrb.mxu0 %v2351_v41  ;;  %v9051_v41 = vld [vmem:[%s13019_s5 + $0x548] ss:$0 sm:$0xff] }
 0xa4e   : > { %8594 = vmatmul.msk.f32.vlgmr.msrb.gmra.mxu1 %vm460_vm1, %v2210_v40  ;;  %v2347_v40 = vld [vmem:[%s13019_s5 + $0x450] sm:$0xff] }
 0xa56   : > { %8595 = vmatmul.msk.f32.gmra.mxu1 %vm460_vm1, %v2213_v44  ;;  %v2346_v44 = vld [vmem:[%s13019_s5 + $0x448] sm:$0xff] }
 0xa8b   : > { %v2011_v49 = vpop.f32.mrf.mxu1 }
 0xa91   : > { %v1926_v33 = vpop.f32.mrf.mxu2 }
 0xa92   : > { %v1956_v55 = vadd.f32 %v1955_v50, %v1926_v33  ;;  %v2314_v33 = vld [vmem:[%s13019_s5 + $0x440] sm:$0xff] }
 0xa93   : > { %v2014_v12 = vpop.f32.mrf.mxu1  ;;  %2335 = vmatpush.msrb.mxu2 %v2314_v33  ;;  %v2468_v50 = vld [vmem:[%s13019_s5 + $0x480] sm:$0xff]  ;;  %v2780_v33 = vld [vmem:[%s13019_s5 + $0x4a8] sm:$0xff] }
 0xa94   : > { %v2017_v57 = vadd.f32 %v2011_v49, %v1956_v55  ;;  %v2470_v55 = vld [vmem:[%s13019_s5 + $0x4f0] sm:$0xff] }
 0xa95   : > { %2336 = vmatpush.msrb.mxu2 %v2313_v36 }
 0xa99   : > { %v1929_v39 = vpop.f32.mrf.mxu2 }
 0xa9a   : > { %v1959_v60 = vadd.f32 %v1958_v51, %v1929_v39  ;;  %v2312_v39 = vld [vmem:[%s13019_s5 + $0x430] sm:$0xff]  ;;  %v2467_v51 = vld [vmem:[%s13019_s5 + $0x478] sm:$0xff] }
 0xa9b   : > { %2337 = vmatpush.msrb.mxu2 %v2312_v39 }
 0xa9c   : > { %v2018_v63 = vadd.f32 %v2014_v12, %v1959_v60  ;;  %v2472_v12 = vld [vmem:[%s13019_s5 + $0x500] sm:$0xff] }
 0xaa1   : > { %v2036_v43 = vpop.f32.mrf.mxu2 }
 0xaa2   : > { %8582 = vmatmul.msk.f32.vlgmr.msrb.gmra.mxu3 %vm460_vm1, %v2036_v43  ;;  %v2311_v43 = vld [vmem:[%s13019_s5 + $0x428] sm:$0xff] }
 0xaa3   : > { %2369 = vmatpush.msrb.mxu3 %v2349_v34  ;;  %2338 = vmatpush.msrb.mxu2 %v2311_v43 }
 0xaa5   : > { %2370 = vmatpush.msrb.mxu3 %v2348_v37  ;;  %2488 = vmatpush.msra.mxu2 %v2468_v50  ;;  %v9050_v37 = vld [vmem:[%s13019_s5 + $0x54d] ss:$0 sm:$0xff]  ;;  %v2643_v50 = vld [vmem:[%s13019_s5 + $0x520] sm:$0xff] }
 0xaa7   : > { %2371 = vmatpush.msrb.mxu3 %v2347_v40  ;;  %2489 = vmatpush.msra.mxu2 %v2467_v51 }
 0xaa9   : > { %v2039_v46 = vpop.f32.mrf.mxu2  ;;  %2372 = vmatpush.msrb.mxu3 %v2346_v44 }
 0xaaa   : > { %8583 = vmatmul.msk.f32.gmra.mxu3 %vm460_vm1, %v2039_v46  ;;  %v2350_v46 = vld [vmem:[%s13019_s5 + $0x4c8] sm:$0xff] }
 0xaab   : > { %2396 = vmatpush.msrb.mxu0 %v2350_v46 }
 0xab1   : > { %v2152_v47 = vpop.f32.mrf.mxu2 }
 0xab2   : > { %8590 = vmatmul.msk.f32.vlgmr.msra.gmra.mxu3 %vm460_vm1, %v2152_v47 }
 0xab3   : > { %2512 = vmatpush.msra.mxu3 %v2472_v12  ;;  %v2642_v12 = vld [vmem:[%s13019_s5 + $0x518] sm:$0xff] }
 0xab9   : > { %v2155_v48 = vpop.f32.mrf.mxu2 }
 0xaba   : > { %8591 = vmatmul.msk.f32.gmra.mxu3 %vm460_vm1, %v2155_v48 }
 0xabb   : > { %v2127_v52 = vpop.f32.mrf.mxu1 }
 0xac3   : > { %v2130_v54 = vpop.f32.mrf.mxu1 }
 0xacb   : > { %v2243_v61 = vpop.f32.mrf.mxu1 }
 0xad3   : > { %v2246_v25 = vpop.f32.mrf.mxu1 }
 0xb25   : > { %v2069_v53 = vpop.f32.mrf.mxu3 }
 0xb26   : > { %v2075_v59 = vadd.f32 %v2069_v53, %v2017_v57  ;;  %v2465_v57 = vld [vmem:[%s13019_s5 + $0x468] sm:$0xff] }
 0xb28   : > { %v2133_v45 = vadd.f32 %v2127_v52, %v2075_v59  ;;  %v2471_v52 = vld [vmem:[%s13019_s5 + $0x4f8] sm:$0xff]  ;;  %v2469_v59 = vld [vmem:[%s13019_s5 + $0x4e8] sm:$0xff] }
 0xb29   : > { %2513 = vmatpush.msra.mxu3 %v2471_v52 }
 0xb2b   : > { %2514 = vmatpush.msra.mxu3 %v2470_v55  ;;  %v2641_v55 = vld [vmem:[%s13019_s5 + $0x510] sm:$0xff] }
 0xb2d   : > { %v2072_v56 = vpop.f32.mrf.mxu3  ;;  %2515 = vmatpush.msra.mxu3 %v2469_v59  ;;  %v2786_v59 = vld [vmem:[%s13019_s5 + $0x538] sm:$0xff] }
 0xb2e   : > { %v2076_v2 = vadd.f32 %v2072_v56, %v2018_v63 }
 0xb30   : > { %v2134_v5 = vadd.f32 %v2130_v54, %v2076_v2  ;;  %v2466_v54 = vld [vmem:[%s13019_s5 + $0x470] sm:$0xff] }
 0xb31   : > { %2490 = vmatpush.msra.mxu2 %v2466_v54 }
 0xb33   : > { %2491 = vmatpush.msra.mxu2 %v2465_v57  ;;  %v2787_v57 = vld [vmem:[%s13019_s5 + $0x540] sm:$0xff] }
 0xb35   : > { %v2185_v62 = vpop.f32.mrf.mxu3 }
 0xb36   : > { %v2191_v0 = vadd.f32 %v2185_v62, %v2133_v45 }
 0xb38   : > { %v2249_v3 = vadd.f32 %v2243_v61, %v2191_v0 }
 0xb3a   : > { %v2253_v4 = vadd.f32 %v9047_v1, %v2249_v3 }
 0xb3c   : > { %v2255_v11 = vmax.f32 %v2253_v4, 0.0  ;;  %v9048_v4 = vld [vmem:[%s13019_s5 + $0x420] ss:$0 sm:$0xff] }
 0xb3d   : > { %v2188_v17 = vpop.f32.mrf.mxu3 }
 0xb3e   : > { %v2192_v27 = vadd.f32 %v2188_v17, %v2134_v5  ;;  %v10292_v6 = vadd.f32 %v2255_v11, %v10143_v42  ;;  %v9049_v17 = vld [vmem:[%s13019_s5 + $0x421] ss:$0 sm:$0xff] }
 0xb40   : > { %v2250_v8 = vadd.f32 %v2246_v25, %v2192_v27  ;;  %v2261_v10 = vsel %vm460_vm1, %v10292_v6, 0.0 }
 0xb41   : > { %2262 = vadd.xlane.f32.xlu1 %v2261_v10 }
 0xb42   : > { %v2254_v18 = vadd.f32 %v9047_v1, %v2250_v8 }
 0xb44   : > { %v2256_v16 = vmax.f32 %v2254_v18, 0.0 }
 0xb46   : > { %v10297_v19 = vadd.f32 %v2256_v16, %v10148_v7  ;;  %v2639_v16 = vld [vmem:[%s13019_s5 + $0x4a0] sm:$0xff] }
 0xb48   : > { %v2264_v15 = vsel %vm460_vm1, %v10297_v19, 0.0 }
 0xb49   : > { %2265 = vadd.xlane.f32.xlu2 %v2264_v15 }
 0xbb4   : > { %v2263_v23 = vpop.xlane.xlu1 %2262 }
 0xbb5   : > { %v2267_v20 = vmul.f32 %v2263_v23, %v9679_v24  ;;  %v2638_v23 = vld [vmem:[%s13019_s5 + $0x498] sm:$0xff] }
 0xbb7   : > { %v10303_v42 = vsub.f32 %v10292_v6, %v2267_v20 }
 0xbb9   : > { %v2271_v28 = vmul.f32 %v10303_v42, %v10303_v42 }
 0xbbb   : > { %v2273_v29 = vsel %vm460_vm1, %v2271_v28, 0.0  ;;  %v2637_v28 = vld [vmem:[%s13019_s5 + $0x490] sm:$0xff] }
 0xbbc   : > { %2274 = vadd.xlane.f32.xlu0 %v2273_v29  ;;  %v2266_v30 = vpop.xlane.xlu2 %2265 }
 0xbbd   : > { %v2268_v7 = vmul.f32 %v2266_v30, %v9679_v24  ;;  %v2636_v30 = vld [vmem:[%s13019_s5 + $0x488] sm:$0xff] }
 0xbbf   : > { %v10310_v58 = vsub.f32 %v10297_v19, %v2268_v7 }
 0xbc1   : > { %v2272_v31 = vmul.f32 %v10310_v58, %v10310_v58 }
 0xbc3   : > { %v2276_v32 = vsel %vm460_vm1, %v2272_v31, 0.0  ;;  %v2782_v31 = vld [vmem:[%s13019_s5 + $0x4b8] sm:$0xff] }
 0xbc4   : > { %2277 = vadd.xlane.f32.xlu1 %v2276_v32  ;;  %v2781_v32 = vld [vmem:[%s13019_s5 + $0x4b0] sm:$0xff] }
 0xc2f   : > { %v2275_v47 = vpop.xlane.xlu0 %2274 }
 0xc30   : > { %v2279_v48 = vmul.f32 %v2275_v47, %v9679_v24  ;;  %v9052_v47 = vld [vmem:[%s13019_s5 + $0x549] ss:$0 sm:$0xff] }
 0xc32   : > { %v2281_v49 = vadd.f32 1e-06, %v2279_v48 }
 0xc34   : > { %9121 = vrsqrt.f32 %v2281_v49  ;;  %vm2289_vm15 = vweird.f32 %v2281_v49 }
 0xc37   : > { %v2278_v53 = vpop.xlane.xlu1 %2277 }
 0xc38   : > { %v2280_v56 = vmul.f32 %v2278_v53, %v9679_v24 }
 0xc3a   : > { %v9122_v60 = vpop.eup %9121  ;;  %v2282_v61 = vadd.f32 1e-06, %v2280_v56  ;;  %v2640_v56 = vld [vmem:[%s13019_s5 + $0x508] sm:$0xff] }
 0xc3b   : > { %v2284_v45 = vmul.f32 %v9122_v60, %v2281_v49  ;;  %vm2290_vm14 = vweird.f32 %v9122_v60  ;;  %v9053_v49 = vld [vmem:[%s13019_s5 + $0x54a] ss:$0 sm:$0xff] }
 0xc3c   : > { %9123 = vrsqrt.f32 %v2282_v61  ;;  %vm2291_vm2 = vmor %vm2289_vm15, %vm2290_vm14  ;;  %vm2299_vm4 = vweird.f32 %v2282_v61  ;;  %vm3190_vm14 = vcmask 80896  }
 0xc3d   : > { %v2285_v62 = vmul.f32 %v9122_v60, %v2284_v45 }
 0xc3f   : > { %v2286_v63 = vmul.f32 0.5, %v2285_v62 }
 0xc41   : > { %v2287_v0 = vsub.f32 1.5, %v2286_v63 }
 0xc42   : > { %v9124_v1 = vpop.eup %9123 }
 0xc43   : > { %v2288_v2 = vmul.f32 %v9122_v60, %v2287_v0  ;;  %v2294_v3 = vmul.f32 %v9124_v1, %v2282_v61  ;;  %vm2300_vm3 = vweird.f32 %v9124_v1 }
 0xc44   : > { %vm2301_vm5 = vmor %vm2299_vm4, %vm2300_vm3  ;;  %vm3285_vm3 = vcmask 244736   ;;  %vm3239_vm4 = vcmask 162816  }
 0xc45   : > { %v2292_v5 = vsel %vm2291_vm2, %v9122_v60, %v2288_v2  ;;  %v2295_v11 = vmul.f32 %v9124_v1, %v2294_v3  ;;  %v9054_v60 = vld [vmem:[%s13019_s5 + $0x54e] ss:$0 sm:$0xff] }
 0xc46   : > { %v2303_v25 = vmul.f32 %v2292_v5, %v10303_v42  ;;  %v2784_v3 = vld [vmem:[%s13019_s5 + $0x528] sm:$0xff] }
 0xc47   : > { %v2296_v27 = vmul.f32 0.5, %v2295_v11 }
 0xc48   : > { %v2306_v8 = vmul.f32 %v9048_v4, %v2303_v25 }
 0xc49   : > { %v2297_v10 = vsub.f32 1.5, %v2296_v27 }
 0xc4a   : > { %v10384_v18 = vadd.f32 %v9049_v17, %v2306_v8 }
 0xc4b   : > { %v2298_v15 = vmul.f32 %v9124_v1, %v2297_v10 }
 0xc4c   : > { %8596 = vmatmul.msk.f32.vlgmr.msrb.gmra.mxu2 %vm460_vm1, %v10384_v18  ;;  %8598 = vmatmul.msk.f32.vlgmr.msrb.gmra.mxu3 %vm460_vm1, %v10384_v18 }
 0xc4d   : > { %v2302_v20 = vsel %vm2301_vm5, %v9124_v1, %v2298_v15  ;;  %8600 = vmatmul.msk.f32.vlgmr.msrb.gmra.mxu0 %vm460_vm1, %v10384_v18  ;;  %2659 = vmatpush.msrb.mxu3 %v2639_v16  ;;  %v2785_v1 = vld [vmem:[%s13019_s5 + $0x530] sm:$0xff] }
 0xc4e   : > { %v2304_v42 = vmul.f32 %v2302_v20, %v10310_v58  ;;  %v2783_v58 = vld [vmem:[%s13019_s5 + $0x4c0] sm:$0xff] }
 0xc4f   : > { %2660 = vmatpush.msrb.mxu3 %v2638_v23 }
 0xc50   : > { %v2307_v29 = vmul.f32 %v9048_v4, %v2304_v42  ;;  %v405_v4 = vld [vmem:[%s358_s23] sm:$0x1]  ;;  %s9578_s23 = smov 88  }
 0xc51   : > { %2661 = vmatpush.msrb.mxu3 %v2637_v28  ;;  %v406_v5 = vsub.f32 1.0, %v405_v4 }
 0xc52   : > { %v10405_v7 = vadd.f32 %v9049_v17, %v2307_v29 }
 0xc53   : > { %2662 = vmatpush.msrb.mxu3 %v2636_v30  ;;  %v407_v11 = vmul.f32 -1e+30, %v406_v5 }
 0xc54   : > { %8597 = vmatmul.msk.f32.gmra.mxu2 %vm460_vm1, %v10405_v7  ;;  %8599 = vmatmul.msk.f32.gmra.mxu3 %vm460_vm1, %v10405_v7 }
 0xc55   : > { %8601 = vmatmul.msk.f32.gmra.mxu0 %vm460_vm1, %v10405_v7  ;;  %v10512_v17 = vperm.slane %v407_v11, 0 }
 0xc5c   : > { %8606 = vmatmul.msk.f32.vlgmr.msra.gmra.mxu2 %vm460_vm1, %v10384_v18  ;;  %8608 = vmatmul.msk.f32.vlgmr.msra.gmra.mxu3 %vm460_vm1, %v10384_v18 }
 0xc5d   : > { %2803 = vmatpush.msra.mxu3 %v2783_v58 }
 0xc5f   : > { %2804 = vmatpush.msra.mxu3 %v2782_v31 }
 0xc61   : > { %2805 = vmatpush.msra.mxu3 %v2781_v32 }
 0xc63   : > { %2806 = vmatpush.msra.mxu3 %v2780_v33 }
 0xc64   : > { %8607 = vmatmul.msk.f32.gmra.mxu2 %vm460_vm1, %v10405_v7  ;;  %8609 = vmatmul.msk.f32.gmra.mxu3 %vm460_vm1, %v10405_v7 }
 0xc6c   : > { %8618 = vmatmul.msk.f32.vlgmr.msrb.gmra.mxu3 %vm460_vm1, %v10384_v18 }
 0xc74   : > { %8619 = vmatmul.msk.f32.gmra.mxu3 %vm460_vm1, %v10405_v7 }
 0xc7c   : > { %8628 = vmatmul.msk.f32.vlgmr.msra.gmra.mxu3 %vm460_vm1, %v10384_v18 }
 0xc84   : > { %8629 = vmatmul.msk.f32.gmra.mxu3 %vm460_vm1, %v10405_v7 }
 0xcca   : > { %v2398_v34 = vpop.f32.mrf.mxu0 }
 0xccb   : > { %v2399_v40 = vadd.f32 %v9050_v37, %v2398_v34 }
 0xccf   : > { %v2340_v35 = vpop.f32.mrf.mxu2  ;;  %v2374_v36 = vpop.f32.mrf.mxu3 }
 0xcd0   : > { %v10456_v48 = vadd.f32 %v9051_v41, %v2340_v35  ;;  %v2375_v51 = vadd.f32 %v9052_v47, %v2374_v36 }
 0xcd2   : > { %v2401_v38 = vpop.f32.mrf.mxu0 }
 0xcd3   : > { %v2402_v39 = vadd.f32 %v9050_v37, %v2401_v38 }
 0xcd5   : > { %2627 = vmatpush.msrb.mxu2 %v2402_v39 }
 0xcd7   : > { %2628 = vmatpush.msrb.mxu2 %v2399_v40  ;;  %v2343_v43 = vpop.f32.mrf.mxu2  ;;  %v2377_v44 = vpop.f32.mrf.mxu3 }
 0xcd8   : > { %v10447_v46 = vadd.f32 %v9051_v41, %v2343_v43  ;;  %v2378_v61 = vadd.f32 %v9052_v47, %v2377_v44 }
 0xcda   : > { %8602 = vmatpush.xpose.msk.msra.mxu1 %vm460_vm1, %v10447_v46  ;;  %8610 = vmatpush.xpose.msk.msra.mxu0 %vm460_vm1, %v10447_v46 }
 0xcde   : > { %8603 = vmatpush.xpose.msk.msra.mxu1 %vm460_vm1, %v10456_v48  ;;  %8611 = vmatpush.xpose.msk.msra.mxu0 %vm460_vm1, %v10456_v48 }
 0xcdf   : > { %v2493_v52 = vpop.f32.mrf.mxu2  ;;  %v2517_v53 = vpop.f32.mrf.mxu3 }
 0xce0   : > { %v2494_v54 = vadd.f32 %v9053_v49, %v2493_v52  ;;  %v2518_v2 = vadd.f32 %v9054_v60, %v2517_v53 }
 0xce1   : > { %8604 = vmatmul.msk.f32.vlgmr.msra.gmra.mxu1 %vm460_vm1, %v2375_v51 }
 0xce2   : > { %2683 = vmatpush.msrb.mxu0 %v2643_v50 }
 0xce3   : > { %8612 = vmatmul.msk.f32.vlgmr.msra.gmra.mxu0 %vm460_vm1, %v2494_v54 }
 0xce4   : > { %2684 = vmatpush.msrb.mxu0 %v2642_v12 }
 0xce6   : > { %2685 = vmatpush.msrb.mxu0 %v2641_v55 }
 0xce7   : > { %v2496_v45 = vpop.f32.mrf.mxu2  ;;  %v2520_v62 = vpop.f32.mrf.mxu3 }
 0xce8   : > { %2686 = vmatpush.msrb.mxu0 %v2640_v56  ;;  %v2497_v63 = vadd.f32 %v9053_v49, %v2496_v45  ;;  %v2521_v0 = vadd.f32 %v9054_v60, %v2520_v62  ;;  %v9056_v45 = vld [vmem:[%s13019_s5 + $0x54c] ss:$0 sm:$0xff] }
 0xce9   : > { %8605 = vmatmul.msk.f32.gmra.mxu1 %vm460_vm1, %v2378_v61 }
 0xcea   : > { %2827 = vmatpush.msra.mxu0 %v2787_v57  ;;  %2598 = vmatpush.msrb.mxu1 %v2521_v0  ;;  %v9055_v57 = vld [vmem:[%s13019_s5 + $0x54b] ss:$0 sm:$0xff] }
 0xceb   : > { %8613 = vmatmul.msk.f32.gmra.mxu0 %vm460_vm1, %v2497_v63 }
 0xcec   : > { %2828 = vmatpush.msra.mxu0 %v2786_v59  ;;  %2599 = vmatpush.msrb.mxu1 %v2518_v2 }
 0xcee   : > { %2829 = vmatpush.msra.mxu0 %v2785_v1  ;;  %8622 = vmatpush.xpose.msk.msra.mxu1 %vm460_vm1, %v10447_v46 }
 0xcef   : > { %v2664_v55 = vpop.f32.mrf.mxu3 }
 0xcf0   : > { %2830 = vmatpush.msra.mxu0 %v2784_v3  ;;  %v2665_v59 = vadd.f32 %v9055_v57, %v2664_v55 }
 0xcf2   : > { %8623 = vmatpush.xpose.msk.msra.mxu1 %vm460_vm1, %v10456_v48 }
 0xcf3   : > { %8620 = vmatmul.msk.f32.vlgmr.msrb.gmra.mxu0 %vm460_vm1, %v10384_v18 }
 0xcf7   : > { %v2667_v60 = vpop.f32.mrf.mxu3 }
 0xcf8   : > { %v2668_v61 = vadd.f32 %v9055_v57, %v2667_v60 }
 0xcfb   : > { %8621 = vmatmul.msk.f32.gmra.mxu0 %vm460_vm1, %v10405_v7 }
 0xd03   : > { %8630 = vmatmul.msk.f32.vlgmr.msra.gmra.mxu0 %vm460_vm1, %v10384_v18 }
 0xd0b   : > { %8631 = vmatmul.msk.f32.gmra.mxu0 %vm460_vm1, %v10405_v7  ;;  %v9057_v7 = vld [vmem:[%s13019_s5 + $0x54f] ss:$0 sm:$0xff] }
 0xd5e   : > { %v2433_v15 = vpop.f32.mrf.mxu1 }
 0xd5f   : > { %v2439_v20 = vmul.f32 0.35355338, %v2433_v15 }
 0xd60   : > { %v2546_v25 = vpop.f32.mrf.mxu0 }
 0xd61   : > { %v2552_v27 = vmul.f32 0.35355338, %v2546_v25  ;;  %v10519_v29 = vadd.f32 %v2439_v20, %v10512_v17 }
 0xd63   : > { %v2554_v8 = vadd.f32 %v2552_v27, %v10512_v17  ;;  %v2443_v30 = vsel %vm522_vm10, %v10519_v29, -inf }
 0xd65   : > { %v2556_v10 = vsel %vm522_vm10, %v2554_v8, -inf }
 0xd66   : > { %2557 = vmax.xlane.f32.xlu2 %v2556_v10  ;;  %v2436_v37 = vpop.f32.mrf.mxu1 }
 0xd67   : > { %v2440_v41 = vmul.f32 0.35355338, %v2436_v37 }
 0xd68   : > { %v2549_v18 = vpop.f32.mrf.mxu0 }
 0xd69   : > { %v2553_v16 = vmul.f32 0.35355338, %v2549_v18  ;;  %v2442_v44 = vadd.f32 %v2440_v41, %v10512_v17 }
 0xd6b   : > { %v2555_v23 = vadd.f32 %v2553_v16, %v10512_v17  ;;  %v2446_v50 = vsel %vm522_vm10, %v2442_v44, -inf }
 0xd6d   : > { %v2559_v42 = vsel %vm522_vm10, %v2555_v23, -inf }
 0xd6e   : > { %2560 = vmax.xlane.f32.xlu0 %v2559_v42 }
 0xd70   : > { %v2688_v28 = vpop.f32.mrf.mxu0 }
 0xd71   : > { %v2689_v32 = vadd.f32 %v9057_v7, %v2688_v28 }
 0xd76   : > { %2444 = vmax.xlane.f32.xlu0 %v2443_v30 }
 0xd78   : > { %v2691_v58 = vpop.f32.mrf.mxu0 }
 0xd79   : > { %v2692_v31 = vadd.f32 %v9057_v7, %v2691_v58 }
 0xd7b   : > { %2769 = vmatpush.msra.mxu2 %v2692_v31 }
 0xd7d   : > { %2770 = vmatpush.msra.mxu2 %v2689_v32 }
 0xdd9   : > { %v2558_v33 = vpop.xlane.xlu2 %2557 }
 0xdda   : > { %v2562_v34 = vsub.f32 %v2554_v8, %v2558_v33 }
 0xddc   : > { %v2564_v35 = vmul.f32 1.442695, %v2562_v34 }
 0xdde   : > { %9125 = vpow2.f32 %v2564_v35 }
 0xde1   : > { %v2561_v36 = vpop.xlane.xlu0 %2560 }
 0xde2   : > { %v2563_v38 = vsub.f32 %v2555_v23, %v2561_v36 }
 0xde4   : > { %v9126_v39 = vpop.eup %9125  ;;  %v2566_v40 = vmul.f32 1.442695, %v2563_v38 }
 0xde5   : > { %v2568_v43 = vsel %vm522_vm10, %v9126_v39, 0.0 }
 0xde6   : > { %9127 = vpow2.f32 %v2566_v40  ;;  %2569 = vadd.xlane.f32.xlu1 %v2568_v43 }
 0xde9   : > { %v2445_v3 = vpop.xlane.xlu0 %2444 }
 0xdea   : > { %v2449_v11 = vsub.f32 %v10519_v29, %v2445_v3 }
 0xdec   : > { %v9128_v47 = vpop.eup %9127  ;;  %v2451_v27 = vmul.f32 1.442695, %v2449_v11 }
 0xded   : > { %v2571_v49 = vsel %vm522_vm10, %v9128_v47, 0.0 }
 0xdee   : > { %2572 = vadd.xlane.f32.xlu2 %v2571_v49  ;;  %2447 = vmax.xlane.f32.xlu1 %v2446_v50 }
 0xe59   : > { %v2570_v12 = vpop.xlane.xlu1 %2569 }
 0xe5a   : > { %9129 = vrcp.f32 %v2570_v12 }
 0xe60   : > { %v9130_v51 = vpop.eup %9129 }
 0xe61   : > { %v2576_v52 = vmul.f32 %v9130_v51, %v9126_v39  ;;  %v2573_v53 = vpop.xlane.xlu2 %2572  ;;  %v2448_v10 = vpop.xlane.xlu1 %2447 }
 0xe62   : > { %9131 = vrcp.f32 %v2573_v53  ;;  %v2450_v15 = vsub.f32 %v2442_v44, %v2448_v10 }
 0xe63   : > { %8614 = vmatmul.msk.f32.vlgmr.msrb.gmra.mxu1 %vm522_vm10, %v2576_v52  ;;  %9133 = vpow2.f32 %v2451_v27 }
 0xe64   : > { %8632 = vmatpush.xpose.msk.msrb.mxu1 %vm460_vm1, %v10447_v46  ;;  %v2808_v46 = vpop.f32.mrf.mxu3  ;;  %v2453_v20 = vmul.f32 1.442695, %v2450_v15 }
 0xe66   : > { %9135 = vpow2.f32 %v2453_v20 }
 0xe68   : > { %v9132_v54 = vpop.eup %9131  ;;  %8633 = vmatpush.xpose.msk.msrb.mxu1 %vm460_vm1, %v10456_v48  ;;  %v2809_v48 = vadd.f32 %v9056_v45, %v2808_v46 }
 0xe69   : > { %v2577_v56 = vmul.f32 %v9132_v54, %v9128_v47  ;;  %v9134_v30 = vpop.eup %9133  ;;  %v2832_v47 = vpop.f32.mrf.mxu0 }
 0xe6a   : > { %v2455_v7 = vsel %vm522_vm10, %v9134_v30, 0.0 }
 0xe6b   : > { %8615 = vmatmul.msk.f32.gmra.mxu1 %vm522_vm10, %v2577_v56  ;;  %v9058_v56 = vld [vmem:[%s13019_s5 + $0x550] ss:$0 sm:$0xff] }
 0xe6c   : > { %v2811_v62 = vpop.f32.mrf.mxu3  ;;  %v9136_v33 = vpop.eup %9135 }
 0xe6d   : > { %v2812_v63 = vadd.f32 %v9056_v45, %v2811_v62  ;;  %v2458_v36 = vsel %vm522_vm10, %v9136_v33, 0.0 }
 0xe71   : > { %v2835_v54 = vpop.f32.mrf.mxu0 }
 0xe73   : > { %8624 = vmatmul.msk.f32.vlgmr.msra.gmra.mxu1 %vm460_vm1, %v2665_v59 }
 0xe7b   : > { %8625 = vmatmul.msk.f32.gmra.mxu1 %vm460_vm1, %v2668_v61  ;;  %v2836_v61 = vadd.f32 %v9058_v56, %v2835_v54 }
 0xe83   : > { %8634 = vmatmul.msk.f32.vlgmr.msrb.gmra.mxu1 %vm460_vm1, %v2809_v48  ;;  %v2833_v48 = vadd.f32 %v9058_v56, %v2832_v47  ;;  %v3045_v47 = vld [vmem:[%s13020_s6 + $0x8] sm:$0xff] }
 0xe8b   : > { %8635 = vmatmul.msk.f32.gmra.mxu1 %vm460_vm1, %v2812_v63 }
 0xee0   : > { %v10546_v0 = vpop.f32.mrf.mxu1 }
 0xee8   : > { %v10548_v1 = vpop.f32.mrf.mxu1 }
 0xef0   : > { %v2717_v2 = vpop.f32.mrf.mxu1 }
 0xef1   : > { %v2723_v4 = vmul.f32 0.35355338, %v2717_v2 }
 0xef3   : > { %v2725_v5 = vadd.f32 %v2723_v4, %v10512_v17 }
 0xef5   : > { %v2727_v25 = vsel %vm522_vm10, %v2725_v5, -inf }
 0xef6   : > { %2728 = vmax.xlane.f32.xlu2 %v2727_v25 }
 0xef8   : > { %v2720_v8 = vpop.f32.mrf.mxu1 }
 0xef9   : > { %v2724_v18 = vmul.f32 0.35355338, %v2720_v8 }
 0xefb   : > { %v2726_v16 = vadd.f32 %v2724_v18, %v10512_v17 }
 0xefd   : > { %v2730_v23 = vsel %vm522_vm10, %v2726_v16, -inf }
 0xefe   : > { %2731 = vmax.xlane.f32.xlu0 %v2730_v23 }
 0xf00   : > { %v2861_v42 = vpop.f32.mrf.mxu1 }
 0xf01   : > { %v2867_v28 = vmul.f32 0.35355338, %v2861_v42 }
 0xf03   : > { %v2869_v29 = vadd.f32 %v2867_v28, %v10512_v17 }
 0xf05   : > { %v2871_v58 = vsel %vm522_vm10, %v2869_v29, -inf }
 0xf06   : > { %2456 = vadd.xlane.f32.xlu0 %v2455_v7  ;;  %2872 = vmax.xlane.f32.xlu1 %v2871_v58  ;;  %v3056_v7 = vld [vmem:[%s13020_s6 + $0x60] sm:$0xff]  ;;  %v3018_v58 = vld [vmem:[%s13019_s5 + $0x38] sm:$0xff] }
 0xf07   : > { %3038 = vmatpush.msrb.mxu0 %v3018_v58 }
 0xf08   : > { %v2864_v31 = vpop.f32.mrf.mxu1 }
 0xf09   : > { %v2868_v32 = vmul.f32 0.35355338, %v2864_v31  ;;  %v3017_v31 = vld [vmem:[%s13019_s5 + $0x30] sm:$0xff] }
 0xf0a   : > { %3039 = vmatpush.msrb.mxu0 %v3017_v31 }
 0xf0b   : > { %v2870_v34 = vadd.f32 %v2868_v32, %v10512_v17  ;;  %v3052_v32 = vld [vmem:[%s13020_s6 + $0x40] sm:$0xff] }
 0xf0d   : > { %v2874_v35 = vsel %vm522_vm10, %v2870_v34, -inf }
 0xf0e   : > { %2875 = vmax.xlane.f32.xlu2 %v2874_v35  ;;  %2459 = vadd.xlane.f32.xlu1 %v2458_v36  ;;  %v3044_v36 = vld [vmem:[%s13020_s6] sm:$0xff] }
 0xf69   : > { %v2729_v37 = vpop.xlane.xlu2 %2728 }
 0xf6a   : > { %v2733_v38 = vsub.f32 %v2725_v5, %v2729_v37  ;;  %v3061_v37 = vld [vmem:[%s13020_s6 + $0x88] sm:$0xff] }
 0xf6c   : > { %v2735_v39 = vmul.f32 1.442695, %v2733_v38  ;;  %v3015_v38 = vld [vmem:[%s351_s11] sm:$0xff] }
 0xf6d   : > { %8640 = vmatmul.msk.f32.vlgmr.msrb.gmra.mxu0 %vm522_vm10, %v3015_v38  ;;  %v3188_v38 = vld [vmem:[%s13019_s5 + $0x580] sm:$0xff] }
 0xf6e   : > { %9137 = vpow2.f32 %v2735_v39  ;;  %v10611_v39 = vld [vmem:[%s355_s14] sm:$0xff] }
 0xf71   : > { %v2732_v40 = vpop.xlane.xlu0 %2731 }
 0xf72   : > { %v2734_v41 = vsub.f32 %v2726_v16, %v2732_v40  ;;  %v3057_v40 = vld [vmem:[%s13020_s6 + $0x68] sm:$0xff] }
 0xf74   : > { %v9138_v43 = vpop.eup %9137  ;;  %v2737_v44 = vmul.f32 1.442695, %v2734_v41  ;;  %v3053_v41 = vld [vmem:[%s13020_s6 + $0x48] sm:$0xff] }
 0xf75   : > { %v2739_v49 = vsel %vm522_vm10, %v9138_v43, 0.0 }
 0xf76   : > { %9139 = vpow2.f32 %v2737_v44  ;;  %2740 = vadd.xlane.f32.xlu2 %v2739_v49  ;;  %v3066_v49 = vld [vmem:[%s13020_s6 + $0xb0] sm:$0xff] }
 0xf79   : > { %v2457_v17 = vpop.xlane.xlu0 %2456  ;;  %v2873_v50 = vpop.xlane.xlu1 %2872 }
 0xf7a   : > { %9141 = vrcp.f32 %v2457_v17  ;;  %v2877_v12 = vsub.f32 %v2869_v29, %v2873_v50  ;;  %v3060_v29 = vld [vmem:[%s13020_s6 + $0x80] sm:$0xff]  ;;  %v3062_v17 = vld [vmem:[%s13020_s6 + $0x90] sm:$0xff] }
 0xf7b   : > { %v3058_v50 = vld [vmem:[%s13020_s6 + $0x70] sm:$0xff] }
 0xf7c   : > { %v9140_v51 = vpop.eup %9139  ;;  %v2879_v52 = vmul.f32 1.442695, %v2877_v12  ;;  %v3054_v12 = vld [vmem:[%s13020_s6 + $0x50] sm:$0xff] }
 0xf7d   : > { %v2742_v53 = vsel %vm522_vm10, %v9140_v51, 0.0 }
 0xf7e   : > { %9143 = vpow2.f32 %v2879_v52  ;;  %2743 = vadd.xlane.f32.xlu0 %v2742_v53  ;;  %v3050_v52 = vld [vmem:[%s13020_s6 + $0x30] sm:$0xff] }
 0xf7f   : > { %v3046_v53 = vld [vmem:[%s13020_s6 + $0x10] sm:$0xff] }
 0xf80   : > { %v9142_v55 = vpop.eup %9141 }
 0xf81   : > { %v2463_v57 = vmul.f32 %v9142_v55, %v9134_v30  ;;  %v2876_v59 = vpop.xlane.xlu2 %2875  ;;  %v2460_v60 = vpop.xlane.xlu1 %2459  ;;  %v3064_v30 = vld [vmem:[%s13020_s6 + $0xa0] sm:$0xff] }
 0xf82   : > { %v2878_v46 = vsub.f32 %v2870_v34, %v2876_v59  ;;  %9145 = vrcp.f32 %v2460_v60  ;;  %3093 = vmatpush.msra.mxu1 %v3064_v30  ;;  %v3048_v34 = vld [vmem:[%s13020_s6 + $0x20] sm:$0xff] }
 0xf83   : > { %8616 = vmatmul.msk.f32.vlgmr.msrb.gmra.mxu2 %vm522_vm10, %v2463_v57 }
 0xf84   : > { %v9144_v45 = vpop.eup %9143  ;;  %v2881_v62 = vmul.f32 1.442695, %v2878_v46  ;;  %2913 = vmatpush.msrb.mxu2 %v2836_v61  ;;  %3094 = vmatpush.msra.mxu1 %v3060_v29 }
 0xf85   : > { %v2883_v63 = vsel %vm522_vm10, %v9144_v45, 0.0 }
 0xf86   : > { %9147 = vpow2.f32 %v2881_v62  ;;  %2914 = vmatpush.msrb.mxu2 %v2833_v48  ;;  %2884 = vadd.xlane.f32.xlu1 %v2883_v63 }
 0xf87   : > { %3095 = vmatpush.msra.mxu1 %v3056_v7 }
 0xf88   : > { %v9146_v2 = vpop.eup %9145 }
 0xf89   : > { %v2464_v3 = vmul.f32 %v9146_v2, %v9136_v33  ;;  %v3065_v33 = vld [vmem:[%s13020_s6 + $0xa8] sm:$0xff]  ;;  %3096 = vmatpush.msra.mxu1 %v3052_v32  ;;  %v2981_v32 = vld [vmem:[%s13019_s5 + $0x570] sm:$0xff] }
 0xf8a   : > { %3113 = vmatpush.msra.mxu0 %v3065_v33  ;;  %3002 = vmatpush.msrb.mxu3 %v2981_v32  ;;  %v2980_v33 = vld [vmem:[%s13019_s5 + $0x568] sm:$0xff] }
 0xf8b   : > { %8617 = vmatmul.msk.f32.gmra.mxu2 %vm522_vm10, %v2464_v3  ;;  %3097 = vmatpush.msra.mxu1 %v3048_v34 }
 0xf8c   : > { %v9148_v4 = vpop.eup %9147  ;;  %3114 = vmatpush.msra.mxu0 %v3061_v37  ;;  %3003 = vmatpush.msrb.mxu3 %v2980_v33  ;;  %v2978_v37 = vld [vmem:[%s13019_s5 + $0x558] sm:$0xff] }
 0xf8d   : > { %v2886_v5 = vsel %vm522_vm10, %v9148_v4, 0.0  ;;  %3098 = vmatpush.msra.mxu1 %v3044_v36  ;;  %v3189_v36 = vld [vmem:[%s13019_s5 + $0x588] sm:$0x3] }
 0xf8e   : > { %2887 = vadd.xlane.f32.xlu2 %v2886_v5  ;;  %8642 = vmatmul.msk.f32.vlgmr.msra.gmra.mxu1 %vm3079_vm6, %v10611_v39 }
 0xf8f   : > { %3115 = vmatpush.msra.mxu0 %v3057_v40  ;;  %v3067_v40 = vld [vmem:[%s13020_s6 + $0xb8] sm:$0xff] }
 0xf91   : > { %3116 = vmatpush.msra.mxu0 %v3053_v41 }
 0xfe9   : > { %v2741_v11 = vpop.xlane.xlu2 %2740 }
 0xfea   : > { %9149 = vrcp.f32 %v2741_v11  ;;  %v10668_v2 = vpop.f32.mrf.mxu0 }
 0xff0   : > { %v9150_v25 = vpop.eup %9149 }
 0xff1   : > { %v2747_v27 = vmul.f32 %v9150_v25, %v9138_v43  ;;  %v2744_v8 = vpop.xlane.xlu0 %2743  ;;  %v3049_v43 = vld [vmem:[%s13020_s6 + $0x28] sm:$0xff] }
 0xff2   : > { %9151 = vrcp.f32 %v2744_v8  ;;  %3117 = vmatpush.msra.mxu0 %v3049_v43 }
 0xff3   : > { %8626 = vmatmul.msk.f32.vlgmr.msra.gmra.mxu2 %vm522_vm10, %v2747_v27 }
 0xff4   : > { %3118 = vmatpush.msra.mxu0 %v3045_v47  ;;  %3133 = vmatpush.msra.mxu2 %v3066_v49  ;;  %v3063_v49 = vld [vmem:[%s13020_s6 + $0x98] sm:$0xff] }
 0xff5   : > { %8643 = vmatmul.msk.f32.vlgmr.msra.gmra.mxu0 %vm3079_vm6, %v10611_v39 }
 0xff6   : > { %3134 = vmatpush.msra.mxu2 %v3062_v17  ;;  %v3059_v17 = vld [vmem:[%s13020_s6 + $0x78] sm:$0xff] }
 0xff8   : > { %v9152_v10 = vpop.eup %9151  ;;  %3135 = vmatpush.msra.mxu2 %v3058_v50  ;;  %v3055_v50 = vld [vmem:[%s13020_s6 + $0x58] sm:$0xff] }
 0xff9   : > { %v2885_v18 = vpop.xlane.xlu1 %2884  ;;  %v2748_v16 = vmul.f32 %v9152_v10, %v9140_v51 }
 0xffa   : > { %9153 = vrcp.f32 %v2885_v18  ;;  %3136 = vmatpush.msra.mxu2 %v3054_v12 }
 0xffb   : > { %8627 = vmatmul.msk.f32.gmra.mxu2 %vm522_vm10, %v2748_v16 }
 0xffc   : > { %3137 = vmatpush.msra.mxu2 %v3050_v52  ;;  %v3051_v52 = vld [vmem:[%s13020_s6 + $0x38] sm:$0xff] }
 0xffe   : > { %3138 = vmatpush.msra.mxu2 %v3046_v53 }
0x1000   : > { %v9154_v15 = vpop.eup %9153 }
0x1001   : > { %v2891_v23 = vmul.f32 %v9154_v15, %v9144_v45  ;;  %v2888_v20 = vpop.xlane.xlu2 %2887 }
0x1002   : > { %9155 = vrcp.f32 %v2888_v20 }
0x1003   : > { %8636 = vmatmul.msk.f32.vlgmr.msrb.gmra.mxu2 %vm522_vm10, %v2891_v23 }
0x1006   : > { %v2630_v35 = vpop.f32.mrf.mxu2 }
0x1007   : > { %v2631_v55 = vadd.f32 %v2630_v35, %v10546_v0  ;;  %v2979_v35 = vld [vmem:[%s13019_s5 + $0x560] sm:$0xff] }
0x1008   : > { %v9156_v42 = vpop.eup %9155  ;;  %3004 = vmatpush.msrb.mxu3 %v2979_v35  ;;  %v9385_v35 = vld [vmem:[%s13019_s5 + $0xb8] sm:$0xff] }
0x1009   : > { %v2892_v28 = vmul.f32 %v9156_v42, %v9148_v4 }
0x100a   : > { %3005 = vmatpush.msrb.mxu3 %v2978_v37 }
0x100b   : > { %8637 = vmatmul.msk.f32.gmra.mxu2 %vm522_vm10, %v2892_v28  ;;  %v3100_v3 = vpop.f32.mrf.mxu1  ;;  %vm3194_vm10 = vcmask 1041408  }
0x100c   : > { %8646 = vmatpush.msk.msrb.mxu1 %vm3194_vm10, %v3189_v36  ;;  %3153 = vmatpush.msra.mxu3 %v3067_v40  ;;  %v9387_v40 = vld [vmem:[%s13019_s5 + $0xb0] sm:$0xff]  ;;  %vm3384_vm10 = vcmask 64512  }
0x100e   : > { %v2633_v44 = vpop.f32.mrf.mxu2  ;;  %3213 = vmatpush.msrb.mxu1 %v3188_v38  ;;  %3154 = vmatpush.msra.mxu3 %v3063_v49  ;;  %v9388_v49 = vld [vmem:[%s13019_s5 + $0x100] sm:$0xff] }
0x100f   : > { %v2634_v61 = vadd.f32 %v2633_v44, %v10548_v1 }
0x1010   : > { %3155 = vmatpush.msra.mxu3 %v3059_v17 }
0x1012   : > { %3156 = vmatpush.msra.mxu3 %v3055_v50  ;;  %v9389_v50 = vld [vmem:[%s13019_s5 + $0xa8] sm:$0xff] }
0x1013   : > { %8644 = vmatmul.msk.f32.vlgmr.msra.gmra.mxu2 %vm3079_vm6, %v10611_v39 }
0x1014   : > { %3157 = vmatpush.msra.mxu3 %v3051_v52 }
0x1072   : > { %v3120_v11 = vpop.f32.mrf.mxu0 }
0x1076   : > { %v2772_v51 = vpop.f32.mrf.mxu2 }
0x1077   : > { %v2778_v56 = vadd.f32 %v2772_v51, %v2631_v55 }
0x107e   : > { %v2775_v54 = vpop.f32.mrf.mxu2 }
0x107f   : > { %v2779_v45 = vadd.f32 %v2775_v54, %v2634_v61  ;;  %v3284_v61 = vld [vmem:[%s13019_s5 + $0x5c0] sm:$0x3f] }
0x1080   : > { %8650 = vmatpush.msk.msrb.mxu2 %vm3289_vm7, %v3284_v61 }
0x1086   : > { %v2916_v57 = vpop.f32.mrf.mxu2 }
0x1087   : > { %v2922_v59 = vadd.f32 %v2916_v57, %v2778_v56  ;;  %v3047_v57 = vld [vmem:[%s13020_s6 + $0x18] sm:$0xff] }
0x1088   : > { %3158 = vmatpush.msra.mxu3 %v3047_v57 }
0x1089   : > { %v10652_v60 = vadd.f32 %v2922_v59, %v10292_v6  ;;  %v10665_v6 = vld [vmem:[%s13020_s6 + $0xc0] ss:$8 sm:$0xf] }
0x108a   : > { %v3071_v1 = vperm.slane %v10665_v6, 0  ;;  %v3073_v29 = vperm.slane %v10665_v6, 2 }
0x108b   : > { %v2928_v46 = vsel %vm460_vm1, %v10652_v60, 0.0 }
0x108c   : > { %2929 = vadd.xlane.f32.xlu0 %v2928_v46  ;;  %v3101_v4 = vadd.f32 %v3100_v3, %v3071_v1  ;;  %v3283_v46 = vld [vmem:[%s13019_s5 + $0x5b8] sm:$0xff] }
0x108d   : > { %3306 = vmatpush.msrb.mxu2 %v3283_v46 }
0x108e   : > { %v2919_v48 = vpop.f32.mrf.mxu2  ;;  %v10670_v5 = vmax.f32 %v3101_v4, 0.0 }
0x108f   : > { %v2923_v62 = vadd.f32 %v2919_v48, %v2779_v45 }
0x1091   : > { %v10658_v63 = vadd.f32 %v2923_v62, %v10297_v19  ;;  %v3072_v19 = vperm.slane %v10665_v6, 1  ;;  %v3238_v62 = vld [vmem:[%s13019_s5 + $0x5a0] sm:$0xf] }
0x1092   : > { %8648 = vmatpush.msk.msrb.mxu0 %vm3243_vm8, %v3238_v62 }
0x1093   : > { %v2931_v0 = vsel %vm460_vm1, %v10658_v63, 0.0  ;;  %v3121_v25 = vadd.f32 %v3120_v11, %v3072_v19 }
0x1094   : > { %2932 = vadd.xlane.f32.xlu1 %v2931_v0  ;;  %v3282_v0 = vld [vmem:[%s13019_s5 + $0x5b0] sm:$0xff] }
0x1095   : > { %v10674_v27 = vmax.f32 %v3121_v25, 0.0  ;;  %3307 = vmatpush.msrb.mxu2 %v3282_v0 }
0x1096   : > { %v3140_v7 = vpop.f32.mrf.mxu2 }
0x1097   : > { %v3141_v58 = vadd.f32 %v3140_v7, %v3073_v29  ;;  %v9061_v29 = vld [vmem:[%s13019_s5 + $0x423] ss:$0 sm:$0xff] }
0x1099   : > { %v10697_v31 = vmax.f32 %v3141_v58, 0.0  ;;  %v9384_v58 = vld [vmem:[%s13019_s5 + $0x110] sm:$0xff] }
0x10ad   : > { %3168 = vrot.lane.b32.xlu1 %v10670_v5, %s9576_s21 }
0x10b5   : > { %3220 = vrot.lane.b32.xlu1 %v10674_v27, %s9577_s22 }
0x10bd   : > { %3224 = vrot.lane.b32.xlu1 %v10674_v27, %s9578_s23 }
0x10c5   : > { %3184 = vrot.lane.b32.xlu1 %v10670_v5, %s9579_s24 }
0x10cd   : > { %3232 = vrot.lane.b32.xlu1 %v10674_v27, %s9580_s25 }
0x10ff   : > { %v2930_v8 = vpop.xlane.xlu0 %2929 }
0x1100   : > { %v2934_v10 = vmul.f32 %v2930_v8, %v9679_v24 }
0x1102   : > { %v10681_v18 = vsub.f32 %v10652_v60, %v2934_v10  ;;  %v3237_v10 = vld [vmem:[%s13019_s5 + $0x598] sm:$0xff] }
0x1103   : > { %3261 = vmatpush.msrb.mxu0 %v3237_v10  ;;  %v3324_v10 = vld [vmem:[%s13019_s5 + $0x5d0] sm:$0xff] }
0x1104   : > { %v2938_v16 = vmul.f32 %v10681_v18, %v10681_v18 }
0x1106   : > { %v2940_v15 = vsel %vm460_vm1, %v2938_v16, 0.0  ;;  %v9060_v16 = vld [vmem:[%s13019_s5 + $0x422] ss:$0 sm:$0xff] }
0x1107   : > { %2941 = vadd.xlane.f32.xlu2 %v2940_v15  ;;  %v2933_v23 = vpop.xlane.xlu1 %2932 }
0x1108   : > { %v2935_v20 = vmul.f32 %v2933_v23, %v9679_v24  ;;  %v9383_v23 = vld [vmem:[%s13019_s5 + $0x118] sm:$0xff] }
0x110a   : > { %v10689_v42 = vsub.f32 %v10658_v63, %v2935_v20 }
0x110c   : > { %v2939_v28 = vmul.f32 %v10689_v42, %v10689_v42 }
0x110e   : > { %v2943_v30 = vsel %vm460_vm1, %v2939_v28, 0.0 }
0x110f   : > { %2944 = vadd.xlane.f32.xlu0 %v2943_v30  ;;  %v3236_v30 = vld [vmem:[%s13019_s5 + $0x590] sm:$0xff] }
0x1110   : > { %3262 = vmatpush.msrb.mxu0 %v3236_v30  ;;  %v9059_v30 = vld [vmem:[%s13019_s5 + $0x40] ss:$0 sm:$0xff] }
0x1112   : > { %3422 = vmatpush.msra.mxu0 %v9385_v35 }
0x1114   : > { %3423 = vmatpush.msra.mxu0 %v9387_v40 }
0x1116   : > { %3424 = vmatpush.msra.mxu0 %v9389_v50 }
0x111f   : > { %3172 = vrot.lane.b32.xlu2 %v10670_v5, %s9577_s22  ;;  %v3169_v34 = vpop.permute.xlu1 %3168 }
0x1120   : > { %v3171_v59 = vmax.f32 %v10670_v5, %v3169_v34 }
0x1123   : > { %3269 = vrot.lane.b32.xlu0 %v10697_v31, %s9581_s26 }
0x1127   : > { %3176 = vrot.lane.b32.xlu2 %v10670_v5, %s9581_s26  ;;  %v10729_v47 = vpop.permute.xlu1 %3220 }
0x1128   : > { %v3223_v61 = vmax.f32 %v10674_v27, %v10729_v47  ;;  %v9394_v47 = vld [vmem:[%s13019_s5 + $0xe0] sm:$0xff] }
0x112b   : > { %3273 = vrot.lane.b32.xlu0 %v10697_v31, %s9582_s29 }
0x112f   : > { %3180 = vrot.lane.b32.xlu2 %v10670_v5, %s9578_s23  ;;  %v10757_v48 = vpop.permute.xlu1 %3224  ;;  %v3281_v5 = vld [vmem:[%s13019_s5 + $0x5a8] sm:$0xff] }
0x1130   : > { %3308 = vmatpush.msrb.mxu2 %v3281_v5 }
0x1132   : > { %3445 = vmatpush.msra.mxu2 %v9383_v23 }
0x1133   : > { %3277 = vrot.lane.b32.xlu0 %v10697_v31, %s9583_s30 }
0x1134   : > { %3446 = vmatpush.msra.mxu2 %v9384_v58 }
0x1137   : > { %v3185_v34 = vpop.permute.xlu1 %3184 }
0x113b   : > { %3228 = vrot.lane.b32.xlu0 %v10674_v27, %s9582_s29  ;;  %v9393_v27 = vld [vmem:[%s13019_s5 + $0xe8] sm:$0xff] }
0x113f   : > { %v3233_v0 = vpop.permute.xlu1 %3232 }
0x117a   : > { %v2942_v41 = vpop.xlane.xlu2 %2941 }
0x117b   : > { %v2946_v43 = vmul.f32 %v2942_v41, %v9679_v24 }
0x117d   : > { %v2948_v44 = vadd.f32 1e-06, %v2946_v43 }
0x117f   : > { %9157 = vrsqrt.f32 %v2948_v44  ;;  %vm2956_vm11 = vweird.f32 %v2948_v44 }
0x1182   : > { %v3173_v12 = vpop.permute.xlu2 %3172  ;;  %v2945_v51 = vpop.xlane.xlu0 %2944 }
0x1183   : > { %v2947_v53 = vmul.f32 %v2945_v51, %v9679_v24  ;;  %v3175_v4 = vmax.f32 %v3171_v59, %v3173_v12  ;;  %v9390_v51 = vld [vmem:[%s13019_s5 + $0xa0] sm:$0xff] }
0x1184   : > { %3425 = vmatpush.msra.mxu0 %v9390_v51 }
0x1185   : > { %v9158_v54 = vpop.eup %9157  ;;  %v10744_v55 = vadd.f32 1e-06, %v2947_v53 }
0x1186   : > { %v2951_v56 = vmul.f32 %v9158_v54, %v2948_v44  ;;  %vm2957_vm9 = vweird.f32 %v9158_v54 }
0x1187   : > { %9159 = vrsqrt.f32 %v10744_v55  ;;  %vm2958_vm12 = vmor %vm2956_vm11, %vm2957_vm9  ;;  %vm2966_vm15 = vweird.f32 %v10744_v55 }
0x1188   : > { %v2952_v45 = vmul.f32 %v9158_v54, %v2951_v56 }
0x118a   : > { %v2953_v1 = vmul.f32 0.5, %v2952_v45  ;;  %v3177_v3 = vpop.permute.xlu2 %3176  ;;  %v9392_v45 = vld [vmem:[%s13019_s5 + $0xf0] sm:$0xff] }
0x118b   : > { %v3179_v15 = vmax.f32 %v3175_v4, %v3177_v3  ;;  %v3074_v4 = vperm.slane %v10665_v6, 3  ;;  %v3325_v6 = vld [vmem:[%s13019_s5 + $0x5d8] sm:$0xff] }
0x118c   : > { %v2954_v19 = vsub.f32 1.5, %v2953_v1 }
0x118d   : > { %v9160_v11 = vpop.eup %9159 }
0x118e   : > { %v2955_v25 = vmul.f32 %v9158_v54, %v2954_v19  ;;  %v2961_v8 = vmul.f32 %v9160_v11, %v10744_v55  ;;  %vm2967_vm13 = vweird.f32 %v9160_v11 }
0x118f   : > { %vm2968_vm2 = vmor %vm2966_vm15, %vm2967_vm13 }
0x1190   : > { %v2959_v20 = vsel %vm2958_vm12, %v9158_v54, %v2955_v25  ;;  %v2962_v28 = vmul.f32 %v9160_v11, %v2961_v8  ;;  %v3327_v25 = vld [vmem:[%s13019_s5 + $0x5e8] sm:$0xff]  ;;  %v3326_v8 = vld [vmem:[%s13019_s5 + $0x5e0] sm:$0xff] }
0x1191   : > { %v2970_v7 = vmul.f32 %v2959_v20, %v10681_v18  ;;  %v9386_v18 = vld [vmem:[%s13019_s5 + $0x108] sm:$0xff] }
0x1192   : > { %v2963_v32 = vmul.f32 0.5, %v2962_v28  ;;  %v3181_v33 = vpop.permute.xlu2 %3180  ;;  %3447 = vmatpush.msra.mxu2 %v9386_v18 }
0x1193   : > { %v2973_v36 = vmul.f32 %v9060_v16, %v2970_v7  ;;  %v3183_v37 = vmax.f32 %v3179_v15, %v3181_v33  ;;  %v3042_v7 = vadd.f32 %v9059_v30, %v10668_v2 }
0x1194   : > { %v2964_v38 = vsub.f32 1.5, %v2963_v32  ;;  %3448 = vmatpush.msra.mxu2 %v9388_v49 }
0x1195   : > { %v2976_v41 = vadd.f32 %v9061_v29, %v2973_v36  ;;  %v3187_v43 = vmax.f32 %v3183_v37, %v3185_v34  ;;  %v3270_v44 = vpop.permute.xlu0 %3269  ;;  %v3355_v37 = vld [vmem:[%s13019_s5 + $0x48] sm:$0xff] }
0x1196   : > { %v2965_v17 = vmul.f32 %v9160_v11, %v2964_v38  ;;  %v3272_v56 = vmax.f32 %v10697_v31, %v3270_v44  ;;  %v3227_v31 = vmax.f32 %v3223_v61, %v10757_v48  ;;  %v9395_v61 = vld [vmem:[%s13019_s5 + $0x88] ss:$0 sm:$0xff] }
0x1197   : > { %8638 = vmatmul.msk.f32.vlgmr.msrb.gmra.mxu3 %vm460_vm1, %v2976_v41  ;;  %8647 = vmatmul.msk.f32.vlgmr.msrb.gmra.mxu1 %vm3190_vm14, %v3187_v43 }
0x1198   : > { %v2969_v12 = vsel %vm2968_vm2, %v9160_v11, %v2965_v17  ;;  %3342 = vmatpush.msrb.mxu3 %v3327_v25  ;;  %v9408_v25 = vld [vmem:[%s13019_s5 + $0x1f0] sm:$0xff] }
0x1199   : > { %v2971_v52 = vmul.f32 %v2969_v12, %v10689_v42  ;;  %v9391_v42 = vld [vmem:[%s13019_s5 + $0xf8] sm:$0xff] }
0x119a   : > { %3343 = vmatpush.msrb.mxu3 %v3326_v8  ;;  %v9409_v8 = vld [vmem:[%s13019_s5 + $0x128] sm:$0xff] }
0x119b   : > { %v2974_v53 = vmul.f32 %v9060_v16, %v2971_v52  ;;  %v3323_v16 = vld [vmem:[%s13019_s5 + $0x5c8] sm:$0xff] }
0x119c   : > { %3344 = vmatpush.msrb.mxu3 %v3325_v6  ;;  %v9410_v6 = vld [vmem:[%s13019_s5 + $0x1e8] sm:$0xff] }
0x119d   : > { %v3274_v54 = vpop.permute.xlu0 %3273  ;;  %v2977_v55 = vadd.f32 %v9061_v29, %v2974_v53 }
0x119e   : > { %v3276_v57 = vmax.f32 %v3272_v56, %v3274_v54  ;;  %3345 = vmatpush.msrb.mxu3 %v3324_v10  ;;  %v9411_v10 = vld [vmem:[%s13019_s5 + $0x120] sm:$0xff] }
0x119f   : > { %8639 = vmatmul.msk.f32.gmra.mxu3 %vm460_vm1, %v2977_v55 }
0x11a0   : > { %3346 = vmatpush.msrb.mxu3 %v3323_v16  ;;  %v9412_v16 = vld [vmem:[%s13019_s5 + $0x1e0] sm:$0xff] }
0x11a5   : > { %v3278_v59 = vpop.permute.xlu0 %3277 }
0x11a6   : > { %v3280_v46 = vmax.f32 %v3276_v57, %v3278_v59 }
0x11a7   : > { %8645 = vmatmul.msk.f32.vlgmr.msra.gmra.mxu3 %vm3079_vm6, %v10611_v39 }
0x11a8   : > { %8651 = vmatmul.msk.f32.vlgmr.msrb.gmra.mxu2 %vm3285_vm3, %v3280_v46 }
0x11a9   : > { %3536 = vmatpush.msrb.mxu2 %v9391_v42  ;;  %v9396_v42 = vld [vmem:[%s13019_s5 + $0x90] ss:$0 sm:$0xff] }
0x11ab   : > { %3537 = vmatpush.msrb.mxu2 %v9392_v45  ;;  %v9397_v45 = vld [vmem:[%s13019_s5 + $0xd8] sm:$0xff] }
0x11ad   : > { %v3229_v62 = vpop.permute.xlu0 %3228  ;;  %3538 = vmatpush.msrb.mxu2 %v9393_v27  ;;  %v9400_v27 = vld [vmem:[%s13019_s5 + $0x150] sm:$0xff] }
0x11ae   : > { %v3231_v39 = vmax.f32 %v3227_v31, %v3229_v62  ;;  %v9398_v62 = vld [vmem:[%s13019_s5 + $0x158] sm:$0xff] }
0x11af   : > { %3539 = vmatpush.msrb.mxu2 %v9394_v47  ;;  %v9402_v47 = vld [vmem:[%s13019_s5 + $0x148] sm:$0xff] }
0x11b0   : > { %v3235_v48 = vmax.f32 %v3231_v39, %v3233_v0  ;;  %v9399_v0 = vld [vmem:[%s13019_s5 + $0xd0] sm:$0xff]  ;;  %v9401_v39 = vld [vmem:[%s13019_s5 + $0xc8] sm:$0xff] }
0x11b2   : > { %8649 = vmatmul.msk.f32.vlgmr.msrb.gmra.mxu0 %vm3239_vm4, %v3235_v48  ;;  %v9403_v48 = vld [vmem:[%s13019_s5 + $0xc0] sm:$0xff] }
0x1214   : > { %v3215_v29 = vpop.f32.mrf.mxu1 }
0x1215   : > { %v3218_v32 = vadd.f32 %v3215_v29, %v3042_v7  ;;  %v9417_v7 = vld [vmem:[%s13019_s5 + $0x178] sm:$0xff] }
0x121a   : > { %v10828_v1 = vpop.f32.mrf.mxu3 }
0x1222   : > { %v10830_v3 = vpop.f32.mrf.mxu3 }
0x122a   : > { %v3160_v5 = vpop.f32.mrf.mxu3 }
0x122b   : > { %v3161_v19 = vadd.f32 %v3160_v5, %v3074_v4  ;;  %v3310_v34 = vpop.f32.mrf.mxu2  ;;  %v9404_v4 = vld [vmem:[%s13019_s5 + $0x138] sm:$0xff]  ;;  %v9405_v5 = vld [vmem:[%s13019_s5 + $0x140] sm:$0xff] }
0x122d   : > { %v3166_v11 = vmax.f32 %v3161_v19, 0.0  ;;  %v9406_v19 = vld [vmem:[%s13019_s5 + $0x1f8] sm:$0xff] }
0x122f   : > { %3315 = vrot.lane.b32.xlu2 %v3166_v11, %s9578_s23  ;;  %v3264_v58 = vpop.f32.mrf.mxu0 }
0x1230   : > { %v3267_v33 = vadd.f32 %v3264_v58, %v3218_v32  ;;  %v9418_v58 = vld [vmem:[%s13019_s5 + $0x170] sm:$0xff]  ;;  %v9419_v32 = vld [vmem:[%s13019_s5 + $0x168] sm:$0xff] }
0x1232   : > { %v3313_v35 = vadd.f32 %v3310_v34, %v3267_v33  ;;  %v9420_v33 = vld [vmem:[%s13019_s5 + $0x160] sm:$0xff] }
0x1237   : > { %3319 = vrot.lane.b32.xlu2 %v3166_v11, %s9580_s25 }
0x1289   : > { %v3316_v15 = vpop.permute.xlu2 %3315 }
0x128a   : > { %v3318_v23 = vmax.f32 %v3166_v11, %v3316_v15  ;;  %v9407_v11 = vld [vmem:[%s13019_s5 + $0x130] sm:$0xff]  ;;  %v9413_v15 = vld [vmem:[%s13019_s5 + $0x1d8] sm:$0xff] }
0x1291   : > { %v3320_v20 = vpop.permute.xlu2 %3319 }
0x1292   : > { %v3322_v28 = vmax.f32 %v3318_v23, %v3320_v20  ;;  %v9414_v23 = vld [vmem:[%s13019_s5 + $0x1d0] sm:$0xff]  ;;  %v9415_v20 = vld [vmem:[%s13019_s5 + $0x1c8] sm:$0xff] }
0x1294   : > { %8652 = vmatmul.msk.f32.vlgmr.msrb.gmra.mxu3 %vm375_vm0, %v3322_v28  ;;  %v9416_v28 = vld [vmem:[%s13019_s5 + $0x1c0] sm:$0xff] }
0x1317   : > { %v3348_v36 = vpop.f32.mrf.mxu3 }
0x1318   : > { %v3351_v18 = vadd.f32 %v3348_v36, %v3313_v35 }
0x131a   : > { %v10858_v38 = vadd.f32 %v3355_v37, %v3351_v18  ;;  %v9421_v18 = vld [vmem:[%s13019_s5 + $0x198] sm:$0xff] }
0x131c   : > { %v3360_v40 = vsel %vm460_vm1, %v10858_v38, 0.0 }
0x131d   : > { %3361 = vadd.xlane.f32.xlu0 %v3360_v40  ;;  %v9422_v40 = vld [vmem:[%s13019_s5 + $0x190] sm:$0xff] }
0x1390   : > { %v3362_v41 = vpop.xlane.xlu0 %3361 }
0x1391   : > { %v3363_v2 = vmul.f32 %v3362_v41, %v9679_v24  ;;  %v9423_v41 = vld [vmem:[%s13019_s5 + $0x188] sm:$0xff] }
0x1393   : > { %v3364_v43 = vsub.f32 %v10858_v38, %v3363_v2 }
0x1395   : > { %v3365_v44 = vmul.f32 %v3364_v43, %v3364_v43 }
0x1397   : > { %v3366_v49 = vsel %vm460_vm1, %v3365_v44, 0.0 }
0x1398   : > { %3367 = vadd.xlane.f32.xlu2 %v3366_v49 }
0x140b   : > { %v3368_v17 = vpop.xlane.xlu2 %3367 }
0x140c   : > { %v3369_v50 = vmul.f32 %v3368_v17, %v9679_v24 }
0x140e   : > { %v3370_v12 = vadd.f32 1e-06, %v3369_v50 }
0x1410   : > { %9161 = vrsqrt.f32 %v3370_v12  ;;  %vm3377_vm5 = vweird.f32 %v3370_v12 }
0x1416   : > { %v9162_v51 = vpop.eup %9161 }
0x1417   : > { %v3372_v52 = vmul.f32 %v9162_v51, %v3370_v12  ;;  %vm3378_vm0 = vweird.f32 %v9162_v51 }
0x1418   : > { %vm3379_vm6 = vmor %vm3377_vm5, %vm3378_vm0 }
0x1419   : > { %v3373_v53 = vmul.f32 %v9162_v51, %v3372_v52 }
0x141b   : > { %v3374_v54 = vmul.f32 0.5, %v3373_v53 }
0x141d   : > { %v3375_v55 = vsub.f32 1.5, %v3374_v54 }
0x141f   : > { %v3376_v56 = vmul.f32 %v9162_v51, %v3375_v55 }
0x1421   : > { %v3380_v57 = vsel %vm3379_vm6, %v9162_v51, %v3376_v56 }
0x1422   : > { %v3381_v59 = vmul.f32 %v3380_v57, %v3364_v43  ;;  %v9424_v43 = vld [vmem:[%s13019_s5 + $0x180] sm:$0xff] }
0x1424   : > { %v3382_v46 = vmul.f32 %v9395_v61, %v3381_v59  ;;  %v9425_v59 = vld [vmem:[%s13019_s5 + $0x98] ss:$0 sm:$0xff] }
0x1426   : > { %v3383_v31 = vadd.f32 %v9396_v42, %v3382_v46 }
0x1428   : > { %3402 = vmatpush.msra.mxu1 %v3383_v31  ;;  %8655 = vmatmul.msk.f32.vlgmr.msra.gmra.mxu2 %vm460_vm1, %v3383_v31 }
0x1429   : > { %3470 = vmatpush.msra.mxu3 %v3383_v31  ;;  %3516 = vmatpush.msrb.mxu0 %v3383_v31 }
0x142a   : > { %8653 = vmatmul.msk.f32.vlgmr.msra.gmra.mxu1 %vm3384_vm10, %v9707_v9  ;;  %8656 = vmatmul.msk.f32.vlgmr.msra.gmra.mxu3 %vm3384_vm10, %v9719_v14 }
0x142b   : > { %3562 = vmatpush.msrb.mxu3 %v3383_v31  ;;  %3490 = vmatpush.msrb.mxu1 %v9397_v45 }
0x142c   : > { %3628 = vmatpush.msra.mxu2 %v9398_v62 }
0x142d   : > { %3654 = vmatpush.msra.mxu3 %v3383_v31  ;;  %3491 = vmatpush.msrb.mxu1 %v9399_v0 }
0x142e   : > { %3629 = vmatpush.msra.mxu2 %v9400_v27 }
0x142f   : > { %3492 = vmatpush.msrb.mxu1 %v9401_v39 }
0x1430   : > { %3630 = vmatpush.msra.mxu2 %v9402_v47 }
0x1431   : > { %3493 = vmatpush.msrb.mxu1 %v9403_v48 }
0x1432   : > { %8660 = vmatmul.msk.f32.vlgmr.msrb.gmra.mxu3 %vm3384_vm10, %v9744_v22  ;;  %3631 = vmatpush.msra.mxu2 %v9405_v5 }
0x1433   : > { %3582 = vmatpush.msra.mxu1 %v9404_v4  ;;  %3768 = vmatpush.msrb.mxu3 %v9406_v19 }
0x1435   : > { %3583 = vmatpush.msra.mxu1 %v9407_v11  ;;  %3769 = vmatpush.msrb.mxu3 %v9408_v25 }
0x1437   : > { %3584 = vmatpush.msra.mxu1 %v9409_v8  ;;  %3770 = vmatpush.msrb.mxu3 %v9410_v6 }
0x1439   : > { %3585 = vmatpush.msra.mxu1 %v9411_v10  ;;  %3771 = vmatpush.msrb.mxu3 %v9412_v16  ;;  %v9426_v16 = vld [vmem:[%s13019_s5 + $0x89] ss:$0 sm:$0xff] }
0x143a   : > { %8664 = vmatmul.msk.f32.vlgmr.msra.gmra.mxu3 %vm3384_vm10, %v9758_v26 }
0x143b   : > { %3855 = vmatpush.msra.mxu3 %v9413_v15 }
0x143d   : > { %3856 = vmatpush.msra.mxu3 %v9414_v23  ;;  %v9427_v23 = vld [vmem:[%s13019_s5 + $0x91] ss:$0 sm:$0xff] }
0x143f   : > { %3857 = vmatpush.msra.mxu3 %v9415_v20 }
0x1441   : > { %3858 = vmatpush.msra.mxu3 %v9416_v28  ;;  %v9428_v28 = vld [vmem:[%s13019_s5 + $0x1b8] sm:$0xff] }
0x14a7   : > { %v3404_v30 = vpop.f32.mrf.mxu1 }
0x14a8   : > { %8654 = vmatmul.msk.f32.vlgmr.msra.gmra.mxu0 %vm460_vm1, %v3404_v30  ;;  %v9429_v30 = vld [vmem:[%s13019_s5 + $0x238] sm:$0xff] }
0x14a9   : > { %3608 = vmatpush.msra.mxu0 %v3383_v31 }
0x14ab   : > { %v3450_v49 = vpop.f32.mrf.mxu2 }
0x14ad   : > { %v3472_v29 = vpop.f32.mrf.mxu3 }
0x14ae   : > { %8657 = vmatmul.msk.f32.vlgmr.msrb.gmra.mxu1 %vm460_vm1, %v3472_v29  ;;  %v9430_v29 = vld [vmem:[%s13019_s5 + $0x1b0] sm:$0xff] }
0x14af   : > { %3674 = vmatpush.msrb.mxu1 %v9417_v7  ;;  %v9431_v7 = vld [vmem:[%s13019_s5 + $0x230] sm:$0xff] }
0x14b0   : > { %8658 = vmatmul.msk.f32.vlgmr.msrb.gmra.mxu0 %vm3384_vm10, %v9717_v13 }
0x14b1   : > { %3675 = vmatpush.msrb.mxu1 %v9418_v58  ;;  %v9432_v58 = vld [vmem:[%s13019_s5 + $0x1a8] sm:$0xff] }
0x14b3   : > { %3676 = vmatpush.msrb.mxu1 %v9419_v32  ;;  %v9433_v32 = vld [vmem:[%s13019_s5 + $0x228] sm:$0xff] }
0x14b5   : > { %3677 = vmatpush.msrb.mxu1 %v9420_v33  ;;  %v3564_v34 = vpop.f32.mrf.mxu3  ;;  %v9434_v33 = vld [vmem:[%s13019_s5 + $0x1a0] sm:$0xff] }
0x14b6   : > { %8661 = vmatmul.msk.f32.vlgmr.msra.gmra.mxu1 %vm460_vm1, %v3564_v34  ;;  %v9435_v34 = vld [vmem:[%s13019_s5 + $0x218] sm:$0xff] }
0x14b8   : > { %8662 = vmatmul.msk.f32.vlgmr.msra.gmra.mxu0 %vm3384_vm10, %v9742_v21 }
0x14bd   : > { %v3656_v35 = vpop.f32.mrf.mxu3 }
0x14be   : > { %8665 = vmatmul.msk.f32.vlgmr.msrb.gmra.mxu1 %vm460_vm1, %v3656_v35  ;;  %v9436_v35 = vld [vmem:[%s13019_s5 + $0x220] sm:$0xff] }
0x1525   : > { %v3427_v36 = vpop.f32.mrf.mxu0 }
0x1526   : > { %v3451_v50 = vadd.f32 %v3450_v49, %v3427_v36  ;;  %v9437_v36 = vld [vmem:[%s13019_s5 + $0x210] sm:$0xff] }
0x1527   : > { %v9445_v49 = vld [vmem:[%s13019_s5 + $0x2b0] sm:$0xff] }
0x152b   : > { %v3495_v44 = vpop.f32.mrf.mxu1 }
0x152c   : > { %v3498_v51 = vadd.f32 %v3495_v44, %v3451_v50  ;;  %v9444_v44 = vld [vmem:[%s13019_s5 + $0x2b8] sm:$0xff]  ;;  %v9447_v50 = vld [vmem:[%s13019_s5 + $0x2a0] sm:$0xff] }
0x152d   : > { %v3518_v37 = vpop.f32.mrf.mxu0 }
0x152e   : > { %8659 = vmatmul.msk.f32.vlgmr.msrb.gmra.mxu2 %vm460_vm1, %v3518_v37  ;;  %v9438_v37 = vld [vmem:[%s13019_s5 + $0x2d8] sm:$0xff] }
0x152f   : > { %3745 = vmatpush.msrb.mxu2 %v9421_v18  ;;  %v9439_v18 = vld [vmem:[%s13019_s5 + $0x208] sm:$0xff] }
0x1531   : > { %3746 = vmatpush.msrb.mxu2 %v9422_v40  ;;  %v9440_v40 = vld [vmem:[%s13019_s5 + $0x2d0] sm:$0xff] }
0x1533   : > { %3747 = vmatpush.msrb.mxu2 %v9423_v41  ;;  %v3587_v17 = vpop.f32.mrf.mxu1  ;;  %v9441_v41 = vld [vmem:[%s13019_s5 + $0x200] sm:$0xff] }
0x1535   : > { %v3610_v2 = vpop.f32.mrf.mxu0  ;;  %3748 = vmatpush.msrb.mxu2 %v9424_v43  ;;  %v9443_v43 = vld [vmem:[%s13019_s5 + $0x2c0] sm:$0xff] }
0x1536   : > { %8663 = vmatmul.msk.f32.vlgmr.msra.gmra.mxu2 %vm460_vm1, %v3610_v2  ;;  %v9442_v2 = vld [vmem:[%s13019_s5 + $0x2c8] sm:$0xff] }
0x153b   : > { %v3679_v55 = vpop.f32.mrf.mxu1 }
0x15b1   : > { %v3541_v12 = vpop.f32.mrf.mxu2 }
0x15b2   : > { %v3544_v52 = vadd.f32 %v3541_v12, %v3498_v51 }
0x15b4   : > { %v3590_v53 = vadd.f32 %v3587_v17, %v3544_v52  ;;  %v9446_v17 = vld [vmem:[%s13019_s5 + $0x2a8] sm:$0xff]  ;;  %v9448_v52 = vld [vmem:[%s13019_s5 + $0x258] sm:$0xff] }
0x15b9   : > { %v3633_v54 = vpop.f32.mrf.mxu2 }
0x15ba   : > { %v3636_v56 = vadd.f32 %v3633_v54, %v3590_v53  ;;  %v9449_v53 = vld [vmem:[%s13019_s5 + $0x250] sm:$0xff]  ;;  %v9450_v54 = vld [vmem:[%s13019_s5 + $0x248] sm:$0xff] }
0x15bc   : > { %v3682_v57 = vadd.f32 %v3679_v55, %v3636_v56  ;;  %v9451_v55 = vld [vmem:[%s13019_s5 + $0x240] sm:$0xff] }
0x15be   : > { %v3683_v61 = vadd.f32 %v9425_v59, %v3682_v57 }
0x15c0   : > { %v3684_v46 = vmax.f32 %v3683_v61, 0.0 }
0x15c2   : > { %v10979_v42 = vadd.f32 %v3684_v46, %v10858_v38  ;;  %v9452_v46 = vld [vmem:[%s13019_s5 + $0x278] sm:$0xff] }
0x15c4   : > { %v3686_v31 = vsel %vm460_vm1, %v10979_v42, 0.0 }
0x15c5   : > { %3687 = vadd.xlane.f32.xlu1 %v3686_v31  ;;  %v9453_v31 = vld [vmem:[%s13019_s5 + $0x270] sm:$0xff] }
0x1638   : > { %v3688_v45 = vpop.xlane.xlu1 %3687 }
0x1639   : > { %v3689_v62 = vmul.f32 %v3688_v45, %v9679_v24  ;;  %v9454_v45 = vld [vmem:[%s13019_s5 + $0x268] sm:$0xff] }
0x163b   : > { %v3690_v0 = vsub.f32 %v10979_v42, %v3689_v62 }
0x163d   : > { %v3691_v27 = vmul.f32 %v3690_v0, %v3690_v0 }
0x163f   : > { %v3692_v39 = vsel %vm460_vm1, %v3691_v27, 0.0 }
0x1640   : > { %3693 = vadd.xlane.f32.xlu0 %v3692_v39 }
0x16b3   : > { %v3694_v47 = vpop.xlane.xlu0 %3693 }
0x16b4   : > { %v3695_v48 = vmul.f32 %v3694_v47, %v9679_v24 }
0x16b6   : > { %v3696_v4 = vadd.f32 1e-06, %v3695_v48 }
0x16b8   : > { %9163 = vrsqrt.f32 %v3696_v4  ;;  %vm3703_vm8 = vweird.f32 %v3696_v4 }
0x16be   : > { %v9164_v38 = vpop.eup %9163 }
0x16bf   : > { %v3698_v5 = vmul.f32 %v9164_v38, %v3696_v4  ;;  %vm3704_vm7 = vweird.f32 %v9164_v38 }
0x16c0   : > { %vm3705_vm9 = vmor %vm3703_vm8, %vm3704_vm7  ;;  %vm5142_vm8 = vcmask 1040384  }
0x16c1   : > { %v3699_v19 = vmul.f32 %v9164_v38, %v3698_v5 }
0x16c3   : > { %v3700_v11 = vmul.f32 0.5, %v3699_v19 }
0x16c5   : > { %v3701_v25 = vsub.f32 1.5, %v3700_v11 }
0x16c7   : > { %v3702_v8 = vmul.f32 %v9164_v38, %v3701_v25 }
0x16c9   : > { %v3706_v6 = vsel %vm3705_vm9, %v9164_v38, %v3702_v8  ;;  %vm5333_vm9 = vcmask 138240  }
0x16ca   : > { %v3707_v10 = vmul.f32 %v3706_v6, %v3690_v0  ;;  %v9455_v0 = vld [vmem:[%s13019_s5 + $0x260] sm:$0xff] }
0x16cc   : > { %v3708_v15 = vmul.f32 %v9426_v16, %v3707_v10  ;;  %v9456_v10 = vld [vmem:[%s13019_s5 + $0x99] ss:$0 sm:$0xff] }
0x16ce   : > { %v3709_v20 = vadd.f32 %v9427_v23, %v3708_v15 }
0x16d0   : > { %3725 = vmatpush.msrb.mxu0 %v3709_v20  ;;  %8668 = vmatmul.msk.f32.vlgmr.msrb.gmra.mxu3 %vm460_vm1, %v3709_v20 }
0x16d1   : > { %3791 = vmatpush.msra.mxu1 %v3709_v20  ;;  %3835 = vmatpush.msra.mxu2 %v3709_v20 }
0x16d2   : > { %8666 = vmatmul.msk.f32.vlgmr.msrb.gmra.mxu0 %vm3384_vm10, %v9707_v9  ;;  %8669 = vmatmul.msk.f32.vlgmr.msra.gmra.mxu1 %vm3384_vm10, %v9719_v14 }
0x16d3   : > { %3879 = vmatpush.msrb.mxu1 %v3709_v20  ;;  %3811 = vmatpush.msra.mxu0 %v9428_v28 }
0x16d4   : > { %3943 = vmatpush.msrb.mxu3 %v9429_v30 }
0x16d5   : > { %3967 = vmatpush.msra.mxu1 %v3709_v20  ;;  %3812 = vmatpush.msra.mxu0 %v9430_v29 }
0x16d6   : > { %3944 = vmatpush.msrb.mxu3 %v9431_v7 }
0x16d7   : > { %3813 = vmatpush.msra.mxu0 %v9432_v58 }
0x16d8   : > { %3945 = vmatpush.msrb.mxu3 %v9433_v32 }
0x16d9   : > { %3814 = vmatpush.msra.mxu0 %v9434_v33 }
0x16da   : > { %3946 = vmatpush.msrb.mxu3 %v9436_v35  ;;  %8673 = vmatmul.msk.f32.vlgmr.msrb.gmra.mxu1 %vm3384_vm10, %v9744_v22 }
0x16db   : > { %3899 = vmatpush.msrb.mxu0 %v9435_v34  ;;  %4081 = vmatpush.msrb.mxu1 %v9438_v37 }
0x16dd   : > { %3900 = vmatpush.msrb.mxu0 %v9437_v36  ;;  %4082 = vmatpush.msrb.mxu1 %v9440_v40 }
0x16df   : > { %3901 = vmatpush.msrb.mxu0 %v9439_v18  ;;  %4083 = vmatpush.msrb.mxu1 %v9442_v2 }
0x16e1   : > { %3902 = vmatpush.msrb.mxu0 %v9441_v41  ;;  %4084 = vmatpush.msrb.mxu1 %v9443_v43  ;;  %v9457_v43 = vld [vmem:[%s13019_s5 + $0x8a] ss:$0 sm:$0xff] }
0x16e2   : > { %8677 = vmatmul.msk.f32.vlgmr.msra.gmra.mxu1 %vm3384_vm10, %v9758_v26 }
0x16e3   : > { %4168 = vmatpush.msra.mxu1 %v9444_v44 }
0x16e5   : > { %4169 = vmatpush.msra.mxu1 %v9445_v49  ;;  %v9458_v49 = vld [vmem:[%s13019_s5 + $0x92] ss:$0 sm:$0xff] }
0x16e7   : > { %4170 = vmatpush.msra.mxu1 %v9446_v17 }
0x16e9   : > { %4171 = vmatpush.msra.mxu1 %v9447_v50  ;;  %v9459_v50 = vld [vmem:[%s13019_s5 + $0x298] sm:$0xff] }
0x174f   : > { %v3727_v12 = vpop.f32.mrf.mxu0  ;;  %v3793_v51 = vpop.f32.mrf.mxu1 }
0x1750   : > { %8667 = vmatmul.msk.f32.vlgmr.msrb.gmra.mxu2 %vm460_vm1, %v3727_v12  ;;  %8670 = vmatmul.msk.f32.vlgmr.msra.gmra.mxu0 %vm460_vm1, %v3793_v51  ;;  %v9460_v12 = vld [vmem:[%s13019_s5 + $0x318] sm:$0xff]  ;;  %v9461_v51 = vld [vmem:[%s13019_s5 + $0x290] sm:$0xff] }
0x1751   : > { %3923 = vmatpush.msrb.mxu2 %v3709_v20  ;;  %3987 = vmatpush.msra.mxu0 %v9448_v52  ;;  %v9462_v52 = vld [vmem:[%s13019_s5 + $0x310] sm:$0xff] }
0x1753   : > { %3988 = vmatpush.msra.mxu0 %v9449_v53  ;;  %v3773_v39 = vpop.f32.mrf.mxu3  ;;  %v9463_v53 = vld [vmem:[%s13019_s5 + $0x288] sm:$0xff] }
0x1755   : > { %3989 = vmatpush.msra.mxu0 %v9450_v54  ;;  %v9464_v54 = vld [vmem:[%s13019_s5 + $0x308] sm:$0xff] }
0x1757   : > { %3990 = vmatpush.msra.mxu0 %v9451_v55  ;;  %v3881_v56 = vpop.f32.mrf.mxu1  ;;  %v9465_v55 = vld [vmem:[%s13019_s5 + $0x280] sm:$0xff] }
0x1758   : > { %8671 = vmatmul.msk.f32.vlgmr.msra.gmra.mxu2 %vm3384_vm10, %v9717_v13  ;;  %8674 = vmatmul.msk.f32.vlgmr.msrb.gmra.mxu0 %vm460_vm1, %v3881_v56  ;;  %v9466_v56 = vld [vmem:[%s13019_s5 + $0x2f8] sm:$0xff] }
0x175f   : > { %v3969_v57 = vpop.f32.mrf.mxu1 }
0x1760   : > { %8675 = vmatmul.msk.f32.vlgmr.msrb.gmra.mxu2 %vm3384_vm10, %v9742_v21  ;;  %8678 = vmatmul.msk.f32.vlgmr.msra.gmra.mxu0 %vm460_vm1, %v3969_v57  ;;  %v9467_v57 = vld [vmem:[%s13019_s5 + $0x300] sm:$0xff] }
0x17cd   : > { %v3816_v27 = vpop.f32.mrf.mxu0 }
0x17d3   : > { %v3750_v59 = vpop.f32.mrf.mxu2 }
0x17d4   : > { %v3774_v47 = vadd.f32 %v3773_v39, %v3750_v59  ;;  %v9468_v59 = vld [vmem:[%s13019_s5 + $0x2f0] sm:$0xff] }
0x17d5   : > { %v3904_v48 = vpop.f32.mrf.mxu0  ;;  %v9476_v39 = vld [vmem:[%s13019_s5 + $0x390] sm:$0xff] }
0x17d6   : > { %v3819_v38 = vadd.f32 %v3816_v27, %v3774_v47  ;;  %v9475_v27 = vld [vmem:[%s13019_s5 + $0x398] sm:$0xff]  ;;  %v9477_v47 = vld [vmem:[%s13019_s5 + $0x388] sm:$0xff] }
0x17db   : > { %v3837_v61 = vpop.f32.mrf.mxu2 }
0x17dc   : > { %8672 = vmatmul.msk.f32.vlgmr.msra.gmra.mxu3 %vm460_vm1, %v3837_v61  ;;  %v9469_v61 = vld [vmem:[%s13019_s5 + $0x3b8] sm:$0xff] }
0x17dd   : > { %4058 = vmatpush.msra.mxu3 %v9452_v46  ;;  %v3992_v25 = vpop.f32.mrf.mxu0  ;;  %v9470_v46 = vld [vmem:[%s13019_s5 + $0x2e8] sm:$0xff] }
0x17df   : > { %4059 = vmatpush.msra.mxu3 %v9453_v31  ;;  %v9471_v31 = vld [vmem:[%s13019_s5 + $0x3b0] sm:$0xff] }
0x17e1   : > { %4060 = vmatpush.msra.mxu3 %v9454_v45  ;;  %v9472_v45 = vld [vmem:[%s13019_s5 + $0x2e0] sm:$0xff] }
0x17e3   : > { %v3925_v62 = vpop.f32.mrf.mxu2  ;;  %4061 = vmatpush.msra.mxu3 %v9455_v0  ;;  %v9474_v0 = vld [vmem:[%s13019_s5 + $0x3a0] sm:$0xff] }
0x17e4   : > { %8676 = vmatmul.msk.f32.vlgmr.msrb.gmra.mxu3 %vm460_vm1, %v3925_v62  ;;  %v9473_v62 = vld [vmem:[%s13019_s5 + $0x3a8] sm:$0xff] }
0x185f   : > { %v3860_v4 = vpop.f32.mrf.mxu3 }
0x1860   : > { %v3863_v5 = vadd.f32 %v3860_v4, %v3819_v38  ;;  %v9479_v38 = vld [vmem:[%s13019_s5 + $0x338] sm:$0xff] }
0x1862   : > { %v3907_v19 = vadd.f32 %v3904_v48, %v3863_v5  ;;  %v9478_v48 = vld [vmem:[%s13019_s5 + $0x380] sm:$0xff]  ;;  %v9480_v5 = vld [vmem:[%s13019_s5 + $0x330] sm:$0xff] }
0x1867   : > { %v3948_v11 = vpop.f32.mrf.mxu3 }
0x1868   : > { %v3951_v8 = vadd.f32 %v3948_v11, %v3907_v19  ;;  %v9481_v11 = vld [vmem:[%s13019_s5 + $0x328] sm:$0xff] }
0x186a   : > { %v3995_v6 = vadd.f32 %v3992_v25, %v3951_v8  ;;  %v9482_v25 = vld [vmem:[%s13019_s5 + $0x320] sm:$0xff] }
0x186c   : > { %v3996_v16 = vadd.f32 %v9456_v10, %v3995_v6 }
0x186e   : > { %v3997_v15 = vmax.f32 %v3996_v16, 0.0 }
0x1870   : > { %v11100_v23 = vadd.f32 %v3997_v15, %v10979_v42  ;;  %v9483_v15 = vld [vmem:[%s13019_s5 + $0x358] sm:$0xff] }
0x1872   : > { %v3999_v20 = vsel %vm460_vm1, %v11100_v23, 0.0 }
0x1873   : > { %4000 = vadd.xlane.f32.xlu2 %v3999_v20  ;;  %v9484_v20 = vld [vmem:[%s13019_s5 + $0x350] sm:$0xff] }
0x18e6   : > { %v4001_v28 = vpop.xlane.xlu2 %4000 }
0x18e7   : > { %v4002_v30 = vmul.f32 %v4001_v28, %v9679_v24  ;;  %v9485_v28 = vld [vmem:[%s13019_s5 + $0x348] sm:$0xff] }
0x18e9   : > { %v4003_v29 = vsub.f32 %v11100_v23, %v4002_v30 }
0x18eb   : > { %v4004_v7 = vmul.f32 %v4003_v29, %v4003_v29 }
0x18ed   : > { %v4005_v58 = vsel %vm460_vm1, %v4004_v7, 0.0 }
0x18ee   : > { %4006 = vadd.xlane.f32.xlu1 %v4005_v58 }
0x1961   : > { %v4007_v32 = vpop.xlane.xlu1 %4006 }
0x1962   : > { %v4008_v33 = vmul.f32 %v4007_v32, %v9679_v24 }
0x1964   : > { %v4009_v34 = vadd.f32 1e-06, %v4008_v33 }
0x1966   : > { %9165 = vrsqrt.f32 %v4009_v34  ;;  %vm4016_vm12 = vweird.f32 %v4009_v34 }
0x196c   : > { %v9166_v42 = vpop.eup %9165 }
0x196d   : > { %v4011_v35 = vmul.f32 %v9166_v42, %v4009_v34  ;;  %vm4017_vm11 = vweird.f32 %v9166_v42 }
0x196e   : > { %vm4018_vm13 = vmor %vm4016_vm12, %vm4017_vm11  ;;  %vm5340_vm11 = vcmask 131072   ;;  %vm8338_vm12 = vcmask 1046528  }
0x196f   : > { %v4012_v36 = vmul.f32 %v9166_v42, %v4011_v35 }
0x1971   : > { %v4013_v37 = vmul.f32 0.5, %v4012_v36 }
0x1973   : > { %v4014_v18 = vsub.f32 1.5, %v4013_v37 }
0x1975   : > { %v4015_v40 = vmul.f32 %v9166_v42, %v4014_v18 }
0x1977   : > { %v4019_v41 = vsel %vm4018_vm13, %v9166_v42, %v4015_v40  ;;  %vm8371_vm13 = vcmask 123904  }
0x1978   : > { %v4020_v2 = vmul.f32 %v4019_v41, %v4003_v29  ;;  %v9486_v29 = vld [vmem:[%s13019_s5 + $0x340] sm:$0xff] }
0x197a   : > { %v4021_v44 = vmul.f32 %v9457_v43, %v4020_v2  ;;  %v9487_v2 = vld [vmem:[%s13019_s5 + $0x9a] ss:$0 sm:$0xff] }
0x197c   : > { %v4022_v17 = vadd.f32 %v9458_v49, %v4021_v44 }
0x197e   : > { %4038 = vmatpush.msra.mxu2 %v4022_v17  ;;  %8681 = vmatmul.msk.f32.vlgmr.msrb.gmra.mxu1 %vm460_vm1, %v4022_v17 }
0x197f   : > { %4104 = vmatpush.msrb.mxu0 %v4022_v17  ;;  %4148 = vmatpush.msrb.mxu3 %v4022_v17 }
0x1980   : > { %8679 = vmatmul.msk.f32.vlgmr.msra.gmra.mxu2 %vm3384_vm10, %v9707_v9  ;;  %8682 = vmatmul.msk.f32.vlgmr.msrb.gmra.mxu0 %vm3384_vm10, %v9719_v14 }
0x1981   : > { %4192 = vmatpush.msra.mxu0 %v4022_v17  ;;  %4124 = vmatpush.msrb.mxu2 %v9459_v50 }
0x1982   : > { %4256 = vmatpush.msrb.mxu1 %v9460_v12 }
0x1983   : > { %4280 = vmatpush.msrb.mxu0 %v4022_v17  ;;  %4125 = vmatpush.msrb.mxu2 %v9461_v51 }
0x1984   : > { %4257 = vmatpush.msrb.mxu1 %v9462_v52 }
0x1985   : > { %4126 = vmatpush.msrb.mxu2 %v9463_v53 }
0x1986   : > { %4258 = vmatpush.msrb.mxu1 %v9464_v54 }
0x1987   : > { %4127 = vmatpush.msrb.mxu2 %v9465_v55 }
0x1988   : > { %4259 = vmatpush.msrb.mxu1 %v9467_v57  ;;  %8686 = vmatmul.msk.f32.vlgmr.msra.gmra.mxu0 %vm3384_vm10, %v9744_v22 }
0x1989   : > { %4212 = vmatpush.msra.mxu2 %v9466_v56  ;;  %4394 = vmatpush.msra.mxu0 %v9469_v61 }
0x198b   : > { %4213 = vmatpush.msra.mxu2 %v9468_v59  ;;  %4395 = vmatpush.msra.mxu0 %v9471_v31 }
0x198d   : > { %4214 = vmatpush.msra.mxu2 %v9470_v46  ;;  %4396 = vmatpush.msra.mxu0 %v9473_v62 }
0x198f   : > { %4215 = vmatpush.msra.mxu2 %v9472_v45  ;;  %4397 = vmatpush.msra.mxu0 %v9474_v0  ;;  %v9488_v0 = vld [vmem:[%s13019_s5 + $0x8b] ss:$0 sm:$0xff] }
0x1990   : > { %8690 = vmatmul.msk.f32.vlgmr.msrb.gmra.mxu0 %vm3384_vm10, %v9758_v26 }
0x1991   : > { %4481 = vmatpush.msrb.mxu0 %v9475_v27 }
0x1993   : > { %4482 = vmatpush.msrb.mxu0 %v9476_v39  ;;  %v9489_v39 = vld [vmem:[%s13019_s5 + $0x93] ss:$0 sm:$0xff] }
0x1995   : > { %4483 = vmatpush.msrb.mxu0 %v9477_v47 }
0x1997   : > { %4484 = vmatpush.msrb.mxu0 %v9478_v48  ;;  %v9490_v48 = vld [vmem:[%s13019_s5 + $0x378] sm:$0xff] }
0x19fb   : > { %v4086_v58 = vpop.f32.mrf.mxu1 }
0x19fd   : > { %v4106_v4 = vpop.f32.mrf.mxu0 }
0x19fe   : > { %8683 = vmatmul.msk.f32.vlgmr.msrb.gmra.mxu2 %vm460_vm1, %v4106_v4  ;;  %v9491_v4 = vld [vmem:[%s13019_s5 + $0x3f8] sm:$0xff] }
0x19ff   : > { %4300 = vmatpush.msrb.mxu2 %v9479_v38  ;;  %v9492_v38 = vld [vmem:[%s13019_s5 + $0x370] sm:$0xff] }
0x1a01   : > { %4301 = vmatpush.msrb.mxu2 %v9480_v5  ;;  %v9495_v5 = vld [vmem:[%s13019_s5 + $0x3e8] sm:$0xff] }
0x1a03   : > { %v4040_v19 = vpop.f32.mrf.mxu2  ;;  %4302 = vmatpush.msrb.mxu2 %v9481_v11  ;;  %v9497_v11 = vld [vmem:[%s13019_s5 + $0x3d8] sm:$0xff] }
0x1a04   : > { %8680 = vmatmul.msk.f32.vlgmr.msra.gmra.mxu3 %vm460_vm1, %v4040_v19  ;;  %v9496_v19 = vld [vmem:[%s13019_s5 + $0x360] sm:$0xff] }
0x1a05   : > { %4236 = vmatpush.msra.mxu3 %v4022_v17  ;;  %4303 = vmatpush.msrb.mxu2 %v9482_v25  ;;  %v4194_v8 = vpop.f32.mrf.mxu0  ;;  %v9498_v25 = vld [vmem:[%s13019_s5 + $0x3e0] sm:$0xff] }
0x1a06   : > { %8687 = vmatmul.msk.f32.vlgmr.msra.gmra.mxu2 %vm460_vm1, %v4194_v8  ;;  %v9499_v8 = vld [vmem:[%s13019_s5 + $0x4e0] sm:$0xff] }
0x1a0c   : > { %8684 = vmatmul.msk.f32.vlgmr.msrb.gmra.mxu3 %vm3384_vm10, %v9717_v13 }
0x1a0d   : > { %v4282_v6 = vpop.f32.mrf.mxu0 }
0x1a0e   : > { %8691 = vmatmul.msk.f32.vlgmr.msrb.gmra.mxu2 %vm460_vm1, %v4282_v6  ;;  %v9500_v6 = vld [vmem:[%s13019_s5 + $0x3d0] sm:$0xff] }
0x1a14   : > { %8688 = vmatmul.msk.f32.vlgmr.msra.gmra.mxu3 %vm3384_vm10, %v9742_v21 }
0x1a81   : > { %v4129_v7 = vpop.f32.mrf.mxu2 }
0x1a87   : > { %v4063_v10 = vpop.f32.mrf.mxu3 }
0x1a88   : > { %v4087_v32 = vadd.f32 %v4086_v58, %v4063_v10  ;;  %v9502_v10 = vld [vmem:[%s13019_s5 + $0x3c8] sm:$0xff]  ;;  %v9509_v58 = vld [vmem:[%s13019_s5 + $0x400] sm:$0xff] }
0x1a89   : > { %v4217_v33 = vpop.f32.mrf.mxu2 }
0x1a8a   : > { %v4132_v42 = vadd.f32 %v4129_v7, %v4087_v32  ;;  %v9507_v7 = vld [vmem:[%s13019_s5 + $0x410] sm:$0xff]  ;;  %v9510_v32 = vld [vmem:[%s13019_s5 + $0x440] sm:$0xff] }
0x1a8f   : > { %v4150_v16 = vpop.f32.mrf.mxu3 }
0x1a90   : > { %8685 = vmatmul.msk.f32.vlgmr.msra.gmra.mxu1 %vm460_vm1, %v4150_v16  ;;  %v9503_v16 = vld [vmem:[%s13019_s5 + $0x4d0] sm:$0xff] }
0x1a91   : > { %4371 = vmatpush.msra.mxu1 %v9483_v15  ;;  %v4305_v18 = vpop.f32.mrf.mxu2  ;;  %v9504_v15 = vld [vmem:[%s13019_s5 + $0x3c0] sm:$0xff] }
0x1a93   : > { %4372 = vmatpush.msra.mxu1 %v9484_v20  ;;  %v9505_v20 = vld [vmem:[%s13019_s5 + $0x4c8] sm:$0xff] }
0x1a95   : > { %4373 = vmatpush.msra.mxu1 %v9485_v28 }
0x1a97   : > { %v4238_v30 = vpop.f32.mrf.mxu3  ;;  %4374 = vmatpush.msra.mxu1 %v9486_v29  ;;  %v9506_v29 = vld [vmem:[%s13019_s5 + $0x418] sm:$0xff] }
0x1a98   : > { %8689 = vmatmul.msk.f32.vlgmr.msrb.gmra.mxu1 %vm460_vm1, %v4238_v30 }
0x1b0d   : > { %v4173_v34 = vpop.f32.mrf.mxu1 }
0x1b0e   : > { %v4176_v35 = vadd.f32 %v4173_v34, %v4132_v42  ;;  %v9512_v34 = vld [vmem:[%s13019_s5 + $0x430] sm:$0xff]  ;;  %v9513_v42 = vld [vmem:[%s13019_s5 + $0x428] sm:$0xff] }
0x1b10   : > { %v4220_v36 = vadd.f32 %v4217_v33, %v4176_v35  ;;  %v9511_v33 = vld [vmem:[%s13019_s5 + $0x438] sm:$0xff] }
0x1b11   : > { %v9515_v35 = vld [vmem:[%s13019_s5 + $0x478] sm:$0xff] }
0x1b15   : > { %v4261_v37 = vpop.f32.mrf.mxu1 }
0x1b16   : > { %v4264_v40 = vadd.f32 %v4261_v37, %v4220_v36  ;;  %v9516_v36 = vld [vmem:[%s13019_s5 + $0x470] sm:$0xff]  ;;  %v9517_v37 = vld [vmem:[%s13019_s5 + $0x468] sm:$0xff] }
0x1b18   : > { %v4308_v41 = vadd.f32 %v4305_v18, %v4264_v40 }
0x1b1a   : > { %v4309_v43 = vadd.f32 %v9487_v2, %v4308_v41  ;;  %v9518_v2 = vld [vmem:[%s13019_s5 + $0x460] sm:$0xff] }
0x1b1c   : > { %v4310_v44 = vmax.f32 %v4309_v43, 0.0  ;;  %v9519_v43 = vld [vmem:[%s13019_s5 + $0x458] sm:$0xff] }
0x1b1e   : > { %v11221_v49 = vadd.f32 %v4310_v44, %v11100_v23  ;;  %v9520_v44 = vld [vmem:[%s13019_s5 + $0x450] sm:$0xff] }
0x1b20   : > { %v4312_v17 = vsel %vm460_vm1, %v11221_v49, 0.0 }
0x1b21   : > { %4313 = vadd.xlane.f32.xlu0 %v4312_v17 }
0x1b94   : > { %v4314_v50 = vpop.xlane.xlu0 %4313 }
0x1b95   : > { %v4315_v12 = vmul.f32 %v4314_v50, %v9679_v24  ;;  %v9521_v50 = vld [vmem:[%s13019_s5 + $0x448] sm:$0xff] }
0x1b97   : > { %v4316_v51 = vsub.f32 %v11221_v49, %v4315_v12  ;;  %v9522_v12 = vld [vmem:[%s13019_s5 + $0x500] sm:$0xff] }
0x1b99   : > { %v4317_v52 = vmul.f32 %v4316_v51, %v4316_v51 }
0x1b9b   : > { %v4318_v53 = vsel %vm460_vm1, %v4317_v52, 0.0  ;;  %v9524_v52 = vld [vmem:[%s13019_s5 + $0x4f0] sm:$0xff] }
0x1b9c   : > { %4319 = vadd.xlane.f32.xlu2 %v4318_v53  ;;  %v9525_v53 = vld [vmem:[%s13019_s5 + $0x4e8] sm:$0xff] }
0x1c0f   : > { %v4320_v54 = vpop.xlane.xlu2 %4319 }
0x1c10   : > { %v4321_v55 = vmul.f32 %v4320_v54, %v9679_v24 }
0x1c12   : > { %v4322_v56 = vadd.f32 1e-06, %v4321_v55 }
0x1c14   : > { %9167 = vrsqrt.f32 %v4322_v56  ;;  %vm4329_vm15 = vweird.f32 %v4322_v56 }
0x1c1a   : > { %v9168_v23 = vpop.eup %9167 }
0x1c1b   : > { %v4324_v57 = vmul.f32 %v9168_v23, %v4322_v56  ;;  %vm4330_vm14 = vweird.f32 %v9168_v23 }
0x1c1c   : > { %vm4331_vm2 = vmor %vm4329_vm15, %vm4330_vm14 }
0x1c1d   : > { %v4325_v59 = vmul.f32 %v9168_v23, %v4324_v57 }
0x1c1f   : > { %v4326_v61 = vmul.f32 0.5, %v4325_v59 }
0x1c21   : > { %v4327_v46 = vsub.f32 1.5, %v4326_v61 }
0x1c23   : > { %v4328_v31 = vmul.f32 %v9168_v23, %v4327_v46 }
0x1c25   : > { %v4332_v45 = vsel %vm4331_vm2, %v9168_v23, %v4328_v31 }
0x1c26   : > { %v4333_v62 = vmul.f32 %v4332_v45, %v4316_v51  ;;  %v9523_v51 = vld [vmem:[%s13019_s5 + $0x4f8] sm:$0xff] }
0x1c28   : > { %v4334_v27 = vmul.f32 %v9488_v0, %v4333_v62 }
0x1c2a   : > { %v4335_v47 = vadd.f32 %v9489_v39, %v4334_v27  ;;  %v9526_v27 = vld [vmem:[%s13019_s5 + $0x9b] ss:$0 sm:$0xff] }
0x1c2c   : > { %4351 = vmatpush.msrb.mxu3 %v4335_v47  ;;  %8694 = vmatmul.msk.f32.vlgmr.msra.gmra.mxu0 %vm460_vm1, %v4335_v47 }
0x1c2d   : > { %4417 = vmatpush.msra.mxu2 %v4335_v47  ;;  %4461 = vmatpush.msrb.mxu1 %v4335_v47 }
0x1c2e   : > { %8692 = vmatmul.msk.f32.vlgmr.msrb.gmra.mxu3 %vm3384_vm10, %v9707_v9  ;;  %8695 = vmatmul.msk.f32.vlgmr.msra.gmra.mxu2 %vm3384_vm10, %v9719_v14  ;;  %v9493_v9 = vld [vmem:[%s13019_s5 + $0x3f0] sm:$0xff]  ;;  %v9494_v14 = vld [vmem:[%s13019_s5 + $0x368] sm:$0xff] }
0x1c2f   : > { %4505 = vmatpush.msrb.mxu2 %v4335_v47  ;;  %4437 = vmatpush.msra.mxu3 %v9490_v48 }
0x1c30   : > { %4569 = vmatpush.msra.mxu0 %v9491_v4 }
0x1c31   : > { %4593 = vmatpush.msra.mxu2 %v4335_v47  ;;  %4438 = vmatpush.msra.mxu3 %v9492_v38 }
0x1c32   : > { %4570 = vmatpush.msra.mxu0 %v9493_v9 }
0x1c33   : > { %4439 = vmatpush.msra.mxu3 %v9494_v14 }
0x1c34   : > { %4571 = vmatpush.msra.mxu0 %v9495_v5 }
0x1c35   : > { %4440 = vmatpush.msra.mxu3 %v9496_v19 }
0x1c36   : > { %8699 = vmatmul.msk.f32.vlgmr.msrb.gmra.mxu2 %vm3384_vm10, %v9744_v22  ;;  %4572 = vmatpush.msra.mxu0 %v9498_v25  ;;  %v9501_v22 = vld [vmem:[%s13019_s5 + $0x4d8] sm:$0xff] }
0x1c37   : > { %4525 = vmatpush.msrb.mxu3 %v9497_v11  ;;  %4704 = vmatpush.msrb.mxu2 %v9499_v8 }
0x1c39   : > { %4526 = vmatpush.msrb.mxu3 %v9500_v6  ;;  %4705 = vmatpush.msrb.mxu2 %v9501_v22 }
0x1c3b   : > { %4527 = vmatpush.msrb.mxu3 %v9502_v10  ;;  %4706 = vmatpush.msrb.mxu2 %v9503_v16 }
0x1c3d   : > { %4528 = vmatpush.msrb.mxu3 %v9504_v15  ;;  %4707 = vmatpush.msrb.mxu2 %v9505_v20 }
0x1c3e   : > { %8703 = vmatmul.msk.f32.vlgmr.msra.gmra.mxu2 %vm3384_vm10, %v9758_v26  ;;  %v9508_v26 = vld [vmem:[%s13019_s5 + $0x408] sm:$0xff] }
0x1ca9   : > { %v4399_v55 = vpop.f32.mrf.mxu0 }
0x1cb1   : > { %v4353_v28 = vpop.f32.mrf.mxu3  ;;  %v4419_v30 = vpop.f32.mrf.mxu2 }
0x1cb2   : > { %8693 = vmatmul.msk.f32.vlgmr.msra.gmra.mxu1 %vm460_vm1, %v4353_v28  ;;  %8696 = vmatmul.msk.f32.vlgmr.msra.gmra.mxu3 %vm460_vm1, %v4419_v30  ;;  %v9527_v30 = vld [vmem:[%s13019_s5 + $0x420] ss:$0 sm:$0xff] }
0x1cb3   : > { %4549 = vmatpush.msra.mxu1 %v4335_v47  ;;  %4613 = vmatpush.msra.mxu3 %v9506_v29 }
0x1cb5   : > { %4614 = vmatpush.msra.mxu3 %v9507_v7  ;;  %v9528_v7 = vld [vmem:[%s13019_s5 + $0x421] ss:$0 sm:$0xff] }
0x1cb7   : > { %4615 = vmatpush.msra.mxu3 %v9508_v26 }
0x1cb9   : > { %4616 = vmatpush.msra.mxu3 %v9509_v58  ;;  %v9529_v58 = vld [vmem:[%s13019_s5 + $0x4a0] sm:$0xff] }
0x1cba   : > { %8697 = vmatmul.msk.f32.vlgmr.msrb.gmra.mxu1 %vm3384_vm10, %v9717_v13  ;;  %v9514_v13 = vld [vmem:[%s13019_s5 + $0x480] sm:$0xff] }
0x1cbb   : > { %4664 = vmatpush.msrb.mxu1 %v9510_v32  ;;  %v9530_v32 = vld [vmem:[%s13019_s5 + $0x498] sm:$0xff] }
0x1cbd   : > { %4665 = vmatpush.msrb.mxu1 %v9511_v33  ;;  %v9531_v33 = vld [vmem:[%s13019_s5 + $0x490] sm:$0xff] }
0x1cbf   : > { %4666 = vmatpush.msrb.mxu1 %v9512_v34  ;;  %v9532_v34 = vld [vmem:[%s13019_s5 + $0x488] sm:$0xff] }
0x1cc1   : > { %4667 = vmatpush.msrb.mxu1 %v9513_v42  ;;  %v9533_v42 = vld [vmem:[%s13019_s5 + $0x4c0] sm:$0xff] }
0x1cc2   : > { %8701 = vmatmul.msk.f32.vlgmr.msra.gmra.mxu1 %vm3384_vm10, %v9742_v21  ;;  %v4507_v21 = vpop.f32.mrf.mxu2 }
0x1cc3   : > { %4763 = vmatpush.msra.mxu1 %v9514_v13  ;;  %8700 = vmatmul.msk.f32.vlgmr.msrb.gmra.mxu3 %vm460_vm1, %v4507_v21  ;;  %v9534_v13 = vld [vmem:[%s13019_s5 + $0x4b8] sm:$0xff]  ;;  %v9538_v21 = vld [vmem:[%s13019_s5 + $0x568] sm:$0xff] }
0x1cc5   : > { %4764 = vmatpush.msra.mxu1 %v9515_v35  ;;  %v9535_v35 = vld [vmem:[%s13019_s5 + $0x4b0] sm:$0xff] }
0x1cc7   : > { %4765 = vmatpush.msra.mxu1 %v9516_v36  ;;  %v9536_v36 = vld [vmem:[%s13019_s5 + $0x4a8] sm:$0xff] }
0x1cc9   : > { %4766 = vmatpush.msra.mxu1 %v9517_v37  ;;  %v9537_v37 = vld [vmem:[%s13019_s5 + $0x570] sm:$0xff] }
0x1cca   : > { %v4595_v18 = vpop.f32.mrf.mxu2 }
0x1ccb   : > { %8704 = vmatmul.msk.f32.vlgmr.msra.gmra.mxu3 %vm460_vm1, %v4595_v18  ;;  %v9539_v18 = vld [vmem:[%s13019_s5 + $0x560] sm:$0xff] }
0x1d2f   : > { %v4376_v40 = vpop.f32.mrf.mxu1 }
0x1d30   : > { %v4400_v23 = vadd.f32 %v4399_v55, %v4376_v40  ;;  %v9540_v40 = vld [vmem:[%s13019_s5 + $0x558] sm:$0xff] }
0x1d35   : > { %v4442_v54 = vpop.f32.mrf.mxu3 }
0x1d36   : > { %v4445_v59 = vadd.f32 %v4442_v54, %v4400_v23  ;;  %v9546_v23 = vld [vmem:[%s13019_s5 + $0x510] sm:$0xff] }
0x1d37   : > { %v4463_v41 = vpop.f32.mrf.mxu1 }
0x1d38   : > { %8698 = vmatmul.msk.f32.vlgmr.msrb.gmra.mxu0 %vm460_vm1, %v4463_v41 }
0x1d39   : > { %4684 = vmatpush.msrb.mxu0 %v9518_v2 }
0x1d3b   : > { %4685 = vmatpush.msrb.mxu0 %v9519_v43  ;;  %v9541_v43 = vld [vmem:[%s13019_s5 + $0x548] ss:$0 sm:$0xff] }
0x1d3d   : > { %4686 = vmatpush.msrb.mxu0 %v9520_v44 }
0x1d3f   : > { %v4551_v17 = vpop.f32.mrf.mxu1  ;;  %4687 = vmatpush.msrb.mxu0 %v9521_v50 }
0x1d40   : > { %8702 = vmatmul.msk.f32.vlgmr.msra.gmra.mxu0 %vm460_vm1, %v4551_v17  ;;  %v9542_v17 = vld [vmem:[%s13019_s5 + $0x549] ss:$0 sm:$0xff] }
0x1d41   : > { %4783 = vmatpush.msra.mxu0 %v9522_v12  ;;  %v9543_v12 = vld [vmem:[%s13019_s5 + $0x520] sm:$0xff] }
0x1d43   : > { %4784 = vmatpush.msra.mxu0 %v9523_v51  ;;  %v9544_v51 = vld [vmem:[%s13019_s5 + $0x518] sm:$0xff] }
0x1d45   : > { %4785 = vmatpush.msra.mxu0 %v9524_v52 }
0x1d46   : > { %v4530_v56 = vpop.f32.mrf.mxu3 }
0x1d47   : > { %4786 = vmatpush.msra.mxu0 %v9525_v53  ;;  %v9545_v53 = vld [vmem:[%s13019_s5 + $0x54d] ss:$0 sm:$0xff] }
0x1d4e   : > { %v4618_v45 = vpop.f32.mrf.mxu3 }
0x1db5   : > { %v4486_v57 = vpop.f32.mrf.mxu0 }
0x1db6   : > { %v4489_v61 = vadd.f32 %v4486_v57, %v4445_v59  ;;  %v9547_v57 = vld [vmem:[%s13019_s5 + $0x54a] ss:$0 sm:$0xff] }
0x1db8   : > { %v4533_v46 = vadd.f32 %v4530_v56, %v4489_v61  ;;  %v9548_v61 = vld [vmem:[%s13019_s5 + $0x54e] ss:$0 sm:$0xff] }
0x1dbd   : > { %v4574_v31 = vpop.f32.mrf.mxu0 }
0x1dbe   : > { %v4577_v62 = vadd.f32 %v4574_v31, %v4533_v46  ;;  %v9549_v31 = vld [vmem:[%s13019_s5 + $0x508] sm:$0xff] }
0x1dc0   : > { %v4621_v0 = vadd.f32 %v4618_v45, %v4577_v62  ;;  %v9550_v45 = vld [vmem:[%s13019_s5 + $0x540] sm:$0xff]  ;;  %v9551_v62 = vld [vmem:[%s13019_s5 + $0x538] sm:$0xff] }
0x1dc2   : > { %v4622_v39 = vadd.f32 %v9526_v27, %v4621_v0  ;;  %v9552_v0 = vld [vmem:[%s13019_s5 + $0x530] sm:$0xff]  ;;  %v9553_v27 = vld [vmem:[%s13019_s5 + $0x528] sm:$0xff] }
0x1dc4   : > { %v4623_v47 = vmax.f32 %v4622_v39, 0.0  ;;  %v3352_v39 = vld [vmem:[%s361_s15] sm:$0x1]  ;;  %s365_s15 = scalar_lea.vmem %s13022_s8, %s8477_s12 }
0x1dc6   : > { %v11366_v48 = vadd.f32 %v4623_v47, %v11221_v49  ;;  %v3353_v47 = vsub.f32 1.0, %v3352_v39 }
0x1dc8   : > { %v4625_v4 = vsel %vm460_vm1, %v11366_v48, 0.0 }
0x1dc9   : > { %4626 = vadd.xlane.f32.xlu1 %v4625_v4  ;;  %v3354_v4 = vmul.f32 -1e+30, %v3353_v47 }
0x1e3c   : > { %v4627_v38 = vpop.xlane.xlu1 %4626 }
0x1e3d   : > { %v4628_v9 = vmul.f32 %v4627_v38, %v9679_v24  ;;  %v3358_v38 = vperm.slane %v3354_v4, 0 }
0x1e3f   : > { %v4629_v14 = vsub.f32 %v11366_v48, %v4628_v9 }
0x1e41   : > { %v4630_v5 = vmul.f32 %v4629_v14, %v4629_v14 }
0x1e43   : > { %v4631_v19 = vsel %vm460_vm1, %v4630_v5, 0.0 }
0x1e44   : > { %4632 = vadd.xlane.f32.xlu0 %v4631_v19 }
0x1eb7   : > { %v4633_v11 = vpop.xlane.xlu0 %4632 }
0x1eb8   : > { %v4634_v25 = vmul.f32 %v4633_v11, %v9679_v24 }
0x1eba   : > { %v4635_v8 = vadd.f32 1e-06, %v4634_v25 }
0x1ebc   : > { %9169 = vrsqrt.f32 %v4635_v8  ;;  %vm4642_vm4 = vweird.f32 %v4635_v8 }
0x1ec2   : > { %v9170_v49 = vpop.eup %9169 }
0x1ec3   : > { %v4637_v6 = vmul.f32 %v9170_v49, %v4635_v8  ;;  %vm4643_vm3 = vweird.f32 %v9170_v49 }
0x1ec4   : > { %vm4644_vm0 = vmor %vm4642_vm4, %vm4643_vm3 }
0x1ec5   : > { %v4638_v22 = vmul.f32 %v9170_v49, %v4637_v6 }
0x1ec7   : > { %v4639_v10 = vmul.f32 0.5, %v4638_v22  ;;  %v9554_v22 = vld [vmem:[%s13019_s5 + $0x54f] ss:$0 sm:$0xff] }
0x1ec9   : > { %v4640_v16 = vsub.f32 1.5, %v4639_v10 }
0x1ecb   : > { %v4641_v15 = vmul.f32 %v9170_v49, %v4640_v16 }
0x1ecd   : > { %v4645_v20 = vsel %vm4644_vm0, %v9170_v49, %v4641_v15 }
0x1ece   : > { %v4646_v28 = vmul.f32 %v4645_v20, %v4629_v14 }
0x1ed0   : > { %v4647_v29 = vmul.f32 %v9527_v30, %v4646_v28 }
0x1ed2   : > { %v11380_v26 = vadd.f32 %v9528_v7, %v4647_v29 }
0x1ed4   : > { %8705 = vmatmul.msk.f32.vlgmr.msrb.gmra.mxu1 %vm460_vm1, %v11380_v26  ;;  %8706 = vmatmul.msk.f32.vlgmr.msrb.gmra.mxu0 %vm460_vm1, %v11380_v26 }
0x1ed5   : > { %8707 = vmatmul.msk.f32.vlgmr.msrb.gmra.mxu2 %vm460_vm1, %v11380_v26  ;;  %4885 = vmatpush.msrb.mxu0 %v9529_v58 }
0x1ed7   : > { %4886 = vmatpush.msrb.mxu0 %v9530_v32 }
0x1ed9   : > { %4887 = vmatpush.msrb.mxu0 %v9531_v33 }
0x1edb   : > { %4888 = vmatpush.msrb.mxu0 %v9532_v34 }
0x1edc   : > { %8710 = vmatmul.msk.f32.vlgmr.msra.gmra.mxu1 %vm460_vm1, %v11380_v26  ;;  %8711 = vmatmul.msk.f32.vlgmr.msra.gmra.mxu0 %vm460_vm1, %v11380_v26 }
0x1edd   : > { %4985 = vmatpush.msra.mxu0 %v9533_v42 }
0x1edf   : > { %4986 = vmatpush.msra.mxu0 %v9534_v13 }
0x1ee1   : > { %4987 = vmatpush.msra.mxu0 %v9535_v35 }
0x1ee3   : > { %4988 = vmatpush.msra.mxu0 %v9536_v36  ;;  %v9555_v36 = vld [vmem:[%s13019_s5 + $0x550] ss:$0 sm:$0xff] }
0x1ee4   : > { %8716 = vmatmul.msk.f32.vlgmr.msrb.gmra.mxu0 %vm460_vm1, %v11380_v26 }
0x1ee5   : > { %5113 = vmatpush.msrb.mxu0 %v9537_v37 }
0x1ee7   : > { %5114 = vmatpush.msrb.mxu0 %v9538_v21 }
0x1ee9   : > { %5115 = vmatpush.msrb.mxu0 %v9539_v18 }
0x1eeb   : > { %5116 = vmatpush.msrb.mxu0 %v9540_v40 }
0x1eec   : > { %8721 = vmatmul.msk.f32.vlgmr.msra.gmra.mxu0 %vm460_vm1, %v11380_v26 }
0x1f51   : > { %v4669_v41 = vpop.f32.mrf.mxu1  ;;  %v4689_v2 = vpop.f32.mrf.mxu0 }
0x1f52   : > { %v11435_v44 = vadd.f32 %v9541_v43, %v4669_v41  ;;  %v4690_v50 = vadd.f32 %v9542_v17, %v4689_v2  ;;  %v9556_v41 = vld [vmem:[%s13019_s5 + $0x54b] ss:$0 sm:$0xff]  ;;  %v9557_v17 = vld [vmem:[%s13019_s5 + $0x54c] ss:$0 sm:$0xff] }
0x1f54   : > { %8708 = vmatpush.xpose.msk.msrb.mxu3 %vm460_vm1, %v11435_v44  ;;  %8712 = vmatpush.xpose.msk.msra.mxu2 %vm460_vm1, %v11435_v44 }
0x1f57   : > { %8709 = vmatmul.msk.f32.vlgmr.msrb.gmra.mxu3 %vm460_vm1, %v4690_v50 }
0x1f58   : > { %4905 = vmatpush.msrb.mxu2 %v9543_v12  ;;  %v4709_v52 = vpop.f32.mrf.mxu2 }
0x1f59   : > { %v4710_v54 = vadd.f32 %v9545_v53, %v4709_v52  ;;  %v4768_v55 = vpop.f32.mrf.mxu1  ;;  %v4788_v56 = vpop.f32.mrf.mxu0 }
0x1f5a   : > { %4906 = vmatpush.msrb.mxu2 %v9544_v51  ;;  %v4769_v59 = vadd.f32 %v9547_v57, %v4768_v55  ;;  %v4789_v46 = vadd.f32 %v9548_v61, %v4788_v56 }
0x1f5b   : > { %4868 = vmatpush.msrb.mxu1 %v4710_v54 }
0x1f5c   : > { %4907 = vmatpush.msrb.mxu2 %v9546_v23  ;;  %4845 = vmatpush.msra.mxu3 %v4789_v46 }
0x1f5d   : > { %8713 = vmatmul.msk.f32.vlgmr.msra.gmra.mxu2 %vm460_vm1, %v4769_v59 }
0x1f5e   : > { %4908 = vmatpush.msrb.mxu2 %v9549_v31  ;;  %8718 = vmatpush.xpose.msk.msrb.mxu3 %vm460_vm1, %v11435_v44 }
0x1f60   : > { %5005 = vmatpush.msra.mxu2 %v9550_v45 }
0x1f61   : > { %v4890_v40 = vpop.f32.mrf.mxu0 }
0x1f62   : > { %5006 = vmatpush.msra.mxu2 %v9551_v62  ;;  %v4891_v2 = vadd.f32 %v9556_v41, %v4890_v40  ;;  %v5190_v40 = vld [vmem:[%s13019_s5 + $0x608] sm:$0xff] }
0x1f63   : > { %v5222_v41 = vld [vmem:[%s13019_s5 + $0x628] sm:$0xff] }
0x1f64   : > { %5007 = vmatpush.msra.mxu2 %v9552_v0 }
0x1f65   : > { %8717 = vmatmul.msk.f32.vlgmr.msrb.gmra.mxu2 %vm460_vm1, %v11380_v26 }
0x1f66   : > { %5008 = vmatpush.msra.mxu2 %v9553_v27 }
0x1f69   : > { %v4990_v43 = vpop.f32.mrf.mxu0 }
0x1f6a   : > { %v4991_v50 = vadd.f32 %v9557_v17, %v4990_v43  ;;  %v5150_v43 = vld [vmem:[%s13019_s5 + $0x730] sm:$0xff]  ;;  %v5189_v17 = vld [vmem:[%s13019_s5 + $0x600] sm:$0xff] }
0x1f6d   : > { %8722 = vmatmul.msk.f32.vlgmr.msra.gmra.mxu2 %vm460_vm1, %v11380_v26 }
0x1fda   : > { %v4735_v9 = vpop.f32.mrf.mxu3 }
0x1fdb   : > { %v4738_v14 = vmul.f32 0.35355338, %v4735_v9 }
0x1fdd   : > { %v4739_v5 = vadd.f32 %v4738_v14, %v3358_v38 }
0x1fdf   : > { %v4740_v11 = vsel %vm3384_vm10, %v4739_v5, -inf }
0x1fe0   : > { %v4811_v19 = vpop.f32.mrf.mxu2  ;;  %4741 = vmax.xlane.f32.xlu0 %v4740_v11 }
0x1fe1   : > { %v4814_v25 = vmul.f32 0.35355338, %v4811_v19 }
0x1fe3   : > { %v4815_v8 = vadd.f32 %v4814_v25, %v3358_v38 }
0x1fe5   : > { %v4816_v49 = vsel %vm3384_vm10, %v4815_v8, -inf }
0x1fe6   : > { %4817 = vmax.xlane.f32.xlu2 %v4816_v49 }
0x1fe8   : > { %v4910_v6 = vpop.f32.mrf.mxu2 }
0x1fe9   : > { %v4911_v10 = vadd.f32 %v9554_v22, %v4910_v6 }
0x1feb   : > { %4967 = vmatpush.msra.mxu1 %v4911_v10 }
0x1ff0   : > { %v5010_v42 = vpop.f32.mrf.mxu2 }
0x1ff1   : > { %v5011_v37 = vadd.f32 %v9555_v36, %v5010_v42  ;;  %v9558_v36 = vld [vmem:[%s13019_s5 + $0x422] ss:$0 sm:$0xff] }
0x2053   : > { %v4742_v16 = vpop.xlane.xlu0 %4741 }
0x2054   : > { %v4743_v15 = vsub.f32 %v4739_v5, %v4742_v16 }
0x2056   : > { %v4744_v20 = vmul.f32 1.442695, %v4743_v15 }
0x2058   : > { %9171 = vpow2.f32 %v4744_v20 }
0x2059   : > { %v4818_v28 = vpop.xlane.xlu2 %4817 }
0x205a   : > { %v4819_v30 = vsub.f32 %v4815_v8, %v4818_v28 }
0x205c   : > { %v4820_v29 = vmul.f32 1.442695, %v4819_v30 }
0x205e   : > { %9173 = vpow2.f32 %v4820_v29  ;;  %v9172_v7 = vpop.eup %9171 }
0x205f   : > { %v4746_v26 = vsel %vm3384_vm10, %v9172_v7, 0.0 }
0x2060   : > { %4747 = vadd.xlane.f32.xlu0 %v4746_v26 }
0x2064   : > { %v9174_v58 = vpop.eup %9173 }
0x2065   : > { %v4822_v32 = vsel %vm3384_vm10, %v9174_v58, 0.0 }
0x2066   : > { %4823 = vadd.xlane.f32.xlu1 %v4822_v32 }
0x20d3   : > { %v4748_v33 = vpop.xlane.xlu0 %4747 }
0x20d4   : > { %9175 = vrcp.f32 %v4748_v33 }
0x20d9   : > { %v4824_v34 = vpop.xlane.xlu1 %4823 }
0x20da   : > { %9177 = vrcp.f32 %v4824_v34  ;;  %v9176_v13 = vpop.eup %9175 }
0x20db   : > { %v4750_v35 = vmul.f32 %v9176_v13, %v9172_v7 }
0x20dd   : > { %8715 = vmatmul.msk.f32.vlgmr.msrb.gmra.mxu1 %vm3384_vm10, %v4750_v35 }
0x20de   : > { %5067 = vmatpush.msrb.mxu1 %v5011_v37 }
0x20e0   : > { %v9178_v21 = vpop.eup %9177 }
0x20e1   : > { %v4826_v18 = vmul.f32 %v9178_v21, %v9174_v58 }
0x20e3   : > { %8714 = vmatmul.msk.f32.vlgmr.msra.gmra.mxu3 %vm3384_vm10, %v4826_v18  ;;  %v5151_v18 = vld [vmem:[%s13019_s5 + $0x738] sm:$0xff] }
0x20e4   : > { %8723 = vmatpush.xpose.msk.msra.mxu3 %vm460_vm1, %v11435_v44  ;;  %5173 = vmatpush.msrb.mxu2 %v5151_v18 }
0x20e6   : > { %5174 = vmatpush.msrb.mxu2 %v5150_v43 }
0x20eb   : > { %8719 = vmatmul.msk.f32.vlgmr.msrb.gmra.mxu3 %vm460_vm1, %v4891_v2  ;;  %v5226_v2 = vld [vmem:[%s13019_s5 + $0x6a8] sm:$0xff] }
0x20ec   : > { %5205 = vmatpush.msrb.mxu3 %v5190_v40  ;;  %5269 = vmatpush.msra.mxu0 %v5226_v2  ;;  %v9064_v40 = vld [vmem:[%s13019_s5 + $0x715] ss:$0 sm:$0xff] }
0x20ee   : > { %5206 = vmatpush.msrb.mxu3 %v5189_v17 }
0x20f3   : > { %8724 = vmatmul.msk.f32.vlgmr.msra.gmra.mxu3 %vm460_vm1, %v4991_v50  ;;  %v5221_v50 = vld [vmem:[%s13019_s5 + $0x620] sm:$0xff] }
0x215a   : > { %v4870_v19 = vpop.f32.mrf.mxu1 }
0x2166   : > { %v4847_v12 = vpop.f32.mrf.mxu3 }
0x2167   : > { %v4871_v25 = vadd.f32 %v4870_v19, %v4847_v12  ;;  %v5225_v12 = vld [vmem:[%s13019_s5 + $0x6a0] sm:$0xff]  ;;  %v5369_v19 = vld [vmem:[%s13019_s5 + $0x638] sm:$0xff] }
0x2168   : > { %5270 = vmatpush.msra.mxu0 %v5225_v12 }
0x216e   : > { %v4933_v51 = vpop.f32.mrf.mxu3 }
0x216f   : > { %v4936_v52 = vmul.f32 0.35355338, %v4933_v51  ;;  %v5149_v51 = vld [vmem:[%s13019_s5 + $0x728] sm:$0xff] }
0x2170   : > { %5175 = vmatpush.msrb.mxu2 %v5149_v51 }
0x2171   : > { %v4937_v53 = vadd.f32 %v4936_v52, %v3358_v38  ;;  %v5188_v52 = vld [vmem:[%s13019_s5 + $0x5f8] sm:$0xff] }
0x2172   : > { %5207 = vmatpush.msrb.mxu3 %v5188_v52 }
0x2173   : > { %v4938_v44 = vsel %vm3384_vm10, %v4937_v53, -inf }
0x2174   : > { %4939 = vmax.xlane.f32.xlu2 %v4938_v44  ;;  %v5224_v44 = vld [vmem:[%s13019_s5 + $0x698] sm:$0xff] }
0x2175   : > { %5271 = vmatpush.msra.mxu0 %v5224_v44 }
0x2176   : > { %v5033_v54 = vpop.f32.mrf.mxu3 }
0x2177   : > { %v5036_v55 = vmul.f32 0.35355338, %v5033_v54  ;;  %v5148_v54 = vld [vmem:[%s13019_s5 + $0x720] sm:$0xff] }
0x2178   : > { %5176 = vmatpush.msrb.mxu2 %v5148_v54  ;;  %v9063_v54 = vld [vmem:[%s13019_s5 + $0x711] ss:$0 sm:$0xff] }
0x2179   : > { %v5037_v56 = vadd.f32 %v5036_v55, %v3358_v38  ;;  %v5187_v55 = vld [vmem:[%s13019_s5 + $0x5f0] sm:$0xff] }
0x217a   : > { %5208 = vmatpush.msrb.mxu3 %v5187_v55  ;;  %v9068_v55 = vld [vmem:[%s13019_s5 + $0x712] ss:$0 sm:$0xff] }
0x217b   : > { %v5038_v23 = vsel %vm3384_vm10, %v5037_v56, -inf }
0x217c   : > { %5039 = vmax.xlane.f32.xlu1 %v5038_v23  ;;  %v5223_v23 = vld [vmem:[%s13019_s5 + $0x690] sm:$0xff] }
0x217d   : > { %5272 = vmatpush.msra.mxu0 %v5223_v23 }
0x21e7   : > { %v4940_v57 = vpop.xlane.xlu2 %4939 }
0x21e8   : > { %v4941_v59 = vsub.f32 %v4937_v53, %v4940_v57  ;;  %v5220_v53 = vld [vmem:[%s13019_s5 + $0x618] sm:$0xff]  ;;  %v9584_v57 = vmov 8.0  }
0x21ea   : > { %v4942_v61 = vmul.f32 1.442695, %v4941_v59 }
0x21ec   : > { %9179 = vpow2.f32 %v4942_v61  ;;  %v9062_v61 = vld [vmem:[%s13019_s5 + $0x578] ss:$0 sm:$0xff] }
0x21ef   : > { %v5040_v46 = vpop.xlane.xlu1 %5039 }
0x21f0   : > { %v5041_v31 = vsub.f32 %v5037_v56, %v5040_v46  ;;  %v5219_v56 = vld [vmem:[%s13019_s5 + $0x610] sm:$0xff] }
0x21f2   : > { %v9180_v45 = vpop.eup %9179  ;;  %v5042_v62 = vmul.f32 1.442695, %v5041_v31 }
0x21f3   : > { %v4944_v0 = vsel %vm3384_vm10, %v9180_v45, 0.0 }
0x21f4   : > { %9181 = vpow2.f32 %v5042_v62  ;;  %4945 = vadd.xlane.f32.xlu2 %v4944_v0 }
0x21fa   : > { %v9182_v27 = vpop.eup %9181 }
0x21fb   : > { %v5044_v39 = vsel %vm3384_vm10, %v9182_v27, 0.0 }
0x21fc   : > { %5045 = vadd.xlane.f32.xlu1 %v5044_v39 }
0x2267   : > { %v4946_v47 = vpop.xlane.xlu2 %4945 }
0x2268   : > { %9183 = vrcp.f32 %v4946_v47  ;;  %v5371_v47 = vld [vmem:[%s13019_s5 + $0x648] sm:$0xff] }
0x2269   : > { %5391 = vmatpush.msra.mxu3 %v5371_v47 }
0x226e   : > { %v9184_v4 = vpop.eup %9183 }
0x226f   : > { %v4948_v38 = vmul.f32 %v9184_v4, %v9180_v45  ;;  %v5046_v9 = vpop.xlane.xlu1 %5045  ;;  %v5375_v4 = vld [vmem:[%s13019_s5 + $0x6c8] sm:$0xff] }
0x2270   : > { %9185 = vrcp.f32 %v5046_v9 }
0x2271   : > { %8720 = vmatmul.msk.f32.vlgmr.msra.gmra.mxu1 %vm3384_vm10, %v4948_v38  ;;  %v5370_v38 = vld [vmem:[%s13019_s5 + $0x640] sm:$0xff] }
0x2272   : > { %5242 = vmatpush.msra.mxu1 %v5222_v41  ;;  %5392 = vmatpush.msra.mxu3 %v5370_v38 }
0x2274   : > { %5243 = vmatpush.msra.mxu1 %v5221_v50  ;;  %5393 = vmatpush.msra.mxu3 %v5369_v19  ;;  %v9066_v50 = vld [vmem:[%s13019_s5 + $0x710] ss:$0 sm:$0xff] }
0x2276   : > { %v9186_v14 = vpop.eup %9185  ;;  %5244 = vmatpush.msra.mxu1 %v5220_v53 }
0x2277   : > { %v5048_v5 = vmul.f32 %v9186_v14, %v9182_v27  ;;  %v5374_v14 = vld [vmem:[%s13019_s5 + $0x6c0] sm:$0xff] }
0x2278   : > { %5245 = vmatpush.msra.mxu1 %v5219_v56 }
0x2279   : > { %8725 = vmatmul.msk.f32.vlgmr.msrb.gmra.mxu1 %vm3384_vm10, %v5048_v5 }
0x227a   : > { %5418 = vmatpush.msrb.mxu1 %v5375_v4 }
0x227c   : > { %5419 = vmatpush.msrb.mxu1 %v5374_v14  ;;  %v5768_v14 = vld [vmem:[%s13019_s5 + $0x708] sm:$0xff] }
0x22ee   : > { %v4969_v11 = vpop.f32.mrf.mxu1 }
0x22ef   : > { %v4972_v8 = vadd.f32 %v4969_v11, %v4871_v25  ;;  %v5373_v11 = vld [vmem:[%s13019_s5 + $0x6b8] sm:$0xff]  ;;  %v3008_v25 = vadd.f32 %v9062_v61, %v10828_v1 }
0x22f0   : > { %5420 = vmatpush.msrb.mxu1 %v5373_v11 }
0x22f6   : > { %v5069_v49 = vpop.f32.mrf.mxu1 }
0x22f7   : > { %v5072_v6 = vadd.f32 %v5069_v49, %v4972_v8  ;;  %v5368_v49 = vld [vmem:[%s13019_s5 + $0x630] sm:$0xff] }
0x22f8   : > { %5394 = vmatpush.msra.mxu3 %v5368_v49  ;;  %v5765_v49 = vld [vmem:[%s13019_s5 + $0x6f0] sm:$0xff] }
0x22f9   : > { %v11518_v22 = vadd.f32 %v5072_v6, %v11366_v48  ;;  %v5372_v6 = vld [vmem:[%s13019_s5 + $0x6b0] sm:$0xff] }
0x22fa   : > { %5421 = vmatpush.msrb.mxu1 %v5372_v6 }
0x22fb   : > { %v5074_v10 = vsel %vm460_vm1, %v11518_v22, 0.0 }
0x22fc   : > { %5075 = vadd.xlane.f32.xlu0 %v5074_v10 }
0x236f   : > { %v5076_v16 = vpop.xlane.xlu0 %5075 }
0x2370   : > { %v5077_v15 = vmul.f32 %v5076_v16, %v9679_v24  ;;  %v3013_v16 = vadd.f32 %v3008_v25, %v10652_v60 }
0x2372   : > { %v5078_v20 = vsub.f32 %v11518_v22, %v5077_v15 }
0x2374   : > { %v5079_v28 = vmul.f32 %v5078_v20, %v5078_v20 }
0x2376   : > { %v5080_v30 = vsel %vm460_vm1, %v5079_v28, 0.0 }
0x2377   : > { %5081 = vadd.xlane.f32.xlu2 %v5080_v30  ;;  %v5143_v30 = vrot.slane %v3013_v16, 7 }
0x23ea   : > { %v5082_v29 = vpop.xlane.xlu2 %5081 }
0x23eb   : > { %v5083_v7 = vmul.f32 %v5082_v29, %v9679_v24  ;;  %v9559_v24 = vld [vmem:[%s13019_s5 + $0x423] ss:$0 sm:$0xff] }
0x23ed   : > { %v5084_v26 = vadd.f32 1e-06, %v5083_v7 }
0x23ef   : > { %9187 = vrsqrt.f32 %v5084_v26  ;;  %vm5091_vm6 = vweird.f32 %v5084_v26 }
0x23f0   : > { %9189 = vrcp.f32 %v9584_v57  ;;  %v5589_v57 = vld [vmem:[%s13019_s5 + $0x6e8] sm:$0xff] }
0x23f5   : > { %v9188_v48 = vpop.eup %9187 }
0x23f6   : > { %v5086_v58 = vmul.f32 %v9188_v48, %v5084_v26  ;;  %vm5092_vm5 = vweird.f32 %v9188_v48  ;;  %v9190_v59 = vpop.eup %9189 }
0x23f7   : > { %vm5093_vm10 = vmor %vm5091_vm6, %vm5092_vm5  ;;  %v5133_v46 = vmul.f32 8.0, %v9190_v59  ;;  %vm5137_vm7 = vweird.f32 %v9190_v59 }
0x23f8   : > { %v5087_v32 = vmul.f32 %v9188_v48, %v5086_v58  ;;  %v5583_v58 = vld [vmem:[%s13019_s5 + $0x658] sm:$0xff] }
0x23f9   : > { %v5134_v0 = vsub.f32 1.0, %v5133_v46 }
0x23fa   : > { %v5088_v33 = vmul.f32 0.5, %v5087_v32  ;;  %v5582_v32 = vld [vmem:[%s13019_s5 + $0x650] sm:$0xff] }
0x23fb   : > { %v5135_v9 = vmul.f32 %v9190_v59, %v5134_v0  ;;  %v5586_v0 = vld [vmem:[%s13019_s5 + $0x6d0] sm:$0xff] }
0x23fc   : > { %v5089_v34 = vsub.f32 1.5, %v5088_v33  ;;  %v5764_v33 = vld [vmem:[%s13019_s5 + $0x688] sm:$0xff] }
0x23fe   : > { %v5090_v42 = vmul.f32 %v9188_v48, %v5089_v34  ;;  %v5763_v34 = vld [vmem:[%s13019_s5 + $0x680] sm:$0xff] }
0x2400   : > { %v5094_v13 = vsel %vm5093_vm10, %v9188_v48, %v5090_v42  ;;  %v5584_v48 = vld [vmem:[%s13019_s5 + $0x660] sm:$0xff]  ;;  %v5762_v42 = vld [vmem:[%s13019_s5 + $0x678] sm:$0xff] }
0x2401   : > { %v5095_v35 = vmul.f32 %v5094_v13, %v5078_v20  ;;  %v3011_v20 = vadd.f32 %v9062_v61, %v10830_v3  ;;  %v5585_v3 = vld [vmem:[%s13019_s5 + $0x668] sm:$0xff]  ;;  %v5761_v13 = vld [vmem:[%s13019_s5 + $0x670] sm:$0xff] }
0x2403   : > { %v5096_v37 = vmul.f32 %v9558_v36, %v5095_v35  ;;  %v3014_v7 = vadd.f32 %v3011_v20, %v10658_v63 }
0x2405   : > { %v5097_v21 = vadd.f32 %v9559_v24, %v5096_v37  ;;  %v11625_v60 = vrot.slane %v3014_v7, 7 }
0x2407   : > { %8726 = vmatmul.msk.f32.vlgmr.msrb.gmra.mxu0 %vm460_vm1, %v5097_v21  ;;  %v11629_v63 = vsel %vm5142_vm8, %v5143_v30, %v11625_v60 }
0x2484   : > { %v5118_v31 = vpop.f32.mrf.mxu0 }
0x2485   : > { %v5119_v45 = vadd.f32 %v9062_v61, %v5118_v31  ;;  %v5588_v31 = vld [vmem:[%s13019_s5 + $0x6e0] sm:$0xff] }
0x2487   : > { %v5121_v62 = vadd.f32 %v5119_v45, %v11518_v22  ;;  %v5136_v22 = vadd.f32 %v9190_v59, %v5135_v9  ;;  %v5587_v45 = vld [vmem:[%s13019_s5 + $0x6d8] sm:$0xff] }
0x2489   : > { %v5125_v27 = vsel %vm460_vm1, %v5121_v62, 0.0  ;;  %v5138_v1 = vsel %vm5137_vm7, %v9190_v59, %v5136_v22 }
0x248a   : > { %v5126_v39 = vrot.slane %v5125_v27, 4 }
0x248c   : > { %v5127_v5 = vadd.f32 %v5126_v39, %v5125_v27  ;;  %v9067_v27 = vld [vmem:[%s13019_s5 + $0x716] ss:$0 sm:$0xff] }
0x248e   : > { %v5128_v8 = vrot.slane %v5127_v5, 2 }
0x2490   : > { %v5129_v10 = vadd.f32 %v5128_v8, %v5127_v5  ;;  %v5767_v5 = vld [vmem:[%s13019_s5 + $0x700] sm:$0xff]  ;;  %v5766_v8 = vld [vmem:[%s13019_s5 + $0x6f8] sm:$0xff] }
0x2492   : > { %v5130_v15 = vrot.slane %v5129_v10, 1 }
0x2494   : > { %v5131_v28 = vadd.f32 %v5130_v15, %v5129_v10  ;;  %v11781_v10 = vld [vmem:[%s13021_s7] sm:$0xff] }
0x2496   : > { %v5139_v29 = vmul.f32 %v5138_v1, %v5131_v28  ;;  %v11788_v28 = vld [vmem:[%s13021_s7 + $0x8] sm:$0xff] }
0x2498   : > { %v11615_v26 = vsel %vm5142_vm8, %v5139_v29, %v5143_v30 }
0x2499   : > { %8727 = vmatmul.msk.f32.vlgmr.msrb.gmra.mxu2 %vm460_vm1, %v11615_v26  ;;  %8730 = vmatmul.msk.f32.vlgmr.msrb.gmra.mxu3 %vm460_vm1, %v11615_v26 }
0x249a   : > { %8733 = vmatmul.msk.f32.vlgmr.msra.gmra.mxu1 %vm460_vm1, %v11615_v26  ;;  %8736 = vmatmul.msk.f32.vlgmr.msra.gmra.mxu0 %vm460_vm1, %v11615_v26 }
0x249b   : > { %5605 = vmatpush.msra.mxu1 %v5585_v3 }
0x249d   : > { %5606 = vmatpush.msra.mxu1 %v5584_v48 }
0x249f   : > { %5607 = vmatpush.msra.mxu1 %v5583_v58 }
0x24a1   : > { %8728 = vmatmul.msk.f32.gmra.mxu2 %vm460_vm1, %v11629_v63  ;;  %8731 = vmatmul.msk.f32.gmra.mxu3 %vm460_vm1, %v11629_v63 }
0x24a2   : > { %8734 = vmatmul.msk.f32.gmra.mxu1 %vm460_vm1, %v11629_v63  ;;  %8737 = vmatmul.msk.f32.gmra.mxu0 %vm460_vm1, %v11629_v63 }
0x24a3   : > { %5608 = vmatpush.msra.mxu1 %v5582_v32 }
0x24a9   : > { %8729 = vmatmul.msk.f32.gmra.mxu2 %vm460_vm1, %v11625_v60  ;;  %8732 = vmatmul.msk.f32.gmra.mxu3 %vm460_vm1, %v11625_v60 }
0x24aa   : > { %8735 = vmatmul.msk.f32.gmra.mxu1 %vm460_vm1, %v11625_v60  ;;  %8738 = vmatmul.msk.f32.gmra.mxu0 %vm460_vm1, %v11625_v60 }
0x24b1   : > { %8745 = vmatmul.msk.f32.vlgmr.msra.gmra.mxu3 %vm460_vm1, %v11615_v26 }
0x24b2   : > { %8748 = vmatmul.msk.f32.vlgmr.msrb.gmra.mxu1 %vm460_vm1, %v11615_v26 }
0x24b3   : > { %5784 = vmatpush.msrb.mxu1 %v5764_v33  ;;  %v9071_v33 = vld [vmem:[%s13019_s5 + $0x717] ss:$0 sm:$0xff] }
0x24b5   : > { %5785 = vmatpush.msrb.mxu1 %v5763_v34 }
0x24b7   : > { %5786 = vmatpush.msrb.mxu1 %v5762_v42 }
0x24b9   : > { %8746 = vmatmul.msk.f32.gmra.mxu3 %vm460_vm1, %v11629_v63  ;;  %5787 = vmatpush.msrb.mxu1 %v5761_v13 }
0x24ba   : > { %8749 = vmatmul.msk.f32.gmra.mxu1 %vm460_vm1, %v11629_v63 }
0x24c1   : > { %8747 = vmatmul.msk.f32.gmra.mxu3 %vm460_vm1, %v11625_v60 }
0x24c2   : > { %8750 = vmatmul.msk.f32.gmra.mxu1 %vm460_vm1, %v11625_v60 }
0x24ca   : > { %8765 = vmatmul.msk.f32.vlgmr.msra.gmra.mxu1 %vm460_vm1, %v11615_v26 }
0x24d2   : > { %8766 = vmatmul.msk.f32.gmra.mxu1 %vm460_vm1, %v11629_v63 }
0x24da   : > { %8767 = vmatmul.msk.f32.gmra.mxu1 %vm460_vm1, %v11625_v60 }
0x24e2   : > { %8781 = vmatmul.msk.f32.vlgmr.msrb.gmra.mxu1 %vm460_vm1, %v11615_v26 }
0x24ea   : > { %8782 = vmatmul.msk.f32.gmra.mxu1 %vm460_vm1, %v11629_v63 }
0x24f2   : > { %8783 = vmatmul.msk.f32.gmra.mxu1 %vm460_vm1, %v11625_v60 }
0x2517   : > { %v5247_v35 = vpop.f32.mrf.mxu1  ;;  %v5274_v36 = vpop.f32.mrf.mxu0 }
0x2518   : > { %v5275_v12 = vadd.f32 %v9064_v40, %v5274_v36  ;;  %v5248_v61 = vadd.f32 %v9063_v54, %v5247_v35 }
0x251c   : > { %v5210_v37 = vpop.f32.mrf.mxu3  ;;  %v11803_v36 = vpop.f32.mrf.mxu2 }
0x251d   : > { %v11720_v23 = vadd.f32 %v9066_v50, %v5210_v37 }
0x251f   : > { %v5250_v24 = vpop.f32.mrf.mxu1  ;;  %v5277_v21 = vpop.f32.mrf.mxu0 }
0x2520   : > { %v5278_v17 = vadd.f32 %v9064_v40, %v5277_v21  ;;  %v5251_v38 = vadd.f32 %v9063_v54, %v5250_v24 }
0x2524   : > { %v5213_v18 = vpop.f32.mrf.mxu3  ;;  %v11805_v37 = vpop.f32.mrf.mxu2 }
0x2525   : > { %v11708_v44 = vadd.f32 %v9066_v50, %v5213_v18 }
0x2527   : > { %v5253_v41 = vpop.f32.mrf.mxu1  ;;  %v5280_v2 = vpop.f32.mrf.mxu0 }
0x2528   : > { %v5281_v43 = vadd.f32 %v9064_v40, %v5280_v2  ;;  %v5254_v6 = vadd.f32 %v9063_v54, %v5253_v41 }
0x252a   : > { %8761 = vmatpush.msk.msrb.mxu3 %vm5142_vm8, %v5281_v43 }
0x252c   : > { %5570 = vmatpush.msrb.mxu3 %v5278_v17  ;;  %v5216_v51 = vpop.f32.mrf.mxu3  ;;  %v11807_v24 = vpop.f32.mrf.mxu2 }
0x252d   : > { %v11702_v52 = vadd.f32 %v9066_v50, %v5216_v51 }
0x252e   : > { %5571 = vmatpush.msrb.mxu3 %v5275_v12 }
0x252f   : > { %v5423_v53 = vpop.f32.mrf.mxu1  ;;  %8739 = vmatpush.xpose.msk.msra.mxu2 %vm460_vm1, %v11702_v52  ;;  %8751 = vmatpush.xpose.msk.msrb.mxu0 %vm460_vm1, %v11702_v52 }
0x2530   : > { %v5424_v19 = vadd.f32 %v9067_v27, %v5423_v53 }
0x2533   : > { %8740 = vmatpush.xpose.msk.msra.mxu2 %vm460_vm1, %v11708_v44  ;;  %8752 = vmatpush.xpose.msk.msrb.mxu0 %vm460_vm1, %v11708_v44 }
0x2534   : > { %v5396_v56 = vpop.f32.mrf.mxu3 }
0x2535   : > { %v5397_v46 = vadd.f32 %v9068_v55, %v5396_v56 }
0x2537   : > { %v5426_v59 = vpop.f32.mrf.mxu1  ;;  %8741 = vmatpush.xpose.msk.msra.mxu2 %vm460_vm1, %v11720_v23  ;;  %8753 = vmatpush.xpose.msk.msrb.mxu0 %vm460_vm1, %v11720_v23 }
0x2538   : > { %v5427_v9 = vadd.f32 %v9067_v27, %v5426_v59 }
0x253a   : > { %8742 = vmatmul.msk.f32.vlgmr.msra.gmra.mxu2 %vm460_vm1, %v5248_v61  ;;  %8754 = vmatmul.msk.f32.vlgmr.msrb.gmra.mxu0 %vm460_vm1, %v5397_v46 }
0x253b   : > { %5632 = vmatpush.msra.mxu0 %v5589_v57 }
0x253c   : > { %v5399_v62 = vpop.f32.mrf.mxu3 }
0x253d   : > { %5633 = vmatpush.msra.mxu0 %v5588_v31  ;;  %v5400_v47 = vadd.f32 %v9068_v55, %v5399_v62 }
0x253f   : > { %5634 = vmatpush.msra.mxu0 %v5587_v45  ;;  %v5429_v39 = vpop.f32.mrf.mxu1 }
0x2540   : > { %v5430_v4 = vadd.f32 %v9067_v27, %v5429_v39 }
0x2541   : > { %5635 = vmatpush.msra.mxu0 %v5586_v0 }
0x2542   : > { %8757 = vmatpush.msk.msrb.mxu2 %vm5142_vm8, %v5430_v4  ;;  %8755 = vmatmul.msk.f32.gmra.mxu0 %vm460_vm1, %v5400_v47 }
0x2543   : > { %8743 = vmatmul.msk.f32.gmra.mxu2 %vm460_vm1, %v5251_v38  ;;  %5811 = vmatpush.msrb.mxu0 %v5768_v14 }
0x2544   : > { %5532 = vmatpush.msrb.mxu2 %v5427_v9  ;;  %v5402_v11 = vpop.f32.mrf.mxu3 }
0x2545   : > { %5812 = vmatpush.msrb.mxu0 %v5767_v5  ;;  %v5403_v25 = vadd.f32 %v9068_v55, %v5402_v11 }
0x2546   : > { %5533 = vmatpush.msrb.mxu2 %v5424_v19 }
0x2547   : > { %5813 = vmatpush.msrb.mxu0 %v5766_v8 }
0x2548   : > { %8771 = vmatpush.xpose.msk.msra.mxu2 %vm460_vm1, %v11702_v52 }
0x2549   : > { %5814 = vmatpush.msrb.mxu0 %v5765_v49  ;;  %v5610_v49 = vpop.f32.mrf.mxu1 }
0x254a   : > { %8756 = vmatmul.msk.f32.gmra.mxu0 %vm460_vm1, %v5403_v25 }
0x254b   : > { %8744 = vmatmul.msk.f32.gmra.mxu2 %vm460_vm1, %v5254_v6 }
0x254c   : > { %8772 = vmatpush.xpose.msk.msra.mxu2 %vm460_vm1, %v11708_v44 }
0x2550   : > { %8773 = vmatpush.xpose.msk.msra.mxu2 %vm460_vm1, %v11720_v23 }
0x2552   : > { %8768 = vmatmul.msk.f32.vlgmr.msra.gmra.mxu0 %vm460_vm1, %v11615_v26 }
0x255a   : > { %8769 = vmatmul.msk.f32.gmra.mxu0 %vm460_vm1, %v11629_v63 }
0x2562   : > { %8770 = vmatmul.msk.f32.gmra.mxu0 %vm460_vm1, %v11625_v60 }
0x256a   : > { %8784 = vmatmul.msk.f32.vlgmr.msrb.gmra.mxu0 %vm460_vm1, %v11615_v26 }
0x2572   : > { %8785 = vmatmul.msk.f32.gmra.mxu0 %vm460_vm1, %v11629_v63 }
0x257a   : > { %8786 = vmatmul.msk.f32.gmra.mxu0 %vm460_vm1, %v11625_v60  ;;  %v11795_v60 = vld [vmem:[%s13021_s7 + $0x10] sm:$0x1] }
0x25b7   : > { %v5458_v22 = vpop.f32.mrf.mxu0 }
0x25b8   : > { %v5467_v16 = vmul.f32 0.35355338, %v5458_v22 }
0x25ba   : > { %v5470_v15 = vadd.f32 %v5467_v16, %v11781_v10  ;;  %v5613_v16 = vpop.f32.mrf.mxu1 }
0x25bc   : > { %v5473_v1 = vsel %vm5333_vm9, %v5470_v15, -inf }
0x25bd   : > { %5474 = vmax.xlane.f32.xlu1 %v5473_v1  ;;  %v5318_v41 = vpop.f32.mrf.mxu2 }
0x25be   : > { %v5327_v12 = vmul.f32 0.35355338, %v5318_v41 }
0x25bf   : > { %v5461_v20 = vpop.f32.mrf.mxu0 }
0x25c0   : > { %v5468_v30 = vmul.f32 0.35355338, %v5461_v20  ;;  %v11811_v55 = vadd.f32 %v5327_v12, %v11781_v10 }
0x25c2   : > { %v5471_v29 = vadd.f32 %v5468_v30, %v11788_v28  ;;  %v5334_v31 = vsel %vm5333_vm9, %v11811_v55, -inf }
0x25c4   : > { %v5476_v7 = vsel %vm5333_vm9, %v5471_v29, -inf }
0x25c5   : > { %5477 = vmax.xlane.f32.xlu0 %v5476_v7 }
0x25c6   : > { %v5321_v53 = vpop.f32.mrf.mxu2 }
0x25c7   : > { %v5464_v26 = vpop.f32.mrf.mxu0  ;;  %v5328_v61 = vmul.f32 0.35355338, %v5321_v53 }
0x25c8   : > { %v5469_v63 = vmul.f32 0.35355338, %v5464_v26 }
0x25c9   : > { %v11817_v45 = vadd.f32 %v5328_v61, %v11788_v28 }
0x25ca   : > { %v5472_v3 = vadd.f32 %v5469_v63, %v11795_v60 }
0x25cb   : > { %v5337_v47 = vsel %vm5333_vm9, %v11817_v45, -inf }
0x25cc   : > { %v5479_v48 = vsel %vm5340_vm11, %v5472_v3, -inf }
0x25cd   : > { %5480 = vmax.xlane.f32.xlu2 %v5479_v48 }
0x25ce   : > { %v5324_v62 = vpop.f32.mrf.mxu2 }
0x25cf   : > { %v5637_v58 = vpop.f32.mrf.mxu0  ;;  %v5329_v27 = vmul.f32 0.35355338, %v5324_v62 }
0x25d0   : > { %v5638_v35 = vadd.f32 %v9071_v33, %v5637_v58 }
0x25d1   : > { %v11823_v4 = vadd.f32 %v5329_v27, %v11795_v60 }
0x25d3   : > { %v5341_v38 = vsel %vm5340_vm11, %v11823_v4, -inf }
0x25d7   : > { %v5640_v32 = vpop.f32.mrf.mxu0 }
0x25d8   : > { %v5641_v13 = vadd.f32 %v9071_v33, %v5640_v32 }
0x25df   : > { %v5643_v34 = vpop.f32.mrf.mxu0 }
0x25e0   : > { %v5644_v42 = vadd.f32 %v9071_v33, %v5643_v34 }
0x25e2   : > { %8777 = vmatpush.msk.msra.mxu3 %vm5142_vm8, %v5644_v42 }
0x25e4   : > { %5746 = vmatpush.msra.mxu3 %v5641_v13 }
0x25e6   : > { %5747 = vmatpush.msra.mxu3 %v5638_v35 }
0x2630   : > { %v5475_v21 = vpop.xlane.xlu1 %5474 }
0x2631   : > { %v5482_v18 = vsub.f32 %v5470_v15, %v5475_v21 }
0x2633   : > { %v5485_v40 = vmul.f32 1.442695, %v5482_v18 }
0x2635   : > { %9191 = vpow2.f32 %v5485_v40 }
0x2638   : > { %v5478_v2 = vpop.xlane.xlu0 %5477 }
0x2639   : > { %v5483_v43 = vsub.f32 %v5471_v29, %v5478_v2 }
0x263b   : > { %v9192_v17 = vpop.eup %9191  ;;  %v5487_v50 = vmul.f32 1.442695, %v5483_v43 }
0x263c   : > { %v5491_v51 = vsel %vm5333_vm9, %v9192_v17, 0.0 }
0x263d   : > { %9193 = vpow2.f32 %v5487_v50  ;;  %5492 = vadd.xlane.f32.xlu1 %v5491_v51 }
0x2640   : > { %v5481_v54 = vpop.xlane.xlu2 %5480 }
0x2641   : > { %v5484_v56 = vsub.f32 %v5472_v3, %v5481_v54 }
0x2643   : > { %v9194_v57 = vpop.eup %9193  ;;  %v5489_v59 = vmul.f32 1.442695, %v5484_v56 }
0x2644   : > { %v5494_v46 = vsel %vm5333_vm9, %v9194_v57, 0.0 }
0x2645   : > { %9195 = vpow2.f32 %v5489_v59  ;;  %5495 = vadd.xlane.f32.xlu0 %v5494_v46  ;;  %5335 = vmax.xlane.f32.xlu1 %v5334_v31 }
0x264b   : > { %v9196_v0 = vpop.eup %9195 }
0x264c   : > { %v5497_v39 = vsel %vm5340_vm11, %v9196_v0, 0.0 }
0x264d   : > { %5498 = vadd.xlane.f32.xlu2 %v5497_v39  ;;  %5338 = vmax.xlane.f32.xlu0 %v5337_v47 }
0x2655   : > { %5342 = vmax.xlane.f32.xlu2 %v5341_v38 }
0x26b0   : > { %v5493_v9 = vpop.xlane.xlu1 %5492 }
0x26b1   : > { %9197 = vrcp.f32 %v5493_v9 }
0x26b7   : > { %v9198_v14 = vpop.eup %9197 }
0x26b8   : > { %v5503_v5 = vmul.f32 %v9198_v14, %v9192_v17  ;;  %v5496_v19 = vpop.xlane.xlu0 %5495  ;;  %v5336_v34 = vpop.xlane.xlu1 %5335 }
0x26b9   : > { %9199 = vrcp.f32 %v5496_v19  ;;  %v5344_v35 = vsub.f32 %v11811_v55, %v5336_v34 }
0x26ba   : > { %8758 = vmatmul.msk.f32.vlgmr.msrb.gmra.mxu2 %vm5333_vm9, %v5503_v5 }
0x26bb   : > { %8787 = vmatpush.xpose.msk.msrb.mxu2 %vm460_vm1, %v11702_v52  ;;  %v9069_v52 = vld [vmem:[%s13019_s5 + $0x713] ss:$0 sm:$0xff]  ;;  %v5347_v18 = vmul.f32 1.442695, %v5344_v35 }
0x26bc   : > { %v5611_v15 = vadd.f32 %v9069_v52, %v5610_v49  ;;  %v5614_v1 = vadd.f32 %v9069_v52, %v5613_v16 }
0x26bf   : > { %v9200_v11 = vpop.eup %9199  ;;  %8788 = vmatpush.xpose.msk.msrb.mxu2 %vm460_vm1, %v11708_v44  ;;  %v5616_v44 = vpop.f32.mrf.mxu1 }
0x26c0   : > { %v5499_v25 = vpop.xlane.xlu2 %5498  ;;  %v5504_v8 = vmul.f32 %v9200_v11, %v9194_v57  ;;  %v5617_v20 = vadd.f32 %v9069_v52, %v5616_v44  ;;  %v5339_v50 = vpop.xlane.xlu0 %5338 }
0x26c1   : > { %9201 = vrcp.f32 %v5499_v25  ;;  %v5345_v54 = vsub.f32 %v11817_v45, %v5339_v50 }
0x26c2   : > { %8759 = vmatmul.msk.f32.gmra.mxu2 %vm5333_vm9, %v5504_v8  ;;  %9203 = vpow2.f32 %v5347_v18 }
0x26c3   : > { %8789 = vmatpush.xpose.msk.msrb.mxu2 %vm460_vm1, %v11720_v23  ;;  %v9070_v23 = vld [vmem:[%s13019_s5 + $0x714] ss:$0 sm:$0xff]  ;;  %v5349_v57 = vmul.f32 1.442695, %v5345_v54 }
0x26c5   : > { %9205 = vpow2.f32 %v5349_v57 }
0x26c7   : > { %v9202_v6 = vpop.eup %9201  ;;  %v5789_v30 = vpop.f32.mrf.mxu1 }
0x26c8   : > { %v5505_v22 = vmul.f32 %v9202_v6, %v9196_v0  ;;  %v5790_v29 = vadd.f32 %v9070_v23, %v5789_v30  ;;  %v9204_v51 = vpop.eup %9203  ;;  %v5343_v61 = vpop.xlane.xlu2 %5342 }
0x26c9   : > { %v5353_v55 = vsel %vm5333_vm9, %v9204_v51, 0.0  ;;  %v5346_v62 = vsub.f32 %v11823_v4, %v5343_v61 }
0x26ca   : > { %8760 = vmatmul.msk.f32.gmra.mxu2 %vm5333_vm9, %v5505_v22  ;;  %v5816_v22 = vpop.f32.mrf.mxu0 }
0x26cb   : > { %v5351_v27 = vmul.f32 1.442695, %v5346_v62  ;;  %v11866_v47 = vpop.eup %9205 }
0x26cc   : > { %v5356_v9 = vsel %vm5333_vm9, %v11866_v47, 0.0 }
0x26cd   : > { %9207 = vpow2.f32 %v5351_v27 }
0x26cf   : > { %v5792_v7 = vpop.f32.mrf.mxu1 }
0x26d0   : > { %v5793_v26 = vadd.f32 %v9070_v23, %v5792_v7 }
0x26d2   : > { %8774 = vmatmul.msk.f32.vlgmr.msra.gmra.mxu2 %vm460_vm1, %v5611_v15 }
0x26d3   : > { %v11872_v19 = vpop.eup %9207 }
0x26d4   : > { %v5359_v8 = vsel %vm5340_vm11, %v11872_v19, 0.0 }
0x26d7   : > { %v5795_v63 = vpop.f32.mrf.mxu1 }
0x26d8   : > { %v5796_v3 = vadd.f32 %v9070_v23, %v5795_v63 }
0x26da   : > { %8775 = vmatmul.msk.f32.gmra.mxu2 %vm460_vm1, %v5614_v1 }
0x26e2   : > { %8776 = vmatmul.msk.f32.gmra.mxu2 %vm460_vm1, %v5617_v20  ;;  %v5819_v20 = vpop.f32.mrf.mxu0 }
0x26ea   : > { %8790 = vmatmul.msk.f32.vlgmr.msrb.gmra.mxu2 %vm460_vm1, %v5790_v29 }
0x26f2   : > { %8791 = vmatmul.msk.f32.gmra.mxu2 %vm460_vm1, %v5793_v26 }
0x26fa   : > { %8792 = vmatmul.msk.f32.gmra.mxu2 %vm460_vm1, %v5796_v3 }
0x273d   : > { %v11848_v48 = vpop.f32.mrf.mxu2 }
0x2745   : > { %v11850_v58 = vpop.f32.mrf.mxu2 }
0x274d   : > { %v11852_v32 = vpop.f32.mrf.mxu2 }
0x2755   : > { %v5672_v33 = vpop.f32.mrf.mxu2 }
0x2756   : > { %v5681_v42 = vmul.f32 0.35355338, %v5672_v33  ;;  %v5822_v33 = vpop.f32.mrf.mxu0 }
0x2758   : > { %v5684_v13 = vadd.f32 %v5681_v42, %v11781_v10  ;;  %v9072_v42 = vld [vmem:[%s13019_s5 + $0x718] ss:$0 sm:$0xff] }
0x275a   : > { %v5687_v21 = vsel %vm5333_vm9, %v5684_v13, -inf }
0x275b   : > { %5688 = vmax.xlane.f32.xlu1 %v5687_v21  ;;  %v5823_v21 = vadd.f32 %v9072_v42, %v5822_v33  ;;  %v5945_v33 = vld [vmem:[%s13019_s5 + $0x888] sm:$0xff] }
0x275d   : > { %v5675_v40 = vpop.f32.mrf.mxu2 }
0x275e   : > { %v5682_v41 = vmul.f32 0.35355338, %v5675_v40 }
0x2760   : > { %v5685_v2 = vadd.f32 %v5682_v41, %v11788_v28  ;;  %v5820_v41 = vadd.f32 %v9072_v42, %v5819_v20 }
0x2762   : > { %v5690_v43 = vsel %vm5333_vm9, %v5685_v2, -inf }
0x2763   : > { %5691 = vmax.xlane.f32.xlu0 %v5690_v43 }
0x2765   : > { %v5678_v17 = vpop.f32.mrf.mxu2 }
0x2766   : > { %v5683_v12 = vmul.f32 0.35355338, %v5678_v17  ;;  %v5817_v17 = vadd.f32 %v9072_v42, %v5816_v22  ;;  %v6018_v42 = vld [vmem:[%s13019_s5 + $0x778] sm:$0xff] }
0x2768   : > { %v5686_v53 = vadd.f32 %v5683_v12, %v11795_v60 }
0x276a   : > { %v5693_v56 = vsel %vm5340_vm11, %v5686_v53, -inf }
0x276b   : > { %5354 = vadd.xlane.f32.xlu0 %v5353_v55  ;;  %5694 = vmax.xlane.f32.xlu2 %v5693_v56 }
0x276d   : > { %v5851_v59 = vpop.f32.mrf.mxu2 }
0x276e   : > { %v5860_v46 = vmul.f32 0.35355338, %v5851_v59 }
0x2770   : > { %v5863_v31 = vadd.f32 %v5860_v46, %v11781_v10 }
0x2772   : > { %v5866_v0 = vsel %vm5333_vm9, %v5863_v31, -inf }
0x2773   : > { %5867 = vmax.xlane.f32.xlu1 %v5866_v0 }
0x2775   : > { %v5854_v45 = vpop.f32.mrf.mxu2 }
0x2776   : > { %v5861_v39 = vmul.f32 0.35355338, %v5854_v45 }
0x2778   : > { %v5864_v38 = vadd.f32 %v5861_v39, %v11788_v28 }
0x277a   : > { %v5869_v14 = vsel %vm5333_vm9, %v5864_v38, -inf }
0x277b   : > { %5357 = vadd.xlane.f32.xlu1 %v5356_v9  ;;  %5870 = vmax.xlane.f32.xlu2 %v5869_v14 }
0x277d   : > { %v5857_v5 = vpop.f32.mrf.mxu2 }
0x277e   : > { %v5862_v4 = vmul.f32 0.35355338, %v5857_v5 }
0x2780   : > { %v5865_v11 = vadd.f32 %v5862_v4, %v11795_v60 }
0x2782   : > { %v5872_v25 = vsel %vm5340_vm11, %v5865_v11, -inf }
0x2783   : > { %5873 = vmax.xlane.f32.xlu0 %v5872_v25  ;;  %5360 = vadd.xlane.f32.xlu2 %v5359_v8 }
0x27ce   : > { %v5689_v49 = vpop.xlane.xlu1 %5688 }
0x27cf   : > { %v5696_v6 = vsub.f32 %v5684_v13, %v5689_v49 }
0x27d1   : > { %v5699_v52 = vmul.f32 1.442695, %v5696_v6 }
0x27d3   : > { %9209 = vpow2.f32 %v5699_v52 }
0x27d6   : > { %v5692_v16 = vpop.xlane.xlu0 %5691 }
0x27d7   : > { %v5697_v15 = vsub.f32 %v5685_v2, %v5692_v16 }
0x27d9   : > { %v11878_v44 = vpop.eup %9209  ;;  %v5701_v1 = vmul.f32 1.442695, %v5697_v15 }
0x27da   : > { %v5705_v30 = vsel %vm5333_vm9, %v11878_v44, 0.0 }
0x27db   : > { %9211 = vpow2.f32 %v5701_v1  ;;  %5706 = vadd.xlane.f32.xlu1 %v5705_v30 }
0x27de   : > { %v5355_v23 = vpop.xlane.xlu0 %5354  ;;  %v5695_v29 = vpop.xlane.xlu2 %5694 }
0x27df   : > { %9213 = vrcp.f32 %v5355_v23  ;;  %v5698_v7 = vsub.f32 %v5686_v53, %v5695_v29  ;;  %v5946_v29 = vld [vmem:[%s13019_s5 + $0x890] sm:$0xff] }
0x27e0   : > { %5970 = vmatpush.msra.mxu1 %v5946_v29 }
0x27e1   : > { %v9212_v26 = vpop.eup %9211  ;;  %v5703_v63 = vmul.f32 1.442695, %v5698_v7  ;;  %v5987_v7 = vld [vmem:[%s13019_s5 + $0x760] sm:$0xff] }
0x27e2   : > { %v5708_v3 = vsel %vm5333_vm9, %v9212_v26, 0.0  ;;  %6002 = vmatpush.msra.mxu0 %v5987_v7  ;;  %5971 = vmatpush.msra.mxu1 %v5945_v33 }
0x27e3   : > { %9215 = vpow2.f32 %v5703_v63  ;;  %5709 = vadd.xlane.f32.xlu0 %v5708_v3  ;;  %v6023_v63 = vld [vmem:[%s13019_s5 + $0x800] sm:$0xff] }
0x27e5   : > { %v9214_v34 = vpop.eup %9213 }
0x27e6   : > { %v5365_v13 = vmul.f32 %v9214_v34, %v9204_v51  ;;  %v5868_v35 = vpop.xlane.xlu1 %5867  ;;  %v5986_v34 = vld [vmem:[%s13019_s5 + $0x758] sm:$0xff] }
0x27e7   : > { %v5875_v18 = vsub.f32 %v5863_v31, %v5868_v35  ;;  %6003 = vmatpush.msra.mxu0 %v5986_v34  ;;  %v5944_v35 = vld [vmem:[%s13019_s5 + $0x880] sm:$0xff] }
0x27e8   : > { %8762 = vmatmul.msk.f32.vlgmr.msrb.gmra.mxu3 %vm5333_vm9, %v5365_v13  ;;  %v6022_v13 = vld [vmem:[%s13019_s5 + $0x7f8] sm:$0xff]  ;;  %5972 = vmatpush.msra.mxu1 %v5944_v35 }
0x27e9   : > { %v9216_v40 = vpop.eup %9215  ;;  %v5878_v2 = vmul.f32 1.442695, %v5875_v18  ;;  %8793 = vmatpush.msk.msrb.mxu3 %vm5142_vm8, %v5823_v21  ;;  %v5985_v21 = vld [vmem:[%s13019_s5 + $0x750] sm:$0xff] }
0x27ea   : > { %v5711_v43 = vsel %vm5340_vm11, %v9216_v40, 0.0  ;;  %v6017_v18 = vld [vmem:[%s13019_s5 + $0x770] sm:$0xff]  ;;  %6004 = vmatpush.msra.mxu0 %v5985_v21 }
0x27eb   : > { %9217 = vpow2.f32 %v5878_v2  ;;  %5925 = vmatpush.msrb.mxu3 %v5820_v41  ;;  %5712 = vadd.xlane.f32.xlu2 %v5711_v43  ;;  %v5943_v41 = vld [vmem:[%s13019_s5 + $0x878] sm:$0xff]  ;;  %v5984_v2 = vld [vmem:[%s13019_s5 + $0x748] sm:$0xff] }
0x27ec   : > { %v6016_v43 = vld [vmem:[%s13019_s5 + $0x768] sm:$0xff]  ;;  %5973 = vmatpush.msra.mxu1 %v5943_v41  ;;  %6005 = vmatpush.msra.mxu0 %v5984_v2 }
0x27ed   : > { %5926 = vmatpush.msrb.mxu3 %v5817_v17  ;;  %v6020_v17 = vld [vmem:[%s13019_s5 + $0x7e8] sm:$0xff] }
0x27ee   : > { %v5358_v50 = vpop.xlane.xlu1 %5357  ;;  %v5871_v12 = vpop.xlane.xlu2 %5870 }
0x27ef   : > { %9219 = vrcp.f32 %v5358_v50  ;;  %v5876_v51 = vsub.f32 %v5864_v38, %v5871_v12 }
0x27f1   : > { %v9218_v53 = vpop.eup %9217  ;;  %v5880_v54 = vmul.f32 1.442695, %v5876_v51  ;;  %v6166_v51 = vld [vmem:[%s13019_s5 + $0x7a0] sm:$0xff] }
0x27f2   : > { %v5884_v55 = vsel %vm5333_vm9, %v9218_v53, 0.0  ;;  %6186 = vmatpush.msrb.mxu0 %v6166_v51  ;;  %v6382_v51 = vld [vmem:[%s13019_s5 + $0x830] sm:$0xff] }
0x27f3   : > { %9221 = vpow2.f32 %v5880_v54  ;;  %5885 = vadd.xlane.f32.xlu1 %v5884_v55  ;;  %v6165_v54 = vld [vmem:[%s13019_s5 + $0x798] sm:$0xff] }
0x27f4   : > { %v6169_v55 = vld [vmem:[%s13019_s5 + $0x818] sm:$0xff]  ;;  %6187 = vmatpush.msrb.mxu0 %v6165_v54  ;;  %v6381_v54 = vld [vmem:[%s13019_s5 + $0x828] sm:$0xff] }
0x27f5   : > { %v9220_v56 = vpop.eup %9219 }
0x27f6   : > { %v5874_v57 = vpop.xlane.xlu0 %5873  ;;  %v5361_v59 = vpop.xlane.xlu2 %5360  ;;  %v5366_v61 = vmul.f32 %v9220_v56, %v11866_v47 }
0x27f7   : > { %v5877_v46 = vsub.f32 %v5865_v11, %v5874_v57  ;;  %9223 = vrcp.f32 %v5361_v59  ;;  %v6164_v57 = vld [vmem:[%s13019_s5 + $0x790] sm:$0xff] }
0x27f8   : > { %8763 = vmatmul.msk.f32.gmra.mxu3 %vm5333_vm9, %v5366_v61  ;;  %v6168_v59 = vld [vmem:[%s13019_s5 + $0x810] sm:$0xff]  ;;  %v6163_v61 = vld [vmem:[%s13019_s5 + $0x788] sm:$0xff]  ;;  %6188 = vmatpush.msrb.mxu0 %v6164_v57 }
0x27f9   : > { %v9222_v31 = vpop.eup %9221  ;;  %v5882_v62 = vmul.f32 1.442695, %v5877_v46  ;;  %v6167_v46 = vld [vmem:[%s13019_s5 + $0x808] sm:$0xff] }
0x27fa   : > { %v5887_v0 = vsel %vm5333_vm9, %v9222_v31, 0.0  ;;  %6189 = vmatpush.msrb.mxu0 %v6163_v61  ;;  %v6562_v61 = vld [vmem:[%s13019_s5 + $0x858] sm:$0xff] }
0x27fb   : > { %9225 = vpow2.f32 %v5882_v62  ;;  %5888 = vadd.xlane.f32.xlu0 %v5887_v0 }
0x27fd   : > { %v9224_v27 = vpop.eup %9223 }
0x27fe   : > { %v5367_v45 = vmul.f32 %v9224_v27, %v11872_v19 }
0x2800   : > { %8764 = vmatmul.msk.f32.gmra.mxu3 %vm5333_vm9, %v5367_v45 }
0x2801   : > { %v9226_v39 = vpop.eup %9225 }
0x2802   : > { %v5890_v38 = vsel %vm5340_vm11, %v9226_v39, 0.0 }
0x2803   : > { %5891 = vadd.xlane.f32.xlu2 %v5890_v38 }
0x284e   : > { %v5707_v47 = vpop.xlane.xlu1 %5706 }
0x284f   : > { %9227 = vrcp.f32 %v5707_v47 }
0x2855   : > { %v9228_v9 = vpop.eup %9227 }
0x2856   : > { %v5717_v14 = vmul.f32 %v9228_v9, %v11878_v44  ;;  %v5710_v5 = vpop.xlane.xlu0 %5709 }
0x2857   : > { %9229 = vrcp.f32 %v5710_v5 }
0x2858   : > { %8778 = vmatmul.msk.f32.vlgmr.msra.gmra.mxu3 %vm5333_vm9, %v5717_v14 }
0x2859   : > { %6066 = vmatpush.msra.mxu3 %v6023_v63 }
0x285b   : > { %6067 = vmatpush.msra.mxu3 %v6022_v13 }
0x285d   : > { %v9230_v4 = vpop.eup %9229 }
0x285e   : > { %v5713_v11 = vpop.xlane.xlu2 %5712  ;;  %v5718_v25 = vmul.f32 %v9230_v4, %v9212_v26  ;;  %v6019_v26 = vld [vmem:[%s13019_s5 + $0x780] sm:$0xff] }
0x285f   : > { %9231 = vrcp.f32 %v5713_v11  ;;  %6039 = vmatpush.msra.mxu2 %v6019_v26 }
0x2860   : > { %8779 = vmatmul.msk.f32.gmra.mxu3 %vm5333_vm9, %v5718_v25  ;;  %v6378_v25 = vld [vmem:[%s13019_s5 + $0x7b0] sm:$0xff] }
0x2861   : > { %6040 = vmatpush.msra.mxu2 %v6018_v42  ;;  %v9075_v42 = vld [vmem:[%s13019_s5 + $0x869] ss:$0 sm:$0xff] }
0x2863   : > { %6041 = vmatpush.msra.mxu2 %v6017_v18  ;;  %v9077_v18 = vld [vmem:[%s13019_s5 + $0x86a] ss:$0 sm:$0xff] }
0x2865   : > { %v9232_v19 = vpop.eup %9231  ;;  %6042 = vmatpush.msra.mxu2 %v6016_v43 }
0x2866   : > { %v5886_v8 = vpop.xlane.xlu1 %5885  ;;  %v5719_v49 = vmul.f32 %v9232_v19, %v9216_v40  ;;  %v6021_v40 = vld [vmem:[%s13019_s5 + $0x7f0] sm:$0xff] }
0x2867   : > { %9233 = vrcp.f32 %v5886_v8  ;;  %6068 = vmatpush.msra.mxu3 %v6021_v40  ;;  %v6384_v40 = vld [vmem:[%s13019_s5 + $0x840] sm:$0xff] }
0x2868   : > { %8780 = vmatmul.msk.f32.gmra.mxu3 %vm5333_vm9, %v5719_v49 }
0x2869   : > { %6069 = vmatpush.msra.mxu3 %v6020_v17 }
0x286b   : > { %v5573_v30 = vpop.f32.mrf.mxu3 }
0x286c   : > { %v5574_v62 = vadd.f32 %v5573_v30, %v11848_v48  ;;  %v9074_v30 = vld [vmem:[%s13019_s5 + $0x868] ss:$0 sm:$0xff] }
0x286d   : > { %v9234_v6 = vpop.eup %9233 }
0x286e   : > { %v5896_v22 = vmul.f32 %v9234_v6, %v9218_v53  ;;  %v5889_v52 = vpop.xlane.xlu0 %5888  ;;  %v6170_v53 = vld [vmem:[%s13019_s5 + $0x820] sm:$0xff]  ;;  %v6377_v6 = vld [vmem:[%s13019_s5 + $0x7a8] sm:$0xff] }
0x286f   : > { %9235 = vrcp.f32 %v5889_v52  ;;  %6213 = vmatpush.msrb.mxu2 %v6170_v53  ;;  %v6557_v52 = vld [vmem:[%s13019_s5 + $0x7d0] sm:$0xff] }
0x2870   : > { %8794 = vmatmul.msk.f32.vlgmr.msrb.gmra.mxu3 %vm5333_vm9, %v5896_v22  ;;  %v6558_v22 = vld [vmem:[%s13019_s5 + $0x7d8] sm:$0xff] }
0x2871   : > { %6214 = vmatpush.msrb.mxu2 %v6169_v55 }
0x2873   : > { %6215 = vmatpush.msrb.mxu2 %v6168_v59  ;;  %v6563_v59 = vld [vmem:[%s13019_s5 + $0x860] sm:$0xff] }
0x2875   : > { %v9236_v16 = vpop.eup %9235  ;;  %6216 = vmatpush.msrb.mxu2 %v6167_v46 }
0x2876   : > { %v5892_v15 = vpop.xlane.xlu2 %5891  ;;  %v5897_v44 = vmul.f32 %v9236_v16, %v9222_v31  ;;  %v9065_v31 = vld [vmem:[%s13019_s5 + $0x740] ss:$0 sm:$0xff]  ;;  %v6556_v16 = vld [vmem:[%s13019_s5 + $0x7c8] sm:$0xff] }
0x2877   : > { %9237 = vrcp.f32 %v5892_v15  ;;  %v5179_v45 = vadd.f32 %v9065_v31, %v11803_v36  ;;  %v5182_v36 = vadd.f32 %v9065_v31, %v11805_v37  ;;  %v6380_v37 = vld [vmem:[%s13019_s5 + $0x7c0] sm:$0xff]  ;;  %v5185_v19 = vadd.f32 %v9065_v31, %v11807_v24  ;;  %v6561_v31 = vld [vmem:[%s13019_s5 + $0x850] sm:$0xff] }
0x2878   : > { %8795 = vmatmul.msk.f32.gmra.mxu3 %vm5333_vm9, %v5897_v44  ;;  %v6559_v24 = vld [vmem:[%s13019_s5 + $0x7e0] sm:$0xff] }
0x287b   : > { %v5576_v23 = vpop.f32.mrf.mxu3 }
0x287c   : > { %v5577_v47 = vadd.f32 %v5576_v23, %v11850_v58 }
0x287d   : > { %v9238_v1 = vpop.eup %9237 }
0x287e   : > { %v5898_v20 = vmul.f32 %v9238_v1, %v9226_v39 }
0x2880   : > { %8796 = vmatmul.msk.f32.gmra.mxu3 %vm5333_vm9, %v5898_v20 }
0x2883   : > { %v5579_v3 = vpop.f32.mrf.mxu3 }
0x2884   : > { %v5580_v58 = vadd.f32 %v5579_v3, %v11852_v32  ;;  %v6379_v32 = vld [vmem:[%s13019_s5 + $0x7b8] sm:$0xff]  ;;  %v9076_v3 = vld [vmem:[%s13019_s5 + $0x86d] ss:$0 sm:$0xff] }
0x28db   : > { %v5749_v50 = vpop.f32.mrf.mxu3 }
0x28dc   : > { %v5758_v0 = vadd.f32 %v5749_v50, %v5574_v62  ;;  %v6383_v50 = vld [vmem:[%s13019_s5 + $0x838] sm:$0xff] }
0x28e3   : > { %v5752_v12 = vpop.f32.mrf.mxu3 }
0x28e4   : > { %v5759_v48 = vadd.f32 %v5752_v12, %v5577_v47 }
0x28eb   : > { %v5755_v56 = vpop.f32.mrf.mxu3 }
0x28ec   : > { %v5760_v4 = vadd.f32 %v5755_v56, %v5580_v58 }
0x28f3   : > { %v5928_v27 = vpop.f32.mrf.mxu3 }
0x28f4   : > { %v5937_v39 = vadd.f32 %v5928_v27, %v5758_v0  ;;  %v6560_v27 = vld [vmem:[%s13019_s5 + $0x848] sm:$0xff] }
0x28f6   : > { %v11980_v38 = vadd.f32 %v5937_v39, %v5179_v45  ;;  %v9078_v45 = vld [vmem:[%s13019_s5 + $0x86e] ss:$0 sm:$0xff] }
0x28f8   : > { %8797 = vmatmul.msk.f32.vlgmr.msra.gmra.mxu1 %vm460_vm1, %v11980_v38  ;;  %8800 = vmatmul.msk.f32.vlgmr.msra.gmra.mxu0 %vm460_vm1, %v11980_v38 }
0x28f9   : > { %8803 = vmatmul.msk.f32.vlgmr.msra.gmra.mxu2 %vm460_vm1, %v11980_v38  ;;  %8806 = vmatmul.msk.f32.vlgmr.msra.gmra.mxu3 %vm460_vm1, %v11980_v38 }
0x28fa   : > { %6400 = vmatpush.msra.mxu2 %v6380_v37 }
0x28fb   : > { %v5931_v9 = vpop.f32.mrf.mxu3 }
0x28fc   : > { %v5938_v14 = vadd.f32 %v5931_v9, %v5759_v48  ;;  %6401 = vmatpush.msra.mxu2 %v6379_v32 }
0x28fe   : > { %v11992_v5 = vadd.f32 %v5938_v14, %v5182_v36  ;;  %6402 = vmatpush.msra.mxu2 %v6378_v25 }
0x2900   : > { %8798 = vmatmul.msk.f32.gmra.mxu1 %vm460_vm1, %v11992_v5  ;;  %8801 = vmatmul.msk.f32.gmra.mxu0 %vm460_vm1, %v11992_v5 }
0x2901   : > { %8804 = vmatmul.msk.f32.gmra.mxu2 %vm460_vm1, %v11992_v5  ;;  %8807 = vmatmul.msk.f32.gmra.mxu3 %vm460_vm1, %v11992_v5 }
0x2902   : > { %6403 = vmatpush.msra.mxu2 %v6377_v6 }
0x2903   : > { %v5934_v11 = vpop.f32.mrf.mxu3 }
0x2904   : > { %v5939_v8 = vadd.f32 %v5934_v11, %v5760_v4 }
0x2906   : > { %v12013_v49 = vadd.f32 %v5939_v8, %v5185_v19 }
0x2908   : > { %8799 = vmatmul.msk.f32.gmra.mxu1 %vm460_vm1, %v12013_v49  ;;  %8802 = vmatmul.msk.f32.gmra.mxu0 %vm460_vm1, %v12013_v49 }
0x2909   : > { %8805 = vmatmul.msk.f32.gmra.mxu2 %vm460_vm1, %v12013_v49  ;;  %8808 = vmatmul.msk.f32.gmra.mxu3 %vm460_vm1, %v12013_v49 }
0x2910   : > { %8815 = vmatmul.msk.f32.vlgmr.msrb.gmra.mxu0 %vm460_vm1, %v11980_v38 }
0x2911   : > { %8818 = vmatmul.msk.f32.vlgmr.msrb.gmra.mxu2 %vm460_vm1, %v11980_v38 }
0x2912   : > { %6579 = vmatpush.msrb.mxu2 %v6559_v24  ;;  %v9081_v24 = vld [vmem:[%s13019_s5 + $0x86f] ss:$0 sm:$0xff] }
0x2914   : > { %6580 = vmatpush.msrb.mxu2 %v6558_v22 }
0x2916   : > { %6581 = vmatpush.msrb.mxu2 %v6557_v52 }
0x2918   : > { %8816 = vmatmul.msk.f32.gmra.mxu0 %vm460_vm1, %v11992_v5  ;;  %6582 = vmatpush.msrb.mxu2 %v6556_v16 }
0x2919   : > { %8819 = vmatmul.msk.f32.gmra.mxu2 %vm460_vm1, %v11992_v5 }
0x2920   : > { %8817 = vmatmul.msk.f32.gmra.mxu0 %vm460_vm1, %v12013_v49 }
0x2921   : > { %8820 = vmatmul.msk.f32.gmra.mxu2 %vm460_vm1, %v12013_v49 }
0x2929   : > { %8835 = vmatmul.msk.f32.vlgmr.msra.gmra.mxu2 %vm460_vm1, %v11980_v38 }
0x2931   : > { %8836 = vmatmul.msk.f32.gmra.mxu2 %vm460_vm1, %v11992_v5 }
0x2939   : > { %8837 = vmatmul.msk.f32.gmra.mxu2 %vm460_vm1, %v12013_v49 }
0x2941   : > { %8851 = vmatmul.msk.f32.vlgmr.msrb.gmra.mxu2 %vm460_vm1, %v11980_v38 }
0x2949   : > { %8852 = vmatmul.msk.f32.gmra.mxu2 %vm460_vm1, %v11992_v5 }
0x2951   : > { %8853 = vmatmul.msk.f32.gmra.mxu2 %vm460_vm1, %v12013_v49 }
0x2975   : > { %v6007_v15 = vpop.f32.mrf.mxu0 }
0x2976   : > { %v12083_v21 = vadd.f32 %v9074_v30, %v6007_v15 }
0x297c   : > { %v6044_v44 = vpop.f32.mrf.mxu2  ;;  %v6071_v1 = vpop.f32.mrf.mxu3 }
0x297d   : > { %v6010_v20 = vpop.f32.mrf.mxu0  ;;  %v6045_v2 = vadd.f32 %v9075_v42, %v6044_v44  ;;  %v6072_v43 = vadd.f32 %v9076_v3, %v6071_v1  ;;  %v12155_v44 = vpop.f32.mrf.mxu1 }
0x297e   : > { %v12071_v63 = vadd.f32 %v9074_v30, %v6010_v20 }
0x2984   : > { %v6047_v23 = vpop.f32.mrf.mxu2  ;;  %v6074_v29 = vpop.f32.mrf.mxu3 }
0x2985   : > { %v6013_v7 = vpop.f32.mrf.mxu0  ;;  %v6075_v41 = vadd.f32 %v9076_v3, %v6074_v29  ;;  %v6048_v55 = vadd.f32 %v9075_v42, %v6047_v23  ;;  %v12157_v1 = vpop.f32.mrf.mxu1 }
0x2986   : > { %v12065_v26 = vadd.f32 %v9074_v30, %v6013_v7 }
0x2988   : > { %8809 = vmatpush.xpose.msk.msrb.mxu1 %vm460_vm1, %v12065_v26  ;;  %8821 = vmatpush.xpose.msk.msrb.mxu3 %vm460_vm1, %v12065_v26 }
0x298c   : > { %v6050_v33 = vpop.f32.mrf.mxu2  ;;  %v6077_v34 = vpop.f32.mrf.mxu3  ;;  %8810 = vmatpush.xpose.msk.msrb.mxu1 %vm460_vm1, %v12071_v63  ;;  %8822 = vmatpush.xpose.msk.msrb.mxu3 %vm460_vm1, %v12071_v63 }
0x298d   : > { %v6078_v13 = vadd.f32 %v9076_v3, %v6077_v34  ;;  %v6191_v35 = vpop.f32.mrf.mxu0  ;;  %v6051_v62 = vadd.f32 %v9075_v42, %v6050_v33  ;;  %v12159_v20 = vpop.f32.mrf.mxu1 }
0x298e   : > { %v6192_v17 = vadd.f32 %v9077_v18, %v6191_v35 }
0x298f   : > { %8831 = vmatpush.msk.msra.mxu0 %vm5142_vm8, %v6078_v13 }
0x2990   : > { %8811 = vmatpush.xpose.msk.msrb.mxu1 %vm460_vm1, %v12083_v21  ;;  %8823 = vmatpush.xpose.msk.msrb.mxu3 %vm460_vm1, %v12083_v21 }
0x2991   : > { %6365 = vmatpush.msra.mxu0 %v6075_v41 }
0x2993   : > { %6366 = vmatpush.msra.mxu0 %v6072_v43  ;;  %8812 = vmatmul.msk.f32.vlgmr.msrb.gmra.mxu1 %vm460_vm1, %v6045_v2 }
0x2994   : > { %6427 = vmatpush.msra.mxu3 %v6384_v40  ;;  %v6218_v12 = vpop.f32.mrf.mxu2 }
0x2995   : > { %8824 = vmatmul.msk.f32.vlgmr.msrb.gmra.mxu3 %vm460_vm1, %v6192_v17  ;;  %v6194_v53 = vpop.f32.mrf.mxu0  ;;  %v6219_v9 = vadd.f32 %v9078_v45, %v6218_v12 }
0x2996   : > { %6428 = vmatpush.msra.mxu3 %v6383_v50  ;;  %v6195_v56 = vadd.f32 %v9077_v18, %v6194_v53 }
0x2998   : > { %6429 = vmatpush.msra.mxu3 %v6382_v51 }
0x299a   : > { %6430 = vmatpush.msra.mxu3 %v6381_v54 }
0x299b   : > { %8813 = vmatmul.msk.f32.gmra.mxu1 %vm460_vm1, %v6048_v55 }
0x299c   : > { %v6221_v57 = vpop.f32.mrf.mxu2  ;;  %6606 = vmatpush.msrb.mxu3 %v6563_v59 }
0x299d   : > { %8825 = vmatmul.msk.f32.gmra.mxu3 %vm460_vm1, %v6195_v56  ;;  %v6197_v46 = vpop.f32.mrf.mxu0  ;;  %v6222_v48 = vadd.f32 %v9078_v45, %v6221_v57 }
0x299e   : > { %6607 = vmatpush.msrb.mxu3 %v6562_v61  ;;  %v6198_v0 = vadd.f32 %v9077_v18, %v6197_v46 }
0x29a0   : > { %6608 = vmatpush.msrb.mxu3 %v6561_v31 }
0x29a2   : > { %6609 = vmatpush.msrb.mxu3 %v6560_v27 }
0x29a3   : > { %8814 = vmatmul.msk.f32.gmra.mxu1 %vm460_vm1, %v6051_v62 }
0x29a4   : > { %v6224_v39 = vpop.f32.mrf.mxu2 }
0x29a5   : > { %8826 = vmatmul.msk.f32.gmra.mxu3 %vm460_vm1, %v6198_v0  ;;  %v6225_v47 = vadd.f32 %v9078_v45, %v6224_v39 }
0x29a7   : > { %8827 = vmatpush.msk.msra.mxu1 %vm5142_vm8, %v6225_v47 }
0x29a9   : > { %6327 = vmatpush.msra.mxu1 %v6222_v48 }
0x29ab   : > { %6328 = vmatpush.msra.mxu1 %v6219_v9 }
0x29ac   : > { %v6405_v45 = vpop.f32.mrf.mxu2 }
0x29ad   : > { %8838 = vmatmul.msk.f32.vlgmr.msra.gmra.mxu3 %vm460_vm1, %v11980_v38  ;;  %8841 = vmatpush.xpose.msk.msrb.mxu1 %vm460_vm1, %v12065_v26 }
0x29b1   : > { %8842 = vmatpush.xpose.msk.msrb.mxu1 %vm460_vm1, %v12071_v63 }
0x29b4   : > { %v6408_v48 = vpop.f32.mrf.mxu2 }
0x29b5   : > { %8839 = vmatmul.msk.f32.gmra.mxu3 %vm460_vm1, %v11992_v5  ;;  %8843 = vmatpush.xpose.msk.msrb.mxu1 %vm460_vm1, %v12083_v21 }
0x29bd   : > { %8840 = vmatmul.msk.f32.gmra.mxu3 %vm460_vm1, %v12013_v49 }
0x29c5   : > { %8854 = vmatmul.msk.f32.vlgmr.msrb.gmra.mxu3 %vm460_vm1, %v11980_v38 }
0x29cd   : > { %8855 = vmatmul.msk.f32.gmra.mxu3 %vm460_vm1, %v11992_v5 }
0x29d5   : > { %8856 = vmatmul.msk.f32.gmra.mxu3 %vm460_vm1, %v12013_v49 }
0x2a10   : > { %v6115_v7 = vpop.f32.mrf.mxu1 }
0x2a11   : > { %v6124_v13 = vmul.f32 0.35355338, %v6115_v7 }
0x2a13   : > { %v12163_v41 = vadd.f32 %v6124_v13, %v11781_v10 }
0x2a15   : > { %v6130_v51 = vsel %vm5333_vm9, %v12163_v41, -inf }
0x2a18   : > { %v6253_v36 = vpop.f32.mrf.mxu3  ;;  %v6118_v18 = vpop.f32.mrf.mxu1 }
0x2a19   : > { %v6262_v14 = vmul.f32 0.35355338, %v6253_v36  ;;  %v6125_v50 = vmul.f32 0.35355338, %v6118_v18 }
0x2a1b   : > { %v6265_v58 = vadd.f32 %v6262_v14, %v11781_v10  ;;  %v12169_v53 = vadd.f32 %v6125_v50, %v11788_v28 }
0x2a1d   : > { %v6268_v37 = vsel %vm5333_vm9, %v6265_v58, -inf  ;;  %v6133_v57 = vsel %vm5333_vm9, %v12169_v53, -inf }
0x2a1e   : > { %6269 = vmax.xlane.f32.xlu1 %v6268_v37 }
0x2a20   : > { %v6256_v32 = vpop.f32.mrf.mxu3  ;;  %v6121_v54 = vpop.f32.mrf.mxu1 }
0x2a21   : > { %v6263_v4 = vmul.f32 0.35355338, %v6256_v32  ;;  %v6126_v56 = vmul.f32 0.35355338, %v6121_v54 }
0x2a23   : > { %v6266_v11 = vadd.f32 %v6263_v4, %v11788_v28  ;;  %v12175_v59 = vadd.f32 %v6126_v56, %v11795_v60 }
0x2a25   : > { %v6271_v25 = vsel %vm5333_vm9, %v6266_v11, -inf  ;;  %v6136_v61 = vsel %vm5340_vm11, %v12175_v59, -inf }
0x2a26   : > { %6272 = vmax.xlane.f32.xlu0 %v6271_v25 }
0x2a28   : > { %v6259_v38 = vpop.f32.mrf.mxu3 }
0x2a29   : > { %v6264_v19 = vmul.f32 0.35355338, %v6259_v38 }
0x2a2b   : > { %v6267_v5 = vadd.f32 %v6264_v19, %v11795_v60 }
0x2a2d   : > { %v6274_v8 = vsel %vm5340_vm11, %v6267_v5, -inf }
0x2a2e   : > { %6275 = vmax.xlane.f32.xlu2 %v6274_v8 }
0x2a30   : > { %v6432_v49 = vpop.f32.mrf.mxu3 }
0x2a31   : > { %v6433_v15 = vadd.f32 %v9081_v24, %v6432_v49 }
0x2a38   : > { %v6435_v6 = vpop.f32.mrf.mxu3 }
0x2a39   : > { %v6436_v16 = vadd.f32 %v9081_v24, %v6435_v6 }
0x2a40   : > { %v6438_v22 = vpop.f32.mrf.mxu3 }
0x2a41   : > { %v6439_v52 = vadd.f32 %v9081_v24, %v6438_v22  ;;  %v12209_v24 = vld [vmem:[%s13021_s7] sm:$0xff] }
0x2a43   : > { %8847 = vmatpush.msk.msrb.mxu0 %vm5142_vm8, %v6439_v52 }
0x2a45   : > { %6541 = vmatpush.msrb.mxu0 %v6436_v16 }
0x2a47   : > { %6542 = vmatpush.msrb.mxu0 %v6433_v15 }
0x2a91   : > { %v6270_v30 = vpop.xlane.xlu1 %6269 }
0x2a92   : > { %v6277_v23 = vsub.f32 %v6265_v58, %v6270_v30 }
0x2a94   : > { %v6280_v29 = vmul.f32 1.442695, %v6277_v23 }
0x2a96   : > { %9239 = vpow2.f32 %v6280_v29  ;;  %v12217_v29 = vld [vmem:[%s13021_s7 + $0x8] sm:$0xff] }
0x2a99   : > { %v6273_v3 = vpop.xlane.xlu0 %6272 }
0x2a9a   : > { %v6278_v33 = vsub.f32 %v6266_v11, %v6273_v3 }
0x2a9c   : > { %v9240_v34 = vpop.eup %9239  ;;  %v6282_v42 = vmul.f32 1.442695, %v6278_v33 }
0x2a9d   : > { %v6286_v35 = vsel %vm5333_vm9, %v9240_v34, 0.0 }
0x2a9e   : > { %9241 = vpow2.f32 %v6282_v42  ;;  %6287 = vadd.xlane.f32.xlu1 %v6286_v35  ;;  %v12224_v35 = vld [vmem:[%s13021_s7 + $0x10] sm:$0x1] }
0x2aa1   : > { %v6276_v40 = vpop.xlane.xlu2 %6275 }
0x2aa2   : > { %v6279_v2 = vsub.f32 %v6267_v5, %v6276_v40 }
0x2aa4   : > { %v9242_v43 = vpop.eup %9241  ;;  %v6284_v17 = vmul.f32 1.442695, %v6279_v2 }
0x2aa5   : > { %v6289_v12 = vsel %vm5333_vm9, %v9242_v43, 0.0 }
0x2aa6   : > { %9243 = vpow2.f32 %v6284_v17  ;;  %6290 = vadd.xlane.f32.xlu0 %v6289_v12  ;;  %6131 = vmax.xlane.f32.xlu1 %v6130_v51 }
0x2aac   : > { %v9244_v55 = vpop.eup %9243 }
0x2aad   : > { %v6292_v10 = vsel %vm5340_vm11, %v9244_v55, 0.0 }
0x2aae   : > { %6293 = vadd.xlane.f32.xlu2 %v6292_v10  ;;  %6134 = vmax.xlane.f32.xlu0 %v6133_v57 }
0x2ab6   : > { %6137 = vmax.xlane.f32.xlu2 %v6136_v61 }
0x2b11   : > { %v6288_v46 = vpop.xlane.xlu1 %6287 }
0x2b12   : > { %9245 = vrcp.f32 %v6288_v46 }
0x2b18   : > { %v9246_v28 = vpop.eup %9245 }
0x2b19   : > { %v6298_v31 = vmul.f32 %v9246_v28, %v9240_v34  ;;  %v6291_v62 = vpop.xlane.xlu0 %6290  ;;  %v6132_v49 = vpop.xlane.xlu1 %6131 }
0x2b1a   : > { %9247 = vrcp.f32 %v6291_v62  ;;  %v6139_v52 = vsub.f32 %v12163_v41, %v6132_v49 }
0x2b1b   : > { %8828 = vmatmul.msk.f32.vlgmr.msra.gmra.mxu1 %vm5333_vm9, %v6298_v31 }
0x2b1c   : > { %8857 = vmatpush.xpose.msk.msra.mxu1 %vm460_vm1, %v12065_v26  ;;  %v9079_v26 = vld [vmem:[%s13019_s5 + $0x86b] ss:$0 sm:$0xff]  ;;  %v6142_v15 = vmul.f32 1.442695, %v6139_v52 }
0x2b1d   : > { %v6406_v9 = vadd.f32 %v9079_v26, %v6405_v45  ;;  %v6409_v36 = vadd.f32 %v9079_v26, %v6408_v48 }
0x2b20   : > { %v9248_v0 = vpop.eup %9247  ;;  %8858 = vmatpush.xpose.msk.msra.mxu1 %vm460_vm1, %v12071_v63  ;;  %v6411_v63 = vpop.f32.mrf.mxu2 }
0x2b21   : > { %v6294_v60 = vpop.xlane.xlu2 %6293  ;;  %v6299_v27 = vmul.f32 %v9248_v0, %v9242_v43  ;;  %v6412_v14 = vadd.f32 %v9079_v26, %v6411_v63  ;;  %v6135_v34 = vpop.xlane.xlu0 %6134 }
0x2b22   : > { %9249 = vrcp.f32 %v6294_v60  ;;  %v6140_v40 = vsub.f32 %v12169_v53, %v6135_v34 }
0x2b23   : > { %8829 = vmatmul.msk.f32.gmra.mxu1 %vm5333_vm9, %v6299_v27  ;;  %9251 = vpow2.f32 %v6142_v15 }
0x2b24   : > { %8859 = vmatpush.xpose.msk.msra.mxu1 %vm460_vm1, %v12083_v21  ;;  %v9080_v21 = vld [vmem:[%s13019_s5 + $0x86c] ss:$0 sm:$0xff]  ;;  %v6144_v43 = vmul.f32 1.442695, %v6140_v40 }
0x2b26   : > { %9253 = vpow2.f32 %v6144_v43 }
0x2b28   : > { %v9250_v39 = vpop.eup %9249  ;;  %v6584_v58 = vpop.f32.mrf.mxu2 }
0x2b29   : > { %v6300_v47 = vmul.f32 %v9250_v39, %v9244_v55  ;;  %v6585_v37 = vadd.f32 %v9080_v21, %v6584_v58  ;;  %v9252_v13 = vpop.eup %9251  ;;  %v6138_v50 = vpop.xlane.xlu2 %6137 }
0x2b2a   : > { %v6148_v41 = vsel %vm5333_vm9, %v9252_v13, 0.0  ;;  %v6141_v54 = vsub.f32 %v12175_v59, %v6138_v50 }
0x2b2b   : > { %8830 = vmatmul.msk.f32.gmra.mxu1 %vm5333_vm9, %v6300_v47  ;;  %v6611_v47 = vpop.f32.mrf.mxu3 }
0x2b2c   : > { %v6146_v56 = vmul.f32 1.442695, %v6141_v54  ;;  %v12233_v57 = vpop.eup %9253 }
0x2b2d   : > { %v6151_v46 = vsel %vm5333_vm9, %v12233_v57, 0.0 }
0x2b2e   : > { %9255 = vpow2.f32 %v6146_v56 }
0x2b30   : > { %v6587_v32 = vpop.f32.mrf.mxu2 }
0x2b31   : > { %v6588_v4 = vadd.f32 %v9080_v21, %v6587_v32 }
0x2b33   : > { %8844 = vmatmul.msk.f32.vlgmr.msrb.gmra.mxu1 %vm460_vm1, %v6406_v9 }
0x2b34   : > { %v12239_v62 = vpop.eup %9255 }
0x2b35   : > { %v6154_v27 = vsel %vm5340_vm11, %v12239_v62, 0.0 }
0x2b38   : > { %v6590_v11 = vpop.f32.mrf.mxu2 }
0x2b39   : > { %v6591_v25 = vadd.f32 %v9080_v21, %v6590_v11 }
0x2b3b   : > { %8845 = vmatmul.msk.f32.gmra.mxu1 %vm460_vm1, %v6409_v36 }
0x2b43   : > { %8846 = vmatmul.msk.f32.gmra.mxu1 %vm460_vm1, %v6412_v14  ;;  %v6614_v14 = vpop.f32.mrf.mxu3 }
0x2b4b   : > { %8860 = vmatmul.msk.f32.vlgmr.msra.gmra.mxu1 %vm460_vm1, %v6585_v37 }
0x2b53   : > { %8861 = vmatmul.msk.f32.gmra.mxu1 %vm460_vm1, %v6588_v4 }
0x2b5b   : > { %8862 = vmatmul.msk.f32.gmra.mxu1 %vm460_vm1, %v6591_v25 }
0x2b98   : > { %v12200_v38 = vpop.f32.mrf.mxu1 }
0x2ba0   : > { %v12202_v19 = vpop.f32.mrf.mxu1 }
0x2ba8   : > { %v12204_v5 = vpop.f32.mrf.mxu1 }
0x2bb0   : > { %v6467_v8 = vpop.f32.mrf.mxu1 }
0x2bb1   : > { %v6476_v6 = vmul.f32 0.35355338, %v6467_v8  ;;  %v6617_v8 = vpop.f32.mrf.mxu3 }
0x2bb3   : > { %v6479_v22 = vadd.f32 %v12209_v24, %v6476_v6  ;;  %v9082_v6 = vld [vmem:[%s13019_s5 + $0x870] ss:$0 sm:$0xff] }
0x2bb5   : > { %v6482_v16 = vsel %vm5333_vm9, %v6479_v22, -inf }
0x2bb6   : > { %6483 = vmax.xlane.f32.xlu1 %v6482_v16  ;;  %v6618_v16 = vadd.f32 %v9082_v6, %v6617_v8  ;;  %v6740_v8 = vld [vmem:[%s13019_s5 + $0x9e0] sm:$0xff] }
0x2bb8   : > { %v6470_v30 = vpop.f32.mrf.mxu1 }
0x2bb9   : > { %v6477_v23 = vmul.f32 0.35355338, %v6470_v30 }
0x2bbb   : > { %v6480_v7 = vadd.f32 %v12217_v29, %v6477_v23  ;;  %v6615_v23 = vadd.f32 %v9082_v6, %v6614_v14 }
0x2bbd   : > { %v6485_v3 = vsel %vm5333_vm9, %v6480_v7, -inf }
0x2bbe   : > { %6486 = vmax.xlane.f32.xlu0 %v6485_v3 }
0x2bc0   : > { %v6473_v33 = vpop.f32.mrf.mxu1 }
0x2bc1   : > { %v6478_v42 = vmul.f32 0.35355338, %v6473_v33  ;;  %v6612_v33 = vadd.f32 %v9082_v6, %v6611_v47  ;;  %v6813_v6 = vld [vmem:[%s13019_s5 + $0x8d0] sm:$0xff] }
0x2bc3   : > { %v6481_v18 = vadd.f32 %v12224_v35, %v6478_v42 }
0x2bc5   : > { %v6488_v2 = vsel %vm5340_vm11, %v6481_v18, -inf }
0x2bc6   : > { %6149 = vadd.xlane.f32.xlu0 %v6148_v41  ;;  %6489 = vmax.xlane.f32.xlu2 %v6488_v2 }
0x2bc8   : > { %v6646_v17 = vpop.f32.mrf.mxu1 }
0x2bc9   : > { %v6655_v12 = vmul.f32 0.35355338, %v6646_v17 }
0x2bcb   : > { %v6658_v51 = vadd.f32 %v12209_v24, %v6655_v12 }
0x2bcd   : > { %v6661_v55 = vsel %vm5333_vm9, %v6658_v51, -inf }
0x2bce   : > { %6662 = vmax.xlane.f32.xlu1 %v6661_v55 }
0x2bd0   : > { %v6649_v53 = vpop.f32.mrf.mxu1 }
0x2bd1   : > { %v6656_v10 = vmul.f32 0.35355338, %v6649_v53 }
0x2bd3   : > { %v6659_v61 = vadd.f32 %v12217_v29, %v6656_v10 }
0x2bd5   : > { %v6664_v28 = vsel %vm5333_vm9, %v6659_v61, -inf }
0x2bd6   : > { %6152 = vadd.xlane.f32.xlu1 %v6151_v46  ;;  %6665 = vmax.xlane.f32.xlu2 %v6664_v28 }
0x2bd8   : > { %v6652_v31 = vpop.f32.mrf.mxu1 }
0x2bd9   : > { %v6657_v59 = vmul.f32 0.35355338, %v6652_v31 }
0x2bdb   : > { %v6660_v0 = vadd.f32 %v12224_v35, %v6657_v59 }
0x2bdd   : > { %v6667_v60 = vsel %vm5340_vm11, %v6660_v0, -inf }
0x2bde   : > { %6668 = vmax.xlane.f32.xlu0 %v6667_v60  ;;  %6155 = vadd.xlane.f32.xlu2 %v6154_v27 }
0x2c29   : > { %v6484_v45 = vpop.xlane.xlu1 %6483 }
0x2c2a   : > { %v6491_v39 = vsub.f32 %v6479_v22, %v6484_v45 }
0x2c2c   : > { %v6494_v26 = vmul.f32 1.442695, %v6491_v39 }
0x2c2e   : > { %9257 = vpow2.f32 %v6494_v26 }
0x2c31   : > { %v6487_v48 = vpop.xlane.xlu0 %6486 }
0x2c32   : > { %v6492_v9 = vsub.f32 %v6480_v7, %v6487_v48 }
0x2c34   : > { %v12245_v63 = vpop.eup %9257  ;;  %v6496_v36 = vmul.f32 1.442695, %v6492_v9 }
0x2c35   : > { %v6500_v58 = vsel %vm5333_vm9, %v12245_v63, 0.0 }
0x2c36   : > { %9259 = vpow2.f32 %v6496_v36  ;;  %6501 = vadd.xlane.f32.xlu1 %v6500_v58 }
0x2c39   : > { %v6150_v21 = vpop.xlane.xlu0 %6149  ;;  %v6490_v37 = vpop.xlane.xlu2 %6489 }
0x2c3a   : > { %9261 = vrcp.f32 %v6150_v21  ;;  %v6493_v32 = vsub.f32 %v6481_v18, %v6490_v37  ;;  %v6741_v37 = vld [vmem:[%s13019_s5 + $0x9e8] sm:$0xff] }
0x2c3b   : > { %6765 = vmatpush.msra.mxu2 %v6741_v37  ;;  %v9084_v37 = vld [vmem:[%s13019_s5 + $0x9c5] ss:$0 sm:$0xff] }
0x2c3c   : > { %v9260_v4 = vpop.eup %9259  ;;  %v6498_v11 = vmul.f32 1.442695, %v6493_v32  ;;  %v6782_v32 = vld [vmem:[%s13019_s5 + $0x8b8] sm:$0xff] }
0x2c3d   : > { %v6503_v25 = vsel %vm5333_vm9, %v9260_v4, 0.0  ;;  %6797 = vmatpush.msra.mxu3 %v6782_v32  ;;  %6766 = vmatpush.msra.mxu2 %v6740_v8  ;;  %v9086_v8 = vld [vmem:[%s13019_s5 + $0x9c0] ss:$0 sm:$0xff] }
0x2c3e   : > { %9263 = vpow2.f32 %v6498_v11  ;;  %6504 = vadd.xlane.f32.xlu0 %v6503_v25  ;;  %v6818_v11 = vld [vmem:[%s13019_s5 + $0x958] sm:$0xff] }
0x2c40   : > { %v9262_v49 = vpop.eup %9261 }
0x2c41   : > { %v6160_v22 = vmul.f32 %v9262_v49, %v9252_v13  ;;  %v6663_v52 = vpop.xlane.xlu1 %6662  ;;  %v6781_v49 = vld [vmem:[%s13019_s5 + $0x8b0] sm:$0xff] }
0x2c42   : > { %v6670_v15 = vsub.f32 %v6658_v51, %v6663_v52  ;;  %6798 = vmatpush.msra.mxu3 %v6781_v49  ;;  %v6739_v52 = vld [vmem:[%s13019_s5 + $0x9d8] sm:$0xff] }
0x2c43   : > { %8832 = vmatmul.msk.f32.vlgmr.msra.gmra.mxu0 %vm5333_vm9, %v6160_v22  ;;  %v6817_v22 = vld [vmem:[%s13019_s5 + $0x950] sm:$0xff]  ;;  %6767 = vmatpush.msra.mxu2 %v6739_v52 }
0x2c44   : > { %v9264_v30 = vpop.eup %9263  ;;  %v6673_v7 = vmul.f32 1.442695, %v6670_v15  ;;  %8863 = vmatpush.msk.msra.mxu0 %vm5142_vm8, %v6618_v16  ;;  %v6780_v16 = vld [vmem:[%s13019_s5 + $0x8a8] sm:$0xff] }
0x2c45   : > { %v6506_v3 = vsel %vm5340_vm11, %v9264_v30, 0.0  ;;  %v6812_v15 = vld [vmem:[%s13019_s5 + $0x8c8] sm:$0xff]  ;;  %6799 = vmatpush.msra.mxu3 %v6780_v16 }
0x2c46   : > { %9265 = vpow2.f32 %v6673_v7  ;;  %6720 = vmatpush.msra.mxu0 %v6615_v23  ;;  %6507 = vadd.xlane.f32.xlu2 %v6506_v3  ;;  %v6738_v23 = vld [vmem:[%s13019_s5 + $0x9d0] sm:$0xff]  ;;  %v6779_v7 = vld [vmem:[%s13019_s5 + $0x8a0] sm:$0xff] }
0x2c47   : > { %v6811_v3 = vld [vmem:[%s13019_s5 + $0x8c0] sm:$0xff]  ;;  %6768 = vmatpush.msra.mxu2 %v6738_v23  ;;  %6800 = vmatpush.msra.mxu3 %v6779_v7 }
0x2c48   : > { %6721 = vmatpush.msra.mxu0 %v6612_v33  ;;  %v6815_v33 = vld [vmem:[%s13019_s5 + $0x940] sm:$0xff] }
0x2c49   : > { %v6153_v34 = vpop.xlane.xlu1 %6152  ;;  %v6666_v42 = vpop.xlane.xlu2 %6665 }
0x2c4a   : > { %9267 = vrcp.f32 %v6153_v34  ;;  %v6671_v13 = vsub.f32 %v6659_v61, %v6666_v42 }
0x2c4c   : > { %v9266_v18 = vpop.eup %9265  ;;  %v6675_v40 = vmul.f32 1.442695, %v6671_v13  ;;  %v6961_v13 = vld [vmem:[%s13019_s5 + $0x8f8] sm:$0xff] }
0x2c4d   : > { %v6679_v41 = vsel %vm5333_vm9, %v9266_v18, 0.0  ;;  %6981 = vmatpush.msrb.mxu3 %v6961_v13  ;;  %v7178_v13 = vld [vmem:[%s13019_s5 + $0x990] sm:$0xff] }
0x2c4e   : > { %9269 = vpow2.f32 %v6675_v40  ;;  %6680 = vadd.xlane.f32.xlu1 %v6679_v41  ;;  %v6960_v40 = vld [vmem:[%s13019_s5 + $0x8f0] sm:$0xff] }
0x2c4f   : > { %v6964_v41 = vld [vmem:[%s13019_s5 + $0x970] sm:$0xff]  ;;  %6982 = vmatpush.msrb.mxu3 %v6960_v40 }
0x2c50   : > { %v9268_v2 = vpop.eup %9267 }
0x2c51   : > { %v6669_v43 = vpop.xlane.xlu0 %6668  ;;  %v6156_v17 = vpop.xlane.xlu2 %6155  ;;  %v6161_v50 = vmul.f32 %v9268_v2, %v12233_v57 }
0x2c52   : > { %v6672_v12 = vsub.f32 %v6660_v0, %v6669_v43  ;;  %9271 = vrcp.f32 %v6156_v17  ;;  %v6959_v43 = vld [vmem:[%s13019_s5 + $0x8e8] sm:$0xff] }
0x2c53   : > { %8833 = vmatmul.msk.f32.gmra.mxu0 %vm5333_vm9, %v6161_v50  ;;  %v6963_v17 = vld [vmem:[%s13019_s5 + $0x968] sm:$0xff]  ;;  %v6958_v50 = vld [vmem:[%s13019_s5 + $0x8e0] sm:$0xff]  ;;  %6983 = vmatpush.msrb.mxu3 %v6959_v43 }
0x2c54   : > { %v9270_v51 = vpop.eup %9269  ;;  %v6677_v54 = vmul.f32 1.442695, %v6672_v12  ;;  %v6962_v12 = vld [vmem:[%s13019_s5 + $0x960] sm:$0xff] }
0x2c55   : > { %v6682_v55 = vsel %vm5333_vm9, %v9270_v51, 0.0  ;;  %6984 = vmatpush.msrb.mxu3 %v6958_v50 }
0x2c56   : > { %9273 = vpow2.f32 %v6677_v54  ;;  %6683 = vadd.xlane.f32.xlu0 %v6682_v55 }
0x2c58   : > { %v9272_v56 = vpop.eup %9271 }
0x2c59   : > { %v6162_v53 = vmul.f32 %v9272_v56, %v12239_v62 }
0x2c5b   : > { %8834 = vmatmul.msk.f32.gmra.mxu0 %vm5333_vm9, %v6162_v53 }
0x2c5c   : > { %v9274_v10 = vpop.eup %9273 }
0x2c5d   : > { %v6685_v61 = vsel %vm5340_vm11, %v9274_v10, 0.0 }
0x2c5e   : > { %6686 = vadd.xlane.f32.xlu2 %v6685_v61 }
0x2ca9   : > { %v6502_v57 = vpop.xlane.xlu1 %6501 }
0x2caa   : > { %9275 = vrcp.f32 %v6502_v57 }
0x2cb0   : > { %v9276_v46 = vpop.eup %9275 }
0x2cb1   : > { %v6512_v28 = vmul.f32 %v9276_v46, %v12245_v63  ;;  %v6505_v31 = vpop.xlane.xlu0 %6504 }
0x2cb2   : > { %9277 = vrcp.f32 %v6505_v31 }
0x2cb3   : > { %8848 = vmatmul.msk.f32.vlgmr.msrb.gmra.mxu0 %vm5333_vm9, %v6512_v28 }
0x2cb4   : > { %6861 = vmatpush.msrb.mxu0 %v6818_v11 }
0x2cb6   : > { %6862 = vmatpush.msrb.mxu0 %v6817_v22 }
0x2cb8   : > { %v9278_v59 = vpop.eup %9277 }
0x2cb9   : > { %v6508_v0 = vpop.xlane.xlu2 %6507  ;;  %v6513_v60 = vmul.f32 %v9278_v59, %v9260_v4  ;;  %v6814_v4 = vld [vmem:[%s13019_s5 + $0x8d8] sm:$0xff] }
0x2cba   : > { %9279 = vrcp.f32 %v6508_v0  ;;  %6834 = vmatpush.msrb.mxu1 %v6814_v4 }
0x2cbb   : > { %8849 = vmatmul.msk.f32.gmra.mxu0 %vm5333_vm9, %v6513_v60  ;;  %v7173_v60 = vld [vmem:[%s13019_s5 + $0x908] sm:$0xff] }
0x2cbc   : > { %6835 = vmatpush.msrb.mxu1 %v6813_v6 }
0x2cbe   : > { %6836 = vmatpush.msrb.mxu1 %v6812_v15  ;;  %v9083_v15 = vld [vmem:[%s13019_s5 + $0x9c1] ss:$0 sm:$0xff] }
0x2cc0   : > { %v9280_v62 = vpop.eup %9279  ;;  %v6368_v58 = vpop.f32.mrf.mxu0  ;;  %6837 = vmatpush.msrb.mxu1 %v6811_v3  ;;  %v7179_v3 = vld [vmem:[%s13019_s5 + $0x998] sm:$0xff] }
0x2cc1   : > { %v6681_v27 = vpop.xlane.xlu1 %6680  ;;  %v6514_v45 = vmul.f32 %v9280_v62, %v9264_v30  ;;  %v6816_v30 = vld [vmem:[%s13019_s5 + $0x948] sm:$0xff]  ;;  %v6369_v54 = vadd.f32 %v6368_v58, %v12200_v38 }
0x2cc2   : > { %9281 = vrcp.f32 %v6681_v27  ;;  %6863 = vmatpush.msrb.mxu0 %v6816_v30  ;;  %v9088_v30 = vld [vmem:[%s13019_s5 + $0x9c2] ss:$0 sm:$0xff] }
0x2cc3   : > { %8850 = vmatmul.msk.f32.gmra.mxu0 %vm5333_vm9, %v6514_v45 }
0x2cc4   : > { %6864 = vmatpush.msrb.mxu0 %v6815_v33 }
0x2cc8   : > { %v9282_v39 = vpop.eup %9281 }
0x2cc9   : > { %v6691_v47 = vmul.f32 %v9282_v39, %v9266_v18  ;;  %v6684_v26 = vpop.xlane.xlu0 %6683  ;;  %v6965_v18 = vld [vmem:[%s13019_s5 + $0x978] sm:$0xff]  ;;  %v7172_v39 = vld [vmem:[%s13019_s5 + $0x900] sm:$0xff] }
0x2cca   : > { %9283 = vrcp.f32 %v6684_v26  ;;  %7008 = vmatpush.msra.mxu1 %v6965_v18  ;;  %v7352_v26 = vld [vmem:[%s13019_s5 + $0x928] sm:$0xff] }
0x2ccb   : > { %8864 = vmatmul.msk.f32.vlgmr.msra.gmra.mxu0 %vm5333_vm9, %v6691_v47  ;;  %v7353_v47 = vld [vmem:[%s13019_s5 + $0x930] sm:$0xff]  ;;  %v7177_v18 = vld [vmem:[%s13019_s5 + $0x988] sm:$0xff] }
0x2ccc   : > { %7009 = vmatpush.msra.mxu1 %v6964_v41  ;;  %v7176_v41 = vld [vmem:[%s13019_s5 + $0x980] sm:$0xff] }
0x2cce   : > { %7010 = vmatpush.msra.mxu1 %v6963_v17 }
0x2cd0   : > { %v9284_v48 = vpop.eup %9283  ;;  %v6371_v21 = vpop.f32.mrf.mxu0  ;;  %7011 = vmatpush.msra.mxu1 %v6962_v12 }
0x2cd1   : > { %v6687_v9 = vpop.xlane.xlu2 %6686  ;;  %v6692_v63 = vmul.f32 %v9284_v48, %v9270_v51  ;;  %v9073_v51 = vld [vmem:[%s13019_s5 + $0x898] ss:$0 sm:$0xff]  ;;  %v6372_v57 = vadd.f32 %v6371_v21, %v12202_v19  ;;  %v7351_v48 = vld [vmem:[%s13019_s5 + $0x920] sm:$0xff] }
0x2cd2   : > { %9285 = vrcp.f32 %v6687_v9  ;;  %v5976_v53 = vadd.f32 %v9073_v51, %v12155_v44  ;;  %v5979_v44 = vadd.f32 %v9073_v51, %v12157_v1  ;;  %v7175_v1 = vld [vmem:[%s13019_s5 + $0x918] sm:$0xff]  ;;  %v5982_v62 = vadd.f32 %v9073_v51, %v12159_v20 }
0x2cd3   : > { %8865 = vmatmul.msk.f32.gmra.mxu0 %vm5333_vm9, %v6692_v63  ;;  %v7354_v20 = vld [vmem:[%s13019_s5 + $0x938] sm:$0xff] }
0x2cd8   : > { %v9286_v36 = vpop.eup %9285  ;;  %v6374_v25 = vpop.f32.mrf.mxu0 }
0x2cd9   : > { %v6693_v14 = vmul.f32 %v9286_v36, %v9274_v10  ;;  %v6375_v19 = vadd.f32 %v6374_v25, %v12204_v5  ;;  %v7174_v5 = vld [vmem:[%s13019_s5 + $0x910] sm:$0xff] }
0x2cdb   : > { %8866 = vmatmul.msk.f32.gmra.mxu0 %vm5333_vm9, %v6693_v14 }
0x2d30   : > { %v6544_v34 = vpop.f32.mrf.mxu0 }
0x2d31   : > { %v6553_v55 = vadd.f32 %v6544_v34, %v6369_v54  ;;  %v7358_v54 = vld [vmem:[%s13019_s5 + $0x9b8] sm:$0xff] }
0x2d38   : > { %v6547_v42 = vpop.f32.mrf.mxu0 }
0x2d39   : > { %v6554_v38 = vadd.f32 %v6547_v42, %v6372_v57  ;;  %v7356_v57 = vld [vmem:[%s13019_s5 + $0x9a8] sm:$0xff] }
0x2d40   : > { %v6550_v2 = vpop.f32.mrf.mxu0 }
0x2d41   : > { %v6555_v59 = vadd.f32 %v6550_v2, %v6375_v19  ;;  %v9087_v2 = vld [vmem:[%s13019_s5 + $0x9c6] ss:$0 sm:$0xff] }
0x2d48   : > { %v6723_v56 = vpop.f32.mrf.mxu0 }
0x2d49   : > { %v6732_v10 = vadd.f32 %v6723_v56, %v6553_v55  ;;  %v7357_v55 = vld [vmem:[%s13019_s5 + $0x9b0] sm:$0xff] }
0x2d4b   : > { %v12347_v61 = vadd.f32 %v6732_v10, %v5976_v53 }
0x2d4d   : > { %8867 = vmatmul.msk.f32.vlgmr.msra.gmra.mxu2 %vm460_vm1, %v12347_v61  ;;  %8870 = vmatmul.msk.f32.vlgmr.msra.gmra.mxu3 %vm460_vm1, %v12347_v61 }
0x2d4e   : > { %8873 = vmatmul.msk.f32.vlgmr.msrb.gmra.mxu1 %vm460_vm1, %v12347_v61  ;;  %8876 = vmatmul.msk.f32.vlgmr.msrb.gmra.mxu0 %vm460_vm1, %v12347_v61 }
0x2d4f   : > { %7195 = vmatpush.msrb.mxu1 %v7175_v1 }
0x2d50   : > { %v6726_v46 = vpop.f32.mrf.mxu0 }
0x2d51   : > { %v6733_v28 = vadd.f32 %v6726_v46, %v6554_v38  ;;  %7196 = vmatpush.msrb.mxu1 %v7174_v5  ;;  %v7355_v38 = vld [vmem:[%s13019_s5 + $0x9a0] sm:$0xff] }
0x2d53   : > { %v12359_v31 = vadd.f32 %v6733_v28, %v5979_v44  ;;  %7197 = vmatpush.msrb.mxu1 %v7173_v60 }
0x2d55   : > { %8868 = vmatmul.msk.f32.gmra.mxu2 %vm460_vm1, %v12359_v31  ;;  %8871 = vmatmul.msk.f32.gmra.mxu3 %vm460_vm1, %v12359_v31 }
0x2d56   : > { %8874 = vmatmul.msk.f32.gmra.mxu1 %vm460_vm1, %v12359_v31  ;;  %8877 = vmatmul.msk.f32.gmra.mxu0 %vm460_vm1, %v12359_v31 }
0x2d57   : > { %7198 = vmatpush.msrb.mxu1 %v7172_v39 }
0x2d58   : > { %v6729_v0 = vpop.f32.mrf.mxu0 }
0x2d59   : > { %v6734_v27 = vadd.f32 %v6729_v0, %v6555_v59 }
0x2d5b   : > { %v12380_v45 = vadd.f32 %v6734_v27, %v5982_v62 }
0x2d5d   : > { %8869 = vmatmul.msk.f32.gmra.mxu2 %vm460_vm1, %v12380_v45  ;;  %8872 = vmatmul.msk.f32.gmra.mxu3 %vm460_vm1, %v12380_v45 }
0x2d5e   : > { %8875 = vmatmul.msk.f32.gmra.mxu1 %vm460_vm1, %v12380_v45  ;;  %8878 = vmatmul.msk.f32.gmra.mxu0 %vm460_vm1, %v12380_v45 }
0x2d65   : > { %8885 = vmatmul.msk.f32.vlgmr.msrb.gmra.mxu3 %vm460_vm1, %v12347_v61 }
0x2d66   : > { %8888 = vmatmul.msk.f32.vlgmr.msra.gmra.mxu1 %vm460_vm1, %v12347_v61 }
0x2d67   : > { %7374 = vmatpush.msra.mxu1 %v7354_v20  ;;  %v9091_v20 = vld [vmem:[%s13019_s5 + $0x9c7] ss:$0 sm:$0xff] }
0x2d69   : > { %7375 = vmatpush.msra.mxu1 %v7353_v47 }
0x2d6b   : > { %7376 = vmatpush.msra.mxu1 %v7352_v26 }
0x2d6d   : > { %8886 = vmatmul.msk.f32.gmra.mxu3 %vm460_vm1, %v12359_v31  ;;  %7377 = vmatpush.msra.mxu1 %v7351_v48 }
0x2d6e   : > { %8889 = vmatmul.msk.f32.gmra.mxu1 %vm460_vm1, %v12359_v31 }
0x2d75   : > { %8887 = vmatmul.msk.f32.gmra.mxu3 %vm460_vm1, %v12380_v45 }
0x2d76   : > { %8890 = vmatmul.msk.f32.gmra.mxu1 %vm460_vm1, %v12380_v45 }
0x2d7e   : > { %8905 = vmatmul.msk.f32.vlgmr.msrb.gmra.mxu1 %vm460_vm1, %v12347_v61 }
0x2d86   : > { %8906 = vmatmul.msk.f32.gmra.mxu1 %vm460_vm1, %v12359_v31 }
0x2d8e   : > { %8907 = vmatmul.msk.f32.gmra.mxu1 %vm460_vm1, %v12380_v45 }
0x2d96   : > { %8921 = vmatmul.msk.f32.vlgmr.msra.gmra.mxu1 %vm460_vm1, %v12347_v61 }
0x2d9e   : > { %8922 = vmatmul.msk.f32.gmra.mxu1 %vm460_vm1, %v12359_v31 }
0x2da6   : > { %8923 = vmatmul.msk.f32.gmra.mxu1 %vm460_vm1, %v12380_v45 }
0x2dcb   : > { %v6839_v9 = vpop.f32.mrf.mxu1  ;;  %v6866_v63 = vpop.f32.mrf.mxu0 }
0x2dcc   : > { %v6867_v49 = vadd.f32 %v9084_v37, %v6866_v63  ;;  %v6840_v34 = vadd.f32 %v9083_v15, %v6839_v9 }
0x2dd0   : > { %v6802_v36 = vpop.f32.mrf.mxu3  ;;  %v12522_v63 = vpop.f32.mrf.mxu2 }
0x2dd1   : > { %v12454_v7 = vadd.f32 %v9086_v8, %v6802_v36 }
0x2dd3   : > { %v6842_v14 = vpop.f32.mrf.mxu1  ;;  %v6869_v58 = vpop.f32.mrf.mxu0 }
0x2dd4   : > { %v6870_v25 = vadd.f32 %v9084_v37, %v6869_v58  ;;  %v6843_v12 = vadd.f32 %v9083_v15, %v6842_v14 }
0x2dd8   : > { %v6805_v21 = vpop.f32.mrf.mxu3  ;;  %v12524_v36 = vpop.f32.mrf.mxu2 }
0x2dd9   : > { %v12442_v16 = vadd.f32 %v9086_v8, %v6805_v21 }
0x2ddb   : > { %v6845_v32 = vpop.f32.mrf.mxu1  ;;  %v6872_v4 = vpop.f32.mrf.mxu0 }
0x2ddc   : > { %v6873_v11 = vadd.f32 %v9084_v37, %v6872_v4  ;;  %v6846_v46 = vadd.f32 %v9083_v15, %v6845_v32 }
0x2dde   : > { %8901 = vmatpush.msk.msra.mxu3 %vm5142_vm8, %v6873_v11 }
0x2de0   : > { %7160 = vmatpush.msra.mxu3 %v6870_v25  ;;  %v6808_v6 = vpop.f32.mrf.mxu3  ;;  %v12526_v14 = vpop.f32.mrf.mxu2 }
0x2de1   : > { %v12436_v22 = vadd.f32 %v9086_v8, %v6808_v6 }
0x2de2   : > { %7161 = vmatpush.msra.mxu3 %v6867_v49 }
0x2de3   : > { %v7013_v52 = vpop.f32.mrf.mxu1  ;;  %8879 = vmatpush.xpose.msk.msrb.mxu2 %vm460_vm1, %v12436_v22  ;;  %8891 = vmatpush.xpose.msk.msra.mxu0 %vm460_vm1, %v12436_v22 }
0x2de4   : > { %v7014_v56 = vadd.f32 %v9087_v2, %v7013_v52 }
0x2de7   : > { %8880 = vmatpush.xpose.msk.msrb.mxu2 %vm460_vm1, %v12442_v16  ;;  %8892 = vmatpush.xpose.msk.msra.mxu0 %vm460_vm1, %v12442_v16 }
0x2de8   : > { %v6986_v23 = vpop.f32.mrf.mxu3 }
0x2de9   : > { %v6987_v42 = vadd.f32 %v9088_v30, %v6986_v23 }
0x2deb   : > { %v7016_v33 = vpop.f32.mrf.mxu1  ;;  %8881 = vmatpush.xpose.msk.msrb.mxu2 %vm460_vm1, %v12454_v7  ;;  %8893 = vmatpush.xpose.msk.msra.mxu0 %vm460_vm1, %v12454_v7 }
0x2dec   : > { %v7017_v51 = vadd.f32 %v9087_v2, %v7016_v33 }
0x2dee   : > { %8882 = vmatmul.msk.f32.vlgmr.msrb.gmra.mxu2 %vm460_vm1, %v6840_v34  ;;  %8894 = vmatmul.msk.f32.vlgmr.msra.gmra.mxu0 %vm460_vm1, %v6987_v42 }
0x2def   : > { %7222 = vmatpush.msrb.mxu0 %v7179_v3 }
0x2df0   : > { %v6989_v40 = vpop.f32.mrf.mxu3 }
0x2df1   : > { %7223 = vmatpush.msrb.mxu0 %v7178_v13  ;;  %v6990_v17 = vadd.f32 %v9088_v30, %v6989_v40 }
0x2df3   : > { %7224 = vmatpush.msrb.mxu0 %v7177_v18  ;;  %v7019_v43 = vpop.f32.mrf.mxu1 }
0x2df4   : > { %v7020_v50 = vadd.f32 %v9087_v2, %v7019_v43 }
0x2df5   : > { %7225 = vmatpush.msrb.mxu0 %v7176_v41 }
0x2df6   : > { %8897 = vmatpush.msk.msra.mxu2 %vm5142_vm8, %v7020_v50  ;;  %8895 = vmatmul.msk.f32.gmra.mxu0 %vm460_vm1, %v6990_v17 }
0x2df7   : > { %8883 = vmatmul.msk.f32.gmra.mxu2 %vm460_vm1, %v6843_v12  ;;  %7401 = vmatpush.msra.mxu0 %v7358_v54 }
0x2df8   : > { %7122 = vmatpush.msra.mxu2 %v7017_v51  ;;  %v6992_v53 = vpop.f32.mrf.mxu3 }
0x2df9   : > { %7402 = vmatpush.msra.mxu0 %v7357_v55  ;;  %v6993_v10 = vadd.f32 %v9088_v30, %v6992_v53 }
0x2dfa   : > { %7123 = vmatpush.msra.mxu2 %v7014_v56 }
0x2dfb   : > { %7403 = vmatpush.msra.mxu0 %v7356_v57 }
0x2dfc   : > { %8911 = vmatpush.xpose.msk.msrb.mxu2 %vm460_vm1, %v12436_v22 }
0x2dfd   : > { %7404 = vmatpush.msra.mxu0 %v7355_v38  ;;  %v7200_v38 = vpop.f32.mrf.mxu1 }
0x2dfe   : > { %8896 = vmatmul.msk.f32.gmra.mxu0 %vm460_vm1, %v6993_v10 }
0x2dff   : > { %8884 = vmatmul.msk.f32.gmra.mxu2 %vm460_vm1, %v6846_v46 }
0x2e00   : > { %8912 = vmatpush.xpose.msk.msrb.mxu2 %vm460_vm1, %v12442_v16 }
0x2e04   : > { %8913 = vmatpush.xpose.msk.msrb.mxu2 %vm460_vm1, %v12454_v7 }
0x2e06   : > { %8908 = vmatmul.msk.f32.vlgmr.msrb.gmra.mxu0 %vm460_vm1, %v12347_v61 }
0x2e0e   : > { %8909 = vmatmul.msk.f32.gmra.mxu0 %vm460_vm1, %v12359_v31 }
0x2e16   : > { %8910 = vmatmul.msk.f32.gmra.mxu0 %vm460_vm1, %v12380_v45 }
0x2e1e   : > { %8924 = vmatmul.msk.f32.vlgmr.msra.gmra.mxu0 %vm460_vm1, %v12347_v61 }
0x2e26   : > { %8925 = vmatmul.msk.f32.gmra.mxu0 %vm460_vm1, %v12359_v31 }
0x2e2e   : > { %8926 = vmatmul.msk.f32.gmra.mxu0 %vm460_vm1, %v12380_v45 }
0x2e6b   : > { %v7048_v44 = vpop.f32.mrf.mxu0 }
0x2e6c   : > { %v7057_v28 = vmul.f32 0.35355338, %v7048_v44 }
0x2e6e   : > { %v7060_v19 = vadd.f32 %v12209_v24, %v7057_v28  ;;  %v7203_v28 = vpop.f32.mrf.mxu1 }
0x2e70   : > { %v7063_v1 = vsel %vm5333_vm9, %v7060_v19, -inf }
0x2e71   : > { %7064 = vmax.xlane.f32.xlu1 %v7063_v1  ;;  %v6910_v32 = vpop.f32.mrf.mxu2 }
0x2e72   : > { %v6919_v49 = vmul.f32 0.35355338, %v6910_v32 }
0x2e73   : > { %v7051_v5 = vpop.f32.mrf.mxu0 }
0x2e74   : > { %v7058_v59 = vmul.f32 0.35355338, %v7051_v5  ;;  %v12530_v30 = vadd.f32 %v12209_v24, %v6919_v49 }
0x2e76   : > { %v7061_v0 = vadd.f32 %v12217_v29, %v7058_v59  ;;  %v6925_v13 = vsel %vm5333_vm9, %v12530_v30, -inf }
0x2e78   : > { %v7066_v60 = vsel %vm5333_vm9, %v7061_v0, -inf }
0x2e79   : > { %7067 = vmax.xlane.f32.xlu0 %v7066_v60 }
0x2e7a   : > { %v6913_v52 = vpop.f32.mrf.mxu2 }
0x2e7b   : > { %v7054_v61 = vpop.f32.mrf.mxu0  ;;  %v6920_v34 = vmul.f32 0.35355338, %v6913_v52 }
0x2e7c   : > { %v7059_v62 = vmul.f32 0.35355338, %v7054_v61 }
0x2e7d   : > { %v12536_v18 = vadd.f32 %v12217_v29, %v6920_v34 }
0x2e7e   : > { %v7062_v31 = vadd.f32 %v12224_v35, %v7059_v62 }
0x2e7f   : > { %v6928_v17 = vsel %vm5333_vm9, %v12536_v18, -inf }
0x2e80   : > { %v7069_v27 = vsel %vm5340_vm11, %v7062_v31, -inf }
0x2e81   : > { %7070 = vmax.xlane.f32.xlu2 %v7069_v27 }
0x2e82   : > { %v6916_v40 = vpop.f32.mrf.mxu2 }
0x2e83   : > { %v7227_v45 = vpop.f32.mrf.mxu0  ;;  %v6921_v2 = vmul.f32 0.35355338, %v6916_v40 }
0x2e84   : > { %v7228_v9 = vadd.f32 %v9091_v20, %v7227_v45 }
0x2e85   : > { %v12542_v50 = vadd.f32 %v12224_v35, %v6921_v2 }
0x2e87   : > { %v6931_v12 = vsel %vm5340_vm11, %v12542_v50, -inf }
0x2e8b   : > { %v7230_v39 = vpop.f32.mrf.mxu0 }
0x2e8c   : > { %v7231_v48 = vadd.f32 %v9091_v20, %v7230_v39 }
0x2e93   : > { %v7233_v47 = vpop.f32.mrf.mxu0 }
0x2e94   : > { %v7234_v26 = vadd.f32 %v9091_v20, %v7233_v47 }
0x2e96   : > { %8917 = vmatpush.msk.msrb.mxu3 %vm5142_vm8, %v7234_v26 }
0x2e98   : > { %7336 = vmatpush.msrb.mxu3 %v7231_v48 }
0x2e9a   : > { %7337 = vmatpush.msrb.mxu3 %v7228_v9 }
0x2ee4   : > { %v7065_v58 = vpop.xlane.xlu1 %7064 }
0x2ee5   : > { %v7072_v21 = vsub.f32 %v7060_v19, %v7065_v58 }
0x2ee7   : > { %v7075_v37 = vmul.f32 1.442695, %v7072_v21 }
0x2ee9   : > { %9287 = vpow2.f32 %v7075_v37 }
0x2eec   : > { %v7068_v4 = vpop.xlane.xlu0 %7067 }
0x2eed   : > { %v7073_v11 = vsub.f32 %v7061_v0, %v7068_v4 }
0x2eef   : > { %v9288_v25 = vpop.eup %9287  ;;  %v7077_v8 = vmul.f32 1.442695, %v7073_v11 }
0x2ef0   : > { %v7081_v6 = vsel %vm5333_vm9, %v9288_v25, 0.0 }
0x2ef1   : > { %9289 = vpow2.f32 %v7077_v8  ;;  %7082 = vadd.xlane.f32.xlu1 %v7081_v6 }
0x2ef4   : > { %v7071_v15 = vpop.xlane.xlu2 %7070 }
0x2ef5   : > { %v7074_v23 = vsub.f32 %v7062_v31, %v7071_v15 }
0x2ef7   : > { %v9290_v3 = vpop.eup %9289  ;;  %v7079_v33 = vmul.f32 1.442695, %v7074_v23 }
0x2ef8   : > { %v7084_v42 = vsel %vm5333_vm9, %v9290_v3, 0.0 }
0x2ef9   : > { %9291 = vpow2.f32 %v7079_v33  ;;  %7085 = vadd.xlane.f32.xlu0 %v7084_v42  ;;  %6926 = vmax.xlane.f32.xlu1 %v6925_v13 }
0x2eff   : > { %v9292_v41 = vpop.eup %9291 }
0x2f00   : > { %v7087_v43 = vsel %vm5340_vm11, %v9292_v41, 0.0 }
0x2f01   : > { %7088 = vadd.xlane.f32.xlu2 %v7087_v43  ;;  %6929 = vmax.xlane.f32.xlu0 %v6928_v17 }
0x2f09   : > { %6932 = vmax.xlane.f32.xlu2 %v6931_v12 }
0x2f64   : > { %v7083_v51 = vpop.xlane.xlu1 %7082 }
0x2f65   : > { %9293 = vrcp.f32 %v7083_v51 }
0x2f6b   : > { %v9294_v54 = vpop.eup %9293 }
0x2f6c   : > { %v7093_v55 = vmul.f32 %v9294_v54, %v9288_v25  ;;  %v7086_v56 = vpop.xlane.xlu0 %7085  ;;  %v6927_v47 = vpop.xlane.xlu1 %6926 }
0x2f6d   : > { %9295 = vrcp.f32 %v7086_v56  ;;  %v6934_v9 = vsub.f32 %v12530_v30, %v6927_v47 }
0x2f6e   : > { %8898 = vmatmul.msk.f32.vlgmr.msra.gmra.mxu2 %vm5333_vm9, %v7093_v55 }
0x2f6f   : > { %8927 = vmatpush.xpose.msk.msra.mxu2 %vm460_vm1, %v12436_v22  ;;  %v9089_v22 = vld [vmem:[%s13019_s5 + $0x9c3] ss:$0 sm:$0xff]  ;;  %v6937_v21 = vmul.f32 1.442695, %v6934_v9 }
0x2f70   : > { %v7201_v19 = vadd.f32 %v9089_v22, %v7200_v38  ;;  %v7204_v1 = vadd.f32 %v9089_v22, %v7203_v28  ;;  %v7406_v38 = vpop.f32.mrf.mxu0 }
0x2f73   : > { %v9296_v53 = vpop.eup %9295  ;;  %8928 = vmatpush.xpose.msk.msra.mxu2 %vm460_vm1, %v12442_v16  ;;  %v7206_v16 = vpop.f32.mrf.mxu1 }
0x2f74   : > { %v7089_v10 = vpop.xlane.xlu2 %7088  ;;  %v7094_v57 = vmul.f32 %v9296_v53, %v9290_v3  ;;  %v7207_v5 = vadd.f32 %v9089_v22, %v7206_v16  ;;  %v6930_v8 = vpop.xlane.xlu0 %6929 }
0x2f75   : > { %9297 = vrcp.f32 %v7089_v10  ;;  %v6935_v15 = vsub.f32 %v12536_v18, %v6930_v8 }
0x2f76   : > { %8899 = vmatmul.msk.f32.gmra.mxu2 %vm5333_vm9, %v7094_v57  ;;  %9299 = vpow2.f32 %v6937_v21 }
0x2f77   : > { %8929 = vmatpush.xpose.msk.msra.mxu2 %vm460_vm1, %v12454_v7  ;;  %v9090_v7 = vld [vmem:[%s13019_s5 + $0x9c4] ss:$0 sm:$0xff]  ;;  %v6939_v3 = vmul.f32 1.442695, %v6935_v15 }
0x2f78   : > { %v7409_v16 = vpop.f32.mrf.mxu0 }
0x2f79   : > { %9301 = vpow2.f32 %v6939_v3 }
0x2f7b   : > { %v9298_v46 = vpop.eup %9297  ;;  %v7379_v59 = vpop.f32.mrf.mxu1 }
0x2f7c   : > { %v7095_v44 = vmul.f32 %v9298_v46, %v9292_v41  ;;  %v7380_v0 = vadd.f32 %v9090_v7, %v7379_v59  ;;  %v9300_v6 = vpop.eup %9299  ;;  %v6933_v34 = vpop.xlane.xlu2 %6932 }
0x2f7d   : > { %v6943_v30 = vsel %vm5333_vm9, %v9300_v6, 0.0  ;;  %v6936_v40 = vsub.f32 %v12542_v50, %v6933_v34 }
0x2f7e   : > { %8900 = vmatmul.msk.f32.gmra.mxu2 %vm5333_vm9, %v7095_v44 }
0x2f7f   : > { %v6941_v2 = vmul.f32 1.442695, %v6936_v40  ;;  %v12585_v17 = vpop.eup %9301 }
0x2f80   : > { %v6946_v51 = vsel %vm5333_vm9, %v12585_v17, 0.0 }
0x2f81   : > { %9303 = vpow2.f32 %v6941_v2 }
0x2f83   : > { %v7382_v60 = vpop.f32.mrf.mxu1 }
0x2f84   : > { %v7383_v61 = vadd.f32 %v9090_v7, %v7382_v60 }
0x2f86   : > { %8914 = vmatmul.msk.f32.vlgmr.msrb.gmra.mxu2 %vm460_vm1, %v7201_v19 }
0x2f87   : > { %v12591_v55 = vpop.eup %9303 }
0x2f88   : > { %v6949_v10 = vsel %vm5340_vm11, %v12591_v55, 0.0 }
0x2f8b   : > { %v7385_v62 = vpop.f32.mrf.mxu1 }
0x2f8c   : > { %v7386_v31 = vadd.f32 %v9090_v7, %v7385_v62 }
0x2f8e   : > { %8915 = vmatmul.msk.f32.gmra.mxu2 %vm460_vm1, %v7204_v1 }
0x2f96   : > { %8916 = vmatmul.msk.f32.gmra.mxu2 %vm460_vm1, %v7207_v5 }
0x2f9e   : > { %8930 = vmatmul.msk.f32.vlgmr.msra.gmra.mxu2 %vm460_vm1, %v7380_v0 }
0x2fa6   : > { %8931 = vmatmul.msk.f32.gmra.mxu2 %vm460_vm1, %v7383_v61  ;;  %v7412_v61 = vpop.f32.mrf.mxu0 }
0x2fae   : > { %8932 = vmatmul.msk.f32.gmra.mxu2 %vm460_vm1, %v7386_v31  ;;  %v9092_v31 = vld [vmem:[%s13019_s5 + $0x9c8] ss:$0 sm:$0xff] }
0x2ff1   : > { %v12567_v27 = vpop.f32.mrf.mxu2 }
0x2ff9   : > { %v12569_v45 = vpop.f32.mrf.mxu2 }
0x3001   : > { %v12571_v39 = vpop.f32.mrf.mxu2 }
0x3009   : > { %v7262_v20 = vpop.f32.mrf.mxu2 }
0x300a   : > { %v7271_v26 = vmul.f32 0.35355338, %v7262_v20 }
0x300c   : > { %v7274_v48 = vadd.f32 %v12209_v24, %v7271_v26  ;;  %v7413_v26 = vadd.f32 %v9092_v31, %v7412_v61  ;;  %v7612_v61 = vld [vmem:[%s13019_s5 + $0xaa8] sm:$0xff] }
0x300e   : > { %v7277_v58 = vsel %vm5333_vm9, %v7274_v48, -inf }
0x300f   : > { %7278 = vmax.xlane.f32.xlu1 %v7277_v58  ;;  %v7410_v58 = vadd.f32 %v9092_v31, %v7409_v16  ;;  %v7536_v16 = vld [vmem:[%s13019_s5 + $0xb40] sm:$0xff] }
0x3010   : > { %7560 = vmatpush.msrb.mxu1 %v7536_v16 }
0x3011   : > { %v7265_v37 = vpop.f32.mrf.mxu2 }
0x3012   : > { %v7272_v32 = vmul.f32 0.35355338, %v7265_v37 }
0x3014   : > { %v7275_v4 = vadd.f32 %v12217_v29, %v7272_v32  ;;  %v7407_v32 = vadd.f32 %v9092_v31, %v7406_v38  ;;  %v7575_v31 = vld [vmem:[%s13019_s5 + $0xa00] sm:$0xff] }
0x3016   : > { %v7280_v11 = vsel %vm5333_vm9, %v7275_v4, -inf }
0x3017   : > { %7281 = vmax.xlane.f32.xlu0 %v7280_v11 }
0x3019   : > { %v7268_v25 = vpop.f32.mrf.mxu2 }
0x301a   : > { %v7273_v49 = vmul.f32 0.35355338, %v7268_v25 }
0x301c   : > { %v7276_v52 = vadd.f32 %v12224_v35, %v7273_v49 }
0x301e   : > { %v7283_v23 = vsel %vm5340_vm11, %v7276_v52, -inf }
0x301f   : > { %6944 = vadd.xlane.f32.xlu0 %v6943_v30  ;;  %7284 = vmax.xlane.f32.xlu2 %v7283_v23 }
0x3021   : > { %v7441_v33 = vpop.f32.mrf.mxu2 }
0x3022   : > { %v7450_v42 = vmul.f32 0.35355338, %v7441_v33 }
0x3024   : > { %v7453_v13 = vadd.f32 %v12209_v24, %v7450_v42 }
0x3026   : > { %v7456_v41 = vsel %vm5333_vm9, %v7453_v13, -inf }
0x3027   : > { %7457 = vmax.xlane.f32.xlu1 %v7456_v41 }
0x3029   : > { %v7444_v18 = vpop.f32.mrf.mxu2 }
0x302a   : > { %v7451_v43 = vmul.f32 0.35355338, %v7444_v18 }
0x302c   : > { %v7454_v12 = vadd.f32 %v12217_v29, %v7451_v43 }
0x302e   : > { %v7459_v54 = vsel %vm5333_vm9, %v7454_v12, -inf }
0x302f   : > { %6947 = vadd.xlane.f32.xlu1 %v6946_v51  ;;  %7460 = vmax.xlane.f32.xlu2 %v7459_v54 }
0x3031   : > { %v7447_v24 = vpop.f32.mrf.mxu2 }
0x3032   : > { %v7452_v50 = vmul.f32 0.35355338, %v7447_v24 }
0x3034   : > { %v7455_v56 = vadd.f32 %v12224_v35, %v7452_v50 }
0x3036   : > { %v7462_v53 = vsel %vm5340_vm11, %v7455_v56, -inf }
0x3037   : > { %7463 = vmax.xlane.f32.xlu0 %v7462_v53  ;;  %6950 = vadd.xlane.f32.xlu2 %v6949_v10 }
0x3082   : > { %v7279_v29 = vpop.xlane.xlu1 %7278 }
0x3083   : > { %v7286_v57 = vsub.f32 %v7274_v48, %v7279_v29 }
0x3085   : > { %v7289_v46 = vmul.f32 1.442695, %v7286_v57 }
0x3087   : > { %9305 = vpow2.f32 %v7289_v46 }
0x308a   : > { %v7282_v44 = vpop.xlane.xlu0 %7281 }
0x308b   : > { %v7287_v22 = vsub.f32 %v7275_v4, %v7282_v44 }
0x308d   : > { %v12597_v28 = vpop.eup %9305  ;;  %v7291_v19 = vmul.f32 1.442695, %v7287_v22 }
0x308e   : > { %v7295_v35 = vsel %vm5333_vm9, %v12597_v28, 0.0 }
0x308f   : > { %9307 = vpow2.f32 %v7291_v19  ;;  %7296 = vadd.xlane.f32.xlu1 %v7295_v35  ;;  %v7577_v35 = vld [vmem:[%s13019_s5 + $0xa10] sm:$0xff] }
0x3090   : > { %7592 = vmatpush.msrb.mxu0 %v7577_v35  ;;  %v9096_v35 = vld [vmem:[%s13019_s5 + $0xb1d] ss:$0 sm:$0xff] }
0x3092   : > { %v6945_v1 = vpop.xlane.xlu0 %6944  ;;  %v7285_v5 = vpop.xlane.xlu2 %7284 }
0x3093   : > { %9309 = vrcp.f32 %v6945_v1  ;;  %v7288_v59 = vsub.f32 %v7276_v52, %v7285_v5  ;;  %v7609_v1 = vld [vmem:[%s13019_s5 + $0xa30] sm:$0xff] }
0x3094   : > { %v7613_v5 = vld [vmem:[%s13019_s5 + $0xab0] sm:$0xff]  ;;  %7629 = vmatpush.msrb.mxu2 %v7609_v1 }
0x3095   : > { %v9308_v7 = vpop.eup %9307  ;;  %v7293_v0 = vmul.f32 1.442695, %v7288_v59 }
0x3096   : > { %v7298_v60 = vsel %vm5333_vm9, %v9308_v7, 0.0 }
0x3097   : > { %9311 = vpow2.f32 %v7293_v0  ;;  %7299 = vadd.xlane.f32.xlu0 %v7298_v60  ;;  %v7576_v0 = vld [vmem:[%s13019_s5 + $0xa08] sm:$0xff] }
0x3098   : > { %v7608_v60 = vld [vmem:[%s13019_s5 + $0xa28] sm:$0xff]  ;;  %7593 = vmatpush.msrb.mxu0 %v7576_v0 }
0x3099   : > { %v9310_v62 = vpop.eup %9309  ;;  %7630 = vmatpush.msrb.mxu2 %v7608_v60 }
0x309a   : > { %v6955_v20 = vmul.f32 %v9310_v62, %v9300_v6  ;;  %v7458_v47 = vpop.xlane.xlu1 %7457  ;;  %v7534_v62 = vld [vmem:[%s13019_s5 + $0xb30] sm:$0xff]  ;;  %7594 = vmatpush.msrb.mxu0 %v7575_v31 }
0x309b   : > { %v7465_v48 = vsub.f32 %v7453_v13, %v7458_v47  ;;  %v7611_v47 = vld [vmem:[%s13019_s5 + $0xaa0] sm:$0xff] }
0x309c   : > { %8902 = vmatmul.msk.f32.vlgmr.msra.gmra.mxu3 %vm5333_vm9, %v6955_v20  ;;  %v7607_v20 = vld [vmem:[%s13019_s5 + $0xa20] sm:$0xff] }
0x309d   : > { %v9312_v9 = vpop.eup %9311  ;;  %v7468_v21 = vmul.f32 1.442695, %v7465_v48  ;;  %8933 = vmatpush.msk.msra.mxu3 %vm5142_vm8, %v7413_v26  ;;  %v7533_v26 = vld [vmem:[%s13019_s5 + $0xb28] sm:$0xff]  ;;  %v7574_v48 = vld [vmem:[%s13019_s5 + $0x9f8] sm:$0xff]  ;;  %7631 = vmatpush.msrb.mxu2 %v7607_v20 }
0x309e   : > { %v7301_v37 = vsel %vm5340_vm11, %v9312_v9, 0.0  ;;  %7595 = vmatpush.msrb.mxu0 %v7574_v48  ;;  %v7973_v48 = vld [vmem:[%s13019_s5 + $0xae8] sm:$0xff] }
0x309f   : > { %9313 = vpow2.f32 %v7468_v21  ;;  %7515 = vmatpush.msra.mxu3 %v7410_v58  ;;  %7302 = vadd.xlane.f32.xlu2 %v7301_v37  ;;  %v7610_v58 = vld [vmem:[%s13019_s5 + $0xa98] sm:$0xff] }
0x30a1   : > { %7516 = vmatpush.msra.mxu3 %v7407_v32  ;;  %v7756_v32 = vld [vmem:[%s13019_s5 + $0xa50] sm:$0xff] }
0x30a2   : > { %v6948_v4 = vpop.xlane.xlu1 %6947  ;;  %v7461_v11 = vpop.xlane.xlu2 %7460  ;;  %7776 = vmatpush.msra.mxu0 %v7756_v32 }
0x30a3   : > { %9315 = vrcp.f32 %v6948_v4  ;;  %v7466_v25 = vsub.f32 %v7454_v12, %v7461_v11  ;;  %v7760_v4 = vld [vmem:[%s13019_s5 + $0xad0] sm:$0xff]  ;;  %v7755_v11 = vld [vmem:[%s13019_s5 + $0xa48] sm:$0xff] }
0x30a4   : > { %7777 = vmatpush.msra.mxu0 %v7755_v11 }
0x30a5   : > { %v9314_v8 = vpop.eup %9313  ;;  %v7470_v49 = vmul.f32 1.442695, %v7466_v25  ;;  %v7759_v25 = vld [vmem:[%s13019_s5 + $0xac8] sm:$0xff] }
0x30a6   : > { %v7474_v6 = vsel %vm5333_vm9, %v9314_v8, 0.0 }
0x30a7   : > { %9317 = vpow2.f32 %v7470_v49  ;;  %7475 = vadd.xlane.f32.xlu1 %v7474_v6  ;;  %v7754_v49 = vld [vmem:[%s13019_s5 + $0xa40] sm:$0xff] }
0x30a8   : > { %v7758_v6 = vld [vmem:[%s13019_s5 + $0xac0] sm:$0xff]  ;;  %7778 = vmatpush.msra.mxu0 %v7754_v49 }
0x30a9   : > { %v9316_v52 = vpop.eup %9315 }
0x30aa   : > { %v7464_v15 = vpop.xlane.xlu0 %7463  ;;  %v6951_v30 = vpop.xlane.xlu2 %6950  ;;  %v6956_v23 = vmul.f32 %v9316_v52, %v12585_v17  ;;  %v7753_v52 = vld [vmem:[%s13019_s5 + $0xa38] sm:$0xff] }
0x30ab   : > { %v7467_v3 = vsub.f32 %v7455_v56, %v7464_v15  ;;  %9319 = vrcp.f32 %v6951_v30  ;;  %v7757_v15 = vld [vmem:[%s13019_s5 + $0xab8] sm:$0xff]  ;;  %v9085_v30 = vld [vmem:[%s13019_s5 + $0x9f0] ss:$0 sm:$0xff]  ;;  %7779 = vmatpush.msra.mxu0 %v7753_v52 }
0x30ac   : > { %8903 = vmatmul.msk.f32.gmra.mxu3 %vm5333_vm9, %v6956_v23 }
0x30ad   : > { %v9318_v33 = vpop.eup %9317  ;;  %v7472_v34 = vmul.f32 1.442695, %v7467_v3 }
0x30ae   : > { %v7477_v42 = vsel %vm5333_vm9, %v9318_v33, 0.0 }
0x30af   : > { %9321 = vpow2.f32 %v7472_v34  ;;  %7478 = vadd.xlane.f32.xlu0 %v7477_v42  ;;  %v6771_v34 = vadd.f32 %v9085_v30, %v12522_v63  ;;  %v6774_v63 = vadd.f32 %v9085_v30, %v12524_v36  ;;  %v7970_v36 = vld [vmem:[%s13019_s5 + $0xa70] sm:$0xff] }
0x30b1   : > { %v9320_v13 = vpop.eup %9319 }
0x30b2   : > { %v6957_v40 = vmul.f32 %v9320_v13, %v12591_v55 }
0x30b4   : > { %8904 = vmatmul.msk.f32.gmra.mxu3 %vm5333_vm9, %v6957_v40 }
0x30b5   : > { %v9322_v41 = vpop.eup %9321 }
0x30b6   : > { %v7480_v2 = vsel %vm5340_vm11, %v9322_v41, 0.0 }
0x30b7   : > { %7481 = vadd.xlane.f32.xlu2 %v7480_v2 }
0x3102   : > { %v7297_v18 = vpop.xlane.xlu1 %7296 }
0x3103   : > { %9323 = vrcp.f32 %v7297_v18 }
0x3109   : > { %v9324_v43 = vpop.eup %9323 }
0x310a   : > { %v7307_v17 = vmul.f32 %v9324_v43, %v12597_v28  ;;  %v7300_v12 = vpop.xlane.xlu0 %7299 }
0x310b   : > { %9325 = vrcp.f32 %v7300_v12  ;;  %v7968_v12 = vld [vmem:[%s13019_s5 + $0xa60] sm:$0xff] }
0x310c   : > { %8918 = vmatmul.msk.f32.vlgmr.msrb.gmra.mxu3 %vm5333_vm9, %v7307_v17 }
0x310d   : > { %7656 = vmatpush.msrb.mxu3 %v7613_v5 }
0x310f   : > { %7657 = vmatpush.msrb.mxu3 %v7612_v61  ;;  %v9097_v61 = vld [vmem:[%s13019_s5 + $0xb1a] ss:$0 sm:$0xff] }
0x3111   : > { %v9326_v51 = vpop.eup %9325  ;;  %7658 = vmatpush.msrb.mxu3 %v7611_v47 }
0x3112   : > { %v7303_v54 = vpop.xlane.xlu2 %7302  ;;  %v7308_v24 = vmul.f32 %v9326_v51, %v9308_v7  ;;  %v7535_v7 = vld [vmem:[%s13019_s5 + $0xb38] sm:$0xff]  ;;  %v6777_v51 = vadd.f32 %v9085_v30, %v12526_v14  ;;  %v8149_v14 = vld [vmem:[%s13019_s5 + $0xa90] sm:$0xff] }
0x3113   : > { %9327 = vrcp.f32 %v7303_v54  ;;  %7561 = vmatpush.msrb.mxu1 %v7535_v7  ;;  %7659 = vmatpush.msrb.mxu3 %v7610_v58  ;;  %v7972_v58 = vld [vmem:[%s13019_s5 + $0xae0] sm:$0xff]  ;;  %v8150_v30 = vld [vmem:[%s13019_s5 + $0xaf8] sm:$0xff] }
0x3114   : > { %8919 = vmatmul.msk.f32.gmra.mxu3 %vm5333_vm9, %v7308_v24 }
0x3115   : > { %7562 = vmatpush.msrb.mxu1 %v7534_v62  ;;  %v7974_v62 = vld [vmem:[%s13019_s5 + $0xaf0] sm:$0xff] }
0x3117   : > { %7563 = vmatpush.msrb.mxu1 %v7533_v26 }
0x3119   : > { %v9328_v50 = vpop.eup %9327 }
0x311a   : > { %v7476_v55 = vpop.xlane.xlu1 %7475  ;;  %v7309_v56 = vmul.f32 %v9328_v50, %v9312_v9  ;;  %v7606_v9 = vld [vmem:[%s13019_s5 + $0xa18] sm:$0xff] }
0x311b   : > { %9329 = vrcp.f32 %v7476_v55  ;;  %7632 = vmatpush.msrb.mxu2 %v7606_v9  ;;  %v7967_v50 = vld [vmem:[%s13019_s5 + $0xa58] sm:$0xff]  ;;  %v8148_v55 = vld [vmem:[%s13019_s5 + $0xa88] sm:$0xff] }
0x311c   : > { %8920 = vmatmul.msk.f32.gmra.mxu3 %vm5333_vm9, %v7309_v56  ;;  %v8147_v56 = vld [vmem:[%s13019_s5 + $0xa80] sm:$0xff] }
0x311d   : > { %7803 = vmatpush.msra.mxu2 %v7760_v4 }
0x311f   : > { %v7163_v28 = vpop.f32.mrf.mxu3  ;;  %7804 = vmatpush.msra.mxu2 %v7759_v25  ;;  %v8153_v25 = vld [vmem:[%s13019_s5 + $0xb10] sm:$0xff] }
0x3120   : > { %v7164_v23 = vadd.f32 %v7163_v28, %v12567_v27 }
0x3121   : > { %v9330_v53 = vpop.eup %9329  ;;  %7805 = vmatpush.msra.mxu2 %v7758_v6  ;;  %v8151_v6 = vld [vmem:[%s13019_s5 + $0xb00] sm:$0xff] }
0x3122   : > { %v7486_v10 = vmul.f32 %v9330_v53, %v9314_v8  ;;  %v7479_v29 = vpop.xlane.xlu0 %7478  ;;  %v8146_v53 = vld [vmem:[%s13019_s5 + $0xa78] sm:$0xff] }
0x3123   : > { %9331 = vrcp.f32 %v7479_v29  ;;  %7806 = vmatpush.msra.mxu2 %v7757_v15 }
0x3124   : > { %8934 = vmatmul.msk.f32.vlgmr.msra.gmra.mxu3 %vm5333_vm9, %v7486_v10 }
0x3129   : > { %v9332_v57 = vpop.eup %9331 }
0x312a   : > { %v7482_v38 = vpop.xlane.xlu2 %7481  ;;  %v7487_v46 = vmul.f32 %v9332_v57, %v9318_v33 }
0x312b   : > { %9333 = vrcp.f32 %v7482_v38 }
0x312c   : > { %8935 = vmatmul.msk.f32.gmra.mxu3 %vm5333_vm9, %v7487_v46  ;;  %v9094_v46 = vld [vmem:[%s13019_s5 + $0xb18] ss:$0 sm:$0xff] }
0x312f   : > { %v7166_v19 = vpop.f32.mrf.mxu3 }
0x3130   : > { %v7167_v40 = vadd.f32 %v7166_v19, %v12569_v45 }
0x3131   : > { %v9334_v44 = vpop.eup %9333 }
0x3132   : > { %v7488_v22 = vmul.f32 %v9334_v44, %v9322_v41 }
0x3134   : > { %8936 = vmatmul.msk.f32.gmra.mxu3 %vm5333_vm9, %v7488_v22 }
0x3137   : > { %v7169_v59 = vpop.f32.mrf.mxu3 }
0x3138   : > { %v7170_v45 = vadd.f32 %v7169_v59, %v12571_v39  ;;  %v7969_v39 = vld [vmem:[%s13019_s5 + $0xa68] sm:$0xff]  ;;  %v9095_v59 = vld [vmem:[%s13019_s5 + $0xb19] ss:$0 sm:$0xff] }
0x318f   : > { %v7339_v21 = vpop.f32.mrf.mxu3 }
0x3190   : > { %v7348_v3 = vadd.f32 %v7339_v21, %v7164_v23  ;;  %v9098_v23 = vld [vmem:[%s13019_s5 + $0xb1e] ss:$0 sm:$0xff] }
0x3197   : > { %v7342_v37 = vpop.f32.mrf.mxu3 }
0x3198   : > { %v7349_v27 = vadd.f32 %v7342_v37, %v7167_v40  ;;  %v7971_v37 = vld [vmem:[%s13019_s5 + $0xad8] sm:$0xff] }
0x319f   : > { %v7345_v8 = vpop.f32.mrf.mxu3 }
0x31a0   : > { %v7350_v43 = vadd.f32 %v7345_v8, %v7170_v45  ;;  %v8152_v8 = vld [vmem:[%s13019_s5 + $0xb08] sm:$0xff] }
0x31a7   : > { %v7518_v33 = vpop.f32.mrf.mxu3 }
0x31a8   : > { %v7527_v42 = vadd.f32 %v7518_v33, %v7348_v3 }
0x31aa   : > { %v12699_v13 = vadd.f32 %v7527_v42, %v6771_v34 }
0x31ac   : > { %8937 = vmatmul.msk.f32.vlgmr.msrb.gmra.mxu1 %vm460_vm1, %v12699_v13  ;;  %8940 = vmatmul.msk.f32.vlgmr.msrb.gmra.mxu0 %vm460_vm1, %v12699_v13 }
0x31ad   : > { %8943 = vmatmul.msk.f32.vlgmr.msrb.gmra.mxu2 %vm460_vm1, %v12699_v13  ;;  %8946 = vmatmul.msk.f32.vlgmr.msrb.gmra.mxu3 %vm460_vm1, %v12699_v13 }
0x31ae   : > { %7990 = vmatpush.msrb.mxu2 %v7970_v36 }
0x31af   : > { %v7521_v41 = vpop.f32.mrf.mxu3 }
0x31b0   : > { %v7528_v2 = vadd.f32 %v7521_v41, %v7349_v27  ;;  %7991 = vmatpush.msrb.mxu2 %v7969_v39  ;;  %v12867_v41 = vld [vmem:[%s13021_s7] sm:$0xff] }
0x31b2   : > { %v12711_v18 = vadd.f32 %v7528_v2, %v6774_v63  ;;  %7992 = vmatpush.msrb.mxu2 %v7968_v12  ;;  %v12881_v12 = vld [vmem:[%s13021_s7 + $0x10] sm:$0x1] }
0x31b4   : > { %8938 = vmatmul.msk.f32.gmra.mxu1 %vm460_vm1, %v12711_v18  ;;  %8941 = vmatmul.msk.f32.gmra.mxu0 %vm460_vm1, %v12711_v18 }
0x31b5   : > { %8944 = vmatmul.msk.f32.gmra.mxu2 %vm460_vm1, %v12711_v18  ;;  %8947 = vmatmul.msk.f32.gmra.mxu3 %vm460_vm1, %v12711_v18 }
0x31b6   : > { %7993 = vmatpush.msrb.mxu2 %v7967_v50 }
0x31b7   : > { %v7524_v17 = vpop.f32.mrf.mxu3 }
0x31b8   : > { %v7529_v54 = vadd.f32 %v7524_v17, %v7350_v43 }
0x31ba   : > { %v12732_v24 = vadd.f32 %v7529_v54, %v6777_v51 }
0x31bc   : > { %8939 = vmatmul.msk.f32.gmra.mxu1 %vm460_vm1, %v12732_v24  ;;  %8942 = vmatmul.msk.f32.gmra.mxu0 %vm460_vm1, %v12732_v24 }
0x31bd   : > { %8945 = vmatmul.msk.f32.gmra.mxu2 %vm460_vm1, %v12732_v24  ;;  %8948 = vmatmul.msk.f32.gmra.mxu3 %vm460_vm1, %v12732_v24 }
0x31c4   : > { %8955 = vmatmul.msk.f32.vlgmr.msra.gmra.mxu0 %vm460_vm1, %v12699_v13 }
0x31c5   : > { %8958 = vmatmul.msk.f32.vlgmr.msra.gmra.mxu2 %vm460_vm1, %v12699_v13 }
0x31c6   : > { %8169 = vmatpush.msra.mxu2 %v8149_v14  ;;  %v9101_v14 = vld [vmem:[%s13019_s5 + $0xb1f] ss:$0 sm:$0xff] }
0x31c8   : > { %8170 = vmatpush.msra.mxu2 %v8148_v55 }
0x31ca   : > { %8171 = vmatpush.msra.mxu2 %v8147_v56 }
0x31cc   : > { %8956 = vmatmul.msk.f32.gmra.mxu0 %vm460_vm1, %v12711_v18  ;;  %8172 = vmatpush.msra.mxu2 %v8146_v53 }
0x31cd   : > { %8959 = vmatmul.msk.f32.gmra.mxu2 %vm460_vm1, %v12711_v18 }
0x31d4   : > { %8957 = vmatmul.msk.f32.gmra.mxu0 %vm460_vm1, %v12732_v24 }
0x31d5   : > { %8960 = vmatmul.msk.f32.gmra.mxu2 %vm460_vm1, %v12732_v24 }
0x31dd   : > { %8975 = vmatmul.msk.f32.vlgmr.msrb.gmra.mxu2 %vm460_vm1, %v12699_v13 }
0x31e5   : > { %8976 = vmatmul.msk.f32.gmra.mxu2 %vm460_vm1, %v12711_v18 }
0x31ed   : > { %8977 = vmatmul.msk.f32.gmra.mxu2 %vm460_vm1, %v12732_v24 }
0x31f5   : > { %8991 = vmatmul.msk.f32.vlgmr.msra.gmra.mxu2 %vm460_vm1, %v12699_v13 }
0x31fd   : > { %8992 = vmatmul.msk.f32.gmra.mxu2 %vm460_vm1, %v12711_v18 }
0x3205   : > { %8993 = vmatmul.msk.f32.gmra.mxu2 %vm460_vm1, %v12732_v24 }
0x3229   : > { %v7597_v10 = vpop.f32.mrf.mxu0 }
0x322a   : > { %v12802_v60 = vadd.f32 %v9094_v46, %v7597_v10 }
0x3230   : > { %v7634_v29 = vpop.f32.mrf.mxu2  ;;  %v7661_v57 = vpop.f32.mrf.mxu3 }
0x3231   : > { %v7600_v38 = vpop.f32.mrf.mxu0  ;;  %v7635_v20 = vadd.f32 %v9095_v59, %v7634_v29  ;;  %v7662_v47 = vadd.f32 %v9096_v35, %v7661_v57  ;;  %v12889_v29 = vpop.f32.mrf.mxu1 }
0x3232   : > { %v12790_v16 = vadd.f32 %v9094_v46, %v7600_v38 }
0x3238   : > { %v7637_v44 = vpop.f32.mrf.mxu2  ;;  %v7664_v22 = vpop.f32.mrf.mxu3 }
0x3239   : > { %v7603_v28 = vpop.f32.mrf.mxu0  ;;  %v7665_v31 = vadd.f32 %v9096_v35, %v7664_v22  ;;  %v7638_v32 = vadd.f32 %v9095_v59, %v7637_v44  ;;  %v12891_v57 = vpop.f32.mrf.mxu1 }
0x323a   : > { %v12784_v19 = vadd.f32 %v9094_v46, %v7603_v28 }
0x323c   : > { %8949 = vmatpush.xpose.msk.msra.mxu1 %vm460_vm1, %v12784_v19  ;;  %8961 = vmatpush.xpose.msk.msra.mxu3 %vm460_vm1, %v12784_v19 }
0x3240   : > { %v7640_v1 = vpop.f32.mrf.mxu2  ;;  %v7667_v5 = vpop.f32.mrf.mxu3  ;;  %8950 = vmatpush.xpose.msk.msra.mxu1 %vm460_vm1, %v12790_v16  ;;  %8962 = vmatpush.xpose.msk.msra.mxu3 %vm460_vm1, %v12790_v16 }
0x3241   : > { %v7668_v7 = vadd.f32 %v9096_v35, %v7667_v5  ;;  %v7781_v0 = vpop.f32.mrf.mxu0  ;;  %v7641_v52 = vadd.f32 %v9095_v59, %v7640_v1  ;;  %v12893_v38 = vpop.f32.mrf.mxu1 }
0x3242   : > { %v7782_v26 = vadd.f32 %v9097_v61, %v7781_v0 }
0x3243   : > { %8971 = vmatpush.msk.msrb.mxu0 %vm5142_vm8, %v7668_v7 }
0x3244   : > { %8951 = vmatpush.xpose.msk.msra.mxu1 %vm460_vm1, %v12802_v60  ;;  %8963 = vmatpush.xpose.msk.msra.mxu3 %vm460_vm1, %v12802_v60 }
0x3245   : > { %7955 = vmatpush.msrb.mxu0 %v7665_v31 }
0x3247   : > { %7956 = vmatpush.msrb.mxu0 %v7662_v47  ;;  %8952 = vmatmul.msk.f32.vlgmr.msra.gmra.mxu1 %vm460_vm1, %v7635_v20 }
0x3248   : > { %8017 = vmatpush.msrb.mxu3 %v7974_v62  ;;  %v7808_v9 = vpop.f32.mrf.mxu2 }
0x3249   : > { %8964 = vmatmul.msk.f32.vlgmr.msra.gmra.mxu3 %vm460_vm1, %v7782_v26  ;;  %v7784_v21 = vpop.f32.mrf.mxu0  ;;  %v7809_v42 = vadd.f32 %v9098_v23, %v7808_v9 }
0x324a   : > { %8018 = vmatpush.msrb.mxu3 %v7973_v48  ;;  %v7785_v4 = vadd.f32 %v9097_v61, %v7784_v21 }
0x324c   : > { %8019 = vmatpush.msrb.mxu3 %v7972_v58 }
0x324e   : > { %8020 = vmatpush.msrb.mxu3 %v7971_v37 }
0x324f   : > { %8953 = vmatmul.msk.f32.gmra.mxu1 %vm460_vm1, %v7638_v32 }
0x3250   : > { %v7811_v11 = vpop.f32.mrf.mxu2  ;;  %8196 = vmatpush.msra.mxu3 %v8153_v25 }
0x3251   : > { %8965 = vmatmul.msk.f32.gmra.mxu3 %vm460_vm1, %v7785_v4  ;;  %v7787_v49 = vpop.f32.mrf.mxu0  ;;  %v7812_v34 = vadd.f32 %v9098_v23, %v7811_v11 }
0x3252   : > { %8197 = vmatpush.msra.mxu3 %v8152_v8  ;;  %v7788_v15 = vadd.f32 %v9097_v61, %v7787_v49 }
0x3254   : > { %8198 = vmatpush.msra.mxu3 %v8151_v6 }
0x3256   : > { %8199 = vmatpush.msra.mxu3 %v8150_v30 }
0x3257   : > { %8954 = vmatmul.msk.f32.gmra.mxu1 %vm460_vm1, %v7641_v52 }
0x3258   : > { %v7814_v3 = vpop.f32.mrf.mxu2 }
0x3259   : > { %8966 = vmatmul.msk.f32.gmra.mxu3 %vm460_vm1, %v7788_v15  ;;  %v7815_v33 = vadd.f32 %v9098_v23, %v7814_v3 }
0x325b   : > { %8967 = vmatpush.msk.msrb.mxu1 %vm5142_vm8, %v7815_v33 }
0x325d   : > { %7917 = vmatpush.msrb.mxu1 %v7812_v34 }
0x325f   : > { %7918 = vmatpush.msrb.mxu1 %v7809_v42 }
0x3260   : > { %v7995_v34 = vpop.f32.mrf.mxu2 }
0x3261   : > { %8978 = vmatmul.msk.f32.vlgmr.msrb.gmra.mxu3 %vm460_vm1, %v12699_v13  ;;  %8981 = vmatpush.xpose.msk.msra.mxu1 %vm460_vm1, %v12784_v19 }
0x3265   : > { %8982 = vmatpush.xpose.msk.msra.mxu1 %vm460_vm1, %v12790_v16 }
0x3269   : > { %8979 = vmatmul.msk.f32.gmra.mxu3 %vm460_vm1, %v12711_v18  ;;  %8983 = vmatpush.xpose.msk.msra.mxu1 %vm460_vm1, %v12802_v60 }
0x3271   : > { %8980 = vmatmul.msk.f32.gmra.mxu3 %vm460_vm1, %v12732_v24 }
0x3279   : > { %8994 = vmatmul.msk.f32.vlgmr.msra.gmra.mxu3 %vm460_vm1, %v12699_v13 }
0x3281   : > { %8995 = vmatmul.msk.f32.gmra.mxu3 %vm460_vm1, %v12711_v18  ;;  %v12874_v18 = vld [vmem:[%s13021_s7 + $0x8] sm:$0xff] }
0x3289   : > { %8996 = vmatmul.msk.f32.gmra.mxu3 %vm460_vm1, %v12732_v24 }
0x32c4   : > { %v7705_v28 = vpop.f32.mrf.mxu1 }
0x32c5   : > { %v7714_v7 = vmul.f32 0.35355338, %v7705_v28 }
0x32c7   : > { %v12897_v62 = vadd.f32 %v12867_v41, %v7714_v7 }
0x32c9   : > { %v7720_v58 = vsel %vm5333_vm9, %v12897_v62, -inf }
0x32cc   : > { %v7843_v40 = vpop.f32.mrf.mxu3  ;;  %v7708_v61 = vpop.f32.mrf.mxu1 }
0x32cd   : > { %v7852_v27 = vmul.f32 0.35355338, %v7843_v40  ;;  %v7715_v48 = vmul.f32 0.35355338, %v7708_v61 }
0x32cf   : > { %v7855_v63 = vadd.f32 %v12867_v41, %v7852_v27  ;;  %v12903_v21 = vadd.f32 %v12874_v18, %v7715_v48  ;;  %v7998_v27 = vpop.f32.mrf.mxu2 }
0x32d1   : > { %v7858_v2 = vsel %vm5333_vm9, %v7855_v63, -inf  ;;  %v7723_v25 = vsel %vm5333_vm9, %v12903_v21, -inf }
0x32d2   : > { %7859 = vmax.xlane.f32.xlu1 %v7858_v2 }
0x32d4   : > { %v7846_v45 = vpop.f32.mrf.mxu3  ;;  %v7711_v37 = vpop.f32.mrf.mxu1 }
0x32d5   : > { %v7853_v13 = vmul.f32 0.35355338, %v7846_v45  ;;  %v7716_v4 = vmul.f32 0.35355338, %v7711_v37 }
0x32d7   : > { %v7856_v36 = vadd.f32 %v12874_v18, %v7853_v13  ;;  %v12909_v8 = vadd.f32 %v12881_v12, %v7716_v4 }
0x32d9   : > { %v7861_v39 = vsel %vm5333_vm9, %v7856_v36, -inf  ;;  %v7726_v49 = vsel %vm5340_vm11, %v12909_v8, -inf }
0x32da   : > { %7862 = vmax.xlane.f32.xlu0 %v7861_v39 }
0x32dc   : > { %v7849_v43 = vpop.f32.mrf.mxu3 }
0x32dd   : > { %v7854_v17 = vmul.f32 0.35355338, %v7849_v43 }
0x32df   : > { %v7857_v51 = vadd.f32 %v12881_v12, %v7854_v17 }
0x32e1   : > { %v7864_v54 = vsel %vm5340_vm11, %v7857_v51, -inf }
0x32e2   : > { %7865 = vmax.xlane.f32.xlu2 %v7864_v54 }
0x32e4   : > { %v8022_v24 = vpop.f32.mrf.mxu3 }
0x32e5   : > { %v8023_v10 = vadd.f32 %v9101_v14, %v8022_v24 }
0x32ec   : > { %v8025_v50 = vpop.f32.mrf.mxu3 }
0x32ed   : > { %v8026_v53 = vadd.f32 %v9101_v14, %v8025_v50 }
0x32f4   : > { %v8028_v55 = vpop.f32.mrf.mxu3 }
0x32f5   : > { %v8029_v56 = vadd.f32 %v9101_v14, %v8028_v55 }
0x32f7   : > { %8987 = vmatpush.msk.msra.mxu0 %vm5142_vm8, %v8029_v56 }
0x32f9   : > { %8131 = vmatpush.msra.mxu0 %v8026_v53 }
0x32fb   : > { %8132 = vmatpush.msra.mxu0 %v8023_v10 }
0x3345   : > { %v7860_v46 = vpop.xlane.xlu1 %7859 }
0x3346   : > { %v7867_v44 = vsub.f32 %v7855_v63, %v7860_v46 }
0x3348   : > { %v7870_v22 = vmul.f32 1.442695, %v7867_v44 }
0x334a   : > { %9335 = vpow2.f32 %v7870_v22 }
0x334d   : > { %v7863_v35 = vpop.xlane.xlu0 %7862 }
0x334e   : > { %v7868_v1 = vsub.f32 %v7856_v36, %v7863_v35 }
0x3350   : > { %v9336_v5 = vpop.eup %9335  ;;  %v7872_v59 = vmul.f32 1.442695, %v7868_v1 }
0x3351   : > { %v7876_v0 = vsel %vm5333_vm9, %v9336_v5, 0.0 }
0x3352   : > { %9337 = vpow2.f32 %v7872_v59  ;;  %7877 = vadd.xlane.f32.xlu1 %v7876_v0 }
0x3355   : > { %v7866_v31 = vpop.xlane.xlu2 %7865 }
0x3356   : > { %v7869_v20 = vsub.f32 %v7857_v51, %v7866_v31 }
0x3358   : > { %v9338_v47 = vpop.eup %9337  ;;  %v7874_v26 = vmul.f32 1.442695, %v7869_v20 }
0x3359   : > { %v7879_v9 = vsel %vm5333_vm9, %v9338_v47, 0.0 }
0x335a   : > { %9339 = vpow2.f32 %v7874_v26  ;;  %7880 = vadd.xlane.f32.xlu0 %v7879_v9  ;;  %7721 = vmax.xlane.f32.xlu1 %v7720_v58 }
0x3360   : > { %v9340_v32 = vpop.eup %9339 }
0x3361   : > { %v7882_v11 = vsel %vm5340_vm11, %v9340_v32, 0.0 }
0x3362   : > { %7883 = vadd.xlane.f32.xlu2 %v7882_v11  ;;  %7724 = vmax.xlane.f32.xlu0 %v7723_v25 }
0x336a   : > { %7727 = vmax.xlane.f32.xlu2 %v7726_v49 }
0x33c5   : > { %v7878_v6 = vpop.xlane.xlu1 %7877 }
0x33c6   : > { %9341 = vrcp.f32 %v7878_v6 }
0x33cc   : > { %v9342_v52 = vpop.eup %9341 }
0x33cd   : > { %v7888_v15 = vmul.f32 %v9342_v52, %v9336_v5  ;;  %v7881_v30 = vpop.xlane.xlu0 %7880  ;;  %v7722_v55 = vpop.xlane.xlu1 %7721 }
0x33ce   : > { %9343 = vrcp.f32 %v7881_v30  ;;  %v7729_v10 = vsub.f32 %v12897_v62, %v7722_v55 }
0x33cf   : > { %8968 = vmatmul.msk.f32.vlgmr.msrb.gmra.mxu1 %vm5333_vm9, %v7888_v15 }
0x33d0   : > { %8997 = vmatpush.xpose.msk.msrb.mxu1 %vm460_vm1, %v12784_v19  ;;  %v9099_v19 = vld [vmem:[%s13019_s5 + $0xb1b] ss:$0 sm:$0xff]  ;;  %v7732_v44 = vmul.f32 1.442695, %v7729_v10 }
0x33d1   : > { %v7996_v63 = vadd.f32 %v9099_v19, %v7995_v34  ;;  %v7999_v2 = vadd.f32 %v9099_v19, %v7998_v27  ;;  %v8201_v34 = vpop.f32.mrf.mxu3 }
0x33d4   : > { %v9344_v23 = vpop.eup %9343  ;;  %8998 = vmatpush.xpose.msk.msrb.mxu1 %vm460_vm1, %v12790_v16  ;;  %v8001_v16 = vpop.f32.mrf.mxu2 }
0x33d5   : > { %v7884_v3 = vpop.xlane.xlu2 %7883  ;;  %v7889_v33 = vmul.f32 %v9344_v23, %v9338_v47  ;;  %v8002_v45 = vadd.f32 %v9099_v19, %v8001_v16  ;;  %v7725_v59 = vpop.xlane.xlu0 %7724 }
0x33d6   : > { %9345 = vrcp.f32 %v7884_v3  ;;  %v7730_v62 = vsub.f32 %v12903_v21, %v7725_v59 }
0x33d7   : > { %8969 = vmatmul.msk.f32.gmra.mxu1 %vm5333_vm9, %v7889_v33  ;;  %9347 = vpow2.f32 %v7732_v44 }
0x33d8   : > { %8999 = vmatpush.xpose.msk.msrb.mxu1 %vm460_vm1, %v12802_v60  ;;  %v9100_v60 = vld [vmem:[%s13019_s5 + $0xb1c] ss:$0 sm:$0xff]  ;;  %v7734_v47 = vmul.f32 1.442695, %v7730_v62 }
0x33d9   : > { %v8204_v16 = vpop.f32.mrf.mxu3 }
0x33da   : > { %9349 = vpow2.f32 %v7734_v47 }
0x33dc   : > { %v9346_v42 = vpop.eup %9345  ;;  %v8174_v13 = vpop.f32.mrf.mxu2 }
0x33dd   : > { %v7890_v40 = vmul.f32 %v9346_v42, %v9340_v32  ;;  %v8175_v36 = vadd.f32 %v9100_v60, %v8174_v13  ;;  %v9348_v0 = vpop.eup %9347  ;;  %v7728_v48 = vpop.xlane.xlu2 %7727 }
0x33de   : > { %v7738_v31 = vsel %vm5333_vm9, %v9348_v0, 0.0  ;;  %v7731_v37 = vsub.f32 %v12909_v8, %v7728_v48 }
0x33df   : > { %8970 = vmatmul.msk.f32.gmra.mxu1 %vm5333_vm9, %v7890_v40 }
0x33e0   : > { %v7736_v4 = vmul.f32 1.442695, %v7731_v37  ;;  %v12952_v25 = vpop.eup %9349 }
0x33e1   : > { %v7741_v6 = vsel %vm5333_vm9, %v12952_v25, 0.0 }
0x33e2   : > { %9351 = vpow2.f32 %v7736_v4 }
0x33e4   : > { %v8177_v39 = vpop.f32.mrf.mxu2 }
0x33e5   : > { %v8178_v43 = vadd.f32 %v9100_v60, %v8177_v39 }
0x33e7   : > { %8984 = vmatmul.msk.f32.vlgmr.msra.gmra.mxu1 %vm460_vm1, %v7996_v63 }
0x33e8   : > { %v12958_v15 = vpop.eup %9351 }
0x33e9   : > { %v7744_v3 = vsel %vm5340_vm11, %v12958_v15, 0.0 }
0x33ec   : > { %v8180_v17 = vpop.f32.mrf.mxu2 }
0x33ed   : > { %v8181_v51 = vadd.f32 %v9100_v60, %v8180_v17 }
0x33ef   : > { %8985 = vmatmul.msk.f32.gmra.mxu1 %vm460_vm1, %v7999_v2 }
0x33f7   : > { %8986 = vmatmul.msk.f32.gmra.mxu1 %vm460_vm1, %v8002_v45 }
0x33ff   : > { %9000 = vmatmul.msk.f32.vlgmr.msrb.gmra.mxu1 %vm460_vm1, %v8175_v36 }
0x3407   : > { %9001 = vmatmul.msk.f32.gmra.mxu1 %vm460_vm1, %v8178_v43  ;;  %v8207_v43 = vpop.f32.mrf.mxu3 }
0x340f   : > { %9002 = vmatmul.msk.f32.gmra.mxu1 %vm460_vm1, %v8181_v51  ;;  %v9102_v51 = vld [vmem:[%s13019_s5 + $0xb20] ss:$0 sm:$0xff] }
0x344c   : > { %v12934_v54 = vpop.f32.mrf.mxu1 }
0x3454   : > { %v12936_v24 = vpop.f32.mrf.mxu1 }
0x345c   : > { %v12938_v50 = vpop.f32.mrf.mxu1 }
0x3464   : > { %v8057_v14 = vpop.f32.mrf.mxu1 }
0x3465   : > { %v8066_v56 = vmul.f32 0.35355338, %v8057_v14 }
0x3467   : > { %v8069_v53 = vadd.f32 %v12867_v41, %v8066_v56  ;;  %v8208_v56 = vadd.f32 %v9102_v51, %v8207_v43 }
0x3469   : > { %v8072_v46 = vsel %vm5333_vm9, %v8069_v53, -inf }
0x346a   : > { %8073 = vmax.xlane.f32.xlu1 %v8072_v46  ;;  %v8205_v46 = vadd.f32 %v9102_v51, %v8204_v16 }
0x346c   : > { %v8060_v22 = vpop.f32.mrf.mxu1 }
0x346d   : > { %v8067_v28 = vmul.f32 0.35355338, %v8060_v22 }
0x346f   : > { %v8070_v35 = vadd.f32 %v12874_v18, %v8067_v28  ;;  %v8202_v28 = vadd.f32 %v9102_v51, %v8201_v34 }
0x3471   : > { %v8075_v1 = vsel %vm5333_vm9, %v8070_v35, -inf }
0x3472   : > { %8076 = vmax.xlane.f32.xlu0 %v8075_v1 }
0x3474   : > { %v8063_v5 = vpop.f32.mrf.mxu1 }
0x3475   : > { %v8068_v7 = vmul.f32 0.35355338, %v8063_v5 }
0x3477   : > { %v8071_v61 = vadd.f32 %v12881_v12, %v8068_v7 }
0x3479   : > { %v8078_v20 = vsel %vm5340_vm11, %v8071_v61, -inf }
0x347a   : > { %7739 = vadd.xlane.f32.xlu0 %v7738_v31  ;;  %8079 = vmax.xlane.f32.xlu2 %v8078_v20 }
0x347c   : > { %v8236_v26 = vpop.f32.mrf.mxu1 }
0x347d   : > { %v8245_v9 = vmul.f32 0.35355338, %v8236_v26 }
0x347f   : > { %v8248_v58 = vadd.f32 %v12867_v41, %v8245_v9 }
0x3481   : > { %v8251_v32 = vsel %vm5333_vm9, %v8248_v58, -inf }
0x3482   : > { %8252 = vmax.xlane.f32.xlu1 %v8251_v32 }
0x3484   : > { %v8239_v21 = vpop.f32.mrf.mxu1 }
0x3485   : > { %v8246_v11 = vmul.f32 0.35355338, %v8239_v21 }
0x3487   : > { %v8249_v49 = vadd.f32 %v12874_v18, %v8246_v11 }
0x3489   : > { %v8254_v52 = vsel %vm5333_vm9, %v8249_v49, -inf }
0x348a   : > { %7742 = vadd.xlane.f32.xlu1 %v7741_v6  ;;  %8255 = vmax.xlane.f32.xlu2 %v8254_v52 }
0x348c   : > { %v8242_v41 = vpop.f32.mrf.mxu1 }
0x348d   : > { %v8247_v8 = vmul.f32 0.35355338, %v8242_v41 }
0x348f   : > { %v8250_v30 = vadd.f32 %v12881_v12, %v8247_v8 }
0x3491   : > { %v8257_v23 = vsel %vm5340_vm11, %v8250_v30, -inf }
0x3492   : > { %8258 = vmax.xlane.f32.xlu0 %v8257_v23  ;;  %7745 = vadd.xlane.f32.xlu2 %v7744_v3 }
0x34dd   : > { %v8074_v18 = vpop.xlane.xlu1 %8073 }
0x34de   : > { %v8081_v33 = vsub.f32 %v8069_v53, %v8074_v18 }
0x34e0   : > { %v8084_v42 = vmul.f32 1.442695, %v8081_v33 }
0x34e2   : > { %9353 = vpow2.f32 %v8084_v42 }
0x34e5   : > { %v8077_v40 = vpop.xlane.xlu0 %8076 }
0x34e6   : > { %v8082_v19 = vsub.f32 %v8070_v35, %v8077_v40 }
0x34e8   : > { %v12964_v27 = vpop.eup %9353  ;;  %v8086_v63 = vmul.f32 1.442695, %v8082_v19 }
0x34e9   : > { %v8090_v12 = vsel %vm5333_vm9, %v12964_v27, 0.0 }
0x34ea   : > { %9355 = vpow2.f32 %v8086_v63  ;;  %8091 = vadd.xlane.f32.xlu1 %v8090_v12 }
0x34ed   : > { %v7740_v2 = vpop.xlane.xlu0 %7739  ;;  %v8080_v45 = vpop.xlane.xlu2 %8079 }
0x34ee   : > { %9357 = vrcp.f32 %v7740_v2  ;;  %v8083_v13 = vsub.f32 %v8071_v61, %v8080_v45 }
0x34f0   : > { %v9356_v60 = vpop.eup %9355  ;;  %v8088_v36 = vmul.f32 1.442695, %v8083_v13  ;;  %v9093_v13 = vld [vmem:[%s13019_s5 + $0xb48] ss:$0 sm:$0xff] }
0x34f1   : > { %v8093_v39 = vsel %vm5333_vm9, %v9356_v60, 0.0  ;;  %v7566_v51 = vadd.f32 %v9093_v13, %v12889_v29 }
0x34f2   : > { %9359 = vpow2.f32 %v8088_v36  ;;  %8094 = vadd.xlane.f32.xlu0 %v8093_v39  ;;  %v8329_v39 = vld [vmem:[%s13019_s5 + $0xb58] sm:$0x3] }
0x34f4   : > { %v9358_v17 = vpop.eup %9357 }
0x34f5   : > { %v7750_v14 = vmul.f32 %v9358_v17, %v9348_v0  ;;  %v8253_v55 = vpop.xlane.xlu1 %8252  ;;  %v9585_v17 = vmov 0  }
0x34f6   : > { %v8260_v53 = vsub.f32 %v8248_v58, %v8253_v55  ;;  %9033 = vset.pattern.permute.xlu1 %v9585_v17  ;;  %9034 = vset.pattern.permute.xlu0 %v9585_v17 }
0x34f7   : > { %8972 = vmatmul.msk.f32.vlgmr.msrb.gmra.mxu0 %vm5333_vm9, %v7750_v14 }
0x34f8   : > { %v9360_v10 = vpop.eup %9359  ;;  %v8263_v44 = vmul.f32 1.442695, %v8260_v53  ;;  %9003 = vmatpush.msk.msrb.mxu0 %vm5142_vm8, %v8208_v56 }
0x34f9   : > { %v8096_v22 = vsel %vm5340_vm11, %v9360_v10, 0.0 }
0x34fa   : > { %9361 = vpow2.f32 %v8263_v44  ;;  %8310 = vmatpush.msrb.mxu0 %v8205_v46  ;;  %8097 = vadd.xlane.f32.xlu2 %v8096_v22 }
0x34fc   : > { %8311 = vmatpush.msrb.mxu0 %v8202_v28 }
0x34fd   : > { %v7743_v35 = vpop.xlane.xlu1 %7742  ;;  %v8256_v1 = vpop.xlane.xlu2 %8255 }
0x34fe   : > { %9363 = vrcp.f32 %v7743_v35  ;;  %v8261_v5 = vsub.f32 %v8249_v49, %v8256_v1 }
0x3500   : > { %v9362_v59 = vpop.eup %9361  ;;  %v8265_v7 = vmul.f32 1.442695, %v8261_v5 }
0x3501   : > { %v8269_v0 = vsel %vm5333_vm9, %v9362_v59, 0.0 }
0x3502   : > { %9365 = vpow2.f32 %v8265_v7  ;;  %8270 = vadd.xlane.f32.xlu1 %v8269_v0 }
0x3504   : > { %v9364_v61 = vpop.eup %9363 }
0x3505   : > { %v8259_v62 = vpop.xlane.xlu0 %8258  ;;  %v7746_v31 = vpop.xlane.xlu2 %7745  ;;  %v7751_v20 = vmul.f32 %v9364_v61, %v12952_v25 }
0x3506   : > { %v8262_v47 = vsub.f32 %v8250_v30, %v8259_v62  ;;  %9367 = vrcp.f32 %v7746_v31 }
0x3507   : > { %8973 = vmatmul.msk.f32.gmra.mxu0 %vm5333_vm9, %v7751_v20 }
0x3508   : > { %v9366_v26 = vpop.eup %9365  ;;  %v8267_v48 = vmul.f32 1.442695, %v8262_v47 }
0x3509   : > { %v8272_v9 = vsel %vm5333_vm9, %v9366_v26, 0.0 }
0x350a   : > { %9369 = vpow2.f32 %v8267_v48  ;;  %8273 = vadd.xlane.f32.xlu0 %v8272_v9 }
0x350c   : > { %v9368_v58 = vpop.eup %9367 }
0x350d   : > { %v7752_v37 = vmul.f32 %v9368_v58, %v12958_v15 }
0x350f   : > { %8974 = vmatmul.msk.f32.gmra.mxu0 %vm5333_vm9, %v7752_v37 }
0x3510   : > { %v9370_v32 = vpop.eup %9369 }
0x3511   : > { %v8275_v4 = vsel %vm5340_vm11, %v9370_v32, 0.0 }
0x3512   : > { %8276 = vadd.xlane.f32.xlu2 %v8275_v4 }
0x351b   : > { %8332 = vperm.xlu1 %9033, %v8329_v39  }
0x355d   : > { %v8092_v21 = vpop.xlane.xlu1 %8091 }
0x355e   : > { %9371 = vrcp.f32 %v8092_v21 }
0x3564   : > { %v9372_v11 = vpop.eup %9371 }
0x3565   : > { %v8102_v25 = vmul.f32 %v9372_v11, %v12964_v27  ;;  %v8095_v49 = vpop.xlane.xlu0 %8094 }
0x3566   : > { %9373 = vrcp.f32 %v8095_v49 }
0x3567   : > { %8988 = vmatmul.msk.f32.vlgmr.msra.gmra.mxu0 %vm5333_vm9, %v8102_v25 }
0x356c   : > { %v9374_v6 = vpop.eup %9373 }
0x356d   : > { %v8098_v52 = vpop.xlane.xlu2 %8097  ;;  %v8103_v41 = vmul.f32 %v9374_v6, %v9356_v60 }
0x356e   : > { %9375 = vrcp.f32 %v8098_v52 }
0x356f   : > { %8989 = vmatmul.msk.f32.gmra.mxu0 %vm5333_vm9, %v8103_v41 }
0x3574   : > { %v9376_v8 = vpop.eup %9375  ;;  %v7958_v27 = vpop.f32.mrf.mxu0 }
0x3575   : > { %v8271_v15 = vpop.xlane.xlu1 %8270  ;;  %v8104_v30 = vmul.f32 %v9376_v8, %v9360_v10  ;;  %v7959_v60 = vadd.f32 %v7958_v27, %v12934_v54  ;;  %v7569_v54 = vadd.f32 %v9093_v13, %v12891_v57  ;;  %v8328_v57 = vld [vmem:[%s13019_s5 + $0xb50] sm:$0x3] }
0x3576   : > { %9377 = vrcp.f32 %v8271_v15 }
0x3577   : > { %8990 = vmatmul.msk.f32.gmra.mxu0 %vm5333_vm9, %v8104_v30 }
0x357c   : > { %v9378_v23 = vpop.eup %9377 }
0x357d   : > { %v8281_v3 = vmul.f32 %v9378_v23, %v9362_v59  ;;  %v8274_v18 = vpop.xlane.xlu0 %8273  ;;  %v7572_v59 = vadd.f32 %v9093_v13, %v12893_v38 }
0x357e   : > { %9379 = vrcp.f32 %v8274_v18 }
0x357f   : > { %9004 = vmatmul.msk.f32.vlgmr.msrb.gmra.mxu0 %vm5333_vm9, %v8281_v3 }
0x3584   : > { %v9380_v33 = vpop.eup %9379  ;;  %v7961_v63 = vpop.f32.mrf.mxu0 }
0x3585   : > { %v8282_v34 = vmul.f32 %v9380_v33, %v9366_v26  ;;  %v8277_v42 = vpop.xlane.xlu2 %8276  ;;  %v7962_v56 = vadd.f32 %v7961_v63, %v12936_v24 }
0x3586   : > { %9381 = vrcp.f32 %v8277_v42 }
0x3587   : > { %9005 = vmatmul.msk.f32.gmra.mxu0 %vm5333_vm9, %v8282_v34 }
0x358c   : > { %v9382_v40 = vpop.eup %9381  ;;  %v7964_v16 = vpop.f32.mrf.mxu0 }
0x358d   : > { %v8283_v19 = vmul.f32 %v9382_v40, %v9370_v32  ;;  %v7965_v22 = vadd.f32 %v7964_v16, %v12938_v50  ;;  %v8333_v50 = vpop.permute.xlu1 %8332 }
0x358f   : > { %9006 = vmatmul.msk.f32.gmra.mxu0 %vm5333_vm9, %v8283_v19 }
0x35e4   : > { %v8134_v12 = vpop.f32.mrf.mxu0 }
0x35e5   : > { %v8143_v36 = vadd.f32 %v8134_v12, %v7959_v60 }
0x35ec   : > { %v8137_v2 = vpop.f32.mrf.mxu0 }
0x35ed   : > { %v8144_v53 = vadd.f32 %v8137_v2, %v7962_v56 }
0x35f4   : > { %v8140_v45 = vpop.f32.mrf.mxu0 }
0x35f5   : > { %v8145_v1 = vadd.f32 %v8140_v45, %v7965_v22 }
0x35fc   : > { %v8313_v43 = vpop.f32.mrf.mxu0 }
0x35fd   : > { %v8322_v14 = vadd.f32 %v8313_v43, %v8143_v36 }
0x35ff   : > { %v8325_v55 = vadd.f32 %v8322_v14, %v7566_v51 }
0x3601   : > { %v8339_v28 = vrot.slane %v8325_v55, 1 }
0x3604   : > { %v8316_v10 = vpop.f32.mrf.mxu0 }
0x3605   : > { %v8323_v46 = vadd.f32 %v8316_v10, %v8144_v53 }
0x3607   : > { %v8326_v44 = vadd.f32 %v8323_v46, %v7569_v54 }
0x3609   : > { %v8340_v35 = vrot.slane %v8326_v44, 1 }
0x360b   : > { %v8341_v5 = vsel %vm8338_vm12, %v8339_v28, %v8340_v35 }
0x360c   : > { %v8319_v29 = vpop.f32.mrf.mxu0 }
0x360d   : > { %v8324_v7 = vadd.f32 %v8319_v29, %v8145_v1 }
0x360f   : > { %v8327_v0 = vadd.f32 %v8324_v7, %v7572_v59 }
0x3611   : > { %v8342_v24 = vrot.slane %v8327_v0, 1 }
0x3613   : > { %v8343_v61 = vsel %vm8338_vm12, %v8340_v35, %v8342_v24 }
0x3614   : > { %9007 = vmatpush.xpose.msk.msrb.mxu2 %vm460_vm1, %v8343_v61 }
0x3618   : > { %9008 = vmatpush.xpose.msk.msrb.mxu2 %vm460_vm1, %v8341_v5 }
0x361b   : > { %9009 = vmatmul.msk.f32.vlgmr.msrb.gmra.mxu2 %vm460_vm1, %v8328_v57 }
0x369e   : > { %v8368_v38 = vpop.f32.mrf.mxu2 }
0x369f   : > { %v8369_v62 = vadd.f32 %v8368_v38, %v8333_v50 }
0x36a1   : > { %8372 = vst.msk [vmem:[%s365_s15] sm:$0x3] %vm8371_vm13, %v8369_v62 }
0x36a2 PF: > { %s18_s27 = sadd.s32 1, %s9572_s27  }
0x36a3   : > { %p15_p4 = scmp.ge.s32.totalorder %s18_s27, 4  }
0x36a5   :  { %17 = sbr.rel (!%p15_p4) target bundleno = 1 (0x1), region = 95 }

</bundles_post_ra>
